<compile_context>
chip_gen: v6e
topology: v6e:2x2x1
jax: 0.10.0
libtpu: 0.0.40
codegen_flags: <defaults>
</compile_context>

<pallas_src>
import functools

import jax
import jax.numpy as jnp
from jax.experimental import pallas as pl
from jax.experimental.pallas import tpu as pltpu


# ---------------------------------------------------------------------------
# small helpers
# ---------------------------------------------------------------------------
def _round_up(x, m):
    return (x + m - 1) // m * m


def _pick_bm(M, cap=256):
    """Row-block size: full slab when small, else the largest divisor <= cap."""
    if M <= cap:
        return _round_up(M, 8)
    for bm in range(cap, 0, -8):
        if M % bm == 0:
            return bm
    return cap


def _apply_act(v, act):
    if act == "relu":
        return jnp.maximum(v, 0.0)
    if act == "silu":
        return v * jax.nn.sigmoid(v)
    if act == "sigmoid":
        return jax.nn.sigmoid(v)
    return v


def im2col(x, k, stride, pad):
    """NHWC im2col.  Returns ((B*Ho*Wo, k*k*C) cols, (B, Ho, Wo)).

    Column flattening is tap-major / channel-minor, matching conv_w_to_mat.
    """
    B, H, W, C = x.shape
    if pad:
        x = jnp.pad(x, ((0, 0), (pad, pad), (pad, pad), (0, 0)))
    Ho = (H + 2 * pad - k) // stride + 1
    Wo = (W + 2 * pad - k) // stride + 1
    patches = []
    for di in range(k):
        for dj in range(k):
            patches.append(
                x[:, di:di + Ho * stride:stride, dj:dj + Wo * stride:stride, :])
    cols = jnp.stack(patches, axis=3)                  # (B, Ho, Wo, k*k, C)
    return cols.reshape(B * Ho * Wo, k * k * C), (B, Ho, Wo)


def conv_w_to_mat(w, groups=1):
    """PyTorch (Cout, Cin_g, kh, kw) weight -> im2col matrix (kh*kw*Cin, Cout).

    Grouped convs become a single block-diagonal matrix (one matmul, no
    per-group python loop / concat at runtime).
    """
    Cout, Cin_g, kh, kw = w.shape
    cin_total = Cin_g * groups
    Cout_g = Cout // groups
    Wm = jnp.zeros((kh * kw, cin_total, Cout), jnp.float32)
    for g in range(groups):
        wg = jnp.transpose(w[g * Cout_g:(g + 1) * Cout_g], (2, 3, 1, 0))
        wg = wg.reshape(kh * kw, Cin_g, Cout_g)
        Wm = Wm.at[:, g * Cin_g:(g + 1) * Cin_g,
                   g * Cout_g:(g + 1) * Cout_g].set(wg)
    return Wm.reshape(kh * kw * cin_total, Cout)


def dwt_haar_cat(x):
    """Haar DWTForward(J=1, mode='zero'): cat([yL, yH0, yH1, yH2]) in NHWC."""
    a = x[:, 0::2, 0::2, :]
    b = x[:, 0::2, 1::2, :]
    c = x[:, 1::2, 0::2, :]
    d = x[:, 1::2, 1::2, :]
    ll = 0.5 * (a + b + c + d)
    s0 = 0.5 * (a + b - c - d)
    s1 = 0.5 * (a - b + c - d)
    s2 = 0.5 * (a - b - c + d)
    return jnp.concatenate([ll, s0, s1, s2], axis=-1)


def haar_fold_cv2(cv2_w):
    """Fold Haar DWT into the following 1x1 conv.

    cv2_w: (Cout, 4*half, 1, 1) with input index = band*half + ch.
    Returns (4 taps [a,b,c,d], half, Cout) weights for a 2x2 stride-2 conv.
    """
    dout = cv2_w.shape[0]
    half = cv2_w.shape[1] // 4
    wc = cv2_w.reshape(dout, 4, half)
    wll, ws0, ws1, ws2 = wc[:, 0], wc[:, 1], wc[:, 2], wc[:, 3]
    taps = jnp.stack([
        wll + ws0 + ws1 + ws2,   # tap a = (0,0)
        wll + ws0 - ws1 - ws2,   # tap b = (0,1)
        wll - ws0 + ws1 - ws2,   # tap c = (1,0)
        wll - ws0 - ws1 + ws2,   # tap d = (1,1)
    ], axis=0) * 0.5                               # (4, Cout, half)
    return jnp.transpose(taps, (0, 2, 1))          # (4, half, Cout)


# ---------------------------------------------------------------------------
# Pallas kernels
# ---------------------------------------------------------------------------
def _matmul_bias_kernel(x_ref, w_ref, b_ref, o_ref, *, act):
    acc = jnp.dot(x_ref[...], w_ref[...], preferred_element_type=jnp.float32)
    acc = acc + b_ref[...]
    o_ref[...] = _apply_act(acc, act).astype(o_ref.dtype)


def pallas_matmul_bias(x, w, bias, act="none", block_m=256):
    """(M,K) @ (K,N) + per-channel bias + activation.  BN scale pre-folded."""
    M, K = x.shape
    N = w.shape[1]
    bm = _pick_bm(M, block_m)
    Mp = _round_up(M, bm)
    if Mp != M:
        x = jnp.pad(x, ((0, Mp - M), (0, 0)))
    out = pl.pallas_call(
        functools.partial(_matmul_bias_kernel, act=act),
        out_shape=jax.ShapeDtypeStruct((Mp, N), jnp.float32),
        grid=(Mp // bm,),
        in_specs=[
            pl.BlockSpec((bm, K), lambda i: (i, 0)),
            pl.BlockSpec((K, N), lambda i: (0, 0)),
            pl.BlockSpec((1, N), lambda i: (0, 0)),
        ],
        out_specs=pl.BlockSpec((bm, N), lambda i: (i, 0)),
        compiler_params=pltpu.CompilerParams(dimension_semantics=("parallel",)),
    )(x, w, bias.reshape(1, N))
    return out[:M] if Mp != M else out


def _mlp_block_kernel(*refs, with_norm):
    """Fused MLPBlock: partial 3x3 conv + grouped 1x1/BN/ReLU + grouped 1x1
    + residual (+ optional out-norm BN as a second output)."""
    if with_norm:
        (x_ref, p_ref, wp_ref, w1a_ref, w1b_ref, b1_ref, w2_ref,
         ns_ref, nb_ref, o_ref, on_ref) = refs
    else:
        (x_ref, p_ref, wp_ref, w1a_ref, w1b_ref, b1_ref, w2_ref, o_ref) = refs
    x = x_ref[...]
    # Partial_conv3 output on the first dc channels (im2col patches @ weight)
    x1 = jnp.dot(p_ref[...], wp_ref[...], preferred_element_type=jnp.float32)
    # grouped 1x1 conv (block-diag, BN scale folded): first-dc rows come from
    # x1, remaining rows from the untouched channels of x (w1b has its first
    # dc rows zeroed, so no explicit concat is needed).
    h = jnp.dot(x1, w1a_ref[...], preferred_element_type=jnp.float32)
    h = h + jnp.dot(x, w1b_ref[...], preferred_element_type=jnp.float32)
    h = jnp.maximum(h + b1_ref[...], 0.0)
    y = x + jnp.dot(h, w2_ref[...], preferred_element_type=jnp.float32)
    o_ref[...] = y.astype(o_ref.dtype)
    if with_norm:
        on_ref[...] = (y * ns_ref[...] + nb_ref[...]).astype(on_ref.dtype)


def pallas_mlp_block(x2d, patches, bp, norm=None, block_m=256):
    M, dim = x2d.shape
    Kp = patches.shape[1]
    dc = bp["wp"].shape[1]
    hidden = bp["w1b"].shape[1]
    bm = _pick_bm(M, block_m)
    Mp = _round_up(M, bm)
    if Mp != M:
        x2d = jnp.pad(x2d, ((0, Mp - M), (0, 0)))
        patches = jnp.pad(patches, ((0, Mp - M), (0, 0)))
    with_norm = norm is not None
    inputs = [x2d, patches, bp["wp"], bp["w1a"], bp["w1b"],
              bp["b1"].reshape(1, hidden), bp["w2"]]
    in_specs = [
        pl.BlockSpec((bm, dim), lambda i: (i, 0)),
        pl.BlockSpec((bm, Kp), lambda i: (i, 0)),
        pl.BlockSpec((Kp, dc), lambda i: (0, 0)),
        pl.BlockSpec((dc, hidden), lambda i: (0, 0)),
        pl.BlockSpec((dim, hidden), lambda i: (0, 0)),
        pl.BlockSpec((1, hidden), lambda i: (0, 0)),
        pl.BlockSpec((hidden, dim), lambda i: (0, 0)),
    ]
    out_shape = [jax.ShapeDtypeStruct((Mp, dim), jnp.float32)]
    out_specs = [pl.BlockSpec((bm, dim), lambda i: (i, 0))]
    if with_norm:
        ns, nb = norm
        inputs += [ns.reshape(1, dim), nb.reshape(1, dim)]
        in_specs += [pl.BlockSpec((1, dim), lambda i: (0, 0)),
                     pl.BlockSpec((1, dim), lambda i: (0, 0))]
        out_shape.append(jax.ShapeDtypeStruct((Mp, dim), jnp.float32))
        out_specs.append(pl.BlockSpec((bm, dim), lambda i: (i, 0)))
    res = pl.pallas_call(
        functools.partial(_mlp_block_kernel, with_norm=with_norm),
        out_shape=tuple(out_shape) if with_norm else out_shape[0],
        grid=(Mp // bm,),
        in_specs=in_specs,
        out_specs=tuple(out_specs) if with_norm else out_specs[0],
        compiler_params=pltpu.CompilerParams(dimension_semantics=("parallel",)),
    )(*inputs)
    if with_norm:
        y, yn = res
        if Mp != M:
            y, yn = y[:M], yn[:M]
        return y, yn
    return res[:M] if Mp != M else res


def _pm_dw_a_kernel(c_ref, w_ref, b1_ref, lb_ref, s2_ref, b2_ref, o_ref):
    """[reduction 2x2 conv || Haar-folded cv2 conv] -> selective ReLU (BN/ReLU
    only on the cv2 half, identity on the reduction half) -> DWConv depthwise
    affine -> SiLU."""
    t = jnp.dot(c_ref[...], w_ref[...], preferred_element_type=jnp.float32)
    t = t + b1_ref[...]
    u = jnp.maximum(t, lb_ref[...])          # lb = -3e38 (identity) or 0 (relu)
    v = u * s2_ref[...] + b2_ref[...]
    o_ref[...] = (v * jax.nn.sigmoid(v)).astype(o_ref.dtype)


def pallas_pm_dw_a(cols, p, block_m=256):
    M, K = cols.shape
    N = p["WA"].shape[1]
    bm = _pick_bm(M, block_m)
    Mp = _round_up(M, bm)
    if Mp != M:
        cols = jnp.pad(cols, ((0, Mp - M), (0, 0)))
    out = pl.pallas_call(
        _pm_dw_a_kernel,
        out_shape=jax.ShapeDtypeStruct((Mp, N), jnp.float32),
        grid=(Mp // bm,),
        in_specs=[pl.BlockSpec((bm, K), lambda i: (i, 0)),
                  pl.BlockSpec((K, N), lambda i: (0, 0))]
                 + [pl.BlockSpec((1, N), lambda i: (0, 0))] * 4,
        out_specs=pl.BlockSpec((bm, N), lambda i: (i, 0)),
        compiler_params=pltpu.CompilerParams(dimension_semantics=("parallel",)),
    )(cols, p["WA"], p["b1"].reshape(1, N), p["lb"].reshape(1, N),
      p["dw_scale"].reshape(1, N), p["dw_bias"].reshape(1, N))
    return out[:M] if Mp != M else out


def _pm_dw_b_kernel(xc_ref, wa_ref, wb_ref, wme_ref, bme_ref, woa_ref, wob_ref,
                    ns_ref, nb_ref, o_ref, *, dim):
    """ImprovedCMCE mixing + output conv + ReLU + final BN."""
    xc = xc_ref[...]                     # (S, 2*dim)
    fa = xc[:, :dim]
    fb = xc[:, dim:]
    fused = jnp.dot(xc, wme_ref[...], preferred_element_type=jnp.float32)
    fused = jnp.maximum(fused + bme_ref[...], 0.0)
    fa_new = fa + fb * wa_ref[...] + fused
    fb_new = fb + fa * wb_ref[...] + fused
    out = jnp.dot(fa_new, woa_ref[...], preferred_element_type=jnp.float32)
    out = out + jnp.dot(fb_new, wob_ref[...], preferred_element_type=jnp.float32)
    out = jnp.maximum(out, 0.0)
    o_ref[...] = (out * ns_ref[...] + nb_ref[...]).astype(o_ref.dtype)


def pallas_pm_dw_b(xc3, wa, wb, p):
    B, S, C2 = xc3.shape
    C = C2 // 2
    return pl.pallas_call(
        functools.partial(_pm_dw_b_kernel, dim=C),
        out_shape=jax.ShapeDtypeStruct((B, S, C2), jnp.float32),
        grid=(B,),
        in_specs=[
            pl.BlockSpec((None, S, C2), lambda b: (b, 0, 0)),
            pl.BlockSpec((None, 1, C), lambda b: (b, 0, 0)),
            pl.BlockSpec((None, 1, C), lambda b: (b, 0, 0)),
            pl.BlockSpec((C2, C), lambda b: (0, 0)),
            pl.BlockSpec((1, C), lambda b: (0, 0)),
            pl.BlockSpec((C, C2), lambda b: (0, 0)),
            pl.BlockSpec((C, C2), lambda b: (0, 0)),
            pl.BlockSpec((1, C2), lambda b: (0, 0)),
            pl.BlockSpec((1, C2), lambda b: (0, 0)),
        ],
        out_specs=pl.BlockSpec((None, S, C2), lambda b: (b, 0, 0)),
        compiler_params=pltpu.CompilerParams(dimension_semantics=("parallel",)),
    )(xc3, wa.reshape(B, 1, C), wb.reshape(B, 1, C),
      p["wme"], p["bme"].reshape(1, C), p["wo_a"], p["wo_b"],
      p["ns"].reshape(1, C2), p["nb"].reshape(1, C2))


# ---------------------------------------------------------------------------
# Module forwards (NHWC)
# ---------------------------------------------------------------------------
def patch_embed_forward(x, pe):
    B, H, W, _ = x.shape
    cols1, (_, Ho, Wo) = im2col(x, 3, 2, 1)                      # conv_path 3x3 s2
    x1 = pallas_matmul_bias(cols1, pe["w_conv"], pe["b_conv"]).reshape(B, Ho, Wo, -1)
    x2 = dwt_haar_cat(x)                                         # DW_path (Haar)
    xc = jnp.concatenate([x1, x2], axis=-1)
    cols2, (_, Ho2, Wo2) = im2col(xc, 3, 2, 1)                   # combine 3x3 s2 g=2
    y = pallas_matmul_bias(cols2, pe["w_comb"], pe["b_comb"])
    return y.reshape(B, Ho2, Wo2, -1)


def mlp_block_forward(x, bp, norm=None):
    B, H, W, dim = x.shape
    dc = bp["wp"].shape[1]
    cols, _ = im2col(x[..., :dc], 3, 1, 1)    # patches only for the partial conv
    res = pallas_mlp_block(x.reshape(-1, dim), cols, bp, norm=norm)
    if norm is None:
        return res.reshape(B, H, W, dim), None
    y, yn = res
    return y.reshape(B, H, W, dim), yn.reshape(B, H, W, dim)


def pm_dw_forward(x, p):
    B, H, W, C = x.shape
    cols, (_, Ho, Wo) = im2col(x, 2, 2, 0)                       # 2x2 s2 patches
    xc = pallas_pm_dw_a(cols, p)                                 # (M, 2C)
    C2 = 2 * C
    xc3 = xc.reshape(B, Ho * Wo, C2)
    # channel attention: tiny FCs, plain jnp (XLA fuses) per perf review
    pooled = jnp.mean(xc3, axis=1)                               # AdaptiveAvgPool2d(1)
    st = jnp.concatenate([pooled[:, :C], pooled[:, C:]], axis=0)  # (2B, C)
    h = jnp.maximum(st @ p["ca_w1"], 0.0)
    wgt = jax.nn.sigmoid(h @ p["ca_w2"])
    wa, wb = wgt[:B], wgt[B:]
    out = pallas_pm_dw_b(xc3, wa, wb, p)                         # includes final BN
    return out.reshape(B, Ho, Wo, C2)


def pm_forward(x, p):
    B, H, W, C = x.shape
    cols, (_, Ho, Wo) = im2col(x, 2, 2, 0)
    y = pallas_matmul_bias(cols, p["w"], p["b"])
    return y.reshape(B, Ho, Wo, -1)


def fasternet_dwave_forward(x_nchw, prep):
    x = jnp.transpose(x_nchw, (0, 2, 3, 1)).astype(jnp.float32)  # NCHW -> NHWC
    x = patch_embed_forward(x, prep["patch_embed"])
    outs = []
    for idx, (kind, p) in enumerate(prep["stages"]):
        if kind == "basic":
            norm = prep["norms"].get(idx) if idx in prep["out_indices"] else None
            xn = None
            nblocks = len(p["blocks"])
            for bi, bp in enumerate(p["blocks"]):
                fuse = norm if (bi == nblocks - 1) else None
                x, xn = mlp_block_forward(x, bp, norm=fuse)
            if norm is not None:
                outs.append(jnp.transpose(xn, (0, 3, 1, 2)))     # back to NCHW
        elif kind == "pm_dw":
            x = pm_dw_forward(x, p)
        else:
            x = pm_forward(x, p)
        if idx in prep["out_indices"] and kind != "basic":       # not hit here
            s, b = prep["norms"][idx]
            outs.append(jnp.transpose(x * s + b, (0, 3, 1, 2)))
    return outs


# ---------------------------------------------------------------------------
# Offline parameter preparation (BN folding, block-diag weights, Haar folding)
# ---------------------------------------------------------------------------
def prep_mlp_block(bp, groups):
    pconv_w = bp["pconv_w"]
    dc = pconv_w.shape[0]
    wp = jnp.transpose(pconv_w, (2, 3, 1, 0)).reshape(9 * dc, dc)
    s1, b1 = bp["bn1"]
    W1 = conv_w_to_mat(bp["w1"], groups) * s1[None, :]     # BN scale folded
    w1a = W1[:dc]
    w1b = W1.at[:dc].set(0.0)
    W2 = conv_w_to_mat(bp["w2"], groups)
    return {"wp": wp, "w1a": w1a, "w1b": w1b, "b1": b1, "w2": W2}


def prep_pm_dw(p):
    C = p["red_w"].shape[0]                                # pm input channels
    half = C // 2
    wr = jnp.transpose(p["red_w"], (2, 3, 1, 0)).reshape(4, half, C)
    wh = haar_fold_cv2(p["cv2_w"])                         # (4, half, C)
    s_cv2, b_cv2 = p["cv2_bn"]
    wh = wh * s_cv2[None, None, :]
    WA = jnp.zeros((4, C, 2 * C), jnp.float32)
    WA = WA.at[:, :half, :C].set(wr)                       # x1 branch (identity)
    WA = WA.at[:, half:, C:].set(wh)                       # x2 branch (BN/ReLU)
    WA = WA.reshape(4 * C, 2 * C)
    b1 = jnp.concatenate([jnp.zeros((C,), jnp.float32), b_cv2])
    lb = jnp.concatenate([jnp.full((C,), -3e38, jnp.float32),
                          jnp.zeros((C,), jnp.float32)])
    s_me, b_me = p["me_bn"]
    wme = jnp.transpose(p["me_w"], (2, 3, 1, 0)).reshape(2 * C, C) * s_me[None, :]
    wout = jnp.transpose(p["out_w"], (2, 3, 1, 0)).reshape(2 * C, 2 * C)
    ns, nb = p["norm_bn"]
    return {"WA": WA, "b1": b1, "lb": lb,
            "dw_scale": p["dw_scale"], "dw_bias": p["dw_bias"],
            "ca_w1": p["ca_w1"], "ca_w2": p["ca_w2"],
            "wme": wme, "bme": b_me,
            "wo_a": wout[:C], "wo_b": wout[C:],
            "ns": ns, "nb": nb}


def prep_pm(p):
    s, b = p["norm_bn"]
    return {"w": conv_w_to_mat(p["red_w"], 1) * s[None, :], "b": b}


def prepare_params(raw):
    prep = {"out_indices": list(raw["out_indices"]), "norms": dict(raw["norms"])}
    pe = raw["patch_embed"]
    s, b = pe["conv_bn"]
    s2, b2 = pe["comb_bn"]
    prep["patch_embed"] = {
        "w_conv": conv_w_to_mat(pe["conv_w"], 1) * s[None, :],
        "b_conv": b,
        "w_comb": conv_w_to_mat(pe["comb_w"], 2) * s2[None, :],
        "b_comb": b2,
    }
    stages = []
    for kind, p in raw["stages"]:
        if kind == "basic":
            blocks = [prep_mlp_block(bp, p["groups"]) for bp in p["blocks"]]
            stages.append((kind, {"blocks": blocks}))
        elif kind == "pm_dw":
            stages.append((kind, prep_pm_dw(p)))
        else:
            stages.append((kind, prep_pm(p)))
    prep["stages"] = stages
    return prep


# ---------------------------------------------------------------------------
# Deterministic synthetic parameters (raw, PyTorch-layout)
# ---------------------------------------------------------------------------
class KeyGen:
    def __init__(self, key):
        self.key = key

    def __call__(self):
        self.key, sub = jax.random.split(self.key)
        return sub


def make_w(kg, cout, cin_g, k):
    return 0.1 * jax.random.normal(kg(), (cout, cin_g, k, k), jnp.float32)


def make_bn(kg, c, eps=1e-5):
    gamma = 1.0 + 0.1 * jax.random.normal(kg(), (c,), jnp.float32)
    beta = 0.05 * jax.random.normal(kg(), (c,), jnp.float32)
    mean = 0.05 * jax.random.normal(kg(), (c,), jnp.float32)
    var = 1.0 + 0.1 * jax.random.uniform(kg(), (c,), jnp.float32)
    scale = gamma / jnp.sqrt(var + eps)
    shift = beta - mean * scale
    return scale, shift


def make_mlp_block(kg, dim, n_div, mlp_ratio, groups):
    hidden = int(dim * mlp_ratio)
    dc = dim // n_div
    return {
        "pconv_w": make_w(kg, dc, dc, 3),
        "w1": make_w(kg, hidden, dim // groups, 1),
        "bn1": make_bn(kg, hidden),
        "w2": make_w(kg, dim, hidden // groups, 1),
    }


def make_pm_dw(kg, dim):
    half = dim // 2
    p = {}
    p["red_w"] = make_w(kg, dim, half, 2)
    p["cv2_w"] = make_w(kg, dim, 4 * half, 1)
    p["cv2_bn"] = make_bn(kg, dim)
    # DWConv(2*dim, 2*dim, k=1) depthwise weight folded with its BN
    dw_w = 1.0 + 0.1 * jax.random.normal(kg(), (2 * dim,), jnp.float32)
    s, t = make_bn(kg, 2 * dim)
    p["dw_scale"] = s * dw_w
    p["dw_bias"] = t
    # ImprovedCMCE(channels=dim)
    mid = max(dim // 2, 8)
    p["ca_w1"] = 0.1 * jax.random.normal(kg(), (dim, mid), jnp.float32)
    p["ca_w2"] = 0.1 * jax.random.normal(kg(), (mid, dim), jnp.float32)
    p["me_w"] = make_w(kg, dim, 2 * dim, 1)
    p["me_bn"] = make_bn(kg, dim)
    p["out_w"] = make_w(kg, 2 * dim, 2 * dim, 1)
    p["norm_bn"] = make_bn(kg, 2 * dim)
    return p


def make_pm(kg, dim):
    return {"red_w": make_w(kg, 2 * dim, dim, 2), "norm_bn": make_bn(kg, 2 * dim)}


def build_params(key, in_chans=3, embed_dim=16, depths=(1, 1, 1, 1),
                 mlp_ratio=2.0, n_div=4, groups=2):
    kg = KeyGen(key)
    params = {}
    # DW_embedded
    pe = {}
    pe["conv_w"] = make_w(kg, 4 * in_chans, in_chans, 3)
    pe["conv_bn"] = make_bn(kg, 4 * in_chans)
    pe["comb_w"] = make_w(kg, embed_dim, (8 * in_chans) // 2, 3)  # groups=2
    comb_bias = 0.05 * jax.random.normal(kg(), (embed_dim,), jnp.float32)
    ns, nb = make_bn(kg, embed_dim)
    pe["comb_bn"] = (ns, ns * comb_bias + nb)  # fold conv bias into BN shift
    params["patch_embed"] = pe

    stages = []
    num_stages = len(depths)
    for i in range(num_stages):
        dim = embed_dim * (2 ** i)
        blocks = [make_mlp_block(kg, dim, n_div, mlp_ratio, groups)
                  for _ in range(depths[i])]
        stages.append(("basic", {"blocks": blocks, "groups": groups, "n_div": n_div}))
        if i < num_stages - 1:
            if i >= 2:
                stages.append(("pm", make_pm(kg, dim)))
            else:
                stages.append(("pm_dw", make_pm_dw(kg, dim)))
    params["stages"] = stages

    out_indices = [0, 2, 4, 6]
    norms = {}
    for i_emb, idx in enumerate(out_indices):
        norms[idx] = make_bn(kg, embed_dim * (2 ** i_emb))
    params["norms"] = norms
    params["out_indices"] = out_indices
    return params


if __name__ == "__main__":
    key = jax.random.PRNGKey(0)
    k_params, k_x = jax.random.split(key)

    embed_dim = 16
    raw = build_params(k_params, in_chans=3, embed_dim=embed_dim, depths=(1, 1, 1, 1))
    prep = prepare_params(raw)

    # Small input consistent with the module: total downsample factor is 32.
    x = jax.random.normal(k_x, (2, 3, 64, 64), jnp.float32)

    fwd = jax.jit(lambda inp: fasternet_dwave_forward(inp, prep))
    outs = fwd(x)
    outs = jax.block_until_ready(outs)

    expected = [(2, 16, 16, 16), (2, 32, 8, 8), (2, 64, 4, 4), (2, 128, 2, 2)]
    assert [tuple(o.shape) for o in outs] == expected, [o.shape for o in outs]
    assert all(bool(jnp.all(jnp.isfinite(o))) for o in outs)
    print("KERNEL_OK")
</pallas_src>

<mosaic_0001>
module attributes {stable_mosaic.version = 11 : i64} {
  func.func @_matmul_bias_kernel(%arg0: i32, %arg1: memref<256x27xf32, #tpu.memory_space<vmem>>, %arg2: memref<27x12xf32, #tpu.memory_space<vmem>>, %arg3: memref<1x12xf32, #tpu.memory_space<vmem>>, %arg4: memref<256x12xf32, #tpu.memory_space<vmem>>) attributes {dimension_semantics = [#tpu.dimension_semantics<parallel>], iteration_bounds = array<i64: 8>, scalar_prefetch = 0 : i64, scratch_operands = 0 : i64, tpu.core_type = #tpu.core_type<tc>, window_params = [{transform_indices = @transform_0, window_bounds = array<i64: 256, 27>}, {pipeline_mode = #tpu.pipeline_mode<synchronous>, transform_indices = @transform_1, window_bounds = array<i64: 27, 12>}, {pipeline_mode = #tpu.pipeline_mode<synchronous>, transform_indices = @transform_2, window_bounds = array<i64: 1, 12>}, {transform_indices = @transform_3, window_bounds = array<i64: 256, 12>}]} {
    %c0 = arith.constant 0 : index
    %c0_0 = arith.constant 0 : index
    %0 = vector.load %arg1[%c0, %c0_0] : memref<256x27xf32, #tpu.memory_space<vmem>>, vector<256x27xf32>
    %c0_1 = arith.constant 0 : index
    %c0_2 = arith.constant 0 : index
    %1 = vector.load %arg2[%c0_1, %c0_2] : memref<27x12xf32, #tpu.memory_space<vmem>>, vector<27x12xf32>
    %cst = arith.constant dense<0.000000e+00> : vector<256x12xf32>
    %2 = tpu.matmul %0, %1, %cst {dimension_numbers = #tpu.dot_dimension_numbers<[1], [0], [0], [1], [0, 0, 1, 1], [], []>} : vector<256x27xf32>, vector<27x12xf32>, vector<256x12xf32> -> vector<256x12xf32>
    %c0_3 = arith.constant 0 : index
    %c0_4 = arith.constant 0 : index
    %3 = vector.load %arg3[%c0_3, %c0_4] : memref<1x12xf32, #tpu.memory_space<vmem>>, vector<1x12xf32>
    %4 = vector.broadcast %3 : vector<1x12xf32> to vector<256x12xf32>
    %5 = arith.addf %2, %4 : vector<256x12xf32>
    %c0_5 = arith.constant 0 : index
    %c0_6 = arith.constant 0 : index
    %6 = vector.load %arg4[%c0_5, %c0_6] : memref<256x12xf32, #tpu.memory_space<vmem>>, vector<256x12xf32>
    tpu.vector_store %arg4[%c0_5, %c0_6], %5 {strides = array<i32>} : memref<256x12xf32, #tpu.memory_space<vmem>>, vector<256x12xf32>,
    return
  }
  func.func @transform_0(%arg0: i32) -> (i32, i32) {
    %c0_i32 = arith.constant 0 : i32
    %c0_i32_0 = arith.constant 0 : i32
    return %arg0, %c0_i32 : i32, i32
  }
  func.func @transform_1(%arg0: i32) -> (i32, i32) {
    %c0_i32 = arith.constant 0 : i32
    %c0_i32_0 = arith.constant 0 : i32
    %c0_i32_1 = arith.constant 0 : i32
    return %c0_i32, %c0_i32_0 : i32, i32
  }
  func.func @transform_2(%arg0: i32) -> (i32, i32) {
    %c0_i32 = arith.constant 0 : i32
    %c0_i32_0 = arith.constant 0 : i32
    %c0_i32_1 = arith.constant 0 : i32
    return %c0_i32, %c0_i32_0 : i32, i32
  }
  func.func @transform_3(%arg0: i32) -> (i32, i32) {
    %c0_i32 = arith.constant 0 : i32
    %c0_i32_0 = arith.constant 0 : i32
    return %arg0, %c0_i32 : i32, i32
  }
}

module attributes {stable_mosaic.version = 11 : i64} {
  func.func @_matmul_bias_kernel(%arg0: i32, %arg1: memref<256x216xf32, #tpu.memory_space<vmem>>, %arg2: memref<216x16xf32, #tpu.memory_space<vmem>>, %arg3: memref<1x16xf32, #tpu.memory_space<vmem>>, %arg4: memref<256x16xf32, #tpu.memory_space<vmem>>) attributes {dimension_semantics = [#tpu.dimension_semantics<parallel>], iteration_bounds = array<i64: 2>, scalar_prefetch = 0 : i64, scratch_operands = 0 : i64, tpu.core_type = #tpu.core_type<tc>, window_params = [{transform_indices = @transform_0, window_bounds = array<i64: 256, 216>}, {pipeline_mode = #tpu.pipeline_mode<synchronous>, transform_indices = @transform_1, window_bounds = array<i64: 216, 16>}, {pipeline_mode = #tpu.pipeline_mode<synchronous>, transform_indices = @transform_2, window_bounds = array<i64: 1, 16>}, {transform_indices = @transform_3, window_bounds = array<i64: 256, 16>}]} {
    %c0 = arith.constant 0 : index
    %c0_0 = arith.constant 0 : index
    %0 = vector.load %arg1[%c0, %c0_0] : memref<256x216xf32, #tpu.memory_space<vmem>>, vector<256x216xf32>
    %c0_1 = arith.constant 0 : index
    %c0_2 = arith.constant 0 : index
    %1 = vector.load %arg2[%c0_1, %c0_2] : memref<216x16xf32, #tpu.memory_space<vmem>>, vector<216x16xf32>
    %cst = arith.constant dense<0.000000e+00> : vector<256x16xf32>
    %2 = tpu.matmul %0, %1, %cst {dimension_numbers = #tpu.dot_dimension_numbers<[1], [0], [0], [1], [0, 0, 1, 1], [], []>} : vector<256x216xf32>, vector<216x16xf32>, vector<256x16xf32> -> vector<256x16xf32>
    %c0_3 = arith.constant 0 : index
    %c0_4 = arith.constant 0 : index
    %3 = vector.load %arg3[%c0_3, %c0_4] : memref<1x16xf32, #tpu.memory_space<vmem>>, vector<1x16xf32>
    %4 = vector.broadcast %3 : vector<1x16xf32> to vector<256x16xf32>
    %5 = arith.addf %2, %4 : vector<256x16xf32>
    %c0_5 = arith.constant 0 : index
    %c0_6 = arith.constant 0 : index
    %6 = vector.load %arg4[%c0_5, %c0_6] : memref<256x16xf32, #tpu.memory_space<vmem>>, vector<256x16xf32>
    tpu.vector_store %arg4[%c0_5, %c0_6], %5 {strides = array<i32>} : memref<256x16xf32, #tpu.memory_space<vmem>>, vector<256x16xf32>,
    return
  }
  func.func @transform_0(%arg0: i32) -> (i32, i32) {
    %c0_i32 = arith.constant 0 : i32
    %c0_i32_0 = arith.constant 0 : i32
    return %arg0, %c0_i32 : i32, i32
  }
  func.func @transform_1(%arg0: i32) -> (i32, i32) {
    %c0_i32 = arith.constant 0 : i32
    %c0_i32_0 = arith.constant 0 : i32
    %c0_i32_1 = arith.constant 0 : i32
    return %c0_i32, %c0_i32_0 : i32, i32
  }
  func.func @transform_2(%arg0: i32) -> (i32, i32) {
    %c0_i32 = arith.constant 0 : i32
    %c0_i32_0 = arith.constant 0 : i32
    %c0_i32_1 = arith.constant 0 : i32
    return %c0_i32, %c0_i32_0 : i32, i32
  }
  func.func @transform_3(%arg0: i32) -> (i32, i32) {
    %c0_i32 = arith.constant 0 : i32
    %c0_i32_0 = arith.constant 0 : i32
    return %arg0, %c0_i32 : i32, i32
  }
}

module attributes {stable_mosaic.version = 11 : i64} {
  func.func @_mlp_block_kernel(%arg0: i32, %arg1: memref<256x16xf32, #tpu.memory_space<vmem>>, %arg2: memref<256x36xf32, #tpu.memory_space<vmem>>, %arg3: memref<36x4xf32, #tpu.memory_space<vmem>>, %arg4: memref<4x32xf32, #tpu.memory_space<vmem>>, %arg5: memref<16x32xf32, #tpu.memory_space<vmem>>, %arg6: memref<1x32xf32, #tpu.memory_space<vmem>>, %arg7: memref<32x16xf32, #tpu.memory_space<vmem>>, %arg8: memref<1x16xf32, #tpu.memory_space<vmem>>, %arg9: memref<1x16xf32, #tpu.memory_space<vmem>>, %arg10: memref<256x16xf32, #tpu.memory_space<vmem>>, %arg11: memref<256x16xf32, #tpu.memory_space<vmem>>) attributes {dimension_semantics = [#tpu.dimension_semantics<parallel>], iteration_bounds = array<i64: 2>, scalar_prefetch = 0 : i64, scratch_operands = 0 : i64, tpu.core_type = #tpu.core_type<tc>, window_params = [{transform_indices = @transform_0, window_bounds = array<i64: 256, 16>}, {transform_indices = @transform_1, window_bounds = array<i64: 256, 36>}, {pipeline_mode = #tpu.pipeline_mode<synchronous>, transform_indices = @transform_2, window_bounds = array<i64: 36, 4>}, {pipeline_mode = #tpu.pipeline_mode<synchronous>, transform_indices = @transform_3, window_bounds = array<i64: 4, 32>}, {pipeline_mode = #tpu.pipeline_mode<synchronous>, transform_indices = @transform_4, window_bounds = array<i64: 16, 32>}, {pipeline_mode = #tpu.pipeline_mode<synchronous>, transform_indices = @transform_5, window_bounds = array<i64: 1, 32>}, {pipeline_mode = #tpu.pipeline_mode<synchronous>, transform_indices = @transform_6, window_bounds = array<i64: 32, 16>}, {pipeline_mode = #tpu.pipeline_mode<synchronous>, transform_indices = @transform_7, window_bounds = array<i64: 1, 16>}, {pipeline_mode = #tpu.pipeline_mode<synchronous>, transform_indices = @transform_8, window_bounds = array<i64: 1, 16>}, {transform_indices = @transform_9, window_bounds = array<i64: 256, 16>}, {transform_indices = @transform_10, window_bounds = array<i64: 256, 16>}]} {
    %c0 = arith.constant 0 : index
    %c0_0 = arith.constant 0 : index
    %0 = vector.load %arg1[%c0, %c0_0] : memref<256x16xf32, #tpu.memory_space<vmem>>, vector<256x16xf32>
    %c0_1 = arith.constant 0 : index
    %c0_2 = arith.constant 0 : index
    %1 = vector.load %arg2[%c0_1, %c0_2] : memref<256x36xf32, #tpu.memory_space<vmem>>, vector<256x36xf32>
    %c0_3 = arith.constant 0 : index
    %c0_4 = arith.constant 0 : index
    %2 = vector.load %arg3[%c0_3, %c0_4] : memref<36x4xf32, #tpu.memory_space<vmem>>, vector<36x4xf32>
    %cst = arith.constant dense<0.000000e+00> : vector<256x4xf32>
    %3 = tpu.matmul %1, %2, %cst {dimension_numbers = #tpu.dot_dimension_numbers<[1], [0], [0], [1], [0, 0, 1, 1], [], []>} : vector<256x36xf32>, vector<36x4xf32>, vector<256x4xf32> -> vector<256x4xf32>
    %c0_5 = arith.constant 0 : index
    %c0_6 = arith.constant 0 : index
    %4 = vector.load %arg4[%c0_5, %c0_6] : memref<4x32xf32, #tpu.memory_space<vmem>>, vector<4x32xf32>
    %cst_7 = arith.constant dense<0.000000e+00> : vector<256x32xf32>
    %5 = tpu.matmul %3, %4, %cst_7 {dimension_numbers = #tpu.dot_dimension_numbers<[1], [0], [0], [1], [0, 0, 1, 1], [], []>} : vector<256x4xf32>, vector<4x32xf32>, vector<256x32xf32> -> vector<256x32xf32>
    %c0_8 = arith.constant 0 : index
    %c0_9 = arith.constant 0 : index
    %6 = vector.load %arg5[%c0_8, %c0_9] : memref<16x32xf32, #tpu.memory_space<vmem>>, vector<16x32xf32>
    %cst_10 = arith.constant dense<0.000000e+00> : vector<256x32xf32>
    %7 = tpu.matmul %0, %6, %cst_10 {dimension_numbers = #tpu.dot_dimension_numbers<[1], [0], [0], [1], [0, 0, 1, 1], [], []>} : vector<256x16xf32>, vector<16x32xf32>, vector<256x32xf32> -> vector<256x32xf32>
    %8 = arith.addf %5, %7 : vector<256x32xf32>
    %c0_11 = arith.constant 0 : index
    %c0_12 = arith.constant 0 : index
    %9 = vector.load %arg6[%c0_11, %c0_12] : memref<1x32xf32, #tpu.memory_space<vmem>>, vector<1x32xf32>
    %10 = vector.broadcast %9 : vector<1x32xf32> to vector<256x32xf32>
    %11 = arith.addf %8, %10 : vector<256x32xf32>
    %cst_13 = arith.constant 0.000000e+00 : f32
    %12 = vector.broadcast %cst_13 : f32 to vector<256x32xf32>
    %13 = arith.maximumf %11, %12 : vector<256x32xf32>
    %c0_14 = arith.constant 0 : index
    %c0_15 = arith.constant 0 : index
    %14 = vector.load %arg7[%c0_14, %c0_15] : memref<32x16xf32, #tpu.memory_space<vmem>>, vector<32x16xf32>
    %cst_16 = arith.constant dense<0.000000e+00> : vector<256x16xf32>
    %15 = tpu.matmul %13, %14, %cst_16 {dimension_numbers = #tpu.dot_dimension_numbers<[1], [0], [0], [1], [0, 0, 1, 1], [], []>} : vector<256x32xf32>, vector<32x16xf32>, vector<256x16xf32> -> vector<256x16xf32>
    %16 = arith.addf %0, %15 : vector<256x16xf32>
    %c0_17 = arith.constant 0 : index
    %c0_18 = arith.constant 0 : index
    %17 = vector.load %arg10[%c0_17, %c0_18] : memref<256x16xf32, #tpu.memory_space<vmem>>, vector<256x16xf32>
    tpu.vector_store %arg10[%c0_17, %c0_18], %16 {strides = array<i32>} : memref<256x16xf32, #tpu.memory_space<vmem>>, vector<256x16xf32>,
    %c0_19 = arith.constant 0 : index
    %c0_20 = arith.constant 0 : index
    %18 = vector.load %arg8[%c0_19, %c0_20] : memref<1x16xf32, #tpu.memory_space<vmem>>, vector<1x16xf32>
    %19 = vector.broadcast %18 : vector<1x16xf32> to vector<256x16xf32>
    %20 = arith.mulf %16, %19 : vector<256x16xf32>
    %c0_21 = arith.constant 0 : index
    %c0_22 = arith.constant 0 : index
    %21 = vector.load %arg9[%c0_21, %c0_22] : memref<1x16xf32, #tpu.memory_space<vmem>>, vector<1x16xf32>
    %22 = vector.broadcast %21 : vector<1x16xf32> to vector<256x16xf32>
    %23 = arith.addf %20, %22 : vector<256x16xf32>
    %c0_23 = arith.constant 0 : index
    %c0_24 = arith.constant 0 : index
    %24 = vector.load %arg11[%c0_23, %c0_24] : memref<256x16xf32, #tpu.memory_space<vmem>>, vector<256x16xf32>
    tpu.vector_store %arg11[%c0_23, %c0_24], %23 {strides = array<i32>} : memref<256x16xf32, #tpu.memory_space<vmem>>, vector<256x16xf32>,
    return
  }
  func.func @transform_0(%arg0: i32) -> (i32, i32) {
    %c0_i32 = arith.constant 0 : i32
    %c0_i32_0 = arith.constant 0 : i32
    return %arg0, %c0_i32 : i32, i32
  }
  func.func @transform_1(%arg0: i32) -> (i32, i32) {
    %c0_i32 = arith.constant 0 : i32
    %c0_i32_0 = arith.constant 0 : i32
    return %arg0, %c0_i32 : i32, i32
  }
  func.func @transform_2(%arg0: i32) -> (i32, i32) {
    %c0_i32 = arith.constant 0 : i32
    %c0_i32_0 = arith.constant 0 : i32
    %c0_i32_1 = arith.constant 0 : i32
    return %c0_i32, %c0_i32_0 : i32, i32
  }
  func.func @transform_3(%arg0: i32) -> (i32, i32) {
    %c0_i32 = arith.constant 0 : i32
    %c0_i32_0 = arith.constant 0 : i32
    %c0_i32_1 = arith.constant 0 : i32
    return %c0_i32, %c0_i32_0 : i32, i32
  }
  func.func @transform_4(%arg0: i32) -> (i32, i32) {
    %c0_i32 = arith.constant 0 : i32
    %c0_i32_0 = arith.constant 0 : i32
    %c0_i32_1 = arith.constant 0 : i32
    return %c0_i32, %c0_i32_0 : i32, i32
  }
  func.func @transform_5(%arg0: i32) -> (i32, i32) {
    %c0_i32 = arith.constant 0 : i32
    %c0_i32_0 = arith.constant 0 : i32
    %c0_i32_1 = arith.constant 0 : i32
    return %c0_i32, %c0_i32_0 : i32, i32
  }
  func.func @transform_6(%arg0: i32) -> (i32, i32) {
    %c0_i32 = arith.constant 0 : i32
    %c0_i32_0 = arith.constant 0 : i32
    %c0_i32_1 = arith.constant 0 : i32
    return %c0_i32, %c0_i32_0 : i32, i32
  }
  func.func @transform_7(%arg0: i32) -> (i32, i32) {
    %c0_i32 = arith.constant 0 : i32
    %c0_i32_0 = arith.constant 0 : i32
    %c0_i32_1 = arith.constant 0 : i32
    return %c0_i32, %c0_i32_0 : i32, i32
  }
  func.func @transform_8(%arg0: i32) -> (i32, i32) {
    %c0_i32 = arith.constant 0 : i32
    %c0_i32_0 = arith.constant 0 : i32
    %c0_i32_1 = arith.constant 0 : i32
    return %c0_i32, %c0_i32_0 : i32, i32
  }
  func.func @transform_9(%arg0: i32) -> (i32, i32) {
    %c0_i32 = arith.constant 0 : i32
    %c0_i32_0 = arith.constant 0 : i32
    return %arg0, %c0_i32 : i32, i32
  }
  func.func @transform_10(%arg0: i32) -> (i32, i32) {
    %c0_i32 = arith.constant 0 : i32
    %c0_i32_0 = arith.constant 0 : i32
    return %arg0, %c0_i32 : i32, i32
  }
}

module attributes {stable_mosaic.version = 11 : i64} {
  func.func @_pm_dw_a_kernel(%arg0: i32, %arg1: memref<128x64xf32, #tpu.memory_space<vmem>>, %arg2: memref<64x32xf32, #tpu.memory_space<vmem>>, %arg3: memref<1x32xf32, #tpu.memory_space<vmem>>, %arg4: memref<1x32xf32, #tpu.memory_space<vmem>>, %arg5: memref<1x32xf32, #tpu.memory_space<vmem>>, %arg6: memref<1x32xf32, #tpu.memory_space<vmem>>, %arg7: memref<128x32xf32, #tpu.memory_space<vmem>>) attributes {dimension_semantics = [#tpu.dimension_semantics<parallel>], iteration_bounds = array<i64: 1>, scalar_prefetch = 0 : i64, scratch_operands = 0 : i64, tpu.core_type = #tpu.core_type<tc>, window_params = [{transform_indices = @transform_0, window_bounds = array<i64: 128, 64>}, {pipeline_mode = #tpu.pipeline_mode<synchronous>, transform_indices = @transform_1, window_bounds = array<i64: 64, 32>}, {pipeline_mode = #tpu.pipeline_mode<synchronous>, transform_indices = @transform_2, window_bounds = array<i64: 1, 32>}, {pipeline_mode = #tpu.pipeline_mode<synchronous>, transform_indices = @transform_3, window_bounds = array<i64: 1, 32>}, {pipeline_mode = #tpu.pipeline_mode<synchronous>, transform_indices = @transform_4, window_bounds = array<i64: 1, 32>}, {pipeline_mode = #tpu.pipeline_mode<synchronous>, transform_indices = @transform_5, window_bounds = array<i64: 1, 32>}, {transform_indices = @transform_6, window_bounds = array<i64: 128, 32>}]} {
    %c0 = arith.constant 0 : index
    %c0_0 = arith.constant 0 : index
    %0 = vector.load %arg1[%c0, %c0_0] : memref<128x64xf32, #tpu.memory_space<vmem>>, vector<128x64xf32>
    %c0_1 = arith.constant 0 : index
    %c0_2 = arith.constant 0 : index
    %1 = vector.load %arg2[%c0_1, %c0_2] : memref<64x32xf32, #tpu.memory_space<vmem>>, vector<64x32xf32>
    %cst = arith.constant dense<0.000000e+00> : vector<128x32xf32>
    %2 = tpu.matmul %0, %1, %cst {dimension_numbers = #tpu.dot_dimension_numbers<[1], [0], [0], [1], [0, 0, 1, 1], [], []>} : vector<128x64xf32>, vector<64x32xf32>, vector<128x32xf32> -> vector<128x32xf32>
    %c0_3 = arith.constant 0 : index
    %c0_4 = arith.constant 0 : index
    %3 = vector.load %arg3[%c0_3, %c0_4] : memref<1x32xf32, #tpu.memory_space<vmem>>, vector<1x32xf32>
    %4 = vector.broadcast %3 : vector<1x32xf32> to vector<128x32xf32>
    %5 = arith.addf %2, %4 : vector<128x32xf32>
    %c0_5 = arith.constant 0 : index
    %c0_6 = arith.constant 0 : index
    %6 = vector.load %arg4[%c0_5, %c0_6] : memref<1x32xf32, #tpu.memory_space<vmem>>, vector<1x32xf32>
    %7 = vector.broadcast %6 : vector<1x32xf32> to vector<128x32xf32>
    %8 = arith.maximumf %5, %7 : vector<128x32xf32>
    %c0_7 = arith.constant 0 : index
    %c0_8 = arith.constant 0 : index
    %9 = vector.load %arg5[%c0_7, %c0_8] : memref<1x32xf32, #tpu.memory_space<vmem>>, vector<1x32xf32>
    %10 = vector.broadcast %9 : vector<1x32xf32> to vector<128x32xf32>
    %11 = arith.mulf %8, %10 : vector<128x32xf32>
    %c0_9 = arith.constant 0 : index
    %c0_10 = arith.constant 0 : index
    %12 = vector.load %arg6[%c0_9, %c0_10] : memref<1x32xf32, #tpu.memory_space<vmem>>, vector<1x32xf32>
    %13 = vector.broadcast %12 : vector<1x32xf32> to vector<128x32xf32>
    %14 = arith.addf %11, %13 : vector<128x32xf32>
    %15 = arith.negf %14 : vector<128x32xf32>
    %16 = math.exp %15 : vector<128x32xf32>
    %cst_11 = arith.constant 1.000000e+00 : f32
    %17 = vector.broadcast %cst_11 : f32 to vector<128x32xf32>
    %18 = arith.addf %17, %16 : vector<128x32xf32>
    %19 = arith.divf %17, %18 : vector<128x32xf32>
    %20 = arith.mulf %14, %19 : vector<128x32xf32>
    %c0_12 = arith.constant 0 : index
    %c0_13 = arith.constant 0 : index
    %21 = vector.load %arg7[%c0_12, %c0_13] : memref<128x32xf32, #tpu.memory_space<vmem>>, vector<128x32xf32>
    tpu.vector_store %arg7[%c0_12, %c0_13], %20 {strides = array<i32>} : memref<128x32xf32, #tpu.memory_space<vmem>>, vector<128x32xf32>,
    return
  }
  func.func @transform_0(%arg0: i32) -> (i32, i32) {
    %c0_i32 = arith.constant 0 : i32
    %c0_i32_0 = arith.constant 0 : i32
    return %arg0, %c0_i32 : i32, i32
  }
  func.func @transform_1(%arg0: i32) -> (i32, i32) {
    %c0_i32 = arith.constant 0 : i32
    %c0_i32_0 = arith.constant 0 : i32
    %c0_i32_1 = arith.constant 0 : i32
    return %c0_i32, %c0_i32_0 : i32, i32
  }
  func.func @transform_2(%arg0: i32) -> (i32, i32) {
    %c0_i32 = arith.constant 0 : i32
    %c0_i32_0 = arith.constant 0 : i32
    %c0_i32_1 = arith.constant 0 : i32
    return %c0_i32, %c0_i32_0 : i32, i32
  }
  func.func @transform_3(%arg0: i32) -> (i32, i32) {
    %c0_i32 = arith.constant 0 : i32
    %c0_i32_0 = arith.constant 0 : i32
    %c0_i32_1 = arith.constant 0 : i32
    return %c0_i32, %c0_i32_0 : i32, i32
  }
  func.func @transform_4(%arg0: i32) -> (i32, i32) {
    %c0_i32 = arith.constant 0 : i32
    %c0_i32_0 = arith.constant 0 : i32
    %c0_i32_1 = arith.constant 0 : i32
    return %c0_i32, %c0_i32_0 : i32, i32
  }
  func.func @transform_5(%arg0: i32) -> (i32, i32) {
    %c0_i32 = arith.constant 0 : i32
    %c0_i32_0 = arith.constant 0 : i32
    %c0_i32_1 = arith.constant 0 : i32
    return %c0_i32, %c0_i32_0 : i32, i32
  }
  func.func @transform_6(%arg0: i32) -> (i32, i32) {
    %c0_i32 = arith.constant 0 : i32
    %c0_i32_0 = arith.constant 0 : i32
    return %arg0, %c0_i32 : i32, i32
  }
}

module attributes {stable_mosaic.version = 11 : i64} {
  func.func @_pm_dw_b_kernel(%arg0: i32, %arg1: memref<1x64x32xf32, #tpu.memory_space<vmem>>, %arg2: memref<1x1x16xf32, #tpu.memory_space<vmem>>, %arg3: memref<1x1x16xf32, #tpu.memory_space<vmem>>, %arg4: memref<32x16xf32, #tpu.memory_space<vmem>>, %arg5: memref<1x16xf32, #tpu.memory_space<vmem>>, %arg6: memref<16x32xf32, #tpu.memory_space<vmem>>, %arg7: memref<16x32xf32, #tpu.memory_space<vmem>>, %arg8: memref<1x32xf32, #tpu.memory_space<vmem>>, %arg9: memref<1x32xf32, #tpu.memory_space<vmem>>, %arg10: memref<1x64x32xf32, #tpu.memory_space<vmem>>) attributes {dimension_semantics = [#tpu.dimension_semantics<parallel>], iteration_bounds = array<i64: 2>, scalar_prefetch = 0 : i64, scratch_operands = 0 : i64, tpu.core_type = #tpu.core_type<tc>, window_params = [{transform_indices = @transform_0, window_bounds = array<i64: 1, 64, 32>}, {transform_indices = @transform_1, window_bounds = array<i64: 1, 1, 16>}, {transform_indices = @transform_2, window_bounds = array<i64: 1, 1, 16>}, {pipeline_mode = #tpu.pipeline_mode<synchronous>, transform_indices = @transform_3, window_bounds = array<i64: 32, 16>}, {pipeline_mode = #tpu.pipeline_mode<synchronous>, transform_indices = @transform_4, window_bounds = array<i64: 1, 16>}, {pipeline_mode = #tpu.pipeline_mode<synchronous>, transform_indices = @transform_5, window_bounds = array<i64: 16, 32>}, {pipeline_mode = #tpu.pipeline_mode<synchronous>, transform_indices = @transform_6, window_bounds = array<i64: 16, 32>}, {pipeline_mode = #tpu.pipeline_mode<synchronous>, transform_indices = @transform_7, window_bounds = array<i64: 1, 32>}, {pipeline_mode = #tpu.pipeline_mode<synchronous>, transform_indices = @transform_8, window_bounds = array<i64: 1, 32>}, {transform_indices = @transform_9, window_bounds = array<i64: 1, 64, 32>}]} {
    %c0 = arith.constant 0 : index
    %c0_0 = arith.constant 0 : index
    %c0_1 = arith.constant 0 : index
    %0 = vector.load %arg1[%c0, %c0_0, %c0_1] : memref<1x64x32xf32, #tpu.memory_space<vmem>>, vector<1x64x32xf32>
    %1 = vector.shape_cast %0 : vector<1x64x32xf32> to vector<64x32xf32>
    %2 = vector.extract_strided_slice %1 {offsets = [0, 0], sizes = [64, 16], strides = [1, 1]} : vector<64x32xf32> to vector<64x16xf32>
    %3 = vector.extract_strided_slice %1 {offsets = [0, 16], sizes = [64, 16], strides = [1, 1]} : vector<64x32xf32> to vector<64x16xf32>
    %c0_2 = arith.constant 0 : index
    %c0_3 = arith.constant 0 : index
    %4 = vector.load %arg4[%c0_2, %c0_3] : memref<32x16xf32, #tpu.memory_space<vmem>>, vector<32x16xf32>
    %cst = arith.constant dense<0.000000e+00> : vector<64x16xf32>
    %5 = tpu.matmul %1, %4, %cst {dimension_numbers = #tpu.dot_dimension_numbers<[1], [0], [0], [1], [0, 0, 1, 1], [], []>} : vector<64x32xf32>, vector<32x16xf32>, vector<64x16xf32> -> vector<64x16xf32>
    %c0_4 = arith.constant 0 : index
    %c0_5 = arith.constant 0 : index
    %6 = vector.load %arg5[%c0_4, %c0_5] : memref<1x16xf32, #tpu.memory_space<vmem>>, vector<1x16xf32>
    %7 = vector.broadcast %6 : vector<1x16xf32> to vector<64x16xf32>
    %8 = arith.addf %5, %7 : vector<64x16xf32>
    %cst_6 = arith.constant 0.000000e+00 : f32
    %9 = vector.broadcast %cst_6 : f32 to vector<64x16xf32>
    %10 = arith.maximumf %8, %9 : vector<64x16xf32>
    %c0_7 = arith.constant 0 : index
    %c0_8 = arith.constant 0 : index
    %c0_9 = arith.constant 0 : index
    %11 = vector.load %arg2[%c0_7, %c0_8, %c0_9] : memref<1x1x16xf32, #tpu.memory_space<vmem>>, vector<1x1x16xf32>
    %12 = vector.shape_cast %11 : vector<1x1x16xf32> to vector<1x16xf32>
    %13 = vector.broadcast %12 : vector<1x16xf32> to vector<64x16xf32>
    %14 = arith.mulf %3, %13 : vector<64x16xf32>
    %15 = arith.addf %2, %14 : vector<64x16xf32>
    %16 = arith.addf %15, %10 : vector<64x16xf32>
    %c0_10 = arith.constant 0 : index
    %c0_11 = arith.constant 0 : index
    %c0_12 = arith.constant 0 : index
    %17 = vector.load %arg3[%c0_10, %c0_11, %c0_12] : memref<1x1x16xf32, #tpu.memory_space<vmem>>, vector<1x1x16xf32>
    %18 = vector.shape_cast %17 : vector<1x1x16xf32> to vector<1x16xf32>
    %19 = vector.broadcast %18 : vector<1x16xf32> to vector<64x16xf32>
    %20 = arith.mulf %2, %19 : vector<64x16xf32>
    %21 = arith.addf %3, %20 : vector<64x16xf32>
    %22 = arith.addf %21, %10 : vector<64x16xf32>
    %c0_13 = arith.constant 0 : index
    %c0_14 = arith.constant 0 : index
    %23 = vector.load %arg6[%c0_13, %c0_14] : memref<16x32xf32, #tpu.memory_space<vmem>>, vector<16x32xf32>
    %cst_15 = arith.constant dense<0.000000e+00> : vector<64x32xf32>
    %24 = tpu.matmul %16, %23, %cst_15 {dimension_numbers = #tpu.dot_dimension_numbers<[1], [0], [0], [1], [0, 0, 1, 1], [], []>} : vector<64x16xf32>, vector<16x32xf32>, vector<64x32xf32> -> vector<64x32xf32>
    %c0_16 = arith.constant 0 : index
    %c0_17 = arith.constant 0 : index
    %25 = vector.load %arg7[%c0_16, %c0_17] : memref<16x32xf32, #tpu.memory_space<vmem>>, vector<16x32xf32>
    %cst_18 = arith.constant dense<0.000000e+00> : vector<64x32xf32>
    %26 = tpu.matmul %22, %25, %cst_18 {dimension_numbers = #tpu.dot_dimension_numbers<[1], [0], [0], [1], [0, 0, 1, 1], [], []>} : vector<64x16xf32>, vector<16x32xf32>, vector<64x32xf32> -> vector<64x32xf32>
    %27 = arith.addf %24, %26 : vector<64x32xf32>
    %cst_19 = arith.constant 0.000000e+00 : f32
    %28 = vector.broadcast %cst_19 : f32 to vector<64x32xf32>
    %29 = arith.maximumf %27, %28 : vector<64x32xf32>
    %c0_20 = arith.constant 0 : index
    %c0_21 = arith.constant 0 : index
    %30 = vector.load %arg8[%c0_20, %c0_21] : memref<1x32xf32, #tpu.memory_space<vmem>>, vector<1x32xf32>
    %31 = vector.broadcast %30 : vector<1x32xf32> to vector<64x32xf32>
    %32 = arith.mulf %29, %31 : vector<64x32xf32>
    %c0_22 = arith.constant 0 : index
    %c0_23 = arith.constant 0 : index
    %33 = vector.load %arg9[%c0_22, %c0_23] : memref<1x32xf32, #tpu.memory_space<vmem>>, vector<1x32xf32>
    %34 = vector.broadcast %33 : vector<1x32xf32> to vector<64x32xf32>
    %35 = arith.addf %32, %34 : vector<64x32xf32>
    %c0_24 = arith.constant 0 : index
    %c0_25 = arith.constant 0 : index
    %c0_26 = arith.constant 0 : index
    %36 = vector.load %arg10[%c0_24, %c0_25, %c0_26] : memref<1x64x32xf32, #tpu.memory_space<vmem>>, vector<1x64x32xf32>
    %37 = vector.shape_cast %36 : vector<1x64x32xf32> to vector<64x32xf32>
    %38 = vector.shape_cast %35 : vector<64x32xf32> to vector<1x64x32xf32>
    tpu.vector_store %arg10[%c0_24, %c0_25, %c0_26], %38 {strides = array<i32>} : memref<1x64x32xf32, #tpu.memory_space<vmem>>, vector<1x64x32xf32>,
    return
  }
  func.func @transform_0(%arg0: i32) -> (i32, i32, i32) {
    %c0_i32 = arith.constant 0 : i32
    %c0_i32_0 = arith.constant 0 : i32
    %c0_i32_1 = arith.constant 0 : i32
    return %arg0, %c0_i32, %c0_i32_0 : i32, i32, i32
  }
  func.func @transform_1(%arg0: i32) -> (i32, i32, i32) {
    %c0_i32 = arith.constant 0 : i32
    %c0_i32_0 = arith.constant 0 : i32
    %c0_i32_1 = arith.constant 0 : i32
    return %arg0, %c0_i32, %c0_i32_0 : i32, i32, i32
  }
  func.func @transform_2(%arg0: i32) -> (i32, i32, i32) {
    %c0_i32 = arith.constant 0 : i32
    %c0_i32_0 = arith.constant 0 : i32
    %c0_i32_1 = arith.constant 0 : i32
    return %arg0, %c0_i32, %c0_i32_0 : i32, i32, i32
  }
  func.func @transform_3(%arg0: i32) -> (i32, i32) {
    %c0_i32 = arith.constant 0 : i32
    %c0_i32_0 = arith.constant 0 : i32
    %c0_i32_1 = arith.constant 0 : i32
    return %c0_i32, %c0_i32_0 : i32, i32
  }
  func.func @transform_4(%arg0: i32) -> (i32, i32) {
    %c0_i32 = arith.constant 0 : i32
    %c0_i32_0 = arith.constant 0 : i32
    %c0_i32_1 = arith.constant 0 : i32
    return %c0_i32, %c0_i32_0 : i32, i32
  }
  func.func @transform_5(%arg0: i32) -> (i32, i32) {
    %c0_i32 = arith.constant 0 : i32
    %c0_i32_0 = arith.constant 0 : i32
    %c0_i32_1 = arith.constant 0 : i32
    return %c0_i32, %c0_i32_0 : i32, i32
  }
  func.func @transform_6(%arg0: i32) -> (i32, i32) {
    %c0_i32 = arith.constant 0 : i32
    %c0_i32_0 = arith.constant 0 : i32
    %c0_i32_1 = arith.constant 0 : i32
    return %c0_i32, %c0_i32_0 : i32, i32
  }
  func.func @transform_7(%arg0: i32) -> (i32, i32) {
    %c0_i32 = arith.constant 0 : i32
    %c0_i32_0 = arith.constant 0 : i32
    %c0_i32_1 = arith.constant 0 : i32
    return %c0_i32, %c0_i32_0 : i32, i32
  }
  func.func @transform_8(%arg0: i32) -> (i32, i32) {
    %c0_i32 = arith.constant 0 : i32
    %c0_i32_0 = arith.constant 0 : i32
    %c0_i32_1 = arith.constant 0 : i32
    return %c0_i32, %c0_i32_0 : i32, i32
  }
  func.func @transform_9(%arg0: i32) -> (i32, i32, i32) {
    %c0_i32 = arith.constant 0 : i32
    %c0_i32_0 = arith.constant 0 : i32
    %c0_i32_1 = arith.constant 0 : i32
    return %arg0, %c0_i32, %c0_i32_0 : i32, i32, i32
  }
}

module attributes {stable_mosaic.version = 11 : i64} {
  func.func @_mlp_block_kernel(%arg0: i32, %arg1: memref<128x32xf32, #tpu.memory_space<vmem>>, %arg2: memref<128x72xf32, #tpu.memory_space<vmem>>, %arg3: memref<72x8xf32, #tpu.memory_space<vmem>>, %arg4: memref<8x64xf32, #tpu.memory_space<vmem>>, %arg5: memref<32x64xf32, #tpu.memory_space<vmem>>, %arg6: memref<1x64xf32, #tpu.memory_space<vmem>>, %arg7: memref<64x32xf32, #tpu.memory_space<vmem>>, %arg8: memref<1x32xf32, #tpu.memory_space<vmem>>, %arg9: memref<1x32xf32, #tpu.memory_space<vmem>>, %arg10: memref<128x32xf32, #tpu.memory_space<vmem>>, %arg11: memref<128x32xf32, #tpu.memory_space<vmem>>) attributes {dimension_semantics = [#tpu.dimension_semantics<parallel>], iteration_bounds = array<i64: 1>, scalar_prefetch = 0 : i64, scratch_operands = 0 : i64, tpu.core_type = #tpu.core_type<tc>, window_params = [{transform_indices = @transform_0, window_bounds = array<i64: 128, 32>}, {transform_indices = @transform_1, window_bounds = array<i64: 128, 72>}, {pipeline_mode = #tpu.pipeline_mode<synchronous>, transform_indices = @transform_2, window_bounds = array<i64: 72, 8>}, {pipeline_mode = #tpu.pipeline_mode<synchronous>, transform_indices = @transform_3, window_bounds = array<i64: 8, 64>}, {pipeline_mode = #tpu.pipeline_mode<synchronous>, transform_indices = @transform_4, window_bounds = array<i64: 32, 64>}, {pipeline_mode = #tpu.pipeline_mode<synchronous>, transform_indices = @transform_5, window_bounds = array<i64: 1, 64>}, {pipeline_mode = #tpu.pipeline_mode<synchronous>, transform_indices = @transform_6, window_bounds = array<i64: 64, 32>}, {pipeline_mode = #tpu.pipeline_mode<synchronous>, transform_indices = @transform_7, window_bounds = array<i64: 1, 32>}, {pipeline_mode = #tpu.pipeline_mode<synchronous>, transform_indices = @transform_8, window_bounds = array<i64: 1, 32>}, {transform_indices = @transform_9, window_bounds = array<i64: 128, 32>}, {transform_indices = @transform_10, window_bounds = array<i64: 128, 32>}]} {
    %c0 = arith.constant 0 : index
    %c0_0 = arith.constant 0 : index
    %0 = vector.load %arg1[%c0, %c0_0] : memref<128x32xf32, #tpu.memory_space<vmem>>, vector<128x32xf32>
    %c0_1 = arith.constant 0 : index
    %c0_2 = arith.constant 0 : index
    %1 = vector.load %arg2[%c0_1, %c0_2] : memref<128x72xf32, #tpu.memory_space<vmem>>, vector<128x72xf32>
    %c0_3 = arith.constant 0 : index
    %c0_4 = arith.constant 0 : index
    %2 = vector.load %arg3[%c0_3, %c0_4] : memref<72x8xf32, #tpu.memory_space<vmem>>, vector<72x8xf32>
    %cst = arith.constant dense<0.000000e+00> : vector<128x8xf32>
    %3 = tpu.matmul %1, %2, %cst {dimension_numbers = #tpu.dot_dimension_numbers<[1], [0], [0], [1], [0, 0, 1, 1], [], []>} : vector<128x72xf32>, vector<72x8xf32>, vector<128x8xf32> -> vector<128x8xf32>
    %c0_5 = arith.constant 0 : index
    %c0_6 = arith.constant 0 : index
    %4 = vector.load %arg4[%c0_5, %c0_6] : memref<8x64xf32, #tpu.memory_space<vmem>>, vector<8x64xf32>
    %cst_7 = arith.constant dense<0.000000e+00> : vector<128x64xf32>
    %5 = tpu.matmul %3, %4, %cst_7 {dimension_numbers = #tpu.dot_dimension_numbers<[1], [0], [0], [1], [0, 0, 1, 1], [], []>} : vector<128x8xf32>, vector<8x64xf32>, vector<128x64xf32> -> vector<128x64xf32>
    %c0_8 = arith.constant 0 : index
    %c0_9 = arith.constant 0 : index
    %6 = vector.load %arg5[%c0_8, %c0_9] : memref<32x64xf32, #tpu.memory_space<vmem>>, vector<32x64xf32>
    %cst_10 = arith.constant dense<0.000000e+00> : vector<128x64xf32>
    %7 = tpu.matmul %0, %6, %cst_10 {dimension_numbers = #tpu.dot_dimension_numbers<[1], [0], [0], [1], [0, 0, 1, 1], [], []>} : vector<128x32xf32>, vector<32x64xf32>, vector<128x64xf32> -> vector<128x64xf32>
    %8 = arith.addf %5, %7 : vector<128x64xf32>
    %c0_11 = arith.constant 0 : index
    %c0_12 = arith.constant 0 : index
    %9 = vector.load %arg6[%c0_11, %c0_12] : memref<1x64xf32, #tpu.memory_space<vmem>>, vector<1x64xf32>
    %10 = vector.broadcast %9 : vector<1x64xf32> to vector<128x64xf32>
    %11 = arith.addf %8, %10 : vector<128x64xf32>
    %cst_13 = arith.constant 0.000000e+00 : f32
    %12 = vector.broadcast %cst_13 : f32 to vector<128x64xf32>
    %13 = arith.maximumf %11, %12 : vector<128x64xf32>
    %c0_14 = arith.constant 0 : index
    %c0_15 = arith.constant 0 : index
    %14 = vector.load %arg7[%c0_14, %c0_15] : memref<64x32xf32, #tpu.memory_space<vmem>>, vector<64x32xf32>
    %cst_16 = arith.constant dense<0.000000e+00> : vector<128x32xf32>
    %15 = tpu.matmul %13, %14, %cst_16 {dimension_numbers = #tpu.dot_dimension_numbers<[1], [0], [0], [1], [0, 0, 1, 1], [], []>} : vector<128x64xf32>, vector<64x32xf32>, vector<128x32xf32> -> vector<128x32xf32>
    %16 = arith.addf %0, %15 : vector<128x32xf32>
    %c0_17 = arith.constant 0 : index
    %c0_18 = arith.constant 0 : index
    %17 = vector.load %arg10[%c0_17, %c0_18] : memref<128x32xf32, #tpu.memory_space<vmem>>, vector<128x32xf32>
    tpu.vector_store %arg10[%c0_17, %c0_18], %16 {strides = array<i32>} : memref<128x32xf32, #tpu.memory_space<vmem>>, vector<128x32xf32>,
    %c0_19 = arith.constant 0 : index
    %c0_20 = arith.constant 0 : index
    %18 = vector.load %arg8[%c0_19, %c0_20] : memref<1x32xf32, #tpu.memory_space<vmem>>, vector<1x32xf32>
    %19 = vector.broadcast %18 : vector<1x32xf32> to vector<128x32xf32>
    %20 = arith.mulf %16, %19 : vector<128x32xf32>
    %c0_21 = arith.constant 0 : index
    %c0_22 = arith.constant 0 : index
    %21 = vector.load %arg9[%c0_21, %c0_22] : memref<1x32xf32, #tpu.memory_space<vmem>>, vector<1x32xf32>
    %22 = vector.broadcast %21 : vector<1x32xf32> to vector<128x32xf32>
    %23 = arith.addf %20, %22 : vector<128x32xf32>
    %c0_23 = arith.constant 0 : index
    %c0_24 = arith.constant 0 : index
    %24 = vector.load %arg11[%c0_23, %c0_24] : memref<128x32xf32, #tpu.memory_space<vmem>>, vector<128x32xf32>
    tpu.vector_store %arg11[%c0_23, %c0_24], %23 {strides = array<i32>} : memref<128x32xf32, #tpu.memory_space<vmem>>, vector<128x32xf32>,
    return
  }
  func.func @transform_0(%arg0: i32) -> (i32, i32) {
    %c0_i32 = arith.constant 0 : i32
    %c0_i32_0 = arith.constant 0 : i32
    return %arg0, %c0_i32 : i32, i32
  }
  func.func @transform_1(%arg0: i32) -> (i32, i32) {
    %c0_i32 = arith.constant 0 : i32
    %c0_i32_0 = arith.constant 0 : i32
    return %arg0, %c0_i32 : i32, i32
  }
  func.func @transform_2(%arg0: i32) -> (i32, i32) {
    %c0_i32 = arith.constant 0 : i32
    %c0_i32_0 = arith.constant 0 : i32
    %c0_i32_1 = arith.constant 0 : i32
    return %c0_i32, %c0_i32_0 : i32, i32
  }
  func.func @transform_3(%arg0: i32) -> (i32, i32) {
    %c0_i32 = arith.constant 0 : i32
    %c0_i32_0 = arith.constant 0 : i32
    %c0_i32_1 = arith.constant 0 : i32
    return %c0_i32, %c0_i32_0 : i32, i32
  }
  func.func @transform_4(%arg0: i32) -> (i32, i32) {
    %c0_i32 = arith.constant 0 : i32
    %c0_i32_0 = arith.constant 0 : i32
    %c0_i32_1 = arith.constant 0 : i32
    return %c0_i32, %c0_i32_0 : i32, i32
  }
  func.func @transform_5(%arg0: i32) -> (i32, i32) {
    %c0_i32 = arith.constant 0 : i32
    %c0_i32_0 = arith.constant 0 : i32
    %c0_i32_1 = arith.constant 0 : i32
    return %c0_i32, %c0_i32_0 : i32, i32
  }
  func.func @transform_6(%arg0: i32) -> (i32, i32) {
    %c0_i32 = arith.constant 0 : i32
    %c0_i32_0 = arith.constant 0 : i32
    %c0_i32_1 = arith.constant 0 : i32
    return %c0_i32, %c0_i32_0 : i32, i32
  }
  func.func @transform_7(%arg0: i32) -> (i32, i32) {
    %c0_i32 = arith.constant 0 : i32
    %c0_i32_0 = arith.constant 0 : i32
    %c0_i32_1 = arith.constant 0 : i32
    return %c0_i32, %c0_i32_0 : i32, i32
  }
  func.func @transform_8(%arg0: i32) -> (i32, i32) {
    %c0_i32 = arith.constant 0 : i32
    %c0_i32_0 = arith.constant 0 : i32
    %c0_i32_1 = arith.constant 0 : i32
    return %c0_i32, %c0_i32_0 : i32, i32
  }
  func.func @transform_9(%arg0: i32) -> (i32, i32) {
    %c0_i32 = arith.constant 0 : i32
    %c0_i32_0 = arith.constant 0 : i32
    return %arg0, %c0_i32 : i32, i32
  }
  func.func @transform_10(%arg0: i32) -> (i32, i32) {
    %c0_i32 = arith.constant 0 : i32
    %c0_i32_0 = arith.constant 0 : i32
    return %arg0, %c0_i32 : i32, i32
  }
}

module attributes {stable_mosaic.version = 11 : i64} {
  func.func @_pm_dw_a_kernel(%arg0: i32, %arg1: memref<32x128xf32, #tpu.memory_space<vmem>>, %arg2: memref<128x64xf32, #tpu.memory_space<vmem>>, %arg3: memref<1x64xf32, #tpu.memory_space<vmem>>, %arg4: memref<1x64xf32, #tpu.memory_space<vmem>>, %arg5: memref<1x64xf32, #tpu.memory_space<vmem>>, %arg6: memref<1x64xf32, #tpu.memory_space<vmem>>, %arg7: memref<32x64xf32, #tpu.memory_space<vmem>>) attributes {dimension_semantics = [#tpu.dimension_semantics<parallel>], iteration_bounds = array<i64: 1>, scalar_prefetch = 0 : i64, scratch_operands = 0 : i64, tpu.core_type = #tpu.core_type<tc>, window_params = [{transform_indices = @transform_0, window_bounds = array<i64: 32, 128>}, {pipeline_mode = #tpu.pipeline_mode<synchronous>, transform_indices = @transform_1, window_bounds = array<i64: 128, 64>}, {pipeline_mode = #tpu.pipeline_mode<synchronous>, transform_indices = @transform_2, window_bounds = array<i64: 1, 64>}, {pipeline_mode = #tpu.pipeline_mode<synchronous>, transform_indices = @transform_3, window_bounds = array<i64: 1, 64>}, {pipeline_mode = #tpu.pipeline_mode<synchronous>, transform_indices = @transform_4, window_bounds = array<i64: 1, 64>}, {pipeline_mode = #tpu.pipeline_mode<synchronous>, transform_indices = @transform_5, window_bounds = array<i64: 1, 64>}, {transform_indices = @transform_6, window_bounds = array<i64: 32, 64>}]} {
    %c0 = arith.constant 0 : index
    %c0_0 = arith.constant 0 : index
    %0 = vector.load %arg1[%c0, %c0_0] : memref<32x128xf32, #tpu.memory_space<vmem>>, vector<32x128xf32>
    %c0_1 = arith.constant 0 : index
    %c0_2 = arith.constant 0 : index
    %1 = vector.load %arg2[%c0_1, %c0_2] : memref<128x64xf32, #tpu.memory_space<vmem>>, vector<128x64xf32>
    %cst = arith.constant dense<0.000000e+00> : vector<32x64xf32>
    %2 = tpu.matmul %0, %1, %cst {dimension_numbers = #tpu.dot_dimension_numbers<[1], [0], [0], [1], [0, 0, 1, 1], [], []>} : vector<32x128xf32>, vector<128x64xf32>, vector<32x64xf32> -> vector<32x64xf32>
    %c0_3 = arith.constant 0 : index
    %c0_4 = arith.constant 0 : index
    %3 = vector.load %arg3[%c0_3, %c0_4] : memref<1x64xf32, #tpu.memory_space<vmem>>, vector<1x64xf32>
    %4 = vector.broadcast %3 : vector<1x64xf32> to vector<32x64xf32>
    %5 = arith.addf %2, %4 : vector<32x64xf32>
    %c0_5 = arith.constant 0 : index
    %c0_6 = arith.constant 0 : index
    %6 = vector.load %arg4[%c0_5, %c0_6] : memref<1x64xf32, #tpu.memory_space<vmem>>, vector<1x64xf32>
    %7 = vector.broadcast %6 : vector<1x64xf32> to vector<32x64xf32>
    %8 = arith.maximumf %5, %7 : vector<32x64xf32>
    %c0_7 = arith.constant 0 : index
    %c0_8 = arith.constant 0 : index
    %9 = vector.load %arg5[%c0_7, %c0_8] : memref<1x64xf32, #tpu.memory_space<vmem>>, vector<1x64xf32>
    %10 = vector.broadcast %9 : vector<1x64xf32> to vector<32x64xf32>
    %11 = arith.mulf %8, %10 : vector<32x64xf32>
    %c0_9 = arith.constant 0 : index
    %c0_10 = arith.constant 0 : index
    %12 = vector.load %arg6[%c0_9, %c0_10] : memref<1x64xf32, #tpu.memory_space<vmem>>, vector<1x64xf32>
    %13 = vector.broadcast %12 : vector<1x64xf32> to vector<32x64xf32>
    %14 = arith.addf %11, %13 : vector<32x64xf32>
    %15 = arith.negf %14 : vector<32x64xf32>
    %16 = math.exp %15 : vector<32x64xf32>
    %cst_11 = arith.constant 1.000000e+00 : f32
    %17 = vector.broadcast %cst_11 : f32 to vector<32x64xf32>
    %18 = arith.addf %17, %16 : vector<32x64xf32>
    %19 = arith.divf %17, %18 : vector<32x64xf32>
    %20 = arith.mulf %14, %19 : vector<32x64xf32>
    %c0_12 = arith.constant 0 : index
    %c0_13 = arith.constant 0 : index
    %21 = vector.load %arg7[%c0_12, %c0_13] : memref<32x64xf32, #tpu.memory_space<vmem>>, vector<32x64xf32>
    tpu.vector_store %arg7[%c0_12, %c0_13], %20 {strides = array<i32>} : memref<32x64xf32, #tpu.memory_space<vmem>>, vector<32x64xf32>,
    return
  }
  func.func @transform_0(%arg0: i32) -> (i32, i32) {
    %c0_i32 = arith.constant 0 : i32
    %c0_i32_0 = arith.constant 0 : i32
    return %arg0, %c0_i32 : i32, i32
  }
  func.func @transform_1(%arg0: i32) -> (i32, i32) {
    %c0_i32 = arith.constant 0 : i32
    %c0_i32_0 = arith.constant 0 : i32
    %c0_i32_1 = arith.constant 0 : i32
    return %c0_i32, %c0_i32_0 : i32, i32
  }
  func.func @transform_2(%arg0: i32) -> (i32, i32) {
    %c0_i32 = arith.constant 0 : i32
    %c0_i32_0 = arith.constant 0 : i32
    %c0_i32_1 = arith.constant 0 : i32
    return %c0_i32, %c0_i32_0 : i32, i32
  }
  func.func @transform_3(%arg0: i32) -> (i32, i32) {
    %c0_i32 = arith.constant 0 : i32
    %c0_i32_0 = arith.constant 0 : i32
    %c0_i32_1 = arith.constant 0 : i32
    return %c0_i32, %c0_i32_0 : i32, i32
  }
  func.func @transform_4(%arg0: i32) -> (i32, i32) {
    %c0_i32 = arith.constant 0 : i32
    %c0_i32_0 = arith.constant 0 : i32
    %c0_i32_1 = arith.constant 0 : i32
    return %c0_i32, %c0_i32_0 : i32, i32
  }
  func.func @transform_5(%arg0: i32) -> (i32, i32) {
    %c0_i32 = arith.constant 0 : i32
    %c0_i32_0 = arith.constant 0 : i32
    %c0_i32_1 = arith.constant 0 : i32
    return %c0_i32, %c0_i32_0 : i32, i32
  }
  func.func @transform_6(%arg0: i32) -> (i32, i32) {
    %c0_i32 = arith.constant 0 : i32
    %c0_i32_0 = arith.constant 0 : i32
    return %arg0, %c0_i32 : i32, i32
  }
}

module attributes {stable_mosaic.version = 11 : i64} {
  func.func @_pm_dw_b_kernel(%arg0: i32, %arg1: memref<1x16x64xf32, #tpu.memory_space<vmem>>, %arg2: memref<1x1x32xf32, #tpu.memory_space<vmem>>, %arg3: memref<1x1x32xf32, #tpu.memory_space<vmem>>, %arg4: memref<64x32xf32, #tpu.memory_space<vmem>>, %arg5: memref<1x32xf32, #tpu.memory_space<vmem>>, %arg6: memref<32x64xf32, #tpu.memory_space<vmem>>, %arg7: memref<32x64xf32, #tpu.memory_space<vmem>>, %arg8: memref<1x64xf32, #tpu.memory_space<vmem>>, %arg9: memref<1x64xf32, #tpu.memory_space<vmem>>, %arg10: memref<1x16x64xf32, #tpu.memory_space<vmem>>) attributes {dimension_semantics = [#tpu.dimension_semantics<parallel>], iteration_bounds = array<i64: 2>, scalar_prefetch = 0 : i64, scratch_operands = 0 : i64, tpu.core_type = #tpu.core_type<tc>, window_params = [{transform_indices = @transform_0, window_bounds = array<i64: 1, 16, 64>}, {transform_indices = @transform_1, window_bounds = array<i64: 1, 1, 32>}, {transform_indices = @transform_2, window_bounds = array<i64: 1, 1, 32>}, {pipeline_mode = #tpu.pipeline_mode<synchronous>, transform_indices = @transform_3, window_bounds = array<i64: 64, 32>}, {pipeline_mode = #tpu.pipeline_mode<synchronous>, transform_indices = @transform_4, window_bounds = array<i64: 1, 32>}, {pipeline_mode = #tpu.pipeline_mode<synchronous>, transform_indices = @transform_5, window_bounds = array<i64: 32, 64>}, {pipeline_mode = #tpu.pipeline_mode<synchronous>, transform_indices = @transform_6, window_bounds = array<i64: 32, 64>}, {pipeline_mode = #tpu.pipeline_mode<synchronous>, transform_indices = @transform_7, window_bounds = array<i64: 1, 64>}, {pipeline_mode = #tpu.pipeline_mode<synchronous>, transform_indices = @transform_8, window_bounds = array<i64: 1, 64>}, {transform_indices = @transform_9, window_bounds = array<i64: 1, 16, 64>}]} {
    %c0 = arith.constant 0 : index
    %c0_0 = arith.constant 0 : index
    %c0_1 = arith.constant 0 : index
    %0 = vector.load %arg1[%c0, %c0_0, %c0_1] : memref<1x16x64xf32, #tpu.memory_space<vmem>>, vector<1x16x64xf32>
    %1 = vector.shape_cast %0 : vector<1x16x64xf32> to vector<16x64xf32>
    %2 = vector.extract_strided_slice %1 {offsets = [0, 0], sizes = [16, 32], strides = [1, 1]} : vector<16x64xf32> to vector<16x32xf32>
    %3 = vector.extract_strided_slice %1 {offsets = [0, 32], sizes = [16, 32], strides = [1, 1]} : vector<16x64xf32> to vector<16x32xf32>
    %c0_2 = arith.constant 0 : index
    %c0_3 = arith.constant 0 : index
    %4 = vector.load %arg4[%c0_2, %c0_3] : memref<64x32xf32, #tpu.memory_space<vmem>>, vector<64x32xf32>
    %cst = arith.constant dense<0.000000e+00> : vector<16x32xf32>
    %5 = tpu.matmul %1, %4, %cst {dimension_numbers = #tpu.dot_dimension_numbers<[1], [0], [0], [1], [0, 0, 1, 1], [], []>} : vector<16x64xf32>, vector<64x32xf32>, vector<16x32xf32> -> vector<16x32xf32>
    %c0_4 = arith.constant 0 : index
    %c0_5 = arith.constant 0 : index
    %6 = vector.load %arg5[%c0_4, %c0_5] : memref<1x32xf32, #tpu.memory_space<vmem>>, vector<1x32xf32>
    %7 = vector.broadcast %6 : vector<1x32xf32> to vector<16x32xf32>
    %8 = arith.addf %5, %7 : vector<16x32xf32>
    %cst_6 = arith.constant 0.000000e+00 : f32
    %9 = vector.broadcast %cst_6 : f32 to vector<16x32xf32>
    %10 = arith.maximumf %8, %9 : vector<16x32xf32>
    %c0_7 = arith.constant 0 : index
    %c0_8 = arith.constant 0 : index
    %c0_9 = arith.constant 0 : index
    %11 = vector.load %arg2[%c0_7, %c0_8, %c0_9] : memref<1x1x32xf32, #tpu.memory_space<vmem>>, vector<1x1x32xf32>
    %12 = vector.shape_cast %11 : vector<1x1x32xf32> to vector<1x32xf32>
    %13 = vector.broadcast %12 : vector<1x32xf32> to vector<16x32xf32>
    %14 = arith.mulf %3, %13 : vector<16x32xf32>
    %15 = arith.addf %2, %14 : vector<16x32xf32>
    %16 = arith.addf %15, %10 : vector<16x32xf32>
    %c0_10 = arith.constant 0 : index
    %c0_11 = arith.constant 0 : index
    %c0_12 = arith.constant 0 : index
    %17 = vector.load %arg3[%c0_10, %c0_11, %c0_12] : memref<1x1x32xf32, #tpu.memory_space<vmem>>, vector<1x1x32xf32>
    %18 = vector.shape_cast %17 : vector<1x1x32xf32> to vector<1x32xf32>
    %19 = vector.broadcast %18 : vector<1x32xf32> to vector<16x32xf32>
    %20 = arith.mulf %2, %19 : vector<16x32xf32>
    %21 = arith.addf %3, %20 : vector<16x32xf32>
    %22 = arith.addf %21, %10 : vector<16x32xf32>
    %c0_13 = arith.constant 0 : index
    %c0_14 = arith.constant 0 : index
    %23 = vector.load %arg6[%c0_13, %c0_14] : memref<32x64xf32, #tpu.memory_space<vmem>>, vector<32x64xf32>
    %cst_15 = arith.constant dense<0.000000e+00> : vector<16x64xf32>
    %24 = tpu.matmul %16, %23, %cst_15 {dimension_numbers = #tpu.dot_dimension_numbers<[1], [0], [0], [1], [0, 0, 1, 1], [], []>} : vector<16x32xf32>, vector<32x64xf32>, vector<16x64xf32> -> vector<16x64xf32>
    %c0_16 = arith.constant 0 : index
    %c0_17 = arith.constant 0 : index
    %25 = vector.load %arg7[%c0_16, %c0_17] : memref<32x64xf32, #tpu.memory_space<vmem>>, vector<32x64xf32>
    %cst_18 = arith.constant dense<0.000000e+00> : vector<16x64xf32>
    %26 = tpu.matmul %22, %25, %cst_18 {dimension_numbers = #tpu.dot_dimension_numbers<[1], [0], [0], [1], [0, 0, 1, 1], [], []>} : vector<16x32xf32>, vector<32x64xf32>, vector<16x64xf32> -> vector<16x64xf32>
    %27 = arith.addf %24, %26 : vector<16x64xf32>
    %cst_19 = arith.constant 0.000000e+00 : f32
    %28 = vector.broadcast %cst_19 : f32 to vector<16x64xf32>
    %29 = arith.maximumf %27, %28 : vector<16x64xf32>
    %c0_20 = arith.constant 0 : index
    %c0_21 = arith.constant 0 : index
    %30 = vector.load %arg8[%c0_20, %c0_21] : memref<1x64xf32, #tpu.memory_space<vmem>>, vector<1x64xf32>
    %31 = vector.broadcast %30 : vector<1x64xf32> to vector<16x64xf32>
    %32 = arith.mulf %29, %31 : vector<16x64xf32>
    %c0_22 = arith.constant 0 : index
    %c0_23 = arith.constant 0 : index
    %33 = vector.load %arg9[%c0_22, %c0_23] : memref<1x64xf32, #tpu.memory_space<vmem>>, vector<1x64xf32>
    %34 = vector.broadcast %33 : vector<1x64xf32> to vector<16x64xf32>
    %35 = arith.addf %32, %34 : vector<16x64xf32>
    %c0_24 = arith.constant 0 : index
    %c0_25 = arith.constant 0 : index
    %c0_26 = arith.constant 0 : index
    %36 = vector.load %arg10[%c0_24, %c0_25, %c0_26] : memref<1x16x64xf32, #tpu.memory_space<vmem>>, vector<1x16x64xf32>
    %37 = vector.shape_cast %36 : vector<1x16x64xf32> to vector<16x64xf32>
    %38 = vector.shape_cast %35 : vector<16x64xf32> to vector<1x16x64xf32>
    tpu.vector_store %arg10[%c0_24, %c0_25, %c0_26], %38 {strides = array<i32>} : memref<1x16x64xf32, #tpu.memory_space<vmem>>, vector<1x16x64xf32>,
    return
  }
  func.func @transform_0(%arg0: i32) -> (i32, i32, i32) {
    %c0_i32 = arith.constant 0 : i32
    %c0_i32_0 = arith.constant 0 : i32
    %c0_i32_1 = arith.constant 0 : i32
    return %arg0, %c0_i32, %c0_i32_0 : i32, i32, i32
  }
  func.func @transform_1(%arg0: i32) -> (i32, i32, i32) {
    %c0_i32 = arith.constant 0 : i32
    %c0_i32_0 = arith.constant 0 : i32
    %c0_i32_1 = arith.constant 0 : i32
    return %arg0, %c0_i32, %c0_i32_0 : i32, i32, i32
  }
  func.func @transform_2(%arg0: i32) -> (i32, i32, i32) {
    %c0_i32 = arith.constant 0 : i32
    %c0_i32_0 = arith.constant 0 : i32
    %c0_i32_1 = arith.constant 0 : i32
    return %arg0, %c0_i32, %c0_i32_0 : i32, i32, i32
  }
  func.func @transform_3(%arg0: i32) -> (i32, i32) {
    %c0_i32 = arith.constant 0 : i32
    %c0_i32_0 = arith.constant 0 : i32
    %c0_i32_1 = arith.constant 0 : i32
    return %c0_i32, %c0_i32_0 : i32, i32
  }
  func.func @transform_4(%arg0: i32) -> (i32, i32) {
    %c0_i32 = arith.constant 0 : i32
    %c0_i32_0 = arith.constant 0 : i32
    %c0_i32_1 = arith.constant 0 : i32
    return %c0_i32, %c0_i32_0 : i32, i32
  }
  func.func @transform_5(%arg0: i32) -> (i32, i32) {
    %c0_i32 = arith.constant 0 : i32
    %c0_i32_0 = arith.constant 0 : i32
    %c0_i32_1 = arith.constant 0 : i32
    return %c0_i32, %c0_i32_0 : i32, i32
  }
  func.func @transform_6(%arg0: i32) -> (i32, i32) {
    %c0_i32 = arith.constant 0 : i32
    %c0_i32_0 = arith.constant 0 : i32
    %c0_i32_1 = arith.constant 0 : i32
    return %c0_i32, %c0_i32_0 : i32, i32
  }
  func.func @transform_7(%arg0: i32) -> (i32, i32) {
    %c0_i32 = arith.constant 0 : i32
    %c0_i32_0 = arith.constant 0 : i32
    %c0_i32_1 = arith.constant 0 : i32
    return %c0_i32, %c0_i32_0 : i32, i32
  }
  func.func @transform_8(%arg0: i32) -> (i32, i32) {
    %c0_i32 = arith.constant 0 : i32
    %c0_i32_0 = arith.constant 0 : i32
    %c0_i32_1 = arith.constant 0 : i32
    return %c0_i32, %c0_i32_0 : i32, i32
  }
  func.func @transform_9(%arg0: i32) -> (i32, i32, i32) {
    %c0_i32 = arith.constant 0 : i32
    %c0_i32_0 = arith.constant 0 : i32
    %c0_i32_1 = arith.constant 0 : i32
    return %arg0, %c0_i32, %c0_i32_0 : i32, i32, i32
  }
}

module attributes {stable_mosaic.version = 11 : i64} {
  func.func @_mlp_block_kernel(%arg0: i32, %arg1: memref<32x64xf32, #tpu.memory_space<vmem>>, %arg2: memref<32x144xf32, #tpu.memory_space<vmem>>, %arg3: memref<144x16xf32, #tpu.memory_space<vmem>>, %arg4: memref<16x128xf32, #tpu.memory_space<vmem>>, %arg5: memref<64x128xf32, #tpu.memory_space<vmem>>, %arg6: memref<1x128xf32, #tpu.memory_space<vmem>>, %arg7: memref<128x64xf32, #tpu.memory_space<vmem>>, %arg8: memref<1x64xf32, #tpu.memory_space<vmem>>, %arg9: memref<1x64xf32, #tpu.memory_space<vmem>>, %arg10: memref<32x64xf32, #tpu.memory_space<vmem>>, %arg11: memref<32x64xf32, #tpu.memory_space<vmem>>) attributes {dimension_semantics = [#tpu.dimension_semantics<parallel>], iteration_bounds = array<i64: 1>, scalar_prefetch = 0 : i64, scratch_operands = 0 : i64, tpu.core_type = #tpu.core_type<tc>, window_params = [{transform_indices = @transform_0, window_bounds = array<i64: 32, 64>}, {transform_indices = @transform_1, window_bounds = array<i64: 32, 144>}, {pipeline_mode = #tpu.pipeline_mode<synchronous>, transform_indices = @transform_2, window_bounds = array<i64: 144, 16>}, {pipeline_mode = #tpu.pipeline_mode<synchronous>, transform_indices = @transform_3, window_bounds = array<i64: 16, 128>}, {pipeline_mode = #tpu.pipeline_mode<synchronous>, transform_indices = @transform_4, window_bounds = array<i64: 64, 128>}, {pipeline_mode = #tpu.pipeline_mode<synchronous>, transform_indices = @transform_5, window_bounds = array<i64: 1, 128>}, {pipeline_mode = #tpu.pipeline_mode<synchronous>, transform_indices = @transform_6, window_bounds = array<i64: 128, 64>}, {pipeline_mode = #tpu.pipeline_mode<synchronous>, transform_indices = @transform_7, window_bounds = array<i64: 1, 64>}, {pipeline_mode = #tpu.pipeline_mode<synchronous>, transform_indices = @transform_8, window_bounds = array<i64: 1, 64>}, {transform_indices = @transform_9, window_bounds = array<i64: 32, 64>}, {transform_indices = @transform_10, window_bounds = array<i64: 32, 64>}]} {
    %c0 = arith.constant 0 : index
    %c0_0 = arith.constant 0 : index
    %0 = vector.load %arg1[%c0, %c0_0] : memref<32x64xf32, #tpu.memory_space<vmem>>, vector<32x64xf32>
    %c0_1 = arith.constant 0 : index
    %c0_2 = arith.constant 0 : index
    %1 = vector.load %arg2[%c0_1, %c0_2] : memref<32x144xf32, #tpu.memory_space<vmem>>, vector<32x144xf32>
    %c0_3 = arith.constant 0 : index
    %c0_4 = arith.constant 0 : index
    %2 = vector.load %arg3[%c0_3, %c0_4] : memref<144x16xf32, #tpu.memory_space<vmem>>, vector<144x16xf32>
    %cst = arith.constant dense<0.000000e+00> : vector<32x16xf32>
    %3 = tpu.matmul %1, %2, %cst {dimension_numbers = #tpu.dot_dimension_numbers<[1], [0], [0], [1], [0, 0, 1, 1], [], []>} : vector<32x144xf32>, vector<144x16xf32>, vector<32x16xf32> -> vector<32x16xf32>
    %c0_5 = arith.constant 0 : index
    %c0_6 = arith.constant 0 : index
    %4 = vector.load %arg4[%c0_5, %c0_6] : memref<16x128xf32, #tpu.memory_space<vmem>>, vector<16x128xf32>
    %cst_7 = arith.constant dense<0.000000e+00> : vector<32x128xf32>
    %5 = tpu.matmul %3, %4, %cst_7 {dimension_numbers = #tpu.dot_dimension_numbers<[1], [0], [0], [1], [0, 0, 1, 1], [], []>} : vector<32x16xf32>, vector<16x128xf32>, vector<32x128xf32> -> vector<32x128xf32>
    %c0_8 = arith.constant 0 : index
    %c0_9 = arith.constant 0 : index
    %6 = vector.load %arg5[%c0_8, %c0_9] : memref<64x128xf32, #tpu.memory_space<vmem>>, vector<64x128xf32>
    %cst_10 = arith.constant dense<0.000000e+00> : vector<32x128xf32>
    %7 = tpu.matmul %0, %6, %cst_10 {dimension_numbers = #tpu.dot_dimension_numbers<[1], [0], [0], [1], [0, 0, 1, 1], [], []>} : vector<32x64xf32>, vector<64x128xf32>, vector<32x128xf32> -> vector<32x128xf32>
    %8 = arith.addf %5, %7 : vector<32x128xf32>
    %c0_11 = arith.constant 0 : index
    %c0_12 = arith.constant 0 : index
    %9 = vector.load %arg6[%c0_11, %c0_12] : memref<1x128xf32, #tpu.memory_space<vmem>>, vector<1x128xf32>
    %10 = vector.broadcast %9 : vector<1x128xf32> to vector<32x128xf32>
    %11 = arith.addf %8, %10 : vector<32x128xf32>
    %cst_13 = arith.constant 0.000000e+00 : f32
    %12 = vector.broadcast %cst_13 : f32 to vector<32x128xf32>
    %13 = arith.maximumf %11, %12 : vector<32x128xf32>
    %c0_14 = arith.constant 0 : index
    %c0_15 = arith.constant 0 : index
    %14 = vector.load %arg7[%c0_14, %c0_15] : memref<128x64xf32, #tpu.memory_space<vmem>>, vector<128x64xf32>
    %cst_16 = arith.constant dense<0.000000e+00> : vector<32x64xf32>
    %15 = tpu.matmul %13, %14, %cst_16 {dimension_numbers = #tpu.dot_dimension_numbers<[1], [0], [0], [1], [0, 0, 1, 1], [], []>} : vector<32x128xf32>, vector<128x64xf32>, vector<32x64xf32> -> vector<32x64xf32>
    %16 = arith.addf %0, %15 : vector<32x64xf32>
    %c0_17 = arith.constant 0 : index
    %c0_18 = arith.constant 0 : index
    %17 = vector.load %arg10[%c0_17, %c0_18] : memref<32x64xf32, #tpu.memory_space<vmem>>, vector<32x64xf32>
    tpu.vector_store %arg10[%c0_17, %c0_18], %16 {strides = array<i32>} : memref<32x64xf32, #tpu.memory_space<vmem>>, vector<32x64xf32>,
    %c0_19 = arith.constant 0 : index
    %c0_20 = arith.constant 0 : index
    %18 = vector.load %arg8[%c0_19, %c0_20] : memref<1x64xf32, #tpu.memory_space<vmem>>, vector<1x64xf32>
    %19 = vector.broadcast %18 : vector<1x64xf32> to vector<32x64xf32>
    %20 = arith.mulf %16, %19 : vector<32x64xf32>
    %c0_21 = arith.constant 0 : index
    %c0_22 = arith.constant 0 : index
    %21 = vector.load %arg9[%c0_21, %c0_22] : memref<1x64xf32, #tpu.memory_space<vmem>>, vector<1x64xf32>
    %22 = vector.broadcast %21 : vector<1x64xf32> to vector<32x64xf32>
    %23 = arith.addf %20, %22 : vector<32x64xf32>
    %c0_23 = arith.constant 0 : index
    %c0_24 = arith.constant 0 : index
    %24 = vector.load %arg11[%c0_23, %c0_24] : memref<32x64xf32, #tpu.memory_space<vmem>>, vector<32x64xf32>
    tpu.vector_store %arg11[%c0_23, %c0_24], %23 {strides = array<i32>} : memref<32x64xf32, #tpu.memory_space<vmem>>, vector<32x64xf32>,
    return
  }
  func.func @transform_0(%arg0: i32) -> (i32, i32) {
    %c0_i32 = arith.constant 0 : i32
    %c0_i32_0 = arith.constant 0 : i32
    return %arg0, %c0_i32 : i32, i32
  }
  func.func @transform_1(%arg0: i32) -> (i32, i32) {
    %c0_i32 = arith.constant 0 : i32
    %c0_i32_0 = arith.constant 0 : i32
    return %arg0, %c0_i32 : i32, i32
  }
  func.func @transform_2(%arg0: i32) -> (i32, i32) {
    %c0_i32 = arith.constant 0 : i32
    %c0_i32_0 = arith.constant 0 : i32
    %c0_i32_1 = arith.constant 0 : i32
    return %c0_i32, %c0_i32_0 : i32, i32
  }
  func.func @transform_3(%arg0: i32) -> (i32, i32) {
    %c0_i32 = arith.constant 0 : i32
    %c0_i32_0 = arith.constant 0 : i32
    %c0_i32_1 = arith.constant 0 : i32
    return %c0_i32, %c0_i32_0 : i32, i32
  }
  func.func @transform_4(%arg0: i32) -> (i32, i32) {
    %c0_i32 = arith.constant 0 : i32
    %c0_i32_0 = arith.constant 0 : i32
    %c0_i32_1 = arith.constant 0 : i32
    return %c0_i32, %c0_i32_0 : i32, i32
  }
  func.func @transform_5(%arg0: i32) -> (i32, i32) {
    %c0_i32 = arith.constant 0 : i32
    %c0_i32_0 = arith.constant 0 : i32
    %c0_i32_1 = arith.constant 0 : i32
    return %c0_i32, %c0_i32_0 : i32, i32
  }
  func.func @transform_6(%arg0: i32) -> (i32, i32) {
    %c0_i32 = arith.constant 0 : i32
    %c0_i32_0 = arith.constant 0 : i32
    %c0_i32_1 = arith.constant 0 : i32
    return %c0_i32, %c0_i32_0 : i32, i32
  }
  func.func @transform_7(%arg0: i32) -> (i32, i32) {
    %c0_i32 = arith.constant 0 : i32
    %c0_i32_0 = arith.constant 0 : i32
    %c0_i32_1 = arith.constant 0 : i32
    return %c0_i32, %c0_i32_0 : i32, i32
  }
  func.func @transform_8(%arg0: i32) -> (i32, i32) {
    %c0_i32 = arith.constant 0 : i32
    %c0_i32_0 = arith.constant 0 : i32
    %c0_i32_1 = arith.constant 0 : i32
    return %c0_i32, %c0_i32_0 : i32, i32
  }
  func.func @transform_9(%arg0: i32) -> (i32, i32) {
    %c0_i32 = arith.constant 0 : i32
    %c0_i32_0 = arith.constant 0 : i32
    return %arg0, %c0_i32 : i32, i32
  }
  func.func @transform_10(%arg0: i32) -> (i32, i32) {
    %c0_i32 = arith.constant 0 : i32
    %c0_i32_0 = arith.constant 0 : i32
    return %arg0, %c0_i32 : i32, i32
  }
}

module attributes {stable_mosaic.version = 11 : i64} {
  func.func @_matmul_bias_kernel(%arg0: i32, %arg1: memref<8x256xf32, #tpu.memory_space<vmem>>, %arg2: memref<256x128xf32, #tpu.memory_space<vmem>>, %arg3: memref<1x128xf32, #tpu.memory_space<vmem>>, %arg4: memref<8x128xf32, #tpu.memory_space<vmem>>) attributes {dimension_semantics = [#tpu.dimension_semantics<parallel>], iteration_bounds = array<i64: 1>, scalar_prefetch = 0 : i64, scratch_operands = 0 : i64, tpu.core_type = #tpu.core_type<tc>, window_params = [{transform_indices = @transform_0, window_bounds = array<i64: 8, 256>}, {pipeline_mode = #tpu.pipeline_mode<synchronous>, transform_indices = @transform_1, window_bounds = array<i64: 256, 128>}, {pipeline_mode = #tpu.pipeline_mode<synchronous>, transform_indices = @transform_2, window_bounds = array<i64: 1, 128>}, {transform_indices = @transform_3, window_bounds = array<i64: 8, 128>}]} {
    %c0 = arith.constant 0 : index
    %c0_0 = arith.constant 0 : index
    %0 = vector.load %arg1[%c0, %c0_0] : memref<8x256xf32, #tpu.memory_space<vmem>>, vector<8x256xf32>
    %c0_1 = arith.constant 0 : index
    %c0_2 = arith.constant 0 : index
    %1 = vector.load %arg2[%c0_1, %c0_2] : memref<256x128xf32, #tpu.memory_space<vmem>>, vector<256x128xf32>
    %cst = arith.constant dense<0.000000e+00> : vector<8x128xf32>
    %2 = tpu.matmul %0, %1, %cst {dimension_numbers = #tpu.dot_dimension_numbers<[1], [0], [0], [1], [0, 0, 1, 1], [], []>} : vector<8x256xf32>, vector<256x128xf32>, vector<8x128xf32> -> vector<8x128xf32>
    %c0_3 = arith.constant 0 : index
    %c0_4 = arith.constant 0 : index
    %3 = vector.load %arg3[%c0_3, %c0_4] : memref<1x128xf32, #tpu.memory_space<vmem>>, vector<1x128xf32>
    %4 = vector.broadcast %3 : vector<1x128xf32> to vector<8x128xf32>
    %5 = arith.addf %2, %4 : vector<8x128xf32>
    %c0_5 = arith.constant 0 : index
    %c0_6 = arith.constant 0 : index
    %6 = vector.load %arg4[%c0_5, %c0_6] : memref<8x128xf32, #tpu.memory_space<vmem>>, vector<8x128xf32>
    tpu.vector_store %arg4[%c0_5, %c0_6], %5 {strides = array<i32>} : memref<8x128xf32, #tpu.memory_space<vmem>>, vector<8x128xf32>,
    return
  }
  func.func @transform_0(%arg0: i32) -> (i32, i32) {
    %c0_i32 = arith.constant 0 : i32
    %c0_i32_0 = arith.constant 0 : i32
    return %arg0, %c0_i32 : i32, i32
  }
  func.func @transform_1(%arg0: i32) -> (i32, i32) {
    %c0_i32 = arith.constant 0 : i32
    %c0_i32_0 = arith.constant 0 : i32
    %c0_i32_1 = arith.constant 0 : i32
    return %c0_i32, %c0_i32_0 : i32, i32
  }
  func.func @transform_2(%arg0: i32) -> (i32, i32) {
    %c0_i32 = arith.constant 0 : i32
    %c0_i32_0 = arith.constant 0 : i32
    %c0_i32_1 = arith.constant 0 : i32
    return %c0_i32, %c0_i32_0 : i32, i32
  }
  func.func @transform_3(%arg0: i32) -> (i32, i32) {
    %c0_i32 = arith.constant 0 : i32
    %c0_i32_0 = arith.constant 0 : i32
    return %arg0, %c0_i32 : i32, i32
  }
}

module attributes {stable_mosaic.version = 11 : i64} {
  func.func @_mlp_block_kernel(%arg0: i32, %arg1: memref<8x128xf32, #tpu.memory_space<vmem>>, %arg2: memref<8x288xf32, #tpu.memory_space<vmem>>, %arg3: memref<288x32xf32, #tpu.memory_space<vmem>>, %arg4: memref<32x256xf32, #tpu.memory_space<vmem>>, %arg5: memref<128x256xf32, #tpu.memory_space<vmem>>, %arg6: memref<1x256xf32, #tpu.memory_space<vmem>>, %arg7: memref<256x128xf32, #tpu.memory_space<vmem>>, %arg8: memref<1x128xf32, #tpu.memory_space<vmem>>, %arg9: memref<1x128xf32, #tpu.memory_space<vmem>>, %arg10: memref<8x128xf32, #tpu.memory_space<vmem>>, %arg11: memref<8x128xf32, #tpu.memory_space<vmem>>) attributes {dimension_semantics = [#tpu.dimension_semantics<parallel>], iteration_bounds = array<i64: 1>, scalar_prefetch = 0 : i64, scratch_operands = 0 : i64, tpu.core_type = #tpu.core_type<tc>, window_params = [{transform_indices = @transform_0, window_bounds = array<i64: 8, 128>}, {transform_indices = @transform_1, window_bounds = array<i64: 8, 288>}, {pipeline_mode = #tpu.pipeline_mode<synchronous>, transform_indices = @transform_2, window_bounds = array<i64: 288, 32>}, {pipeline_mode = #tpu.pipeline_mode<synchronous>, transform_indices = @transform_3, window_bounds = array<i64: 32, 256>}, {pipeline_mode = #tpu.pipeline_mode<synchronous>, transform_indices = @transform_4, window_bounds = array<i64: 128, 256>}, {pipeline_mode = #tpu.pipeline_mode<synchronous>, transform_indices = @transform_5, window_bounds = array<i64: 1, 256>}, {pipeline_mode = #tpu.pipeline_mode<synchronous>, transform_indices = @transform_6, window_bounds = array<i64: 256, 128>}, {pipeline_mode = #tpu.pipeline_mode<synchronous>, transform_indices = @transform_7, window_bounds = array<i64: 1, 128>}, {pipeline_mode = #tpu.pipeline_mode<synchronous>, transform_indices = @transform_8, window_bounds = array<i64: 1, 128>}, {transform_indices = @transform_9, window_bounds = array<i64: 8, 128>}, {transform_indices = @transform_10, window_bounds = array<i64: 8, 128>}]} {
    %c0 = arith.constant 0 : index
    %c0_0 = arith.constant 0 : index
    %0 = vector.load %arg1[%c0, %c0_0] : memref<8x128xf32, #tpu.memory_space<vmem>>, vector<8x128xf32>
    %c0_1 = arith.constant 0 : index
    %c0_2 = arith.constant 0 : index
    %1 = vector.load %arg2[%c0_1, %c0_2] : memref<8x288xf32, #tpu.memory_space<vmem>>, vector<8x288xf32>
    %c0_3 = arith.constant 0 : index
    %c0_4 = arith.constant 0 : index
    %2 = vector.load %arg3[%c0_3, %c0_4] : memref<288x32xf32, #tpu.memory_space<vmem>>, vector<288x32xf32>
    %cst = arith.constant dense<0.000000e+00> : vector<8x32xf32>
    %3 = tpu.matmul %1, %2, %cst {dimension_numbers = #tpu.dot_dimension_numbers<[1], [0], [0], [1], [0, 0, 1, 1], [], []>} : vector<8x288xf32>, vector<288x32xf32>, vector<8x32xf32> -> vector<8x32xf32>
    %c0_5 = arith.constant 0 : index
    %c0_6 = arith.constant 0 : index
    %4 = vector.load %arg4[%c0_5, %c0_6] : memref<32x256xf32, #tpu.memory_space<vmem>>, vector<32x256xf32>
    %cst_7 = arith.constant dense<0.000000e+00> : vector<8x256xf32>
    %5 = tpu.matmul %3, %4, %cst_7 {dimension_numbers = #tpu.dot_dimension_numbers<[1], [0], [0], [1], [0, 0, 1, 1], [], []>} : vector<8x32xf32>, vector<32x256xf32>, vector<8x256xf32> -> vector<8x256xf32>
    %c0_8 = arith.constant 0 : index
    %c0_9 = arith.constant 0 : index
    %6 = vector.load %arg5[%c0_8, %c0_9] : memref<128x256xf32, #tpu.memory_space<vmem>>, vector<128x256xf32>
    %cst_10 = arith.constant dense<0.000000e+00> : vector<8x256xf32>
    %7 = tpu.matmul %0, %6, %cst_10 {dimension_numbers = #tpu.dot_dimension_numbers<[1], [0], [0], [1], [0, 0, 1, 1], [], []>} : vector<8x128xf32>, vector<128x256xf32>, vector<8x256xf32> -> vector<8x256xf32>
    %8 = arith.addf %5, %7 : vector<8x256xf32>
    %c0_11 = arith.constant 0 : index
    %c0_12 = arith.constant 0 : index
    %9 = vector.load %arg6[%c0_11, %c0_12] : memref<1x256xf32, #tpu.memory_space<vmem>>, vector<1x256xf32>
    %10 = vector.broadcast %9 : vector<1x256xf32> to vector<8x256xf32>
    %11 = arith.addf %8, %10 : vector<8x256xf32>
    %cst_13 = arith.constant 0.000000e+00 : f32
    %12 = vector.broadcast %cst_13 : f32 to vector<8x256xf32>
    %13 = arith.maximumf %11, %12 : vector<8x256xf32>
    %c0_14 = arith.constant 0 : index
    %c0_15 = arith.constant 0 : index
    %14 = vector.load %arg7[%c0_14, %c0_15] : memref<256x128xf32, #tpu.memory_space<vmem>>, vector<256x128xf32>
    %cst_16 = arith.constant dense<0.000000e+00> : vector<8x128xf32>
    %15 = tpu.matmul %13, %14, %cst_16 {dimension_numbers = #tpu.dot_dimension_numbers<[1], [0], [0], [1], [0, 0, 1, 1], [], []>} : vector<8x256xf32>, vector<256x128xf32>, vector<8x128xf32> -> vector<8x128xf32>
    %16 = arith.addf %0, %15 : vector<8x128xf32>
    %c0_17 = arith.constant 0 : index
    %c0_18 = arith.constant 0 : index
    %17 = vector.load %arg10[%c0_17, %c0_18] : memref<8x128xf32, #tpu.memory_space<vmem>>, vector<8x128xf32>
    tpu.vector_store %arg10[%c0_17, %c0_18], %16 {strides = array<i32>} : memref<8x128xf32, #tpu.memory_space<vmem>>, vector<8x128xf32>,
    %c0_19 = arith.constant 0 : index
    %c0_20 = arith.constant 0 : index
    %18 = vector.load %arg8[%c0_19, %c0_20] : memref<1x128xf32, #tpu.memory_space<vmem>>, vector<1x128xf32>
    %19 = vector.broadcast %18 : vector<1x128xf32> to vector<8x128xf32>
    %20 = arith.mulf %16, %19 : vector<8x128xf32>
    %c0_21 = arith.constant 0 : index
    %c0_22 = arith.constant 0 : index
    %21 = vector.load %arg9[%c0_21, %c0_22] : memref<1x128xf32, #tpu.memory_space<vmem>>, vector<1x128xf32>
    %22 = vector.broadcast %21 : vector<1x128xf32> to vector<8x128xf32>
    %23 = arith.addf %20, %22 : vector<8x128xf32>
    %c0_23 = arith.constant 0 : index
    %c0_24 = arith.constant 0 : index
    %24 = vector.load %arg11[%c0_23, %c0_24] : memref<8x128xf32, #tpu.memory_space<vmem>>, vector<8x128xf32>
    tpu.vector_store %arg11[%c0_23, %c0_24], %23 {strides = array<i32>} : memref<8x128xf32, #tpu.memory_space<vmem>>, vector<8x128xf32>,
    return
  }
  func.func @transform_0(%arg0: i32) -> (i32, i32) {
    %c0_i32 = arith.constant 0 : i32
    %c0_i32_0 = arith.constant 0 : i32
    return %arg0, %c0_i32 : i32, i32
  }
  func.func @transform_1(%arg0: i32) -> (i32, i32) {
    %c0_i32 = arith.constant 0 : i32
    %c0_i32_0 = arith.constant 0 : i32
    return %arg0, %c0_i32 : i32, i32
  }
  func.func @transform_2(%arg0: i32) -> (i32, i32) {
    %c0_i32 = arith.constant 0 : i32
    %c0_i32_0 = arith.constant 0 : i32
    %c0_i32_1 = arith.constant 0 : i32
    return %c0_i32, %c0_i32_0 : i32, i32
  }
  func.func @transform_3(%arg0: i32) -> (i32, i32) {
    %c0_i32 = arith.constant 0 : i32
    %c0_i32_0 = arith.constant 0 : i32
    %c0_i32_1 = arith.constant 0 : i32
    return %c0_i32, %c0_i32_0 : i32, i32
  }
  func.func @transform_4(%arg0: i32) -> (i32, i32) {
    %c0_i32 = arith.constant 0 : i32
    %c0_i32_0 = arith.constant 0 : i32
    %c0_i32_1 = arith.constant 0 : i32
    return %c0_i32, %c0_i32_0 : i32, i32
  }
  func.func @transform_5(%arg0: i32) -> (i32, i32) {
    %c0_i32 = arith.constant 0 : i32
    %c0_i32_0 = arith.constant 0 : i32
    %c0_i32_1 = arith.constant 0 : i32
    return %c0_i32, %c0_i32_0 : i32, i32
  }
  func.func @transform_6(%arg0: i32) -> (i32, i32) {
    %c0_i32 = arith.constant 0 : i32
    %c0_i32_0 = arith.constant 0 : i32
    %c0_i32_1 = arith.constant 0 : i32
    return %c0_i32, %c0_i32_0 : i32, i32
  }
  func.func @transform_7(%arg0: i32) -> (i32, i32) {
    %c0_i32 = arith.constant 0 : i32
    %c0_i32_0 = arith.constant 0 : i32
    %c0_i32_1 = arith.constant 0 : i32
    return %c0_i32, %c0_i32_0 : i32, i32
  }
  func.func @transform_8(%arg0: i32) -> (i32, i32) {
    %c0_i32 = arith.constant 0 : i32
    %c0_i32_0 = arith.constant 0 : i32
    %c0_i32_1 = arith.constant 0 : i32
    return %c0_i32, %c0_i32_0 : i32, i32
  }
  func.func @transform_9(%arg0: i32) -> (i32, i32) {
    %c0_i32 = arith.constant 0 : i32
    %c0_i32_0 = arith.constant 0 : i32
    return %arg0, %c0_i32 : i32, i32
  }
  func.func @transform_10(%arg0: i32) -> (i32, i32) {
    %c0_i32 = arith.constant 0 : i32
    %c0_i32_0 = arith.constant 0 : i32
    return %arg0, %c0_i32 : i32, i32
  }
}

</mosaic_0001>

<bundles_post_ra>
// kernel: _lambda_.11
= control target key start
LH: loop header
LB: loop body
LE: loop exit
PB: predicated region body
PF: predicated region fallthrough
CT: control target
= control target key end

     0   :  { %s813_s12 = smov 0   ;;  %s1018_s0 = inlined_call_operand.vmem [shape: f32[2048,27], index: 0, kind: input, shape index: {}]   ;;  %s1019_s1 = inlined_call_operand.vmem [shape: f32[27,12], index: 1, kind: input, shape index: {}]   ;;  %s1020_s2 = inlined_call_operand.vmem [shape: f32[1,12], index: 2, kind: input, shape index: {}]   ;;  %s1021_s3 = inlined_call_operand.vmem [shape: f32[2048,12], index: 3, kind: output, shape index: {}]  }
   0x1 LB: > { %s632_s13 = sadd.s32 4294967295, %s791_s12   ;;  %p636_p0 = scmp.ge.s32.totalorder %s791_s12, 1  ;;  %s791_s12 = sphi %s813_s12, %s13_s12  }
   0x2   : > { %p138_p1 = scmp.lt.s32.totalorder %s791_s12, 9 }
   0x4   : > { %p139_p2 = pnand %p636_p0, %p138_p1 }
   0x5   : > { %s637_s18 = sshll.u32 (!%p139_p2), %s632_s13, 5 }
   0x6   : > { %142 = sbr.rel (%p139_p2) target bundleno = 247 (0xf7), region = 32  ;;  %p163_p3 = scmp.lt.s32.totalorder (!%p139_p2), %s637_s18, 255 }
   0xb   : > { %v209_v0 = vld [vmem:[%s1019_s1 + $0x18] sm:$0x7]  ;;  %vm314_vm0 = vcmask 1042432   ;;  %v208_v1 = vld [vmem:[%s1019_s1 + $0x10] sm:$0xff]  ;;  %v207_v2 = vld [vmem:[%s1019_s1 + $0x8] sm:$0xff]  ;;  %s1023_s18 = smov (!%p163_p3, %s637_s18), 255 }
   0xc   : > { %713 = vmatprep.subr.msk.mxu0 %vm314_vm0, %v209_v0  ;;  %769 = vmatprep.subr.msk.mxu1 %vm314_vm0, %v209_v0  ;;  %v206_v3 = vld [vmem:[%s1019_s1] sm:$0xff]  ;;  %s638_s23 = sshll.u32 %s1023_s18, 3  ;;  %vm217_vm1 = vcmask 220160   ;;  %vm543_vm2 = vcmask 97280  }
   0xd   : > { %714 = vmatpush3.msk.msra.mxu0 %vm314_vm0, %v209_v0  ;;  %773 = vmatpush3.msk.msra.mxu1 %vm314_vm0, %v209_v0  ;;  %s841_s26 = scalar_lea.vmem %s1018_s0, %s638_s23  ;;  %v910_v36 = vld [vmem:[%s1020_s2] ss:$0 sm:$0xff]  ;;  %s917_s4 = scalar_lea.vmem %s1021_s3, %s638_s23 }
   0xe   : > { %715 = vmatprep.subr.mxu0 %v208_v1  ;;  %770 = vmatprep.subr.mxu1 %v208_v1  ;;  %v174_v4 = vld [vmem:[%s841_s26] sm:$0xff]  ;;  %v175_v6 = vld [vmem:[%s841_s26 + $0x8] sm:$0xff]  ;;  %v176_v8 = vld [vmem:[%s841_s26 + $0x10] sm:$0xff] }
   0xf   : > { %716 = vmatpush3.msra.mxu0 %v208_v1  ;;  %774 = vmatpush3.msra.mxu1 %v208_v1  ;;  %v190_v5 = vld [vmem:[%s841_s26 + $0x80] sm:$0xff]  ;;  %v191_v7 = vld [vmem:[%s841_s26 + $0x88] sm:$0xff]  ;;  %v192_v9 = vld [vmem:[%s841_s26 + $0x90] sm:$0xff] }
  0x10   : > { %717 = vmatprep.subr.mxu0 %v207_v2  ;;  %771 = vmatprep.subr.mxu1 %v207_v2  ;;  %v177_v10 = vld [vmem:[%s841_s26 + $0x18] sm:$0xff]  ;;  %v178_v12 = vld [vmem:[%s841_s26 + $0x20] sm:$0xff]  ;;  %v179_v14 = vld [vmem:[%s841_s26 + $0x28] sm:$0xff] }
  0x11   : > { %718 = vmatpush3.msra.mxu0 %v207_v2  ;;  %775 = vmatpush3.msra.mxu1 %v207_v2  ;;  %v193_v11 = vld [vmem:[%s841_s26 + $0x98] sm:$0xff]  ;;  %v194_v13 = vld [vmem:[%s841_s26 + $0xa0] sm:$0xff]  ;;  %v195_v15 = vld [vmem:[%s841_s26 + $0xa8] sm:$0xff] }
  0x12   : > { %719 = vmatprep.subr.mxu0 %v206_v3  ;;  %772 = vmatprep.subr.mxu1 %v206_v3  ;;  %v180_v16 = vld [vmem:[%s841_s26 + $0x30] sm:$0xff]  ;;  %v181_v18 = vld [vmem:[%s841_s26 + $0x38] sm:$0xff]  ;;  %v182_v20 = vld [vmem:[%s841_s26 + $0x40] sm:$0xff] }
  0x13   : > { %720 = vmatpush3.msra.mxu0 %v206_v3  ;;  %776 = vmatpush3.msra.mxu1 %v206_v3  ;;  %v196_v17 = vld [vmem:[%s841_s26 + $0xb0] sm:$0xff]  ;;  %v197_v19 = vld [vmem:[%s841_s26 + $0xb8] sm:$0xff]  ;;  %v198_v21 = vld [vmem:[%s841_s26 + $0xc0] sm:$0xff] }
  0x14   : > { %721 = vmatprep.mubr.msk.f32.mxu0 %vm217_vm1, %v174_v4  ;;  %745 = vmatprep.mubr.msk.f32.mxu1 %vm217_vm1, %v190_v5  ;;  %v183_v22 = vld [vmem:[%s841_s26 + $0x48] sm:$0xff]  ;;  %v184_v24 = vld [vmem:[%s841_s26 + $0x50] sm:$0xff]  ;;  %v185_v26 = vld [vmem:[%s841_s26 + $0x58] sm:$0xff] }
  0x15   : > { %722 = vmatmul.mubr.msk.f32.vlgmr.msra.gmra.mxu0 %vm217_vm1, %v175_v6  ;;  %746 = vmatmul.mubr.msk.f32.vlgmr.msra.gmra.mxu1 %vm217_vm1, %v191_v7  ;;  %v199_v23 = vld [vmem:[%s841_s26 + $0xc8] sm:$0xff]  ;;  %v200_v25 = vld [vmem:[%s841_s26 + $0xd0] sm:$0xff]  ;;  %v201_v27 = vld [vmem:[%s841_s26 + $0xd8] sm:$0xff] }
  0x16   : > { %724 = vmatprep.mubr.msk.f32.mxu0 %vm217_vm1, %v176_v8  ;;  %748 = vmatprep.mubr.msk.f32.mxu1 %vm217_vm1, %v192_v9  ;;  %v186_v28 = vld [vmem:[%s841_s26 + $0x60] sm:$0xff]  ;;  %v187_v30 = vld [vmem:[%s841_s26 + $0x68] sm:$0xff]  ;;  %v188_v32 = vld [vmem:[%s841_s26 + $0x70] sm:$0xff] }
  0x17   : > { %v202_v29 = vld [vmem:[%s841_s26 + $0xe0] sm:$0xff]  ;;  %v203_v31 = vld [vmem:[%s841_s26 + $0xe8] sm:$0xff]  ;;  %v204_v33 = vld [vmem:[%s841_s26 + $0xf0] sm:$0xff] }
  0x18   : > { %v189_v34 = vld [vmem:[%s841_s26 + $0x78] sm:$0xff] }
  0x19   : > { %725 = vmatmul.mubr.msk.f32.gmra.mxu0 %vm217_vm1, %v177_v10  ;;  %749 = vmatmul.mubr.msk.f32.gmra.mxu1 %vm217_vm1, %v193_v11  ;;  %v205_v35 = vld [vmem:[%s841_s26 + $0xf8] sm:$0xff] }
  0x1a   : > { %727 = vmatprep.mubr.msk.f32.mxu0 %vm217_vm1, %v178_v12  ;;  %751 = vmatprep.mubr.msk.f32.mxu1 %vm217_vm1, %v194_v13 }
  0x1d   : > { %728 = vmatmul.mubr.msk.f32.gmra.mxu0 %vm217_vm1, %v179_v14  ;;  %752 = vmatmul.mubr.msk.f32.gmra.mxu1 %vm217_vm1, %v195_v15 }
  0x1e   : > { %730 = vmatprep.mubr.msk.f32.mxu0 %vm217_vm1, %v180_v16  ;;  %754 = vmatprep.mubr.msk.f32.mxu1 %vm217_vm1, %v196_v17 }
  0x21   : > { %731 = vmatmul.mubr.msk.f32.gmra.mxu0 %vm217_vm1, %v181_v18  ;;  %755 = vmatmul.mubr.msk.f32.gmra.mxu1 %vm217_vm1, %v197_v19 }
  0x22   : > { %733 = vmatprep.mubr.msk.f32.mxu0 %vm217_vm1, %v182_v20  ;;  %757 = vmatprep.mubr.msk.f32.mxu1 %vm217_vm1, %v198_v21 }
  0x25   : > { %734 = vmatmul.mubr.msk.f32.gmra.mxu0 %vm217_vm1, %v183_v22  ;;  %758 = vmatmul.mubr.msk.f32.gmra.mxu1 %vm217_vm1, %v199_v23 }
  0x26   : > { %736 = vmatprep.mubr.msk.f32.mxu0 %vm217_vm1, %v184_v24  ;;  %760 = vmatprep.mubr.msk.f32.mxu1 %vm217_vm1, %v200_v25 }
  0x29   : > { %737 = vmatmul.mubr.msk.f32.gmra.mxu0 %vm217_vm1, %v185_v26  ;;  %761 = vmatmul.mubr.msk.f32.gmra.mxu1 %vm217_vm1, %v201_v27 }
  0x2a   : > { %739 = vmatprep.mubr.msk.f32.mxu0 %vm217_vm1, %v186_v28  ;;  %763 = vmatprep.mubr.msk.f32.mxu1 %vm217_vm1, %v202_v29 }
  0x2d   : > { %740 = vmatmul.mubr.msk.f32.gmra.mxu0 %vm217_vm1, %v187_v30  ;;  %764 = vmatmul.mubr.msk.f32.gmra.mxu1 %vm217_vm1, %v203_v31 }
  0x2e   : > { %742 = vmatprep.mubr.msk.f32.mxu0 %vm217_vm1, %v188_v32  ;;  %766 = vmatprep.mubr.msk.f32.mxu1 %vm217_vm1, %v204_v33 }
  0x31   : > { %743 = vmatmul.mubr.msk.f32.gmra.mxu0 %vm217_vm1, %v189_v34  ;;  %767 = vmatmul.mubr.msk.f32.gmra.mxu1 %vm217_vm1, %v205_v35 }
  0xd5   : > { %v723_v37 = vpop.f32.mrf.mxu0  ;;  %v747_v38 = vpop.f32.mrf.mxu1 }
  0xd6   : > { %v390_v39 = vadd.f32 %v723_v37, %v910_v36  ;;  %v470_v40 = vadd.f32 %v747_v38, %v910_v36 }
  0xd7   : > { %v384_v41 = vpop.f32.mrf.mxu0  ;;  %v464_v42 = vpop.f32.mrf.mxu1 }
  0xd8   : > { %545 = vst.msk [vmem:[%s917_s4 + $0x8] sm:$0xff] %vm543_vm2, %v390_v39  ;;  %561 = vst.msk [vmem:[%s917_s4 + $0x88] sm:$0xff] %vm543_vm2, %v470_v40  ;;  %v385_v43 = vadd.f32 %v910_v36, %v384_v41  ;;  %v465_v44 = vadd.f32 %v910_v36, %v464_v42 }
  0xd9   : > { %v726_v45 = vpop.f32.mrf.mxu0  ;;  %v750_v46 = vpop.f32.mrf.mxu1 }
  0xda   : > { %544 = vst.msk [vmem:[%s917_s4] sm:$0xff] %vm543_vm2, %v385_v43  ;;  %560 = vst.msk [vmem:[%s917_s4 + $0x80] sm:$0xff] %vm543_vm2, %v465_v44  ;;  %v400_v47 = vadd.f32 %v726_v45, %v910_v36  ;;  %v480_v48 = vadd.f32 %v750_v46, %v910_v36 }
  0xdb   : > { %v394_v49 = vpop.f32.mrf.mxu0  ;;  %v474_v50 = vpop.f32.mrf.mxu1 }
  0xdc   : > { %547 = vst.msk [vmem:[%s917_s4 + $0x18] sm:$0xff] %vm543_vm2, %v400_v47  ;;  %563 = vst.msk [vmem:[%s917_s4 + $0x98] sm:$0xff] %vm543_vm2, %v480_v48  ;;  %v395_v51 = vadd.f32 %v910_v36, %v394_v49  ;;  %v475_v52 = vadd.f32 %v910_v36, %v474_v50 }
  0xdd   : > { %v729_v53 = vpop.f32.mrf.mxu0  ;;  %v753_v54 = vpop.f32.mrf.mxu1 }
  0xde   : > { %546 = vst.msk [vmem:[%s917_s4 + $0x10] sm:$0xff] %vm543_vm2, %v395_v51  ;;  %562 = vst.msk [vmem:[%s917_s4 + $0x90] sm:$0xff] %vm543_vm2, %v475_v52  ;;  %v410_v55 = vadd.f32 %v729_v53, %v910_v36  ;;  %v490_v56 = vadd.f32 %v753_v54, %v910_v36 }
  0xdf   : > { %v404_v57 = vpop.f32.mrf.mxu0  ;;  %v484_v58 = vpop.f32.mrf.mxu1 }
  0xe0   : > { %549 = vst.msk [vmem:[%s917_s4 + $0x28] sm:$0xff] %vm543_vm2, %v410_v55  ;;  %565 = vst.msk [vmem:[%s917_s4 + $0xa8] sm:$0xff] %vm543_vm2, %v490_v56  ;;  %v405_v59 = vadd.f32 %v910_v36, %v404_v57  ;;  %v485_v60 = vadd.f32 %v910_v36, %v484_v58 }
  0xe1   : > { %v732_v61 = vpop.f32.mrf.mxu0  ;;  %v756_v62 = vpop.f32.mrf.mxu1 }
  0xe2   : > { %548 = vst.msk [vmem:[%s917_s4 + $0x20] sm:$0xff] %vm543_vm2, %v405_v59  ;;  %564 = vst.msk [vmem:[%s917_s4 + $0xa0] sm:$0xff] %vm543_vm2, %v485_v60  ;;  %v420_v63 = vadd.f32 %v732_v61, %v910_v36  ;;  %v500_v0 = vadd.f32 %v756_v62, %v910_v36 }
  0xe3   : > { %v414_v1 = vpop.f32.mrf.mxu0  ;;  %v494_v2 = vpop.f32.mrf.mxu1 }
  0xe4   : > { %551 = vst.msk [vmem:[%s917_s4 + $0x38] sm:$0xff] %vm543_vm2, %v420_v63  ;;  %567 = vst.msk [vmem:[%s917_s4 + $0xb8] sm:$0xff] %vm543_vm2, %v500_v0  ;;  %v415_v3 = vadd.f32 %v910_v36, %v414_v1  ;;  %v495_v4 = vadd.f32 %v910_v36, %v494_v2 }
  0xe5   : > { %v735_v5 = vpop.f32.mrf.mxu0  ;;  %v759_v6 = vpop.f32.mrf.mxu1 }
  0xe6   : > { %550 = vst.msk [vmem:[%s917_s4 + $0x30] sm:$0xff] %vm543_vm2, %v415_v3  ;;  %566 = vst.msk [vmem:[%s917_s4 + $0xb0] sm:$0xff] %vm543_vm2, %v495_v4  ;;  %v430_v7 = vadd.f32 %v735_v5, %v910_v36  ;;  %v510_v8 = vadd.f32 %v759_v6, %v910_v36 }
  0xe7   : > { %v424_v9 = vpop.f32.mrf.mxu0  ;;  %v504_v10 = vpop.f32.mrf.mxu1 }
  0xe8   : > { %553 = vst.msk [vmem:[%s917_s4 + $0x48] sm:$0xff] %vm543_vm2, %v430_v7  ;;  %569 = vst.msk [vmem:[%s917_s4 + $0xc8] sm:$0xff] %vm543_vm2, %v510_v8  ;;  %v425_v11 = vadd.f32 %v910_v36, %v424_v9  ;;  %v505_v12 = vadd.f32 %v910_v36, %v504_v10 }
  0xe9   : > { %v738_v13 = vpop.f32.mrf.mxu0  ;;  %v762_v14 = vpop.f32.mrf.mxu1 }
  0xea   : > { %552 = vst.msk [vmem:[%s917_s4 + $0x40] sm:$0xff] %vm543_vm2, %v425_v11  ;;  %568 = vst.msk [vmem:[%s917_s4 + $0xc0] sm:$0xff] %vm543_vm2, %v505_v12  ;;  %v440_v15 = vadd.f32 %v738_v13, %v910_v36  ;;  %v520_v16 = vadd.f32 %v762_v14, %v910_v36 }
  0xeb   : > { %v434_v17 = vpop.f32.mrf.mxu0  ;;  %v514_v18 = vpop.f32.mrf.mxu1 }
  0xec   : > { %555 = vst.msk [vmem:[%s917_s4 + $0x58] sm:$0xff] %vm543_vm2, %v440_v15  ;;  %571 = vst.msk [vmem:[%s917_s4 + $0xd8] sm:$0xff] %vm543_vm2, %v520_v16  ;;  %v435_v19 = vadd.f32 %v910_v36, %v434_v17  ;;  %v515_v20 = vadd.f32 %v910_v36, %v514_v18 }
  0xed   : > { %v741_v21 = vpop.f32.mrf.mxu0  ;;  %v765_v22 = vpop.f32.mrf.mxu1 }
  0xee   : > { %554 = vst.msk [vmem:[%s917_s4 + $0x50] sm:$0xff] %vm543_vm2, %v435_v19  ;;  %570 = vst.msk [vmem:[%s917_s4 + $0xd0] sm:$0xff] %vm543_vm2, %v515_v20  ;;  %v450_v23 = vadd.f32 %v741_v21, %v910_v36  ;;  %v530_v24 = vadd.f32 %v765_v22, %v910_v36 }
  0xef   : > { %v444_v25 = vpop.f32.mrf.mxu0  ;;  %v524_v26 = vpop.f32.mrf.mxu1 }
  0xf0   : > { %557 = vst.msk [vmem:[%s917_s4 + $0x68] sm:$0xff] %vm543_vm2, %v450_v23  ;;  %573 = vst.msk [vmem:[%s917_s4 + $0xe8] sm:$0xff] %vm543_vm2, %v530_v24  ;;  %v445_v27 = vadd.f32 %v910_v36, %v444_v25  ;;  %v525_v28 = vadd.f32 %v910_v36, %v524_v26 }
  0xf1   : > { %v744_v29 = vpop.f32.mrf.mxu0  ;;  %v768_v30 = vpop.f32.mrf.mxu1 }
  0xf2   : > { %556 = vst.msk [vmem:[%s917_s4 + $0x60] sm:$0xff] %vm543_vm2, %v445_v27  ;;  %572 = vst.msk [vmem:[%s917_s4 + $0xe0] sm:$0xff] %vm543_vm2, %v525_v28  ;;  %v460_v31 = vadd.f32 %v744_v29, %v910_v36  ;;  %v540_v32 = vadd.f32 %v768_v30, %v910_v36 }
  0xf3   : > { %v454_v33 = vpop.f32.mrf.mxu0  ;;  %v534_v34 = vpop.f32.mrf.mxu1 }
  0xf4   : > { %559 = vst.msk [vmem:[%s917_s4 + $0x78] sm:$0xff] %vm543_vm2, %v460_v31  ;;  %575 = vst.msk [vmem:[%s917_s4 + $0xf8] sm:$0xff] %vm543_vm2, %v540_v32  ;;  %v455_v35 = vadd.f32 %v910_v36, %v454_v33  ;;  %v535_v37 = vadd.f32 %v910_v36, %v534_v34 }
  0xf6   : > { %558 = vst.msk [vmem:[%s917_s4 + $0x70] sm:$0xff] %vm543_vm2, %v455_v35  ;;  %574 = vst.msk [vmem:[%s917_s4 + $0xf0] sm:$0xff] %vm543_vm2, %v535_v37 }
  0xf7 PF: > { %s13_s12 = sadd.s32 1, %s791_s12  }
  0xf8   : > { %p10_p4 = scmp.ge.s32.totalorder %s13_s12, 10  }
  0xfa   :  { %12 = sbr.rel (!%p10_p4) target bundleno = 1 (0x1), region = 62 }

// kernel: _lambda_.12
= control target key start
LH: loop header
LB: loop body
LE: loop exit
PB: predicated region body
PF: predicated region fallthrough
CT: control target
= control target key end

     0   :  { %s824_s12 = smov 0   ;;  %s1183_s0 = inlined_call_operand.vmem [shape: f32[512,216], index: 0, kind: input, shape index: {}]   ;;  %s1184_s1 = inlined_call_operand.vmem [shape: f32[216,16], index: 1, kind: input, shape index: {}]   ;;  %s1185_s2 = inlined_call_operand.vmem [shape: f32[1,16], index: 2, kind: input, shape index: {}]   ;;  %s1186_s3 = inlined_call_operand.vmem [shape: f32[512,16], index: 3, kind: output, shape index: {}]  }
   0x1 LB: > { %s686_s13 = sadd.s32 4294967295, %s801_s12   ;;  %p690_p0 = scmp.ge.s32.totalorder %s801_s12, 1  ;;  %s801_s12 = sphi %s824_s12, %s13_s12  }
   0x2   : > { %p139_p1 = scmp.lt.s32.totalorder %s801_s12, 3 }
   0x4   : > { %p140_p2 = pnand %p690_p0, %p139_p1 }
   0x5   : > { %s691_s27 = sshll.u32 (!%p140_p2), %s686_s13, 5 }
   0x6   : > { %143 = sbr.rel (%p140_p2) target bundleno = 323 (0x143), region = 32  ;;  %p165_p3 = scmp.lt.s32.totalorder (!%p140_p2), %s691_s27, 63 }
   0xb   : > { %v256_v0 = vld [vmem:[%s1184_s1 + $0x78] sm:$0xff]  ;;  %v803_v1 = vmov 0.0   ;;  %v255_v2 = vld [vmem:[%s1184_s1 + $0x70] sm:$0xff]  ;;  %v254_v3 = vld [vmem:[%s1184_s1 + $0x68] sm:$0xff]  ;;  %s1188_s27 = smov (!%p165_p3, %s691_s27), 63  ;;  %vm275_vm0 = vcmask 719872  }
   0xc   : > { %372 = vmatprep.subr.mxu0 %v803_v1  ;;  %732 = vmatprep.subr.mxu1 %v803_v1  ;;  %v253_v4 = vld [vmem:[%s1184_s1 + $0x60] sm:$0xff]  ;;  %v252_v5 = vld [vmem:[%s1184_s1 + $0x58] sm:$0xff]  ;;  %v251_v6 = vld [vmem:[%s1184_s1 + $0x50] sm:$0xff]  ;;  %s731_s10 = sshll.u32 %s1188_s27, 4  ;;  %s695_s22 = sshll.u32 %s1188_s27, 3  ;;  %vm597_vm1 = vcmask 130048  }
   0xd   : > { %373 = vmatpush1.msra.mxu0 %v256_v0  ;;  %759 = vmatpush1.msra.mxu1 %v256_v0  ;;  %v250_v7 = vld [vmem:[%s1184_s1 + $0x48] sm:$0xff]  ;;  %v249_v8 = vld [vmem:[%s1184_s1 + $0x40] sm:$0xff]  ;;  %v248_v9 = vld [vmem:[%s1184_s1 + $0x38] sm:$0xff]  ;;  %s968_s19 = scalar_lea.vmem %s1183_s0, %s731_s10  ;;  %s1082_s28 = scalar_lea.vmem %s1186_s3, %s695_s22 }
   0xe   : > { %374 = vmatprep.subr.mxu0 %v803_v1  ;;  %733 = vmatprep.subr.mxu1 %v803_v1  ;;  %v247_v10 = vld [vmem:[%s1184_s1 + $0x30] sm:$0xff]  ;;  %v246_v11 = vld [vmem:[%s1184_s1 + $0x28] sm:$0xff]  ;;  %v245_v12 = vld [vmem:[%s1184_s1 + $0x20] sm:$0xff] }
   0xf   : > { %375 = vmatpush1.msra.mxu0 %v255_v2  ;;  %760 = vmatpush1.msra.mxu1 %v255_v2  ;;  %v244_v13 = vld [vmem:[%s1184_s1 + $0x18] sm:$0xff]  ;;  %v243_v14 = vld [vmem:[%s1184_s1 + $0x10] sm:$0xff]  ;;  %v242_v15 = vld [vmem:[%s1184_s1 + $0x8] sm:$0xff] }
  0x10   : > { %376 = vmatprep.subr.mxu0 %v803_v1  ;;  %734 = vmatprep.subr.mxu1 %v803_v1  ;;  %v241_v16 = vld [vmem:[%s1184_s1] sm:$0xff]  ;;  %v267_v17 = vld [vmem:[%s1184_s1 + $0xd0] sm:$0xff]  ;;  %v266_v18 = vld [vmem:[%s1184_s1 + $0xc8] sm:$0xff] }
  0x11   : > { %377 = vmatpush1.msra.mxu0 %v254_v3  ;;  %761 = vmatpush1.msra.mxu1 %v254_v3  ;;  %v265_v19 = vld [vmem:[%s1184_s1 + $0xc0] sm:$0xff]  ;;  %v264_v20 = vld [vmem:[%s1184_s1 + $0xb8] sm:$0xff]  ;;  %v263_v21 = vld [vmem:[%s1184_s1 + $0xb0] sm:$0xff] }
  0x12   : > { %378 = vmatprep.subr.mxu0 %v803_v1  ;;  %735 = vmatprep.subr.mxu1 %v803_v1  ;;  %v262_v22 = vld [vmem:[%s1184_s1 + $0xa8] sm:$0xff]  ;;  %v261_v23 = vld [vmem:[%s1184_s1 + $0xa0] sm:$0xff]  ;;  %v260_v24 = vld [vmem:[%s1184_s1 + $0x98] sm:$0xff] }
  0x13   : > { %379 = vmatpush1.msra.mxu0 %v253_v4  ;;  %762 = vmatpush1.msra.mxu1 %v253_v4  ;;  %v259_v25 = vld [vmem:[%s1184_s1 + $0x90] sm:$0xff]  ;;  %v258_v26 = vld [vmem:[%s1184_s1 + $0x88] sm:$0xff]  ;;  %v257_v27 = vld [vmem:[%s1184_s1 + $0x80] sm:$0xff] }
  0x14   : > { %380 = vmatprep.subr.mxu0 %v803_v1  ;;  %736 = vmatprep.subr.mxu1 %v803_v1  ;;  %v178_v28 = vld [vmem:[%s968_s19 + $0x8] sm:$0xff]  ;;  %v177_v30 = vld [vmem:[%s968_s19] sm:$0xff]  ;;  %v180_v32 = vld [vmem:[%s968_s19 + $0x18] sm:$0xff] }
  0x15   : > { %381 = vmatpush1.msra.mxu0 %v252_v5  ;;  %763 = vmatpush1.msra.mxu1 %v252_v5  ;;  %v210_v29 = vld [vmem:[%s968_s19 + $0x108] sm:$0xff]  ;;  %v209_v31 = vld [vmem:[%s968_s19 + $0x100] sm:$0xff]  ;;  %v212_v33 = vld [vmem:[%s968_s19 + $0x118] sm:$0xff] }
  0x16   : > { %382 = vmatprep.subr.mxu0 %v803_v1  ;;  %737 = vmatprep.subr.mxu1 %v803_v1  ;;  %v179_v34 = vld [vmem:[%s968_s19 + $0x10] sm:$0xff]  ;;  %v182_v36 = vld [vmem:[%s968_s19 + $0x28] sm:$0xff]  ;;  %v181_v38 = vld [vmem:[%s968_s19 + $0x20] sm:$0xff] }
  0x17   : > { %383 = vmatpush1.msra.mxu0 %v251_v6  ;;  %764 = vmatpush1.msra.mxu1 %v251_v6  ;;  %v211_v35 = vld [vmem:[%s968_s19 + $0x110] sm:$0xff]  ;;  %v214_v37 = vld [vmem:[%s968_s19 + $0x128] sm:$0xff]  ;;  %v213_v39 = vld [vmem:[%s968_s19 + $0x120] sm:$0xff] }
  0x18   : > { %384 = vmatprep.subr.mxu0 %v803_v1  ;;  %738 = vmatprep.subr.mxu1 %v803_v1  ;;  %v184_v40 = vld [vmem:[%s968_s19 + $0x38] sm:$0xff]  ;;  %v183_v42 = vld [vmem:[%s968_s19 + $0x30] sm:$0xff]  ;;  %v186_v44 = vld [vmem:[%s968_s19 + $0x48] sm:$0xff] }
  0x19   : > { %385 = vmatpush1.msra.mxu0 %v250_v7  ;;  %765 = vmatpush1.msra.mxu1 %v250_v7  ;;  %v216_v41 = vld [vmem:[%s968_s19 + $0x138] sm:$0xff]  ;;  %v215_v43 = vld [vmem:[%s968_s19 + $0x130] sm:$0xff]  ;;  %v218_v45 = vld [vmem:[%s968_s19 + $0x148] sm:$0xff] }
  0x1a   : > { %386 = vmatprep.subr.mxu0 %v803_v1  ;;  %739 = vmatprep.subr.mxu1 %v803_v1  ;;  %v185_v46 = vld [vmem:[%s968_s19 + $0x40] sm:$0xff]  ;;  %v188_v48 = vld [vmem:[%s968_s19 + $0x58] sm:$0xff]  ;;  %v187_v50 = vld [vmem:[%s968_s19 + $0x50] sm:$0xff] }
  0x1b   : > { %387 = vmatpush1.msra.mxu0 %v249_v8  ;;  %766 = vmatpush1.msra.mxu1 %v249_v8  ;;  %v217_v47 = vld [vmem:[%s968_s19 + $0x140] sm:$0xff]  ;;  %v220_v49 = vld [vmem:[%s968_s19 + $0x158] sm:$0xff]  ;;  %v219_v51 = vld [vmem:[%s968_s19 + $0x150] sm:$0xff] }
  0x1c   : > { %388 = vmatprep.subr.mxu0 %v803_v1  ;;  %740 = vmatprep.subr.mxu1 %v803_v1  ;;  %v190_v52 = vld [vmem:[%s968_s19 + $0x68] sm:$0xff]  ;;  %v189_v54 = vld [vmem:[%s968_s19 + $0x60] sm:$0xff]  ;;  %v192_v56 = vld [vmem:[%s968_s19 + $0x78] sm:$0xff] }
  0x1d   : > { %389 = vmatpush1.msra.mxu0 %v248_v9  ;;  %767 = vmatpush1.msra.mxu1 %v248_v9  ;;  %v222_v53 = vld [vmem:[%s968_s19 + $0x168] sm:$0xff]  ;;  %v221_v55 = vld [vmem:[%s968_s19 + $0x160] sm:$0xff]  ;;  %v224_v57 = vld [vmem:[%s968_s19 + $0x178] sm:$0xff] }
  0x1e   : > { %390 = vmatprep.subr.mxu0 %v803_v1  ;;  %741 = vmatprep.subr.mxu1 %v803_v1  ;;  %v191_v58 = vld [vmem:[%s968_s19 + $0x70] sm:$0xff]  ;;  %v194_v60 = vld [vmem:[%s968_s19 + $0x88] sm:$0xff]  ;;  %v193_v62 = vld [vmem:[%s968_s19 + $0x80] sm:$0xff] }
  0x1f   : > { %391 = vmatpush1.msra.mxu0 %v247_v10  ;;  %768 = vmatpush1.msra.mxu1 %v247_v10  ;;  %v223_v59 = vld [vmem:[%s968_s19 + $0x170] sm:$0xff]  ;;  %v226_v61 = vld [vmem:[%s968_s19 + $0x188] sm:$0xff]  ;;  %v225_v63 = vld [vmem:[%s968_s19 + $0x180] sm:$0xff] }
  0x20   : > { %392 = vmatprep.subr.mxu0 %v803_v1  ;;  %742 = vmatprep.subr.mxu1 %v803_v1  ;;  %v196_v0 = vld [vmem:[%s968_s19 + $0x98] sm:$0xff]  ;;  %v195_v2 = vld [vmem:[%s968_s19 + $0x90] sm:$0xff]  ;;  %v198_v4 = vld [vmem:[%s968_s19 + $0xa8] sm:$0xff] }
  0x21   : > { %393 = vmatpush1.msra.mxu0 %v246_v11  ;;  %769 = vmatpush1.msra.mxu1 %v246_v11  ;;  %v227_v3 = vld [vmem:[%s968_s19 + $0x190] sm:$0xff]  ;;  %v230_v5 = vld [vmem:[%s968_s19 + $0x1a8] sm:$0xff]  ;;  %v197_v6 = vld [vmem:[%s968_s19 + $0xa0] sm:$0xff] }
  0x22   : > { %394 = vmatprep.subr.mxu0 %v803_v1  ;;  %743 = vmatprep.subr.mxu1 %v803_v1  ;;  %v229_v7 = vld [vmem:[%s968_s19 + $0x1a0] sm:$0xff]  ;;  %v200_v8 = vld [vmem:[%s968_s19 + $0xb8] sm:$0xff]  ;;  %v199_v10 = vld [vmem:[%s968_s19 + $0xb0] sm:$0xff] }
  0x23   : > { %395 = vmatpush1.msra.mxu0 %v245_v12  ;;  %770 = vmatpush1.msra.mxu1 %v245_v12  ;;  %v232_v9 = vld [vmem:[%s968_s19 + $0x1b8] sm:$0xff]  ;;  %v231_v11 = vld [vmem:[%s968_s19 + $0x1b0] sm:$0xff]  ;;  %v202_v12 = vld [vmem:[%s968_s19 + $0xc8] sm:$0xff] }
  0x24   : > { %396 = vmatprep.subr.mxu0 %v803_v1  ;;  %744 = vmatprep.subr.mxu1 %v803_v1 }
  0x25   : > { %397 = vmatpush1.msra.mxu0 %v244_v13  ;;  %771 = vmatpush1.msra.mxu1 %v244_v13  ;;  %v234_v13 = vld [vmem:[%s968_s19 + $0x1c8] sm:$0xff] }
  0x26   : > { %398 = vmatprep.subr.mxu0 %v803_v1  ;;  %745 = vmatprep.subr.mxu1 %v803_v1 }
  0x27   : > { %399 = vmatpush1.msra.mxu0 %v243_v14  ;;  %772 = vmatpush1.msra.mxu1 %v243_v14  ;;  %v201_v14 = vld [vmem:[%s968_s19 + $0xc0] sm:$0xff] }
  0x28   : > { %400 = vmatprep.subr.mxu0 %v803_v1  ;;  %746 = vmatprep.subr.mxu1 %v803_v1 }
  0x29   : > { %401 = vmatpush1.msra.mxu0 %v242_v15  ;;  %773 = vmatpush1.msra.mxu1 %v242_v15  ;;  %v233_v15 = vld [vmem:[%s968_s19 + $0x1c0] sm:$0xff] }
  0x2a   : > { %402 = vmatprep.subr.mxu0 %v803_v1  ;;  %747 = vmatprep.subr.mxu1 %v803_v1 }
  0x2b   : > { %403 = vmatpush1.msra.mxu0 %v241_v16  ;;  %774 = vmatpush1.msra.mxu1 %v241_v16  ;;  %v204_v16 = vld [vmem:[%s968_s19 + $0xd8] sm:$0xff] }
  0x2c   : > { %414 = vmatprep.subr.mxu0 %v803_v1  ;;  %748 = vmatprep.subr.mxu1 %v803_v1 }
  0x2d   : > { %415 = vmatpush2.msra.mxu0 %v267_v17  ;;  %775 = vmatpush2.msra.mxu1 %v267_v17  ;;  %v236_v17 = vld [vmem:[%s968_s19 + $0x1d8] sm:$0xff] }
  0x2e   : > { %416 = vmatprep.subr.mxu0 %v803_v1  ;;  %749 = vmatprep.subr.mxu1 %v803_v1 }
  0x2f   : > { %417 = vmatpush2.msra.mxu0 %v266_v18  ;;  %776 = vmatpush2.msra.mxu1 %v266_v18  ;;  %v203_v18 = vld [vmem:[%s968_s19 + $0xd0] sm:$0xff] }
  0x30   : > { %418 = vmatprep.subr.mxu0 %v803_v1  ;;  %750 = vmatprep.subr.mxu1 %v803_v1 }
  0x31   : > { %419 = vmatpush2.msra.mxu0 %v265_v19  ;;  %777 = vmatpush2.msra.mxu1 %v265_v19  ;;  %v235_v19 = vld [vmem:[%s968_s19 + $0x1d0] sm:$0xff] }
  0x32   : > { %420 = vmatprep.subr.mxu0 %v803_v1  ;;  %751 = vmatprep.subr.mxu1 %v803_v1 }
  0x33   : > { %421 = vmatpush2.msra.mxu0 %v264_v20  ;;  %778 = vmatpush2.msra.mxu1 %v264_v20  ;;  %v206_v20 = vld [vmem:[%s968_s19 + $0xe8] sm:$0xff] }
  0x34   : > { %422 = vmatprep.subr.mxu0 %v803_v1  ;;  %752 = vmatprep.subr.mxu1 %v803_v1 }
  0x35   : > { %423 = vmatpush2.msra.mxu0 %v263_v21  ;;  %779 = vmatpush2.msra.mxu1 %v263_v21  ;;  %v238_v21 = vld [vmem:[%s968_s19 + $0x1e8] sm:$0xff] }
  0x36   : > { %424 = vmatprep.subr.mxu0 %v803_v1  ;;  %753 = vmatprep.subr.mxu1 %v803_v1 }
  0x37   : > { %425 = vmatpush2.msra.mxu0 %v262_v22  ;;  %780 = vmatpush2.msra.mxu1 %v262_v22  ;;  %v205_v22 = vld [vmem:[%s968_s19 + $0xe0] sm:$0xff] }
  0x38   : > { %426 = vmatprep.subr.mxu0 %v803_v1  ;;  %754 = vmatprep.subr.mxu1 %v803_v1 }
  0x39   : > { %427 = vmatpush2.msra.mxu0 %v261_v23  ;;  %781 = vmatpush2.msra.mxu1 %v261_v23  ;;  %v237_v23 = vld [vmem:[%s968_s19 + $0x1e0] sm:$0xff] }
  0x3a   : > { %428 = vmatprep.subr.mxu0 %v803_v1  ;;  %755 = vmatprep.subr.mxu1 %v803_v1 }
  0x3b   : > { %429 = vmatpush2.msra.mxu0 %v260_v24  ;;  %782 = vmatpush2.msra.mxu1 %v260_v24  ;;  %v208_v24 = vld [vmem:[%s968_s19 + $0xf8] sm:$0xff] }
  0x3c   : > { %430 = vmatprep.subr.mxu0 %v803_v1  ;;  %756 = vmatprep.subr.mxu1 %v803_v1 }
  0x3d   : > { %431 = vmatpush2.msra.mxu0 %v259_v25  ;;  %783 = vmatpush2.msra.mxu1 %v259_v25  ;;  %v240_v25 = vld [vmem:[%s968_s19 + $0x1f8] sm:$0xff] }
  0x3e   : > { %432 = vmatprep.subr.mxu0 %v803_v1  ;;  %757 = vmatprep.subr.mxu1 %v803_v1 }
  0x3f   : > { %433 = vmatpush2.msra.mxu0 %v258_v26  ;;  %784 = vmatpush2.msra.mxu1 %v258_v26  ;;  %v207_v26 = vld [vmem:[%s968_s19 + $0xf0] sm:$0xff] }
  0x40   : > { %434 = vmatprep.subr.mxu0 %v803_v1  ;;  %758 = vmatprep.subr.mxu1 %v803_v1  ;;  %v228_v1 = vld [vmem:[%s968_s19 + $0x198] sm:$0xff] }
  0x41   : > { %435 = vmatpush2.msra.mxu0 %v257_v27  ;;  %785 = vmatpush2.msra.mxu1 %v257_v27  ;;  %v239_v27 = vld [vmem:[%s968_s19 + $0x1f0] sm:$0xff] }
  0x42   : > { %697 = vmatprep.mubr.msk.f32.mxu0 %vm275_vm0, %v178_v28  ;;  %713 = vmatprep.mubr.msk.f32.mxu1 %vm275_vm0, %v210_v29  ;;  %v1077_v28 = vld [vmem:[%s1185_s2] ss:$0 sm:$0xff] }
  0x43   : > { %437 = vmatmul.mubr.f32.vlgmr.msra.gmra.mxu0 %v177_v30  ;;  %517 = vmatmul.mubr.f32.vlgmr.msra.gmra.mxu1 %v209_v31 }
  0x44   : > { %698 = vmatprep.mubr.msk.f32.mxu0 %vm275_vm0, %v180_v32  ;;  %714 = vmatprep.mubr.msk.f32.mxu1 %vm275_vm0, %v212_v33 }
  0x47   : > { %442 = vmatmul.mubr.f32.gmra.mxu0 %v179_v34  ;;  %522 = vmatmul.mubr.f32.gmra.mxu1 %v211_v35 }
  0x48   : > { %699 = vmatprep.mubr.msk.f32.mxu0 %vm275_vm0, %v182_v36  ;;  %715 = vmatprep.mubr.msk.f32.mxu1 %vm275_vm0, %v214_v37 }
  0x4b   : > { %447 = vmatmul.mubr.f32.gmra.mxu0 %v181_v38  ;;  %527 = vmatmul.mubr.f32.gmra.mxu1 %v213_v39 }
  0x4c   : > { %700 = vmatprep.mubr.msk.f32.mxu0 %vm275_vm0, %v184_v40  ;;  %716 = vmatprep.mubr.msk.f32.mxu1 %vm275_vm0, %v216_v41 }
  0x4f   : > { %452 = vmatmul.mubr.f32.gmra.mxu0 %v183_v42  ;;  %532 = vmatmul.mubr.f32.gmra.mxu1 %v215_v43 }
  0x50   : > { %701 = vmatprep.mubr.msk.f32.mxu0 %vm275_vm0, %v186_v44  ;;  %717 = vmatprep.mubr.msk.f32.mxu1 %vm275_vm0, %v218_v45 }
  0x53   : > { %457 = vmatmul.mubr.f32.gmra.mxu0 %v185_v46  ;;  %537 = vmatmul.mubr.f32.gmra.mxu1 %v217_v47 }
  0x54   : > { %702 = vmatprep.mubr.msk.f32.mxu0 %vm275_vm0, %v188_v48  ;;  %718 = vmatprep.mubr.msk.f32.mxu1 %vm275_vm0, %v220_v49 }
  0x57   : > { %462 = vmatmul.mubr.f32.gmra.mxu0 %v187_v50  ;;  %542 = vmatmul.mubr.f32.gmra.mxu1 %v219_v51 }
  0x58   : > { %703 = vmatprep.mubr.msk.f32.mxu0 %vm275_vm0, %v190_v52  ;;  %719 = vmatprep.mubr.msk.f32.mxu1 %vm275_vm0, %v222_v53 }
  0x5b   : > { %467 = vmatmul.mubr.f32.gmra.mxu0 %v189_v54  ;;  %547 = vmatmul.mubr.f32.gmra.mxu1 %v221_v55 }
  0x5c   : > { %704 = vmatprep.mubr.msk.f32.mxu0 %vm275_vm0, %v192_v56  ;;  %720 = vmatprep.mubr.msk.f32.mxu1 %vm275_vm0, %v224_v57 }
  0x5f   : > { %472 = vmatmul.mubr.f32.gmra.mxu0 %v191_v58  ;;  %552 = vmatmul.mubr.f32.gmra.mxu1 %v223_v59 }
  0x60   : > { %705 = vmatprep.mubr.msk.f32.mxu0 %vm275_vm0, %v194_v60  ;;  %721 = vmatprep.mubr.msk.f32.mxu1 %vm275_vm0, %v226_v61 }
  0x63   : > { %477 = vmatmul.mubr.f32.gmra.mxu0 %v193_v62  ;;  %557 = vmatmul.mubr.f32.gmra.mxu1 %v225_v63 }
  0x64   : > { %706 = vmatprep.mubr.msk.f32.mxu0 %vm275_vm0, %v196_v0  ;;  %722 = vmatprep.mubr.msk.f32.mxu1 %vm275_vm0, %v228_v1 }
  0x67   : > { %482 = vmatmul.mubr.f32.gmra.mxu0 %v195_v2  ;;  %562 = vmatmul.mubr.f32.gmra.mxu1 %v227_v3 }
  0x68   : > { %707 = vmatprep.mubr.msk.f32.mxu0 %vm275_vm0, %v198_v4  ;;  %723 = vmatprep.mubr.msk.f32.mxu1 %vm275_vm0, %v230_v5 }
  0x6b   : > { %487 = vmatmul.mubr.f32.gmra.mxu0 %v197_v6  ;;  %567 = vmatmul.mubr.f32.gmra.mxu1 %v229_v7 }
  0x6c   : > { %708 = vmatprep.mubr.msk.f32.mxu0 %vm275_vm0, %v200_v8  ;;  %724 = vmatprep.mubr.msk.f32.mxu1 %vm275_vm0, %v232_v9 }
  0x6f   : > { %492 = vmatmul.mubr.f32.gmra.mxu0 %v199_v10  ;;  %572 = vmatmul.mubr.f32.gmra.mxu1 %v231_v11 }
  0x70   : > { %709 = vmatprep.mubr.msk.f32.mxu0 %vm275_vm0, %v202_v12  ;;  %725 = vmatprep.mubr.msk.f32.mxu1 %vm275_vm0, %v234_v13 }
  0x73   : > { %497 = vmatmul.mubr.f32.gmra.mxu0 %v201_v14  ;;  %577 = vmatmul.mubr.f32.gmra.mxu1 %v233_v15 }
  0x74   : > { %710 = vmatprep.mubr.msk.f32.mxu0 %vm275_vm0, %v204_v16  ;;  %726 = vmatprep.mubr.msk.f32.mxu1 %vm275_vm0, %v236_v17 }
  0x77   : > { %502 = vmatmul.mubr.f32.gmra.mxu0 %v203_v18  ;;  %582 = vmatmul.mubr.f32.gmra.mxu1 %v235_v19 }
  0x78   : > { %711 = vmatprep.mubr.msk.f32.mxu0 %vm275_vm0, %v206_v20  ;;  %727 = vmatprep.mubr.msk.f32.mxu1 %vm275_vm0, %v238_v21 }
  0x7b   : > { %507 = vmatmul.mubr.f32.gmra.mxu0 %v205_v22  ;;  %587 = vmatmul.mubr.f32.gmra.mxu1 %v237_v23 }
  0x7c   : > { %712 = vmatprep.mubr.msk.f32.mxu0 %vm275_vm0, %v208_v24  ;;  %728 = vmatprep.mubr.msk.f32.mxu1 %vm275_vm0, %v240_v25 }
  0x7f   : > { %512 = vmatmul.mubr.f32.gmra.mxu0 %v207_v26  ;;  %592 = vmatmul.mubr.f32.gmra.mxu1 %v239_v27 }
 0x103   : > { %v438_v29 = vpop.f32.mrf.mxu0  ;;  %v518_v30 = vpop.f32.mrf.mxu1 }
 0x104   : > { %v439_v31 = vadd.f32 %v1077_v28, %v438_v29  ;;  %v519_v32 = vadd.f32 %v1077_v28, %v518_v30 }
 0x105   : > { %v440_v33 = vpop.f32.mrf.mxu0  ;;  %v520_v34 = vpop.f32.mrf.mxu1 }
 0x106   : > { %598 = vst.msk [vmem:[%s1082_s28] sm:$0xff] %vm597_vm1, %v439_v31  ;;  %614 = vst.msk [vmem:[%s1082_s28 + $0x80] sm:$0xff] %vm597_vm1, %v519_v32 }
 0x107   : > { %v443_v35 = vpop.f32.mrf.mxu0  ;;  %v523_v36 = vpop.f32.mrf.mxu1 }
 0x108   : > { %v444_v37 = vadd.f32 %v1077_v28, %v443_v35  ;;  %v524_v38 = vadd.f32 %v1077_v28, %v523_v36 }
 0x109   : > { %v445_v39 = vpop.f32.mrf.mxu0  ;;  %v525_v40 = vpop.f32.mrf.mxu1 }
 0x10a   : > { %599 = vst.msk [vmem:[%s1082_s28 + $0x8] sm:$0xff] %vm597_vm1, %v444_v37  ;;  %615 = vst.msk [vmem:[%s1082_s28 + $0x88] sm:$0xff] %vm597_vm1, %v524_v38 }
 0x10b   : > { %v448_v41 = vpop.f32.mrf.mxu0  ;;  %v528_v42 = vpop.f32.mrf.mxu1 }
 0x10c   : > { %v449_v43 = vadd.f32 %v1077_v28, %v448_v41  ;;  %v529_v44 = vadd.f32 %v1077_v28, %v528_v42 }
 0x10d   : > { %v450_v45 = vpop.f32.mrf.mxu0  ;;  %v530_v46 = vpop.f32.mrf.mxu1 }
 0x10e   : > { %600 = vst.msk [vmem:[%s1082_s28 + $0x10] sm:$0xff] %vm597_vm1, %v449_v43  ;;  %616 = vst.msk [vmem:[%s1082_s28 + $0x90] sm:$0xff] %vm597_vm1, %v529_v44 }
 0x10f   : > { %v453_v47 = vpop.f32.mrf.mxu0  ;;  %v533_v48 = vpop.f32.mrf.mxu1 }
 0x110   : > { %v454_v49 = vadd.f32 %v1077_v28, %v453_v47  ;;  %v534_v50 = vadd.f32 %v1077_v28, %v533_v48 }
 0x111   : > { %v455_v51 = vpop.f32.mrf.mxu0  ;;  %v535_v52 = vpop.f32.mrf.mxu1 }
 0x112   : > { %601 = vst.msk [vmem:[%s1082_s28 + $0x18] sm:$0xff] %vm597_vm1, %v454_v49  ;;  %617 = vst.msk [vmem:[%s1082_s28 + $0x98] sm:$0xff] %vm597_vm1, %v534_v50 }
 0x113   : > { %v458_v53 = vpop.f32.mrf.mxu0  ;;  %v538_v54 = vpop.f32.mrf.mxu1 }
 0x114   : > { %v459_v55 = vadd.f32 %v1077_v28, %v458_v53  ;;  %v539_v56 = vadd.f32 %v1077_v28, %v538_v54 }
 0x115   : > { %v460_v57 = vpop.f32.mrf.mxu0  ;;  %v540_v58 = vpop.f32.mrf.mxu1 }
 0x116   : > { %602 = vst.msk [vmem:[%s1082_s28 + $0x20] sm:$0xff] %vm597_vm1, %v459_v55  ;;  %618 = vst.msk [vmem:[%s1082_s28 + $0xa0] sm:$0xff] %vm597_vm1, %v539_v56 }
 0x117   : > { %v463_v59 = vpop.f32.mrf.mxu0  ;;  %v543_v60 = vpop.f32.mrf.mxu1 }
 0x118   : > { %v464_v61 = vadd.f32 %v1077_v28, %v463_v59  ;;  %v544_v62 = vadd.f32 %v1077_v28, %v543_v60 }
 0x119   : > { %v465_v63 = vpop.f32.mrf.mxu0  ;;  %v545_v0 = vpop.f32.mrf.mxu1 }
 0x11a   : > { %603 = vst.msk [vmem:[%s1082_s28 + $0x28] sm:$0xff] %vm597_vm1, %v464_v61  ;;  %619 = vst.msk [vmem:[%s1082_s28 + $0xa8] sm:$0xff] %vm597_vm1, %v544_v62 }
 0x11b   : > { %v468_v1 = vpop.f32.mrf.mxu0  ;;  %v548_v2 = vpop.f32.mrf.mxu1 }
 0x11c   : > { %v469_v3 = vadd.f32 %v1077_v28, %v468_v1  ;;  %v549_v4 = vadd.f32 %v1077_v28, %v548_v2 }
 0x11d   : > { %v470_v5 = vpop.f32.mrf.mxu0  ;;  %v550_v6 = vpop.f32.mrf.mxu1 }
 0x11e   : > { %604 = vst.msk [vmem:[%s1082_s28 + $0x30] sm:$0xff] %vm597_vm1, %v469_v3  ;;  %620 = vst.msk [vmem:[%s1082_s28 + $0xb0] sm:$0xff] %vm597_vm1, %v549_v4 }
 0x11f   : > { %v473_v7 = vpop.f32.mrf.mxu0  ;;  %v553_v8 = vpop.f32.mrf.mxu1 }
 0x120   : > { %v474_v9 = vadd.f32 %v1077_v28, %v473_v7  ;;  %v554_v10 = vadd.f32 %v1077_v28, %v553_v8 }
 0x121   : > { %v475_v11 = vpop.f32.mrf.mxu0  ;;  %v555_v12 = vpop.f32.mrf.mxu1 }
 0x122   : > { %605 = vst.msk [vmem:[%s1082_s28 + $0x38] sm:$0xff] %vm597_vm1, %v474_v9  ;;  %621 = vst.msk [vmem:[%s1082_s28 + $0xb8] sm:$0xff] %vm597_vm1, %v554_v10 }
 0x123   : > { %v478_v13 = vpop.f32.mrf.mxu0  ;;  %v558_v14 = vpop.f32.mrf.mxu1 }
 0x124   : > { %v479_v15 = vadd.f32 %v1077_v28, %v478_v13  ;;  %v559_v16 = vadd.f32 %v1077_v28, %v558_v14 }
 0x125   : > { %v480_v17 = vpop.f32.mrf.mxu0  ;;  %v560_v18 = vpop.f32.mrf.mxu1 }
 0x126   : > { %606 = vst.msk [vmem:[%s1082_s28 + $0x40] sm:$0xff] %vm597_vm1, %v479_v15  ;;  %622 = vst.msk [vmem:[%s1082_s28 + $0xc0] sm:$0xff] %vm597_vm1, %v559_v16 }
 0x127   : > { %v483_v19 = vpop.f32.mrf.mxu0  ;;  %v563_v20 = vpop.f32.mrf.mxu1 }
 0x128   : > { %v484_v21 = vadd.f32 %v1077_v28, %v483_v19  ;;  %v564_v22 = vadd.f32 %v1077_v28, %v563_v20 }
 0x129   : > { %v485_v23 = vpop.f32.mrf.mxu0  ;;  %v565_v24 = vpop.f32.mrf.mxu1 }
 0x12a   : > { %607 = vst.msk [vmem:[%s1082_s28 + $0x48] sm:$0xff] %vm597_vm1, %v484_v21  ;;  %623 = vst.msk [vmem:[%s1082_s28 + $0xc8] sm:$0xff] %vm597_vm1, %v564_v22 }
 0x12b   : > { %v488_v25 = vpop.f32.mrf.mxu0  ;;  %v568_v26 = vpop.f32.mrf.mxu1 }
 0x12c   : > { %v489_v27 = vadd.f32 %v1077_v28, %v488_v25  ;;  %v569_v29 = vadd.f32 %v1077_v28, %v568_v26 }
 0x12d   : > { %v490_v30 = vpop.f32.mrf.mxu0  ;;  %v570_v31 = vpop.f32.mrf.mxu1 }
 0x12e   : > { %608 = vst.msk [vmem:[%s1082_s28 + $0x50] sm:$0xff] %vm597_vm1, %v489_v27  ;;  %624 = vst.msk [vmem:[%s1082_s28 + $0xd0] sm:$0xff] %vm597_vm1, %v569_v29 }
 0x12f   : > { %v493_v32 = vpop.f32.mrf.mxu0  ;;  %v573_v33 = vpop.f32.mrf.mxu1 }
 0x130   : > { %v494_v34 = vadd.f32 %v1077_v28, %v493_v32  ;;  %v574_v35 = vadd.f32 %v1077_v28, %v573_v33 }
 0x131   : > { %v495_v36 = vpop.f32.mrf.mxu0  ;;  %v575_v37 = vpop.f32.mrf.mxu1 }
 0x132   : > { %609 = vst.msk [vmem:[%s1082_s28 + $0x58] sm:$0xff] %vm597_vm1, %v494_v34  ;;  %625 = vst.msk [vmem:[%s1082_s28 + $0xd8] sm:$0xff] %vm597_vm1, %v574_v35 }
 0x133   : > { %v498_v38 = vpop.f32.mrf.mxu0  ;;  %v578_v39 = vpop.f32.mrf.mxu1 }
 0x134   : > { %v499_v40 = vadd.f32 %v1077_v28, %v498_v38  ;;  %v579_v41 = vadd.f32 %v1077_v28, %v578_v39 }
 0x135   : > { %v500_v42 = vpop.f32.mrf.mxu0  ;;  %v580_v43 = vpop.f32.mrf.mxu1 }
 0x136   : > { %610 = vst.msk [vmem:[%s1082_s28 + $0x60] sm:$0xff] %vm597_vm1, %v499_v40  ;;  %626 = vst.msk [vmem:[%s1082_s28 + $0xe0] sm:$0xff] %vm597_vm1, %v579_v41 }
 0x137   : > { %v503_v44 = vpop.f32.mrf.mxu0  ;;  %v583_v45 = vpop.f32.mrf.mxu1 }
 0x138   : > { %v504_v46 = vadd.f32 %v1077_v28, %v503_v44  ;;  %v584_v47 = vadd.f32 %v1077_v28, %v583_v45 }
 0x139   : > { %v505_v48 = vpop.f32.mrf.mxu0  ;;  %v585_v49 = vpop.f32.mrf.mxu1 }
 0x13a   : > { %611 = vst.msk [vmem:[%s1082_s28 + $0x68] sm:$0xff] %vm597_vm1, %v504_v46  ;;  %627 = vst.msk [vmem:[%s1082_s28 + $0xe8] sm:$0xff] %vm597_vm1, %v584_v47 }
 0x13b   : > { %v508_v50 = vpop.f32.mrf.mxu0  ;;  %v588_v51 = vpop.f32.mrf.mxu1 }
 0x13c   : > { %v509_v52 = vadd.f32 %v1077_v28, %v508_v50  ;;  %v589_v53 = vadd.f32 %v1077_v28, %v588_v51 }
 0x13d   : > { %v510_v54 = vpop.f32.mrf.mxu0  ;;  %v590_v55 = vpop.f32.mrf.mxu1 }
 0x13e   : > { %612 = vst.msk [vmem:[%s1082_s28 + $0x70] sm:$0xff] %vm597_vm1, %v509_v52  ;;  %628 = vst.msk [vmem:[%s1082_s28 + $0xf0] sm:$0xff] %vm597_vm1, %v589_v53 }
 0x13f   : > { %v513_v56 = vpop.f32.mrf.mxu0  ;;  %v593_v57 = vpop.f32.mrf.mxu1 }
 0x140   : > { %v514_v58 = vadd.f32 %v1077_v28, %v513_v56  ;;  %v594_v59 = vadd.f32 %v1077_v28, %v593_v57 }
 0x141   : > { %v515_v60 = vpop.f32.mrf.mxu0  ;;  %v595_v61 = vpop.f32.mrf.mxu1 }
 0x142   : > { %613 = vst.msk [vmem:[%s1082_s28 + $0x78] sm:$0xff] %vm597_vm1, %v514_v58  ;;  %629 = vst.msk [vmem:[%s1082_s28 + $0xf8] sm:$0xff] %vm597_vm1, %v594_v59 }
 0x143 PF: > { %s13_s12 = sadd.s32 1, %s801_s12  }
 0x144   : > { %p10_p4 = scmp.ge.s32.totalorder %s13_s12, 4  }
 0x146   :  { %12 = sbr.rel (!%p10_p4) target bundleno = 1 (0x1), region = 62 }

// kernel: _lambda_.13
= control target key start
LH: loop header
LB: loop body
LE: loop exit
PB: predicated region body
PF: predicated region fallthrough
CT: control target
= control target key end

     0   :  { %s2692_s13 = smov 0   ;;  %s3397_s0 = inlined_call_operand.vmem [shape: f32[512,16], index: 0, kind: input, shape index: {}]   ;;  %s3398_s1 = inlined_call_operand.vmem [shape: f32[512,36], index: 1, kind: input, shape index: {}]   ;;  %s3399_s2 = inlined_call_operand.vmem [shape: f32[36,4], index: 2, kind: input, shape index: {}]   ;;  %s3400_s3 = inlined_call_operand.vmem [shape: f32[4,32], index: 3, kind: input, shape index: {}]   ;;  %s3401_s4 = inlined_call_operand.vmem [shape: f32[16,32], index: 4, kind: input, shape index: {}]   ;;  %s3402_s5 = inlined_call_operand.vmem [shape: f32[1,32], index: 5, kind: input, shape index: {}]   ;;  %s3403_s6 = inlined_call_operand.vmem [shape: f32[32,16], index: 6, kind: input, shape index: {}]   ;;  %s3404_s7 = inlined_call_operand.vmem [shape: f32[1,16], index: 7, kind: input, shape index: {}]   ;;  %s3405_s8 = inlined_call_operand.vmem [shape: f32[1,16], index: 8, kind: input, shape index: {}]   ;;  %s3406_s9 = inlined_call_operand.vmem [shape: f32[512,16], index: 9, kind: output, shape index: {0}]   ;;  %s3407_s10 = inlined_call_operand.vmem [shape: f32[512,16], index: 10, kind: output, shape index: {1}]  }
   0x1 LB: > { %s2117_s14 = sadd.s32 4294967295, %s2635_s13   ;;  %p2121_p0 = scmp.ge.s32.totalorder %s2635_s13, 1  ;;  %s2635_s13 = sphi %s2692_s13, %s21_s13  }
   0x2   : > { %p327_p1 = scmp.lt.s32.totalorder %s2635_s13, 3 }
   0x4   : > { %p328_p2 = pnand %p2121_p0, %p327_p1 }
   0x6   : > { %331 = sbr.rel (%p328_p2) target bundleno = 682 (0x2aa), region = 56 }
   0xb   : > { %v467_v0 = vld [vmem:[%s3399_s2 + $0x20] sm:$0xf]  ;;  %vm565_vm0 = vcmask 1043456   ;;  %v466_v1 = vld [vmem:[%s3399_s2 + $0x18] sm:$0xff]  ;;  %s2122_s19 = sshll.u32 %s2117_s14, 5  ;;  %v796_v2 = vld [vmem:[%s3401_s4 + $0x8] sm:$0xff] }
   0xc   : > { %2405 = vmatprep.subr.msk.mxu0 %vm565_vm0, %v467_v0  ;;  %p376_p3 = scmp.lt.s32.totalorder %s2122_s19, 63  ;;  %v465_v3 = vld [vmem:[%s3399_s2 + $0x10] sm:$0xff]  ;;  %2463 = vmatprep.subr.mxu1 %v796_v2  ;;  %v795_v4 = vld [vmem:[%s3401_s4] sm:$0xff]  ;;  %v464_v6 = vld [vmem:[%s3399_s2 + $0x8] sm:$0xff]  ;;  %vm468_vm1 = vcmask 293888   ;;  %vm797_vm2 = vcmask 130048  }
   0xd   : > { %2406 = vmatpush3.msk.msra.mxu0 %vm565_vm0, %v467_v0  ;;  %2464 = vmatpush3.msra.mxu1 %v796_v2  ;;  %v794_v5 = vld [vmem:[%s3400_s3] sm:$0xf]  ;;  %vm1119_vm3 = vcmask 31744   ;;  %vm1519_vm4 = vcmask 261120  }
   0xe   : > { %2407 = vmatprep.subr.mxu0 %v466_v1  ;;  %s3454_s19 = smov (!%p376_p3, %s2122_s19), 63  ;;  %2465 = vmatprep.subr.mxu1 %v795_v4  ;;  %v463_v7 = vld [vmem:[%s3399_s2] sm:$0xff] }
   0xf   : > { %2408 = vmatpush3.msra.mxu0 %v466_v1  ;;  %s2723_s30 = sshll.u32 %s3454_s19, 3  ;;  %2466 = vmatpush3.msra.mxu1 %v795_v4 }
  0x10   : > { %2409 = vmatprep.subr.mxu0 %v465_v3  ;;  %s2732_s16 = scalar_lea.vmem %s3398_s1, %s2723_s30  ;;  %2515 = vmatprep.subr.msk.mxu1 %vm565_vm0, %v794_v5  ;;  %s2747_s19 = scalar_lea.vmem %s3397_s0, %s2723_s30 }
  0x11   : > { %2410 = vmatpush3.msra.mxu0 %v465_v3  ;;  %v431_v8 = vld [vmem:[%s2732_s16] sm:$0xff]  ;;  %v432_v9 = vld [vmem:[%s2732_s16 + $0x8] sm:$0xff]  ;;  %v433_v10 = vld [vmem:[%s2732_s16 + $0x10] sm:$0xff]  ;;  %s3152_s14 = scalar_lea.vmem %s3406_s9, %s2723_s30  ;;  %s3173_s21 = scalar_lea.vmem %s3407_s10, %s2723_s30 }
  0x12   : > { %2411 = vmatprep.subr.mxu0 %v464_v6  ;;  %2415 = vmatprep.mubr.msk.f32.mxu0 %vm468_vm1, %v431_v8  ;;  %v434_v11 = vld [vmem:[%s2732_s16 + $0x18] sm:$0xff]  ;;  %v435_v12 = vld [vmem:[%s2732_s16 + $0x20] sm:$0xff]  ;;  %v436_v13 = vld [vmem:[%s2732_s16 + $0x28] sm:$0xff] }
  0x13   : > { %2412 = vmatpush3.msra.mxu0 %v464_v6  ;;  %v437_v14 = vld [vmem:[%s2732_s16 + $0x30] sm:$0xff]  ;;  %v2754_v15 = vld [vmem:[%s2747_s19] sm:$0xff]  ;;  %v2759_v16 = vld [vmem:[%s2747_s19 + $0x8] sm:$0xff] }
  0x14   : > { %2413 = vmatprep.subr.mxu0 %v463_v7  ;;  %2467 = vmatprep.mubr.msk.f32.mxu1 %vm797_vm2, %v2754_v15  ;;  %v2762_v17 = vld [vmem:[%s2747_s19 + $0x10] sm:$0xff]  ;;  %v438_v18 = vld [vmem:[%s2732_s16 + $0x38] sm:$0xff]  ;;  %v439_v20 = vld [vmem:[%s2732_s16 + $0x40] sm:$0xff] }
  0x15   : > { %2414 = vmatpush3.msra.mxu0 %v463_v7  ;;  %2468 = vmatmul.mubr.msk.f32.vlgmr.msra.gmra.mxu1 %vm797_vm2, %v2759_v16  ;;  %v2771_v19 = vld [vmem:[%s2747_s19 + $0x18] sm:$0xff]  ;;  %v2777_v21 = vld [vmem:[%s2747_s19 + $0x20] sm:$0xff]  ;;  %v440_v22 = vld [vmem:[%s2732_s16 + $0x48] sm:$0xff] }
  0x16   : > { %2416 = vmatmul.mubr.msk.f32.vlgmr.msra.gmra.mxu0 %vm468_vm1, %v432_v9  ;;  %2516 = vmatpush3.msk.msra.mxu1 %vm565_vm0, %v794_v5  ;;  %v2787_v23 = vld [vmem:[%s2747_s19 + $0x28] sm:$0xff]  ;;  %v441_v24 = vld [vmem:[%s2732_s16 + $0x50] sm:$0xff]  ;;  %v442_v26 = vld [vmem:[%s2732_s16 + $0x58] sm:$0xff] }
  0x17   : > { %2418 = vmatprep.mubr.msk.f32.mxu0 %vm468_vm1, %v433_v10  ;;  %2470 = vmatprep.mubr.msk.f32.mxu1 %vm797_vm2, %v2762_v17  ;;  %v2791_v25 = vld [vmem:[%s2747_s19 + $0x30] sm:$0xff]  ;;  %v2801_v27 = vld [vmem:[%s2747_s19 + $0x38] sm:$0xff]  ;;  %v443_v28 = vld [vmem:[%s2732_s16 + $0x60] sm:$0xff] }
  0x18   : > { %v2805_v29 = vld [vmem:[%s2747_s19 + $0x40] sm:$0xff]  ;;  %v444_v30 = vld [vmem:[%s2732_s16 + $0x68] sm:$0xff]  ;;  %v445_v32 = vld [vmem:[%s2732_s16 + $0x70] sm:$0xff] }
  0x19   : > { %2471 = vmatmul.mubr.msk.f32.gmra.mxu1 %vm797_vm2, %v2771_v19  ;;  %v2815_v31 = vld [vmem:[%s2747_s19 + $0x48] sm:$0xff]  ;;  %v2819_v33 = vld [vmem:[%s2747_s19 + $0x50] sm:$0xff]  ;;  %v446_v34 = vld [vmem:[%s2732_s16 + $0x78] sm:$0xff] }
  0x1a   : > { %2419 = vmatmul.mubr.msk.f32.gmra.mxu0 %vm468_vm1, %v434_v11  ;;  %2473 = vmatprep.mubr.msk.f32.mxu1 %vm797_vm2, %v2777_v21  ;;  %v2829_v35 = vld [vmem:[%s2747_s19 + $0x58] sm:$0xff]  ;;  %v447_v36 = vld [vmem:[%s2732_s16 + $0x80] sm:$0xff]  ;;  %v448_v38 = vld [vmem:[%s2732_s16 + $0x88] sm:$0xff] }
  0x1b   : > { %2421 = vmatprep.mubr.msk.f32.mxu0 %vm468_vm1, %v435_v12  ;;  %v2833_v37 = vld [vmem:[%s2747_s19 + $0x60] sm:$0xff]  ;;  %v2843_v39 = vld [vmem:[%s2747_s19 + $0x68] sm:$0xff]  ;;  %v449_v40 = vld [vmem:[%s2732_s16 + $0x90] sm:$0xff] }
  0x1c   : > { %v2847_v41 = vld [vmem:[%s2747_s19 + $0x70] sm:$0xff]  ;;  %v450_v42 = vld [vmem:[%s2732_s16 + $0x98] sm:$0xff]  ;;  %v451_v44 = vld [vmem:[%s2732_s16 + $0xa0] sm:$0xff] }
  0x1d   : > { %2474 = vmatmul.mubr.msk.f32.gmra.mxu1 %vm797_vm2, %v2787_v23  ;;  %v2857_v43 = vld [vmem:[%s2747_s19 + $0x78] sm:$0xff]  ;;  %v2861_v45 = vld [vmem:[%s2747_s19 + $0x80] sm:$0xff]  ;;  %v452_v46 = vld [vmem:[%s2732_s16 + $0xa8] sm:$0xff] }
  0x1e   : > { %2422 = vmatmul.mubr.msk.f32.gmra.mxu0 %vm468_vm1, %v436_v13  ;;  %2476 = vmatprep.mubr.msk.f32.mxu1 %vm797_vm2, %v2791_v25  ;;  %3423 = vst [vmem:[#allocation2_spill] sm:$0xff] %v2861_v45  ;;  %v2871_v47 = vld [vmem:[%s2747_s19 + $0x88] sm:$0xff]  ;;  %v453_v48 = vld [vmem:[%s2732_s16 + $0xb0] sm:$0xff]  ;;  %v454_v50 = vld [vmem:[%s2732_s16 + $0xb8] sm:$0xff] }
  0x1f   : > { %2424 = vmatprep.mubr.msk.f32.mxu0 %vm468_vm1, %v437_v14  ;;  %v2875_v49 = vld [vmem:[%s2747_s19 + $0x90] sm:$0xff]  ;;  %v2885_v51 = vld [vmem:[%s2747_s19 + $0x98] sm:$0xff]  ;;  %v455_v52 = vld [vmem:[%s2732_s16 + $0xc0] sm:$0xff] }
  0x20   : > { %3424 = vst [vmem:[#allocation3_spill] sm:$0xff] %v2875_v49  ;;  %3425 = vst [vmem:[#allocation4_spill] sm:$0xff] %v2885_v51  ;;  %v2889_v53 = vld [vmem:[%s2747_s19 + $0xa0] sm:$0xff]  ;;  %v456_v54 = vld [vmem:[%s2732_s16 + $0xc8] sm:$0xff] }
  0x21   : > { %2477 = vmatmul.mubr.msk.f32.gmra.mxu1 %vm797_vm2, %v2801_v27  ;;  %3426 = vst [vmem:[#allocation5_spill] sm:$0xff] %v2889_v53  ;;  %v2899_v55 = vld [vmem:[%s2747_s19 + $0xa8] sm:$0xff]  ;;  %v457_v56 = vld [vmem:[%s2732_s16 + $0xd0] sm:$0xff]  ;;  %v458_v58 = vld [vmem:[%s2732_s16 + $0xd8] sm:$0xff] }
  0x22   : > { %2425 = vmatmul.mubr.msk.f32.gmra.mxu0 %vm468_vm1, %v438_v18  ;;  %2479 = vmatprep.mubr.msk.f32.mxu1 %vm797_vm2, %v2805_v29  ;;  %3427 = vst [vmem:[#allocation6_spill] sm:$0xff] %v2899_v55  ;;  %v2903_v57 = vld [vmem:[%s2747_s19 + $0xb0] sm:$0xff]  ;;  %v2913_v59 = vld [vmem:[%s2747_s19 + $0xb8] sm:$0xff]  ;;  %v459_v60 = vld [vmem:[%s2732_s16 + $0xe0] sm:$0xff] }
  0x23   : > { %2427 = vmatprep.mubr.msk.f32.mxu0 %vm468_vm1, %v439_v20  ;;  %3428 = vst [vmem:[#allocation7_spill] sm:$0xff] %v2903_v57  ;;  %3429 = vst [vmem:[#allocation8_spill] sm:$0xff] %v2913_v59  ;;  %v2917_v61 = vld [vmem:[%s2747_s19 + $0xc0] sm:$0xff]  ;;  %v460_v62 = vld [vmem:[%s2732_s16 + $0xe8] sm:$0xff] }
  0x24   : > { %3430 = vst [vmem:[#allocation9_spill] sm:$0xff] %v2917_v61  ;;  %v2927_v63 = vld [vmem:[%s2747_s19 + $0xc8] sm:$0xff]  ;;  %v461_v0 = vld [vmem:[%s2732_s16 + $0xf0] sm:$0xff]  ;;  %v462_v2 = vld [vmem:[%s2732_s16 + $0xf8] sm:$0xff] }
  0x25   : > { %2480 = vmatmul.mubr.msk.f32.gmra.mxu1 %vm797_vm2, %v2815_v31  ;;  %3431 = vst [vmem:[#allocation10_spill] sm:$0xff] %v2927_v63  ;;  %v2931_v1 = vld [vmem:[%s2747_s19 + $0xd0] sm:$0xff]  ;;  %v2941_v3 = vld [vmem:[%s2747_s19 + $0xd8] sm:$0xff]  ;;  %v2944_v4 = vld [vmem:[%s2747_s19 + $0xe0] sm:$0xff] }
  0x26   : > { %2428 = vmatmul.mubr.msk.f32.gmra.mxu0 %vm468_vm1, %v440_v22  ;;  %2482 = vmatprep.mubr.msk.f32.mxu1 %vm797_vm2, %v2819_v33  ;;  %3432 = vst [vmem:[#allocation11_spill] sm:$0xff] %v2931_v1  ;;  %3433 = vst [vmem:[#allocation12_spill] sm:$0xff] %v2941_v3  ;;  %v2952_v5 = vld [vmem:[%s2747_s19 + $0xe8] sm:$0xff]  ;;  %v2955_v6 = vld [vmem:[%s2747_s19 + $0xf0] sm:$0xff] }
  0x27   : > { %2430 = vmatprep.mubr.msk.f32.mxu0 %vm468_vm1, %v441_v24  ;;  %3434 = vst [vmem:[#allocation13_spill] sm:$0xff] %v2944_v4  ;;  %3435 = vst [vmem:[#allocation14_spill] sm:$0xff] %v2952_v5  ;;  %v2962_v7 = vld [vmem:[%s2747_s19 + $0xf8] sm:$0xff]  ;;  %v1517_v9 = vld [vmem:[%s3403_s6 + $0x10] sm:$0xff] }
  0x28   : > { %3436 = vst [vmem:[#allocation15_spill] sm:$0xff] %v2955_v6  ;;  %3437 = vst [vmem:[#allocation16_spill] sm:$0xff] %v2962_v7  ;;  %v1518_v8 = vld [vmem:[%s3403_s6 + $0x18] sm:$0xff]  ;;  %v1516_v10 = vld [vmem:[%s3403_s6 + $0x8] sm:$0xff] }
  0x29   : > { %2483 = vmatmul.mubr.msk.f32.gmra.mxu1 %vm797_vm2, %v2829_v35  ;;  %2565 = vmatprep.subr.mxu0 %v1518_v8  ;;  %v1515_v11 = vld [vmem:[%s3403_s6] sm:$0xff] }
  0x2a   : > { %2431 = vmatmul.mubr.msk.f32.gmra.mxu0 %vm468_vm1, %v442_v26  ;;  %2485 = vmatprep.mubr.msk.f32.mxu1 %vm797_vm2, %v2833_v37 }
  0x2b   : > { %2433 = vmatprep.mubr.msk.f32.mxu0 %vm468_vm1, %v443_v28  ;;  %2566 = vmatpush3.msra.mxu0 %v1518_v8 }
  0x2c   : > { %2567 = vmatprep.subr.mxu0 %v1517_v9 }
  0x2d   : > { %2486 = vmatmul.mubr.msk.f32.gmra.mxu1 %vm797_vm2, %v2843_v39  ;;  %2568 = vmatpush3.msra.mxu0 %v1517_v9 }
  0x2e   : > { %2434 = vmatmul.mubr.msk.f32.gmra.mxu0 %vm468_vm1, %v444_v30  ;;  %2488 = vmatprep.mubr.msk.f32.mxu1 %vm797_vm2, %v2847_v41 }
  0x2f   : > { %2436 = vmatprep.mubr.msk.f32.mxu0 %vm468_vm1, %v445_v32  ;;  %2569 = vmatprep.subr.mxu0 %v1516_v10 }
  0x30   : > { %2570 = vmatpush3.msra.mxu0 %v1516_v10 }
  0x31   : > { %2489 = vmatmul.mubr.msk.f32.gmra.mxu1 %vm797_vm2, %v2857_v43  ;;  %2571 = vmatprep.subr.mxu0 %v1515_v11 }
  0x32   : > { %2437 = vmatmul.mubr.msk.f32.gmra.mxu0 %vm468_vm1, %v446_v34  ;;  %2491 = vmatprep.mubr.msk.f32.mxu1 %vm797_vm2, %v2861_v45 }
  0x33   : > { %2439 = vmatprep.mubr.msk.f32.mxu0 %vm468_vm1, %v447_v36  ;;  %2572 = vmatpush3.msra.mxu0 %v1515_v11 }
  0x35   : > { %2492 = vmatmul.mubr.msk.f32.gmra.mxu1 %vm797_vm2, %v2871_v47 }
  0x36   : > { %2440 = vmatmul.mubr.msk.f32.gmra.mxu0 %vm468_vm1, %v448_v38  ;;  %2494 = vmatprep.mubr.msk.f32.mxu1 %vm797_vm2, %v2875_v49 }
  0x37   : > { %2442 = vmatprep.mubr.msk.f32.mxu0 %vm468_vm1, %v449_v40 }
  0x39   : > { %2495 = vmatmul.mubr.msk.f32.gmra.mxu1 %vm797_vm2, %v2885_v51 }
  0x3a   : > { %2443 = vmatmul.mubr.msk.f32.gmra.mxu0 %vm468_vm1, %v450_v42  ;;  %2497 = vmatprep.mubr.msk.f32.mxu1 %vm797_vm2, %v2889_v53 }
  0x3b   : > { %2445 = vmatprep.mubr.msk.f32.mxu0 %vm468_vm1, %v451_v44 }
  0x3d   : > { %2498 = vmatmul.mubr.msk.f32.gmra.mxu1 %vm797_vm2, %v2899_v55 }
  0x3e   : > { %2446 = vmatmul.mubr.msk.f32.gmra.mxu0 %vm468_vm1, %v452_v46  ;;  %2500 = vmatprep.mubr.msk.f32.mxu1 %vm797_vm2, %v2903_v57 }
  0x3f   : > { %2448 = vmatprep.mubr.msk.f32.mxu0 %vm468_vm1, %v453_v48 }
  0x41   : > { %2501 = vmatmul.mubr.msk.f32.gmra.mxu1 %vm797_vm2, %v2913_v59 }
  0x42   : > { %2449 = vmatmul.mubr.msk.f32.gmra.mxu0 %vm468_vm1, %v454_v50  ;;  %2503 = vmatprep.mubr.msk.f32.mxu1 %vm797_vm2, %v2917_v61 }
  0x43   : > { %2451 = vmatprep.mubr.msk.f32.mxu0 %vm468_vm1, %v455_v52 }
  0x45   : > { %2504 = vmatmul.mubr.msk.f32.gmra.mxu1 %vm797_vm2, %v2927_v63 }
  0x46   : > { %2452 = vmatmul.mubr.msk.f32.gmra.mxu0 %vm468_vm1, %v456_v54  ;;  %2506 = vmatprep.mubr.msk.f32.mxu1 %vm797_vm2, %v2931_v1 }
  0x47   : > { %2454 = vmatprep.mubr.msk.f32.mxu0 %vm468_vm1, %v457_v56 }
  0x49   : > { %2507 = vmatmul.mubr.msk.f32.gmra.mxu1 %vm797_vm2, %v2941_v3 }
  0x4a   : > { %2455 = vmatmul.mubr.msk.f32.gmra.mxu0 %vm468_vm1, %v458_v58  ;;  %2509 = vmatprep.mubr.msk.f32.mxu1 %vm797_vm2, %v2944_v4  ;;  %v3059_v4 = vld [vmem:[%s3402_s5] ss:$0 sm:$0xff] }
  0x4b   : > { %2457 = vmatprep.mubr.msk.f32.mxu0 %vm468_vm1, %v459_v60 }
  0x4d   : > { %2510 = vmatmul.mubr.msk.f32.gmra.mxu1 %vm797_vm2, %v2952_v5 }
  0x4e   : > { %2458 = vmatmul.mubr.msk.f32.gmra.mxu0 %vm468_vm1, %v460_v62  ;;  %2512 = vmatprep.mubr.msk.f32.mxu1 %vm797_vm2, %v2955_v6 }
  0x4f   : > { %2460 = vmatprep.mubr.msk.f32.mxu0 %vm468_vm1, %v461_v0 }
  0x51   : > { %2513 = vmatmul.mubr.msk.f32.gmra.mxu1 %vm797_vm2, %v2962_v7 }
  0x52   : > { %2461 = vmatmul.mubr.msk.f32.gmra.mxu0 %vm468_vm1, %v462_v2 }
  0xd6   : > { %v2417_v12 = vpop.f32.mrf.mxu0 }
  0xd8   : > { %v635_v13 = vpop.f32.mrf.mxu0 }
  0xd9   : > { %2517 = vmatprep.mubr.msk.f32.mxu1 %vm1119_vm3, %v635_v13 }
  0xda   : > { %v2420_v14 = vpop.f32.mrf.mxu0  ;;  %2518 = vmatmul.mubr.msk.f32.vlgmr.msra.gmra.mxu1 %vm1119_vm3, %v2417_v12  ;;  %v2469_v12 = vpop.f32.mrf.mxu1 }
  0xdc   : > { %v645_v18 = vpop.f32.mrf.mxu0  ;;  %v960_v13 = vpop.f32.mrf.mxu1 }
  0xdd   : > { %2520 = vmatprep.mubr.msk.f32.mxu1 %vm1119_vm3, %v645_v18 }
  0xde   : > { %v2423_v20 = vpop.f32.mrf.mxu0  ;;  %2521 = vmatmul.mubr.msk.f32.gmra.mxu1 %vm1119_vm3, %v2420_v14  ;;  %v2472_v14 = vpop.f32.mrf.mxu1 }
  0xe0   : > { %v655_v22 = vpop.f32.mrf.mxu0  ;;  %v970_v18 = vpop.f32.mrf.mxu1 }
  0xe1   : > { %2523 = vmatprep.mubr.msk.f32.mxu1 %vm1119_vm3, %v655_v22 }
  0xe2   : > { %v2426_v24 = vpop.f32.mrf.mxu0  ;;  %2524 = vmatmul.mubr.msk.f32.gmra.mxu1 %vm1119_vm3, %v2423_v20  ;;  %v2475_v20 = vpop.f32.mrf.mxu1 }
  0xe4   : > { %v665_v26 = vpop.f32.mrf.mxu0  ;;  %v980_v22 = vpop.f32.mrf.mxu1 }
  0xe5   : > { %2526 = vmatprep.mubr.msk.f32.mxu1 %vm1119_vm3, %v665_v26 }
  0xe6   : > { %v2429_v28 = vpop.f32.mrf.mxu0  ;;  %2527 = vmatmul.mubr.msk.f32.gmra.mxu1 %vm1119_vm3, %v2426_v24  ;;  %v2478_v24 = vpop.f32.mrf.mxu1 }
  0xe8   : > { %v675_v30 = vpop.f32.mrf.mxu0  ;;  %v990_v26 = vpop.f32.mrf.mxu1 }
  0xe9   : > { %2529 = vmatprep.mubr.msk.f32.mxu1 %vm1119_vm3, %v675_v30 }
  0xea   : > { %v2432_v32 = vpop.f32.mrf.mxu0  ;;  %2530 = vmatmul.mubr.msk.f32.gmra.mxu1 %vm1119_vm3, %v2429_v28  ;;  %v2481_v28 = vpop.f32.mrf.mxu1 }
  0xec   : > { %v685_v34 = vpop.f32.mrf.mxu0  ;;  %v3010_v30 = vpop.f32.mrf.mxu1 }
  0xed   : > { %2532 = vmatprep.mubr.msk.f32.mxu1 %vm1119_vm3, %v685_v34 }
  0xee   : > { %v2435_v36 = vpop.f32.mrf.mxu0  ;;  %2533 = vmatmul.mubr.msk.f32.gmra.mxu1 %vm1119_vm3, %v2432_v32  ;;  %v3012_v32 = vpop.f32.mrf.mxu1 }
  0xf0   : > { %v695_v38 = vpop.f32.mrf.mxu0  ;;  %v3014_v34 = vpop.f32.mrf.mxu1 }
  0xf1   : > { %2535 = vmatprep.mubr.msk.f32.mxu1 %vm1119_vm3, %v695_v38 }
  0xf2   : > { %v2438_v40 = vpop.f32.mrf.mxu0  ;;  %2536 = vmatmul.mubr.msk.f32.gmra.mxu1 %vm1119_vm3, %v2435_v36  ;;  %v3016_v36 = vpop.f32.mrf.mxu1 }
  0xf4   : > { %v705_v42 = vpop.f32.mrf.mxu0  ;;  %v3018_v38 = vpop.f32.mrf.mxu1 }
  0xf5   : > { %2538 = vmatprep.mubr.msk.f32.mxu1 %vm1119_vm3, %v705_v42 }
  0xf6   : > { %v2441_v44 = vpop.f32.mrf.mxu0  ;;  %2539 = vmatmul.mubr.msk.f32.gmra.mxu1 %vm1119_vm3, %v2438_v40  ;;  %v3020_v40 = vpop.f32.mrf.mxu1 }
  0xf8   : > { %v715_v46 = vpop.f32.mrf.mxu0  ;;  %v3022_v42 = vpop.f32.mrf.mxu1 }
  0xf9   : > { %2541 = vmatprep.mubr.msk.f32.mxu1 %vm1119_vm3, %v715_v46 }
  0xfa   : > { %v2444_v48 = vpop.f32.mrf.mxu0  ;;  %2542 = vmatmul.mubr.msk.f32.gmra.mxu1 %vm1119_vm3, %v2441_v44  ;;  %v3024_v44 = vpop.f32.mrf.mxu1 }
  0xfc   : > { %v725_v50 = vpop.f32.mrf.mxu0  ;;  %v3026_v46 = vpop.f32.mrf.mxu1 }
  0xfd   : > { %2544 = vmatprep.mubr.msk.f32.mxu1 %vm1119_vm3, %v725_v50 }
  0xfe   : > { %v2447_v52 = vpop.f32.mrf.mxu0  ;;  %2545 = vmatmul.mubr.msk.f32.gmra.mxu1 %vm1119_vm3, %v2444_v48  ;;  %v3028_v48 = vpop.f32.mrf.mxu1 }
 0x100   : > { %v735_v54 = vpop.f32.mrf.mxu0  ;;  %v3030_v50 = vpop.f32.mrf.mxu1 }
 0x101   : > { %2547 = vmatprep.mubr.msk.f32.mxu1 %vm1119_vm3, %v735_v54 }
 0x102   : > { %v2450_v56 = vpop.f32.mrf.mxu0  ;;  %2548 = vmatmul.mubr.msk.f32.gmra.mxu1 %vm1119_vm3, %v2447_v52  ;;  %v3032_v52 = vpop.f32.mrf.mxu1 }
 0x104   : > { %v745_v58 = vpop.f32.mrf.mxu0  ;;  %v3034_v54 = vpop.f32.mrf.mxu1 }
 0x105   : > { %2550 = vmatprep.mubr.msk.f32.mxu1 %vm1119_vm3, %v745_v58 }
 0x106   : > { %v2453_v60 = vpop.f32.mrf.mxu0  ;;  %2551 = vmatmul.mubr.msk.f32.gmra.mxu1 %vm1119_vm3, %v2450_v56  ;;  %v3036_v56 = vpop.f32.mrf.mxu1 }
 0x108   : > { %v755_v62 = vpop.f32.mrf.mxu0  ;;  %v3038_v58 = vpop.f32.mrf.mxu1 }
 0x109   : > { %2553 = vmatprep.mubr.msk.f32.mxu1 %vm1119_vm3, %v755_v62 }
 0x10a   : > { %v2456_v0 = vpop.f32.mrf.mxu0  ;;  %2554 = vmatmul.mubr.msk.f32.gmra.mxu1 %vm1119_vm3, %v2453_v60  ;;  %v3040_v60 = vpop.f32.mrf.mxu1 }
 0x10c   : > { %v765_v2 = vpop.f32.mrf.mxu0  ;;  %v3042_v62 = vpop.f32.mrf.mxu1 }
 0x10d   : > { %2556 = vmatprep.mubr.msk.f32.mxu1 %vm1119_vm3, %v765_v2 }
 0x10e   : > { %v2459_v8 = vpop.f32.mrf.mxu0  ;;  %2557 = vmatmul.mubr.msk.f32.gmra.mxu1 %vm1119_vm3, %v2456_v0  ;;  %v3044_v0 = vpop.f32.mrf.mxu1 }
 0x110   : > { %v775_v9 = vpop.f32.mrf.mxu0  ;;  %v3046_v2 = vpop.f32.mrf.mxu1 }
 0x111   : > { %2559 = vmatprep.mubr.msk.f32.mxu1 %vm1119_vm3, %v775_v9 }
 0x112   : > { %v2462_v10 = vpop.f32.mrf.mxu0  ;;  %2560 = vmatmul.mubr.msk.f32.gmra.mxu1 %vm1119_vm3, %v2459_v8  ;;  %v3048_v8 = vpop.f32.mrf.mxu1 }
 0x114   : > { %v785_v11 = vpop.f32.mrf.mxu0  ;;  %v3050_v9 = vpop.f32.mrf.mxu1 }
 0x115   : > { %2562 = vmatprep.mubr.msk.f32.mxu1 %vm1119_vm3, %v785_v11 }
 0x116   : > { %2563 = vmatmul.mubr.msk.f32.gmra.mxu1 %vm1119_vm3, %v2462_v10  ;;  %v3052_v10 = vpop.f32.mrf.mxu1 }
 0x118   : > { %v3054_v11 = vpop.f32.mrf.mxu1 }
 0x19a   : > { %v2519_v6 = vpop.f32.mrf.mxu1 }
 0x19b   : > { %v1291_v7 = vadd.f32 %v2519_v6, %v2469_v12 }
 0x19c   : > { %v1285_v5 = vpop.f32.mrf.mxu1 }
 0x19d   : > { %v1286_v1 = vadd.f32 %v1285_v5, %v960_v13  ;;  %v1452_v3 = vadd.f32 %v3059_v4, %v1291_v7 }
 0x19e   : > { %v2522_v61 = vpop.f32.mrf.mxu1 }
 0x19f   : > { %v1451_v63 = vadd.f32 %v3059_v4, %v1286_v1  ;;  %v1301_v57 = vadd.f32 %v2522_v61, %v2472_v14  ;;  %v1484_v49 = vmax.f32 %v1452_v3, 0.0 }
 0x1a0   : > { %v1295_v59 = vpop.f32.mrf.mxu1 }
 0x1a1   : > { %v1483_v53 = vmax.f32 %v1451_v63, 0.0  ;;  %v1296_v55 = vadd.f32 %v1295_v59, %v970_v18  ;;  %v1454_v6 = vadd.f32 %v3059_v4, %v1301_v57 }
 0x1a2   : > { %v2525_v12 = vpop.f32.mrf.mxu1 }
 0x1a3   : > { %v1453_v51 = vadd.f32 %v3059_v4, %v1296_v55  ;;  %v1311_v45 = vadd.f32 %v2525_v12, %v2475_v20  ;;  %2573 = vmatprep.mubr.msk.f32.mxu0 %vm1519_vm4, %v1483_v53  ;;  %v1486_v1 = vmax.f32 %v1454_v6, 0.0 }
 0x1a4   : > { %v1305_v5 = vpop.f32.mrf.mxu1  ;;  %2574 = vmatmul.mubr.msk.f32.vlgmr.msra.gmra.mxu0 %vm1519_vm4, %v1484_v49 }
 0x1a5   : > { %v1485_v7 = vmax.f32 %v1453_v51, 0.0  ;;  %v1306_v13 = vadd.f32 %v1305_v5, %v980_v22  ;;  %v1456_v61 = vadd.f32 %v3059_v4, %v1311_v45 }
 0x1a6   : > { %v2528_v14 = vpop.f32.mrf.mxu1 }
 0x1a7   : > { %v1455_v59 = vadd.f32 %v3059_v4, %v1306_v13  ;;  %v1321_v63 = vadd.f32 %v2528_v14, %v2478_v24  ;;  %2576 = vmatprep.mubr.msk.f32.mxu0 %vm1519_vm4, %v1485_v7  ;;  %v1488_v53 = vmax.f32 %v1456_v61, 0.0 }
 0x1a8   : > { %v1315_v57 = vpop.f32.mrf.mxu1  ;;  %2577 = vmatmul.mubr.msk.f32.gmra.mxu0 %vm1519_vm4, %v1486_v1 }
 0x1a9   : > { %v1487_v55 = vmax.f32 %v1455_v59, 0.0  ;;  %v1316_v3 = vadd.f32 %v1315_v57, %v990_v26  ;;  %v1458_v18 = vadd.f32 %v3059_v4, %v1321_v63 }
 0x1aa   : > { %v2531_v49 = vpop.f32.mrf.mxu1 }
 0x1ab   : > { %v1457_v51 = vadd.f32 %v3059_v4, %v1316_v3  ;;  %v1331_v20 = vadd.f32 %v2531_v49, %v2481_v28  ;;  %2579 = vmatprep.mubr.msk.f32.mxu0 %vm1519_vm4, %v1487_v55  ;;  %v1490_v6 = vmax.f32 %v1458_v18, 0.0 }
 0x1ac   : > { %v1325_v45 = vpop.f32.mrf.mxu1  ;;  %2580 = vmatmul.mubr.msk.f32.gmra.mxu0 %vm1519_vm4, %v1488_v53 }
 0x1ad   : > { %v1489_v22 = vmax.f32 %v1457_v51, 0.0  ;;  %v1326_v24 = vadd.f32 %v1325_v45, %v3010_v30  ;;  %v1460_v12 = vadd.f32 %v3059_v4, %v1331_v20 }
 0x1ae   : > { %v2534_v5 = vpop.f32.mrf.mxu1 }
 0x1af   : > { %v1459_v26 = vadd.f32 %v3059_v4, %v1326_v24  ;;  %v1341_v7 = vadd.f32 %v2534_v5, %v3012_v32  ;;  %2582 = vmatprep.mubr.msk.f32.mxu0 %vm1519_vm4, %v1489_v22  ;;  %v1492_v61 = vmax.f32 %v1460_v12, 0.0 }
 0x1b0   : > { %v1335_v13 = vpop.f32.mrf.mxu1  ;;  %2583 = vmatmul.mubr.msk.f32.gmra.mxu0 %vm1519_vm4, %v1490_v6 }
 0x1b1   : > { %v1491_v28 = vmax.f32 %v1459_v26, 0.0  ;;  %v1336_v1 = vadd.f32 %v1335_v13, %v3014_v34  ;;  %v1462_v14 = vadd.f32 %v3059_v4, %v1341_v7 }
 0x1b2   : > { %v2537_v30 = vpop.f32.mrf.mxu1 }
 0x1b3   : > { %v1461_v59 = vadd.f32 %v3059_v4, %v1336_v1  ;;  %v1351_v63 = vadd.f32 %v2537_v30, %v3016_v36  ;;  %2585 = vmatprep.mubr.msk.f32.mxu0 %vm1519_vm4, %v1491_v28  ;;  %v1494_v3 = vmax.f32 %v1462_v14, 0.0 }
 0x1b4   : > { %v1345_v57 = vpop.f32.mrf.mxu1  ;;  %2586 = vmatmul.mubr.msk.f32.gmra.mxu0 %vm1519_vm4, %v1492_v61 }
 0x1b5   : > { %v1493_v32 = vmax.f32 %v1461_v59, 0.0  ;;  %v1346_v55 = vadd.f32 %v1345_v57, %v3018_v38  ;;  %v1464_v53 = vadd.f32 %v3059_v4, %v1351_v63 }
 0x1b6   : > { %v2540_v34 = vpop.f32.mrf.mxu1 }
 0x1b7   : > { %v1463_v18 = vadd.f32 %v3059_v4, %v1346_v55  ;;  %v1361_v49 = vadd.f32 %v2540_v34, %v3020_v40  ;;  %2588 = vmatprep.mubr.msk.f32.mxu0 %vm1519_vm4, %v1493_v32  ;;  %v1496_v45 = vmax.f32 %v1464_v53, 0.0 }
 0x1b8   : > { %v1355_v51 = vpop.f32.mrf.mxu1  ;;  %2589 = vmatmul.mubr.msk.f32.gmra.mxu0 %vm1519_vm4, %v1494_v3 }
 0x1b9   : > { %v1495_v36 = vmax.f32 %v1463_v18, 0.0  ;;  %v1356_v20 = vadd.f32 %v1355_v51, %v3022_v42  ;;  %v1466_v22 = vadd.f32 %v3059_v4, %v1361_v49 }
 0x1ba   : > { %v2543_v38 = vpop.f32.mrf.mxu1 }
 0x1bb   : > { %v1465_v24 = vadd.f32 %v3059_v4, %v1356_v20  ;;  %v1371_v6 = vadd.f32 %v2543_v38, %v3024_v44  ;;  %2591 = vmatprep.mubr.msk.f32.mxu0 %vm1519_vm4, %v1495_v36  ;;  %v1498_v26 = vmax.f32 %v1466_v22, 0.0 }
 0x1bc   : > { %v1365_v12 = vpop.f32.mrf.mxu1  ;;  %2592 = vmatmul.mubr.msk.f32.gmra.mxu0 %vm1519_vm4, %v1496_v45 }
 0x1bd   : > { %v1497_v40 = vmax.f32 %v1465_v24, 0.0  ;;  %v1366_v5 = vadd.f32 %v1365_v12, %v3026_v46  ;;  %v1468_v7 = vadd.f32 %v3059_v4, %v1371_v6 }
 0x1be   : > { %v2546_v42 = vpop.f32.mrf.mxu1 }
 0x1bf   : > { %v1467_v13 = vadd.f32 %v3059_v4, %v1366_v5  ;;  %v1381_v28 = vadd.f32 %v2546_v42, %v3028_v48  ;;  %2594 = vmatprep.mubr.msk.f32.mxu0 %vm1519_vm4, %v1497_v40  ;;  %v1500_v14 = vmax.f32 %v1468_v7, 0.0 }
 0x1c0   : > { %v1375_v1 = vpop.f32.mrf.mxu1  ;;  %2595 = vmatmul.mubr.msk.f32.gmra.mxu0 %vm1519_vm4, %v1498_v26 }
 0x1c1   : > { %v1499_v44 = vmax.f32 %v1467_v13, 0.0  ;;  %v1376_v61 = vadd.f32 %v1375_v1, %v3030_v50  ;;  %v1470_v30 = vadd.f32 %v3059_v4, %v1381_v28 }
 0x1c2   : > { %v2549_v46 = vpop.f32.mrf.mxu1 }
 0x1c3   : > { %v1469_v59 = vadd.f32 %v3059_v4, %v1376_v61  ;;  %v1391_v63 = vadd.f32 %v2549_v46, %v3032_v52  ;;  %2597 = vmatprep.mubr.msk.f32.mxu0 %vm1519_vm4, %v1499_v44  ;;  %v1502_v55 = vmax.f32 %v1470_v30, 0.0 }
 0x1c4   : > { %v1385_v57 = vpop.f32.mrf.mxu1  ;;  %2598 = vmatmul.mubr.msk.f32.gmra.mxu0 %vm1519_vm4, %v1500_v14 }
 0x1c5   : > { %v1501_v48 = vmax.f32 %v1469_v59, 0.0  ;;  %v1386_v32 = vadd.f32 %v1385_v57, %v3034_v54  ;;  %v1472_v3 = vadd.f32 %v3059_v4, %v1391_v63 }
 0x1c6   : > { %v2552_v50 = vpop.f32.mrf.mxu1 }
 0x1c7   : > { %v1471_v53 = vadd.f32 %v3059_v4, %v1386_v32  ;;  %v1401_v34 = vadd.f32 %v2552_v50, %v3036_v56  ;;  %2600 = vmatprep.mubr.msk.f32.mxu0 %vm1519_vm4, %v1501_v48  ;;  %v1504_v51 = vmax.f32 %v1472_v3, 0.0  ;;  %v3163_v3 = vld [vmem:[%s3405_s8] ss:$0 sm:$0xff] }
 0x1c8   : > { %v1395_v18 = vpop.f32.mrf.mxu1  ;;  %2601 = vmatmul.mubr.msk.f32.gmra.mxu0 %vm1519_vm4, %v1502_v55 }
 0x1c9   : > { %v1503_v52 = vmax.f32 %v1471_v53, 0.0  ;;  %v1396_v49 = vadd.f32 %v1395_v18, %v3038_v58  ;;  %v1474_v36 = vadd.f32 %v3059_v4, %v1401_v34 }
 0x1ca   : > { %v2555_v54 = vpop.f32.mrf.mxu1 }
 0x1cb   : > { %v1473_v20 = vadd.f32 %v3059_v4, %v1396_v49  ;;  %v1411_v45 = vadd.f32 %v2555_v54, %v3040_v60  ;;  %2603 = vmatprep.mubr.msk.f32.mxu0 %vm1519_vm4, %v1503_v52  ;;  %v1506_v24 = vmax.f32 %v1474_v36, 0.0 }
 0x1cc   : > { %v1405_v22 = vpop.f32.mrf.mxu1  ;;  %2604 = vmatmul.mubr.msk.f32.gmra.mxu0 %vm1519_vm4, %v1504_v51 }
 0x1cd   : > { %v1505_v56 = vmax.f32 %v1473_v20, 0.0  ;;  %v1406_v38 = vadd.f32 %v1405_v22, %v3042_v62  ;;  %v1476_v6 = vadd.f32 %v3059_v4, %v1411_v45 }
 0x1ce   : > { %v2558_v58 = vpop.f32.mrf.mxu1 }
 0x1cf   : > { %v1475_v12 = vadd.f32 %v3059_v4, %v1406_v38  ;;  %v1421_v40 = vadd.f32 %v2558_v58, %v3044_v0  ;;  %2606 = vmatprep.mubr.msk.f32.mxu0 %vm1519_vm4, %v1505_v56  ;;  %v1508_v7 = vmax.f32 %v1476_v6, 0.0 }
 0x1d0   : > { %v1415_v5 = vpop.f32.mrf.mxu1  ;;  %2607 = vmatmul.mubr.msk.f32.gmra.mxu0 %vm1519_vm4, %v1506_v24 }
 0x1d1   : > { %v1507_v60 = vmax.f32 %v1475_v12, 0.0  ;;  %v1416_v26 = vadd.f32 %v1415_v5, %v3046_v2  ;;  %v1478_v42 = vadd.f32 %v3059_v4, %v1421_v40 }
 0x1d2   : > { %v2561_v62 = vpop.f32.mrf.mxu1 }
 0x1d3   : > { %v1477_v13 = vadd.f32 %v3059_v4, %v1416_v26  ;;  %v1431_v28 = vadd.f32 %v2561_v62, %v3048_v8  ;;  %2609 = vmatprep.mubr.msk.f32.mxu0 %vm1519_vm4, %v1507_v60  ;;  %v1510_v61 = vmax.f32 %v1478_v42, 0.0 }
 0x1d4   : > { %v1425_v1 = vpop.f32.mrf.mxu1  ;;  %2610 = vmatmul.mubr.msk.f32.gmra.mxu0 %vm1519_vm4, %v1508_v7 }
 0x1d5   : > { %v1509_v0 = vmax.f32 %v1477_v13, 0.0  ;;  %v1426_v44 = vadd.f32 %v1425_v1, %v3050_v9  ;;  %v1480_v14 = vadd.f32 %v3059_v4, %v1431_v28 }
 0x1d6   : > { %v2564_v2 = vpop.f32.mrf.mxu1 }
 0x1d7   : > { %v1479_v30 = vadd.f32 %v3059_v4, %v1426_v44  ;;  %v1441_v46 = vadd.f32 %v2564_v2, %v3052_v10  ;;  %2612 = vmatprep.mubr.msk.f32.mxu0 %vm1519_vm4, %v1509_v0  ;;  %v1512_v57 = vmax.f32 %v1480_v14, 0.0 }
 0x1d8   : > { %v1435_v8 = vpop.f32.mrf.mxu1  ;;  %2613 = vmatmul.mubr.msk.f32.gmra.mxu0 %vm1519_vm4, %v1510_v61 }
 0x1d9   : > { %v1511_v59 = vmax.f32 %v1479_v30, 0.0  ;;  %v1436_v63 = vadd.f32 %v1435_v8, %v3054_v11  ;;  %v1482_v9 = vadd.f32 %v3059_v4, %v1441_v46 }
 0x1db   : > { %v1481_v48 = vadd.f32 %v3059_v4, %v1436_v63  ;;  %2615 = vmatprep.mubr.msk.f32.mxu0 %vm1519_vm4, %v1511_v59  ;;  %v1514_v10 = vmax.f32 %v1482_v9, 0.0  ;;  %v3157_v4 = vld [vmem:[%s3404_s7] ss:$0 sm:$0xff] }
 0x1dc   : > { %2616 = vmatmul.mubr.msk.f32.gmra.mxu0 %vm1519_vm4, %v1512_v57 }
 0x1dd   : > { %v1513_v32 = vmax.f32 %v1481_v48, 0.0 }
 0x1df   : > { %2618 = vmatprep.mubr.msk.f32.mxu0 %vm1519_vm4, %v1513_v32 }
 0x1e0   : > { %2619 = vmatmul.mubr.msk.f32.gmra.mxu0 %vm1519_vm4, %v1514_v10 }
 0x264   : > { %v2575_v11 = vpop.f32.mrf.mxu0 }
 0x265   : > { %v1842_v55 = vadd.f32 %v2575_v11, %v2759_v16 }
 0x266   : > { %v1682_v50 = vpop.f32.mrf.mxu0 }
 0x267   : > { %1874 = vst.msk [vmem:[%s3152_s14 + $0x8] sm:$0xff] %vm797_vm2, %v1842_v55  ;;  %v1913_v53 = vmul.f32 %v3157_v4, %v1842_v55  ;;  %v1841_v34 = vadd.f32 %v1682_v50, %v2754_v15 }
 0x268   : > { %v2578_v16 = vpop.f32.mrf.mxu0 }
 0x269   : > { %v1952_v18 = vadd.f32 %v3163_v3, %v1913_v53  ;;  %1873 = vst.msk [vmem:[%s3152_s14] sm:$0xff] %vm797_vm2, %v1841_v34  ;;  %v1912_v52 = vmul.f32 %v3157_v4, %v1841_v34  ;;  %v1844_v49 = vadd.f32 %v2578_v16, %v2771_v19 }
 0x26a   : > { %v1692_v15 = vpop.f32.mrf.mxu0 }
 0x26b   : > { %1984 = vst.msk [vmem:[%s3173_s21 + $0x8] sm:$0xff] %vm797_vm2, %v1952_v18  ;;  %v1951_v51 = vadd.f32 %v3163_v3, %v1912_v52  ;;  %1876 = vst.msk [vmem:[%s3152_s14 + $0x18] sm:$0xff] %vm797_vm2, %v1844_v49  ;;  %v1915_v36 = vmul.f32 %v3157_v4, %v1844_v49  ;;  %v1843_v54 = vadd.f32 %v1692_v15, %v2762_v17  ;;  %v3438_v52 = vld [vmem:[#allocation2_spill] sm:$0xff] }
 0x26c   : > { %v2581_v20 = vpop.f32.mrf.mxu0 }
 0x26d   : > { %1983 = vst.msk [vmem:[%s3173_s21] sm:$0xff] %vm797_vm2, %v1951_v51  ;;  %v1954_v45 = vadd.f32 %v3163_v3, %v1915_v36  ;;  %1875 = vst.msk [vmem:[%s3152_s14 + $0x10] sm:$0xff] %vm797_vm2, %v1843_v54  ;;  %v1914_v19 = vmul.f32 %v3157_v4, %v1843_v54  ;;  %v1846_v22 = vadd.f32 %v2581_v20, %v2787_v23  ;;  %v3439_v36 = vld [vmem:[#allocation4_spill] sm:$0xff] }
 0x26e   : > { %v1702_v56 = vpop.f32.mrf.mxu0 }
 0x26f   : > { %1986 = vst.msk [vmem:[%s3173_s21 + $0x18] sm:$0xff] %vm797_vm2, %v1954_v45  ;;  %v1953_v38 = vadd.f32 %v3163_v3, %v1914_v19  ;;  %1878 = vst.msk [vmem:[%s3152_s14 + $0x28] sm:$0xff] %vm797_vm2, %v1846_v22  ;;  %v1917_v17 = vmul.f32 %v3157_v4, %v1846_v22  ;;  %v1845_v24 = vadd.f32 %v1702_v56, %v2777_v21  ;;  %v3440_v22 = vld [vmem:[#allocation3_spill] sm:$0xff] }
 0x270   : > { %v2584_v6 = vpop.f32.mrf.mxu0 }
 0x271   : > { %1985 = vst.msk [vmem:[%s3173_s21 + $0x10] sm:$0xff] %vm797_vm2, %v1953_v38  ;;  %v1956_v58 = vadd.f32 %v3163_v3, %v1917_v17  ;;  %1877 = vst.msk [vmem:[%s3152_s14 + $0x20] sm:$0xff] %vm797_vm2, %v1845_v24  ;;  %v1916_v23 = vmul.f32 %v3157_v4, %v1845_v24  ;;  %v1848_v12 = vadd.f32 %v2584_v6, %v2801_v27  ;;  %v3441_v6 = vld [vmem:[#allocation6_spill] sm:$0xff] }
 0x272   : > { %v1712_v40 = vpop.f32.mrf.mxu0 }
 0x273   : > { %1988 = vst.msk [vmem:[%s3173_s21 + $0x28] sm:$0xff] %vm797_vm2, %v1956_v58  ;;  %v1955_v5 = vadd.f32 %v3163_v3, %v1916_v23  ;;  %1880 = vst.msk [vmem:[%s3152_s14 + $0x38] sm:$0xff] %vm797_vm2, %v1848_v12  ;;  %v1919_v21 = vmul.f32 %v3157_v4, %v1848_v12  ;;  %v1847_v60 = vadd.f32 %v1712_v40, %v2791_v25 }
 0x274   : > { %v2587_v26 = vpop.f32.mrf.mxu0 }
 0x275   : > { %1987 = vst.msk [vmem:[%s3173_s21 + $0x20] sm:$0xff] %vm797_vm2, %v1955_v5  ;;  %v1958_v7 = vadd.f32 %v3163_v3, %v1919_v21  ;;  %1879 = vst.msk [vmem:[%s3152_s14 + $0x30] sm:$0xff] %vm797_vm2, %v1847_v60  ;;  %v1918_v27 = vmul.f32 %v3157_v4, %v1847_v60  ;;  %v1850_v42 = vadd.f32 %v2587_v26, %v2815_v31  ;;  %v3442_v5 = vld [vmem:[#allocation5_spill] sm:$0xff] }
 0x276   : > { %v1722_v62 = vpop.f32.mrf.mxu0 }
 0x277   : > { %1990 = vst.msk [vmem:[%s3173_s21 + $0x38] sm:$0xff] %vm797_vm2, %v1958_v7  ;;  %v1957_v13 = vadd.f32 %v3163_v3, %v1918_v27  ;;  %1882 = vst.msk [vmem:[%s3152_s14 + $0x48] sm:$0xff] %vm797_vm2, %v1850_v42  ;;  %v1921_v25 = vmul.f32 %v3157_v4, %v1850_v42  ;;  %v1849_v28 = vadd.f32 %v1722_v62, %v2805_v29  ;;  %v3443_v27 = vld [vmem:[#allocation8_spill] sm:$0xff] }
 0x278   : > { %v2590_v1 = vpop.f32.mrf.mxu0 }
 0x279   : > { %1989 = vst.msk [vmem:[%s3173_s21 + $0x30] sm:$0xff] %vm797_vm2, %v1957_v13  ;;  %v1960_v0 = vadd.f32 %v3163_v3, %v1921_v25  ;;  %1881 = vst.msk [vmem:[%s3152_s14 + $0x40] sm:$0xff] %vm797_vm2, %v1849_v28  ;;  %v1920_v31 = vmul.f32 %v3157_v4, %v1849_v28  ;;  %v1852_v44 = vadd.f32 %v2590_v1, %v2829_v35  ;;  %v3444_v28 = vld [vmem:[#allocation7_spill] sm:$0xff] }
 0x27a   : > { %v1732_v61 = vpop.f32.mrf.mxu0 }
 0x27b   : > { %1992 = vst.msk [vmem:[%s3173_s21 + $0x48] sm:$0xff] %vm797_vm2, %v1960_v0  ;;  %v1959_v14 = vadd.f32 %v3163_v3, %v1920_v31  ;;  %1884 = vst.msk [vmem:[%s3152_s14 + $0x58] sm:$0xff] %vm797_vm2, %v1852_v44  ;;  %v1923_v29 = vmul.f32 %v3157_v4, %v1852_v44  ;;  %v1851_v2 = vadd.f32 %v1732_v61, %v2819_v33  ;;  %v3445_v61 = vld [vmem:[#allocation10_spill] sm:$0xff] }
 0x27c   : > { %v2593_v30 = vpop.f32.mrf.mxu0 }
 0x27d   : > { %1991 = vst.msk [vmem:[%s3173_s21 + $0x40] sm:$0xff] %vm797_vm2, %v1959_v14  ;;  %v1962_v46 = vadd.f32 %v3163_v3, %v1923_v29  ;;  %1883 = vst.msk [vmem:[%s3152_s14 + $0x50] sm:$0xff] %vm797_vm2, %v1851_v2  ;;  %v1922_v35 = vmul.f32 %v3157_v4, %v1851_v2  ;;  %v1854_v8 = vadd.f32 %v2593_v30, %v2843_v39 }
 0x27e   : > { %v1742_v59 = vpop.f32.mrf.mxu0 }
 0x27f   : > { %1994 = vst.msk [vmem:[%s3173_s21 + $0x58] sm:$0xff] %vm797_vm2, %v1962_v46  ;;  %v1961_v63 = vadd.f32 %v3163_v3, %v1922_v35  ;;  %1886 = vst.msk [vmem:[%s3152_s14 + $0x68] sm:$0xff] %vm797_vm2, %v1854_v8  ;;  %v1925_v33 = vmul.f32 %v3157_v4, %v1854_v8  ;;  %v1853_v57 = vadd.f32 %v1742_v59, %v2833_v37  ;;  %v3446_v46 = vld [vmem:[#allocation9_spill] sm:$0xff] }
 0x280   : > { %v2596_v9 = vpop.f32.mrf.mxu0 }
 0x281   : > { %1993 = vst.msk [vmem:[%s3173_s21 + $0x50] sm:$0xff] %vm797_vm2, %v1961_v63  ;;  %v1964_v48 = vadd.f32 %v3163_v3, %v1925_v33  ;;  %1885 = vst.msk [vmem:[%s3152_s14 + $0x60] sm:$0xff] %vm797_vm2, %v1853_v57  ;;  %v1924_v39 = vmul.f32 %v3157_v4, %v1853_v57  ;;  %v1856_v32 = vadd.f32 %v2596_v9, %v2857_v43  ;;  %v3447_v33 = vld [vmem:[#allocation12_spill] sm:$0xff] }
 0x282   : > { %v1752_v10 = vpop.f32.mrf.mxu0 }
 0x283   : > { %1996 = vst.msk [vmem:[%s3173_s21 + $0x68] sm:$0xff] %vm797_vm2, %v1964_v48  ;;  %v1963_v11 = vadd.f32 %v3163_v3, %v1924_v39  ;;  %1888 = vst.msk [vmem:[%s3152_s14 + $0x78] sm:$0xff] %vm797_vm2, %v1856_v32  ;;  %v1927_v37 = vmul.f32 %v3157_v4, %v1856_v32  ;;  %v1855_v55 = vadd.f32 %v1752_v10, %v2847_v41  ;;  %v3448_v32 = vld [vmem:[#allocation11_spill] sm:$0xff] }
 0x284   : > { %v2599_v50 = vpop.f32.mrf.mxu0 }
 0x285   : > { %1995 = vst.msk [vmem:[%s3173_s21 + $0x60] sm:$0xff] %vm797_vm2, %v1963_v11  ;;  %v1966_v53 = vadd.f32 %v3163_v3, %v1927_v37  ;;  %1887 = vst.msk [vmem:[%s3152_s14 + $0x70] sm:$0xff] %vm797_vm2, %v1855_v55  ;;  %v1926_v43 = vmul.f32 %v3157_v4, %v1855_v55  ;;  %v1858_v34 = vadd.f32 %v2599_v50, %v2871_v47  ;;  %v3449_v50 = vld [vmem:[#allocation14_spill] sm:$0xff] }
 0x286   : > { %v1762_v16 = vpop.f32.mrf.mxu0 }
 0x287   : > { %1998 = vst.msk [vmem:[%s3173_s21 + $0x78] sm:$0xff] %vm797_vm2, %v1966_v53  ;;  %v1965_v18 = vadd.f32 %v3163_v3, %v1926_v43  ;;  %1890 = vst.msk [vmem:[%s3152_s14 + $0x88] sm:$0xff] %vm797_vm2, %v1858_v34  ;;  %v1929_v41 = vmul.f32 %v3157_v4, %v1858_v34  ;;  %v1857_v49 = vadd.f32 %v1762_v16, %v3438_v52 }
 0x288   : > { %v2602_v15 = vpop.f32.mrf.mxu0 }
 0x289   : > { %1997 = vst.msk [vmem:[%s3173_s21 + $0x70] sm:$0xff] %vm797_vm2, %v1965_v18  ;;  %v1968_v51 = vadd.f32 %v3163_v3, %v1929_v41  ;;  %1889 = vst.msk [vmem:[%s3152_s14 + $0x80] sm:$0xff] %vm797_vm2, %v1857_v49  ;;  %v1928_v47 = vmul.f32 %v3157_v4, %v1857_v49  ;;  %v1860_v54 = vadd.f32 %v2602_v15, %v3439_v36  ;;  %v3450_v18 = vld [vmem:[#allocation13_spill] sm:$0xff] }
 0x28a   : > { %v1772_v20 = vpop.f32.mrf.mxu0 }
 0x28b   : > { %2000 = vst.msk [vmem:[%s3173_s21 + $0x88] sm:$0xff] %vm797_vm2, %v1968_v51  ;;  %v1967_v45 = vadd.f32 %v3163_v3, %v1928_v47  ;;  %1892 = vst.msk [vmem:[%s3152_s14 + $0x98] sm:$0xff] %vm797_vm2, %v1860_v54  ;;  %v1931_v19 = vmul.f32 %v3157_v4, %v1860_v54  ;;  %v1859_v56 = vadd.f32 %v1772_v20, %v3440_v22  ;;  %v3451_v51 = vld [vmem:[#allocation16_spill] sm:$0xff] }
 0x28c   : > { %v2605_v38 = vpop.f32.mrf.mxu0 }
 0x28d   : > { %1999 = vst.msk [vmem:[%s3173_s21 + $0x80] sm:$0xff] %vm797_vm2, %v1967_v45  ;;  %v1970_v17 = vadd.f32 %v3163_v3, %v1931_v19  ;;  %1891 = vst.msk [vmem:[%s3152_s14 + $0x90] sm:$0xff] %vm797_vm2, %v1859_v56  ;;  %v1930_v24 = vmul.f32 %v3157_v4, %v1859_v56  ;;  %v1862_v58 = vadd.f32 %v2605_v38, %v3441_v6  ;;  %v3452_v45 = vld [vmem:[#allocation15_spill] sm:$0xff] }
 0x28e   : > { %v1782_v23 = vpop.f32.mrf.mxu0 }
 0x28f   : > { %2002 = vst.msk [vmem:[%s3173_s21 + $0x98] sm:$0xff] %vm797_vm2, %v1970_v17  ;;  %v1969_v12 = vadd.f32 %v3163_v3, %v1930_v24  ;;  %1894 = vst.msk [vmem:[%s3152_s14 + $0xa8] sm:$0xff] %vm797_vm2, %v1862_v58  ;;  %v1933_v40 = vmul.f32 %v3157_v4, %v1862_v58  ;;  %v1861_v21 = vadd.f32 %v1782_v23, %v3442_v5 }
 0x290   : > { %v2608_v60 = vpop.f32.mrf.mxu0 }
 0x291   : > { %2001 = vst.msk [vmem:[%s3173_s21 + $0x90] sm:$0xff] %vm797_vm2, %v1969_v12  ;;  %v1972_v26 = vadd.f32 %v3163_v3, %v1933_v40  ;;  %1893 = vst.msk [vmem:[%s3152_s14 + $0xa0] sm:$0xff] %vm797_vm2, %v1861_v21  ;;  %v1932_v7 = vmul.f32 %v3157_v4, %v1861_v21  ;;  %v1864_v42 = vadd.f32 %v2608_v60, %v3443_v27 }
 0x292   : > { %v1792_v62 = vpop.f32.mrf.mxu0 }
 0x293   : > { %2004 = vst.msk [vmem:[%s3173_s21 + $0xa8] sm:$0xff] %vm797_vm2, %v1972_v26  ;;  %v1971_v13 = vadd.f32 %v3163_v3, %v1932_v7  ;;  %1896 = vst.msk [vmem:[%s3152_s14 + $0xb8] sm:$0xff] %vm797_vm2, %v1864_v42  ;;  %v1935_v25 = vmul.f32 %v3157_v4, %v1864_v42  ;;  %v1863_v1 = vadd.f32 %v1792_v62, %v3444_v28 }
 0x294   : > { %v2611_v0 = vpop.f32.mrf.mxu0 }
 0x295   : > { %2003 = vst.msk [vmem:[%s3173_s21 + $0xa0] sm:$0xff] %vm797_vm2, %v1971_v13  ;;  %v1974_v31 = vadd.f32 %v3163_v3, %v1935_v25  ;;  %1895 = vst.msk [vmem:[%s3152_s14 + $0xb0] sm:$0xff] %vm797_vm2, %v1863_v1  ;;  %v1934_v44 = vmul.f32 %v3157_v4, %v1863_v1  ;;  %v1866_v14 = vadd.f32 %v2611_v0, %v3445_v61 }
 0x296   : > { %v1802_v29 = vpop.f32.mrf.mxu0 }
 0x297   : > { %2006 = vst.msk [vmem:[%s3173_s21 + $0xb8] sm:$0xff] %vm797_vm2, %v1974_v31  ;;  %v1973_v2 = vadd.f32 %v3163_v3, %v1934_v44  ;;  %1898 = vst.msk [vmem:[%s3152_s14 + $0xc8] sm:$0xff] %vm797_vm2, %v1866_v14  ;;  %v1937_v30 = vmul.f32 %v3157_v4, %v1866_v14  ;;  %v1865_v35 = vadd.f32 %v1802_v29, %v3446_v46 }
 0x298   : > { %v2614_v8 = vpop.f32.mrf.mxu0 }
 0x299   : > { %2005 = vst.msk [vmem:[%s3173_s21 + $0xb0] sm:$0xff] %vm797_vm2, %v1973_v2  ;;  %v1976_v59 = vadd.f32 %v3163_v3, %v1937_v30  ;;  %1897 = vst.msk [vmem:[%s3152_s14 + $0xc0] sm:$0xff] %vm797_vm2, %v1865_v35  ;;  %v1936_v63 = vmul.f32 %v3157_v4, %v1865_v35  ;;  %v1868_v57 = vadd.f32 %v2614_v8, %v3447_v33 }
 0x29a   : > { %v1812_v9 = vpop.f32.mrf.mxu0 }
 0x29b   : > { %2008 = vst.msk [vmem:[%s3173_s21 + $0xc8] sm:$0xff] %vm797_vm2, %v1976_v59  ;;  %v1975_v48 = vadd.f32 %v3163_v3, %v1936_v63  ;;  %1900 = vst.msk [vmem:[%s3152_s14 + $0xd8] sm:$0xff] %vm797_vm2, %v1868_v57  ;;  %v1939_v39 = vmul.f32 %v3157_v4, %v1868_v57  ;;  %v1867_v10 = vadd.f32 %v1812_v9, %v3448_v32 }
 0x29c   : > { %v2617_v11 = vpop.f32.mrf.mxu0 }
 0x29d   : > { %2007 = vst.msk [vmem:[%s3173_s21 + $0xc0] sm:$0xff] %vm797_vm2, %v1975_v48  ;;  %v1978_v37 = vadd.f32 %v3163_v3, %v1939_v39  ;;  %1899 = vst.msk [vmem:[%s3152_s14 + $0xd0] sm:$0xff] %vm797_vm2, %v1867_v10  ;;  %v1938_v55 = vmul.f32 %v3157_v4, %v1867_v10  ;;  %v1870_v53 = vadd.f32 %v2617_v11, %v3449_v50 }
 0x29e   : > { %v1822_v43 = vpop.f32.mrf.mxu0 }
 0x29f   : > { %2010 = vst.msk [vmem:[%s3173_s21 + $0xd8] sm:$0xff] %vm797_vm2, %v1978_v37  ;;  %v1977_v34 = vadd.f32 %v3163_v3, %v1938_v55  ;;  %1902 = vst.msk [vmem:[%s3152_s14 + $0xe8] sm:$0xff] %vm797_vm2, %v1870_v53  ;;  %v1941_v16 = vmul.f32 %v3157_v4, %v1870_v53  ;;  %v1869_v41 = vadd.f32 %v1822_v43, %v3450_v18 }
 0x2a0   : > { %v2620_v52 = vpop.f32.mrf.mxu0 }
 0x2a1   : > { %2009 = vst.msk [vmem:[%s3173_s21 + $0xd0] sm:$0xff] %vm797_vm2, %v1977_v34  ;;  %v1980_v49 = vadd.f32 %v3163_v3, %v1941_v16  ;;  %1901 = vst.msk [vmem:[%s3152_s14 + $0xe0] sm:$0xff] %vm797_vm2, %v1869_v41  ;;  %v1940_v15 = vmul.f32 %v3157_v4, %v1869_v41  ;;  %v1872_v47 = vadd.f32 %v2620_v52, %v3451_v51 }
 0x2a2   : > { %v1832_v36 = vpop.f32.mrf.mxu0 }
 0x2a3   : > { %2012 = vst.msk [vmem:[%s3173_s21 + $0xe8] sm:$0xff] %vm797_vm2, %v1980_v49  ;;  %v1979_v54 = vadd.f32 %v3163_v3, %v1940_v15  ;;  %1904 = vst.msk [vmem:[%s3152_s14 + $0xf8] sm:$0xff] %vm797_vm2, %v1872_v47  ;;  %v1943_v20 = vmul.f32 %v3157_v4, %v1872_v47  ;;  %v1871_v19 = vadd.f32 %v1832_v36, %v3452_v45 }
 0x2a5   : > { %2011 = vst.msk [vmem:[%s3173_s21 + $0xe0] sm:$0xff] %vm797_vm2, %v1979_v54  ;;  %v1982_v22 = vadd.f32 %v3163_v3, %v1943_v20  ;;  %1903 = vst.msk [vmem:[%s3152_s14 + $0xf0] sm:$0xff] %vm797_vm2, %v1871_v19  ;;  %v1942_v56 = vmul.f32 %v3157_v4, %v1871_v19 }
 0x2a7   : > { %2014 = vst.msk [vmem:[%s3173_s21 + $0xf8] sm:$0xff] %vm797_vm2, %v1982_v22  ;;  %v1981_v38 = vadd.f32 %v3163_v3, %v1942_v56 }
 0x2a9   : > { %2013 = vst.msk [vmem:[%s3173_s21 + $0xf0] sm:$0xff] %vm797_vm2, %v1981_v38 }
 0x2aa PF: > { %s21_s13 = sadd.s32 1, %s2635_s13  }
 0x2ab   : > { %p18_p4 = scmp.ge.s32.totalorder %s21_s13, 4  }
 0x2ad   :  { %20 = sbr.rel (!%p18_p4) target bundleno = 1 (0x1), region = 101 }

// kernel: _lambda_.14
= control target key start
LH: loop header
LB: loop body
LE: loop exit
PB: predicated region body
PF: predicated region fallthrough
CT: control target
= control target key end

     0   :  { %11 = vsyncpa [#allocation3], 0  ;;  %s1109_s0 = inlined_call_operand.vmem [shape: f32[128,64], index: 0, kind: input, shape index: {}]   ;;  %s1110_s1 = inlined_call_operand.vmem [shape: f32[64,32], index: 1, kind: input, shape index: {}]   ;;  %s1111_s2 = inlined_call_operand.hbm [shape: f32[1,32], index: 2, kind: input, shape index: {}]   ;;  %s1112_s3 = inlined_call_operand.hbm [shape: f32[1,32], index: 3, kind: input, shape index: {}]   ;;  %s1113_s4 = inlined_call_operand.hbm [shape: f32[1,32], index: 4, kind: input, shape index: {}]   ;;  %s1114_s5 = inlined_call_operand.hbm [shape: f32[1,32], index: 5, kind: input, shape index: {}]   ;;  %s1115_s6 = inlined_call_operand.vmem [shape: f32[128,32], index: 6, kind: output, shape index: {}]  }
   0x1   :  { %12 = vsyncpa [#allocation5], 0 }
   0x2   :  { %13 = vsyncpa [#allocation8], 0  ;;  %s770_s21 = smov [#allocation4]   ;;  %s771_s23 = smov [#allocation2]  }
   0x3   :  { %s34_s22 = sshll.u32 %s770_s21, 4  ;;  %s24_s24 = sshll.u32 %s771_s23, 4  ;;  %s35_s22 = int_to_ptr.vmem [resolvable:$true] %s34_s22  ;;  %s25_s24 = int_to_ptr.vmem [resolvable:$true] %s24_s24 }
   0x4   :  { %s692_s25 = scalar_lea.vmem %s35_s22, 16  ;;  %s696_s26 = scalar_lea.vmem %s35_s22, 32 }
   0x5   :  { %p693_p0 = scmp.ne.s32.totalorder %s35_s22, %s692_s25  ;;  %p697_p1 = scmp.lt.s32.totalorder %s35_s22, %s35_s22 }
   0x6   :  { %p698_p2 = scmp.lt.s32.totalorder %s696_s26, %s692_s25 }
   0x8   :  { %p699_p3 = por %p698_p2, %p697_p1 }
   0xa   :  { %p700_p4 = pnand %p699_p3, %p693_p0 }
   0xc   :  { %703 = shalt.err (!%p700_p4)
}
   0xd   :  { %37 = dma.hbm_to_vmem [thread:$0]  %s1112_s3, 16, %s35_s22, [#allocation5]  }
   0xe   :  { %s712_s29 = scalar_lea.vmem %s25_s24, 16  ;;  %s716_s30 = scalar_lea.vmem %s25_s24, 32 }
   0xf   :  { %p713_p5 = scmp.ne.s32.totalorder %s25_s24, %s712_s29  ;;  %p717_p6 = scmp.lt.s32.totalorder %s25_s24, %s25_s24 }
  0x10   :  { %p718_p7 = scmp.lt.s32.totalorder %s716_s30, %s712_s29 }
  0x12   :  { %p719_p8 = por %p718_p7, %p717_p6 }
  0x14   :  { %p720_p9 = pnand %p719_p8, %p713_p5 }
  0x16   :  { %723 = shalt.err (!%p720_p9)
}
  0x17   :  { %27 = dma.hbm_to_vmem [thread:$0]  %s1111_s2, 16, %s25_s24, [#allocation3]  }
  0x18   :  { %s772_s9 = smov [#allocation6]   ;;  %s773_s11 = smov [#allocation7]  }
  0x19   :  { %s44_s10 = sshll.u32 %s772_s9, 4  ;;  %s54_s12 = sshll.u32 %s773_s11, 4  ;;  %s45_s10 = int_to_ptr.vmem [resolvable:$true] %s44_s10  ;;  %s55_s12 = int_to_ptr.vmem [resolvable:$true] %s54_s12 }
  0x1a   :  { %s732_s13 = scalar_lea.vmem %s45_s10, 16  ;;  %s736_s3 = scalar_lea.vmem %s45_s10, 32 }
  0x1b   :  { %p733_p10 = scmp.ne.s32.totalorder %s45_s10, %s732_s13  ;;  %p737_p11 = scmp.lt.s32.totalorder %s45_s10, %s45_s10 }
  0x1c   :  { %p738_p12 = scmp.lt.s32.totalorder %s736_s3, %s732_s13 }
  0x1e   :  { %p739_p13 = por %p738_p12, %p737_p11 }
  0x20   :  { %p740_p0 = pnand %p739_p13, %p733_p10 }
  0x22   :  { %743 = shalt.err (!%p740_p0)
}
  0x23   :  { %47 = dma.hbm_to_vmem [thread:$0]  %s1113_s4, 16, %s45_s10, [#allocation5]  }
  0x24   :  { %s752_s16 = scalar_lea.vmem %s55_s12, 16  ;;  %s756_s2 = scalar_lea.vmem %s55_s12, 32 }
  0x25   :  { %p753_p1 = scmp.ne.s32.totalorder %s55_s12, %s752_s16  ;;  %p757_p2 = scmp.lt.s32.totalorder %s55_s12, %s55_s12 }
  0x26   :  { %p758_p3 = scmp.lt.s32.totalorder %s756_s2, %s752_s16 }
  0x28   :  { %p759_p4 = por %p758_p3, %p757_p2 }
  0x2a   :  { %p760_p5 = pnand %p759_p4, %p753_p1 }
  0x2c   :  { %763 = shalt.err (!%p760_p5)
}
  0x2d   :  { %57 = dma.hbm_to_vmem [thread:$0]  %s1114_s5, 16, %s55_s12, [#allocation8]  }
  0x2e   :  { %764 = dma.done.wait [#allocation3], 16  }
  0x2f   :  { %765 = vsyncadd [#allocation3], 4294967280 }
  0x30   :  { %766 = dma.done.wait [#allocation5], 32  }
  0x31   :  { %767 = vsyncadd [#allocation5], 4294967264 }
  0x32   :  { %768 = dma.done.wait [#allocation8], 16  }
  0x33   :  { %769 = vsyncadd [#allocation8], 4294967280  ;;  %v93_v0 = vld [vmem:[%s1110_s1 + $0x38] sm:$0xff]  ;;  %v92_v1 = vld [vmem:[%s1110_s1 + $0x30] sm:$0xff]  ;;  %vm101_vm0 = vcmask 523264   ;;  %vm476_vm1 = vcmask 261120  }
  0x34   :  { %560 = vmatprep.subr.mxu0 %v93_v0  ;;  %600 = vmatprep.subr.mxu1 %v93_v0  ;;  %v91_v2 = vld [vmem:[%s1110_s1 + $0x28] sm:$0xff]  ;;  %v90_v3 = vld [vmem:[%s1110_s1 + $0x20] sm:$0xff]  ;;  %v89_v4 = vld [vmem:[%s1110_s1 + $0x18] sm:$0xff] }
  0x35   :  { %561 = vmatpush3.msra.mxu0 %v93_v0  ;;  %608 = vmatpush3.msra.mxu1 %v93_v0  ;;  %v88_v5 = vld [vmem:[%s1110_s1 + $0x10] sm:$0xff]  ;;  %v87_v6 = vld [vmem:[%s1110_s1 + $0x8] sm:$0xff]  ;;  %v86_v7 = vld [vmem:[%s1110_s1] sm:$0xff] }
  0x36   :  { %562 = vmatprep.subr.mxu0 %v92_v1  ;;  %601 = vmatprep.subr.mxu1 %v92_v1  ;;  %v70_v8 = vld [vmem:[%s1109_s0] sm:$0xff]  ;;  %v71_v10 = vld [vmem:[%s1109_s0 + $0x8] sm:$0xff]  ;;  %v72_v12 = vld [vmem:[%s1109_s0 + $0x10] sm:$0xff] }
  0x37   :  { %563 = vmatpush3.msra.mxu0 %v92_v1  ;;  %609 = vmatpush3.msra.mxu1 %v92_v1  ;;  %v78_v9 = vld [vmem:[%s1109_s0 + $0x40] sm:$0xff]  ;;  %v79_v11 = vld [vmem:[%s1109_s0 + $0x48] sm:$0xff]  ;;  %v80_v13 = vld [vmem:[%s1109_s0 + $0x50] sm:$0xff] }
  0x38   :  { %564 = vmatprep.subr.mxu0 %v91_v2  ;;  %602 = vmatprep.subr.mxu1 %v91_v2  ;;  %v73_v14 = vld [vmem:[%s1109_s0 + $0x18] sm:$0xff]  ;;  %v74_v16 = vld [vmem:[%s1109_s0 + $0x20] sm:$0xff]  ;;  %v75_v18 = vld [vmem:[%s1109_s0 + $0x28] sm:$0xff] }
  0x39   :  { %565 = vmatpush3.msra.mxu0 %v91_v2  ;;  %610 = vmatpush3.msra.mxu1 %v91_v2  ;;  %v81_v15 = vld [vmem:[%s1109_s0 + $0x58] sm:$0xff]  ;;  %v82_v17 = vld [vmem:[%s1109_s0 + $0x60] sm:$0xff]  ;;  %v83_v19 = vld [vmem:[%s1109_s0 + $0x68] sm:$0xff] }
  0x3a   :  { %566 = vmatprep.subr.mxu0 %v90_v3  ;;  %603 = vmatprep.subr.mxu1 %v90_v3  ;;  %v76_v20 = vld [vmem:[%s1109_s0 + $0x30] sm:$0xff]  ;;  %v77_v22 = vld [vmem:[%s1109_s0 + $0x38] sm:$0xff]  ;;  %v909_v24 = vld [vmem:[#allocation2] ss:$0 sm:$0xff] }
  0x3b   :  { %567 = vmatpush3.msra.mxu0 %v90_v3  ;;  %611 = vmatpush3.msra.mxu1 %v90_v3  ;;  %v84_v21 = vld [vmem:[%s1109_s0 + $0x70] sm:$0xff]  ;;  %v85_v23 = vld [vmem:[%s1109_s0 + $0x78] sm:$0xff]  ;;  %v911_v26 = vld [vmem:[#allocation4] ss:$0 sm:$0xff] }
  0x3c   :  { %568 = vmatprep.subr.mxu0 %v89_v4  ;;  %604 = vmatprep.subr.mxu1 %v89_v4  ;;  %v915_v30 = vld [vmem:[#allocation6] ss:$0 sm:$0xff]  ;;  %v921_v37 = vld [vmem:[#allocation7] ss:$0 sm:$0xff] }
  0x3d   :  { %569 = vmatpush3.msra.mxu0 %v89_v4  ;;  %612 = vmatpush3.msra.mxu1 %v89_v4 }
  0x3e   :  { %570 = vmatprep.subr.mxu0 %v88_v5  ;;  %605 = vmatprep.subr.mxu1 %v88_v5 }
  0x3f   :  { %571 = vmatpush3.msra.mxu0 %v88_v5  ;;  %613 = vmatpush3.msra.mxu1 %v88_v5 }
  0x40   :  { %572 = vmatprep.subr.mxu0 %v87_v6  ;;  %606 = vmatprep.subr.mxu1 %v87_v6 }
  0x41   :  { %573 = vmatpush3.msra.mxu0 %v87_v6  ;;  %614 = vmatpush3.msra.mxu1 %v87_v6 }
  0x42   :  { %574 = vmatprep.subr.mxu0 %v86_v7  ;;  %607 = vmatprep.subr.mxu1 %v86_v7 }
  0x43   :  { %575 = vmatpush3.msra.mxu0 %v86_v7  ;;  %615 = vmatpush3.msra.mxu1 %v86_v7 }
  0x44   :  { %576 = vmatprep.mubr.msk.f32.mxu0 %vm101_vm0, %v70_v8  ;;  %588 = vmatprep.mubr.msk.f32.mxu1 %vm101_vm0, %v78_v9 }
  0x45   :  { %577 = vmatmul.mubr.msk.f32.vlgmr.msra.gmra.mxu0 %vm101_vm0, %v71_v10  ;;  %589 = vmatmul.mubr.msk.f32.vlgmr.msra.gmra.mxu1 %vm101_vm0, %v79_v11 }
  0x46   :  { %579 = vmatprep.mubr.msk.f32.mxu0 %vm101_vm0, %v72_v12  ;;  %591 = vmatprep.mubr.msk.f32.mxu1 %vm101_vm0, %v80_v13 }
  0x49   :  { %580 = vmatmul.mubr.msk.f32.gmra.mxu0 %vm101_vm0, %v73_v14  ;;  %592 = vmatmul.mubr.msk.f32.gmra.mxu1 %vm101_vm0, %v81_v15 }
  0x4a   :  { %582 = vmatprep.mubr.msk.f32.mxu0 %vm101_vm0, %v74_v16  ;;  %594 = vmatprep.mubr.msk.f32.mxu1 %vm101_vm0, %v82_v17 }
  0x4d   :  { %583 = vmatmul.mubr.msk.f32.gmra.mxu0 %vm101_vm0, %v75_v18  ;;  %595 = vmatmul.mubr.msk.f32.gmra.mxu1 %vm101_vm0, %v83_v19 }
  0x4e   :  { %585 = vmatprep.mubr.msk.f32.mxu0 %vm101_vm0, %v76_v20  ;;  %597 = vmatprep.mubr.msk.f32.mxu1 %vm101_vm0, %v84_v21 }
  0x51   :  { %586 = vmatmul.mubr.msk.f32.gmra.mxu0 %vm101_vm0, %v77_v22  ;;  %598 = vmatmul.mubr.msk.f32.gmra.mxu1 %vm101_vm0, %v85_v23 }
 0x105   :  { %v578_v25 = vpop.f32.mrf.mxu0  ;;  %v590_v27 = vpop.f32.mrf.mxu1 }
 0x106   :  { %v222_v28 = vadd.f32 %v578_v25, %v909_v24  ;;  %v262_v29 = vadd.f32 %v590_v27, %v909_v24 }
 0x107   :  { %v216_v31 = vpop.f32.mrf.mxu0  ;;  %v256_v32 = vpop.f32.mrf.mxu1 }
 0x108   :  { %v303_v33 = vmax.f32 %v222_v28, %v911_v26  ;;  %v311_v34 = vmax.f32 %v262_v29, %v911_v26  ;;  %v217_v35 = vadd.f32 %v909_v24, %v216_v31  ;;  %v257_v36 = vadd.f32 %v909_v24, %v256_v32 }
 0x109   :  { %v581_v38 = vpop.f32.mrf.mxu0  ;;  %v593_v39 = vpop.f32.mrf.mxu1 }
 0x10a   :  { %v326_v40 = vmul.f32 %v915_v30, %v303_v33  ;;  %v334_v41 = vmul.f32 %v915_v30, %v311_v34  ;;  %v302_v42 = vmax.f32 %v217_v35, %v911_v26  ;;  %v310_v43 = vmax.f32 %v257_v36, %v911_v26 }
 0x10b   :  { %v232_v44 = vadd.f32 %v581_v38, %v909_v24  ;;  %v272_v45 = vadd.f32 %v593_v39, %v909_v24  ;;  %v226_v46 = vpop.f32.mrf.mxu0  ;;  %v266_v47 = vpop.f32.mrf.mxu1 }
 0x10c   :  { %v930_v48 = vadd.f32 %v921_v37, %v326_v40  ;;  %v933_v49 = vadd.f32 %v921_v37, %v334_v41  ;;  %v325_v50 = vmul.f32 %v915_v30, %v302_v42  ;;  %v333_v51 = vmul.f32 %v915_v30, %v310_v43 }
 0x10d   :  { %v305_v52 = vmax.f32 %v232_v44, %v911_v26  ;;  %v313_v53 = vmax.f32 %v272_v45, %v911_v26  ;;  %v227_v54 = vadd.f32 %v909_v24, %v226_v46  ;;  %v267_v55 = vadd.f32 %v909_v24, %v266_v47  ;;  %v584_v56 = vpop.f32.mrf.mxu0  ;;  %v596_v57 = vpop.f32.mrf.mxu1 }
 0x10e   :  { %v521_v58 = vmul.f32 -1.442695, %v930_v48  ;;  %v529_v59 = vmul.f32 -1.442695, %v933_v49  ;;  %v944_v60 = vadd.f32 %v921_v37, %v325_v50  ;;  %v947_v61 = vadd.f32 %v921_v37, %v333_v51 }
 0x10f   :  { %v328_v62 = vmul.f32 %v915_v30, %v305_v52  ;;  %v336_v63 = vmul.f32 %v915_v30, %v313_v53  ;;  %v304_v0 = vmax.f32 %v227_v54, %v911_v26  ;;  %v312_v1 = vmax.f32 %v267_v55, %v911_v26  ;;  %v236_v2 = vpop.f32.mrf.mxu0  ;;  %v276_v3 = vpop.f32.mrf.mxu1 }
 0x110   :  { %620 = vpow2.f32 %v521_v58  ;;  %v520_v4 = vmul.f32 -1.442695, %v944_v60  ;;  %v528_v5 = vmul.f32 -1.442695, %v947_v61  ;;  %v242_v6 = vadd.f32 %v584_v56, %v909_v24 }
 0x111   :  { %622 = vpow2.f32 %v529_v59  ;;  %v957_v7 = vadd.f32 %v921_v37, %v328_v62  ;;  %v960_v8 = vadd.f32 %v921_v37, %v336_v63  ;;  %v327_v9 = vmul.f32 %v915_v30, %v304_v0  ;;  %v587_v13 = vpop.f32.mrf.mxu0  ;;  %v599_v17 = vpop.f32.mrf.mxu1 }
 0x112   :  { %624 = vpow2.f32 %v520_v4  ;;  %v335_v10 = vmul.f32 %v915_v30, %v312_v1  ;;  %v307_v11 = vmax.f32 %v242_v6, %v911_v26  ;;  %v282_v12 = vadd.f32 %v596_v57, %v909_v24 }
 0x113   :  { %626 = vpow2.f32 %v528_v5  ;;  %v523_v14 = vmul.f32 -1.442695, %v957_v7  ;;  %v531_v15 = vmul.f32 -1.442695, %v960_v8  ;;  %v969_v16 = vadd.f32 %v921_v37, %v327_v9  ;;  %v246_v31 = vpop.f32.mrf.mxu0  ;;  %v286_v34 = vpop.f32.mrf.mxu1 }
 0x114   :  { %v972_v18 = vadd.f32 %v921_v37, %v335_v10  ;;  %v330_v19 = vmul.f32 %v915_v30, %v307_v11  ;;  %v315_v20 = vmax.f32 %v282_v12, %v911_v26  ;;  %v237_v21 = vadd.f32 %v909_v24, %v236_v2 }
 0x115   :  { %628 = vpow2.f32 %v523_v14  ;;  %v522_v22 = vmul.f32 -1.442695, %v969_v16  ;;  %v277_v23 = vadd.f32 %v909_v24, %v276_v3  ;;  %v252_v25 = vadd.f32 %v587_v13, %v909_v24 }
 0x116   :  { %630 = vpow2.f32 %v531_v15  ;;  %v530_v27 = vmul.f32 -1.442695, %v972_v18  ;;  %v982_v28 = vadd.f32 %v921_v37, %v330_v19  ;;  %v338_v29 = vmul.f32 %v915_v30, %v315_v20 }
 0x117   :  { %632 = vpow2.f32 %v522_v22  ;;  %v306_v32 = vmax.f32 %v237_v21, %v911_v26  ;;  %v314_v33 = vmax.f32 %v277_v23, %v911_v26  ;;  %v292_v38 = vadd.f32 %v599_v17, %v909_v24 }
 0x118   :  { %634 = vpow2.f32 %v530_v27  ;;  %v525_v35 = vmul.f32 -1.442695, %v982_v28  ;;  %v989_v36 = vadd.f32 %v921_v37, %v338_v29  ;;  %v309_v41 = vmax.f32 %v252_v25, %v911_v26 }
 0x119   :  { %v329_v39 = vmul.f32 %v915_v30, %v306_v32  ;;  %v337_v40 = vmul.f32 %v915_v30, %v314_v33  ;;  %v247_v42 = vadd.f32 %v909_v24, %v246_v31  ;;  %v287_v44 = vadd.f32 %v909_v24, %v286_v34 }
 0x11a   :  { %636 = vpow2.f32 %v525_v35  ;;  %v533_v43 = vmul.f32 -1.442695, %v989_v36  ;;  %v317_v46 = vmax.f32 %v292_v38, %v911_v26  ;;  %v332_v52 = vmul.f32 %v915_v30, %v309_v41 }
 0x11b   :  { %v999_v45 = vadd.f32 %v921_v37, %v329_v39  ;;  %v1003_v47 = vadd.f32 %v921_v37, %v337_v40  ;;  %v308_v53 = vmax.f32 %v247_v42, %v911_v26  ;;  %v316_v24 = vmax.f32 %v287_v44, %v911_v26 }
 0x11c   :  { %638 = vpow2.f32 %v533_v43  ;;  %v340_v58 = vmul.f32 %v915_v30, %v317_v46  ;;  %v1012_v1 = vadd.f32 %v921_v37, %v332_v52 }
 0x11d   :  { %v621_v50 = vpop.eup %620  ;;  %v524_v51 = vmul.f32 -1.442695, %v999_v45  ;;  %v532_v63 = vmul.f32 -1.442695, %v1003_v47  ;;  %v331_v2 = vmul.f32 %v915_v30, %v308_v53  ;;  %v339_v26 = vmul.f32 %v915_v30, %v316_v24 }
 0x11e   :  { %v623_v54 = vpop.eup %622  ;;  %v413_v55 = vadd.f32 1.0, %v621_v50  ;;  %v1017_v6 = vadd.f32 %v921_v37, %v340_v58  ;;  %v527_v13 = vmul.f32 -1.442695, %v1012_v1 }
 0x11f   :  { %v625_v56 = vpop.eup %624  ;;  %v421_v57 = vadd.f32 1.0, %v623_v54  ;;  %640 = vpow2.f32 %v524_v51  ;;  %v1021_v14 = vadd.f32 %v921_v37, %v331_v2  ;;  %v1024_v30 = vadd.f32 %v921_v37, %v339_v26 }
 0x120   :  { %v627_v59 = vpop.eup %626  ;;  %642 = vrcp.f32 %v413_v55  ;;  %v412_v62 = vadd.f32 1.0, %v625_v56  ;;  %v535_v19 = vmul.f32 -1.442695, %v1017_v6 }
 0x121   :  { %644 = vrcp.f32 %v421_v57  ;;  %v420_v0 = vadd.f32 1.0, %v627_v59  ;;  %v526_v22 = vmul.f32 -1.442695, %v1021_v14  ;;  %v534_v25 = vmul.f32 -1.442695, %v1024_v30 }
 0x122   :  { %v629_v3 = vpop.eup %628  ;;  %646 = vrcp.f32 %v412_v62 }
 0x123   :  { %v631_v4 = vpop.eup %630  ;;  %648 = vrcp.f32 %v420_v0  ;;  %v415_v5 = vadd.f32 1.0, %v629_v3 }
 0x124   :  { %v633_v9 = vpop.eup %632  ;;  %v423_v10 = vadd.f32 1.0, %v631_v4  ;;  %650 = vpow2.f32 %v532_v63 }
 0x125   :  { %v635_v11 = vpop.eup %634  ;;  %652 = vrcp.f32 %v415_v5  ;;  %v414_v12 = vadd.f32 1.0, %v633_v9 }
 0x126   :  { %654 = vrcp.f32 %v423_v10  ;;  %v422_v15 = vadd.f32 1.0, %v635_v11 }
 0x127   :  { %v637_v17 = vpop.eup %636  ;;  %656 = vrcp.f32 %v414_v12 }
 0x128   :  { %658 = vrcp.f32 %v422_v15  ;;  %v417_v20 = vadd.f32 1.0, %v637_v17 }
 0x129   :  { %v639_v21 = vpop.eup %638  ;;  %660 = vpow2.f32 %v527_v13 }
 0x12a   :  { %662 = vrcp.f32 %v417_v20  ;;  %v425_v23 = vadd.f32 1.0, %v639_v21 }
 0x12b   :  { %664 = vpow2.f32 %v535_v19 }
 0x12c   :  { %v641_v27 = vpop.eup %640  ;;  %666 = vrcp.f32 %v425_v23 }
 0x12d   :  { %v643_v29 = vpop.eup %642  ;;  %v416_v37 = vadd.f32 1.0, %v641_v27  ;;  %668 = vpow2.f32 %v526_v22 }
 0x12e   :  { %v645_v31 = vpop.eup %644  ;;  %v461_v32 = vmul.f32 %v643_v29, %v930_v48  ;;  %670 = vpow2.f32 %v534_v25 }
 0x12f   :  { %v647_v33 = vpop.eup %646  ;;  %v469_v34 = vmul.f32 %v645_v31, %v933_v49  ;;  %672 = vrcp.f32 %v416_v37 }
 0x130   :  { %v649_v35 = vpop.eup %648  ;;  %478 = vst.msk [vmem:[%s1115_s6 + $0x8] sm:$0xff] %vm476_vm1, %v461_v32  ;;  %v460_v38 = vmul.f32 %v647_v33, %v944_v60 }
 0x131   :  { %v651_v39 = vpop.eup %650  ;;  %486 = vst.msk [vmem:[%s1115_s6 + $0x48] sm:$0xff] %vm476_vm1, %v469_v34  ;;  %v468_v48 = vmul.f32 %v649_v35, %v947_v61 }
 0x132   :  { %v653_v40 = vpop.eup %652  ;;  %477 = vst.msk [vmem:[%s1115_s6] sm:$0xff] %vm476_vm1, %v460_v38  ;;  %v424_v49 = vadd.f32 1.0, %v651_v39 }
 0x133   :  { %v655_v41 = vpop.eup %654  ;;  %485 = vst.msk [vmem:[%s1115_s6 + $0x40] sm:$0xff] %vm476_vm1, %v468_v48  ;;  %v463_v60 = vmul.f32 %v653_v40, %v957_v7 }
 0x134   :  { %v657_v42 = vpop.eup %656  ;;  %v471_v43 = vmul.f32 %v655_v41, %v960_v8  ;;  %674 = vrcp.f32 %v424_v49 }
 0x135   :  { %v659_v61 = vpop.eup %658  ;;  %480 = vst.msk [vmem:[%s1115_s6 + $0x18] sm:$0xff] %vm476_vm1, %v463_v60  ;;  %v462_v44 = vmul.f32 %v657_v42, %v969_v16 }
 0x136   :  { %v661_v46 = vpop.eup %660  ;;  %488 = vst.msk [vmem:[%s1115_s6 + $0x58] sm:$0xff] %vm476_vm1, %v471_v43  ;;  %v470_v7 = vmul.f32 %v659_v61, %v972_v18 }
 0x137   :  { %v663_v50 = vpop.eup %662  ;;  %479 = vst.msk [vmem:[%s1115_s6 + $0x10] sm:$0xff] %vm476_vm1, %v462_v44  ;;  %v419_v8 = vadd.f32 1.0, %v661_v46 }
 0x138   :  { %v665_v51 = vpop.eup %664  ;;  %487 = vst.msk [vmem:[%s1115_s6 + $0x50] sm:$0xff] %vm476_vm1, %v470_v7  ;;  %v465_v16 = vmul.f32 %v663_v50, %v982_v28 }
 0x139   :  { %v667_v52 = vpop.eup %666  ;;  %676 = vrcp.f32 %v419_v8  ;;  %v427_v53 = vadd.f32 1.0, %v665_v51 }
 0x13a   :  { %v669_v54 = vpop.eup %668  ;;  %482 = vst.msk [vmem:[%s1115_s6 + $0x28] sm:$0xff] %vm476_vm1, %v465_v16  ;;  %v473_v18 = vmul.f32 %v667_v52, %v989_v36 }
 0x13b   :  { %v671_v55 = vpop.eup %670  ;;  %678 = vrcp.f32 %v427_v53  ;;  %v418_v24 = vadd.f32 1.0, %v669_v54 }
 0x13c   :  { %v673_v56 = vpop.eup %672  ;;  %490 = vst.msk [vmem:[%s1115_s6 + $0x68] sm:$0xff] %vm476_vm1, %v473_v18  ;;  %v426_v28 = vadd.f32 1.0, %v671_v55 }
 0x13d   :  { %v464_v57 = vmul.f32 %v673_v56, %v999_v45  ;;  %680 = vrcp.f32 %v418_v24 }
 0x13e   :  { %682 = vrcp.f32 %v426_v28 }
 0x13f   :  { %481 = vst.msk [vmem:[%s1115_s6 + $0x20] sm:$0xff] %vm476_vm1, %v464_v57 }
 0x141   :  { %v675_v36 = vpop.eup %674 }
 0x142   :  { %v472_v58 = vmul.f32 %v675_v36, %v1003_v47 }
 0x144   :  { %489 = vst.msk [vmem:[%s1115_s6 + $0x60] sm:$0xff] %vm476_vm1, %v472_v58 }
 0x146   :  { %v677_v59 = vpop.eup %676 }
 0x147   :  { %v467_v62 = vmul.f32 %v677_v59, %v1012_v1 }
 0x148   :  { %v679_v63 = vpop.eup %678 }
 0x149   :  { %484 = vst.msk [vmem:[%s1115_s6 + $0x38] sm:$0xff] %vm476_vm1, %v467_v62  ;;  %v475_v45 = vmul.f32 %v679_v63, %v1017_v6 }
 0x14a   :  { %v681_v0 = vpop.eup %680 }
 0x14b   :  { %v683_v2 = vpop.eup %682  ;;  %492 = vst.msk [vmem:[%s1115_s6 + $0x78] sm:$0xff] %vm476_vm1, %v475_v45  ;;  %v466_v47 = vmul.f32 %v681_v0, %v1021_v14 }
 0x14c   :  { %v474_v3 = vmul.f32 %v683_v2, %v1024_v30 }
 0x14d   :  { %483 = vst.msk [vmem:[%s1115_s6 + $0x30] sm:$0xff] %vm476_vm1, %v466_v47 }
 0x14e   :  { %491 = vst.msk [vmem:[%s1115_s6 + $0x70] sm:$0xff] %vm476_vm1, %v474_v3 }
 0x14f   :  { %497 = vsyncpa [#allocation3], 1 }
 0x150   :  { %498 = vsyncpa [#allocation5], 1 }
 0x151   :  { %499 = vsyncpa [#allocation8], 1 }

// kernel: _lambda_.15
= control target key start
LH: loop header
LB: loop body
LE: loop exit
PB: predicated region body
PF: predicated region fallthrough
CT: control target
= control target key end

     0   :  { %14 = vsyncpa [#allocation3], 0  ;;  %s1795_s0 = inlined_call_operand.vmem [shape: f32[2,64,32], index: 0, kind: input, shape index: {}]   ;;  %s1796_s1 = inlined_call_operand.vmem [shape: f32[2,1,16], index: 1, kind: input, shape index: {}]   ;;  %s1797_s2 = inlined_call_operand.vmem [shape: f32[2,1,16], index: 2, kind: input, shape index: {}]   ;;  %s1798_s3 = inlined_call_operand.vmem [shape: f32[32,16], index: 3, kind: input, shape index: {}]   ;;  %s1799_s4 = inlined_call_operand.hbm [shape: f32[1,16], index: 4, kind: input, shape index: {}]   ;;  %s1800_s5 = inlined_call_operand.vmem [shape: f32[16,32], index: 5, kind: input, shape index: {}]   ;;  %s1801_s6 = inlined_call_operand.vmem [shape: f32[16,32], index: 6, kind: input, shape index: {}]   ;;  %s1802_s7 = inlined_call_operand.hbm [shape: f32[1,32], index: 7, kind: input, shape index: {}]   ;;  %s1803_s8 = inlined_call_operand.hbm [shape: f32[1,32], index: 8, kind: input, shape index: {}]   ;;  %s1804_s9 = inlined_call_operand.vmem [shape: f32[2,64,32], index: 9, kind: output, shape index: {}]  }
   0x1   :  { %15 = vsyncpa [#allocation5], 0  ;;  %s1471_s30 = smov 0  }
   0x2 LB: > { %s1477_s10 = sadd.s32 4294967295, %s1414_s30   ;;  %p1147_p0 = scmp.ge.s32.totalorder %s1414_s30, 1  ;;  %s1414_s30 = sphi %s1471_s30, %s21_s30  }
   0x3   : > { %p256_p1 = scmp.lt.s32.totalorder %s1414_s30, 3  ;;  %p1805_p2 = scmp.eq.s32.totalorder %s1477_s10, 0 }
   0x4   : > { %s1416_s12 = smov [#allocation4]   ;;  %s1417_s14 = smov [#allocation2]  }
   0x5   : > { %p1482_p3 = pnand %p1147_p0, %p256_p1  ;;  %s289_s13 = sshll.u32 %s1416_s12, 4  ;;  %s290_s13 = int_to_ptr.vmem [resolvable:$true] %s289_s13 }
   0x6   : > { %s272_s15 = sshll.u32 %s1417_s14, 4  ;;  %s1418_s16 = smov [#allocation6]   ;;  %s273_s15 = int_to_ptr.vmem [resolvable:$true] %s272_s15 }
   0x7   : > { %p1293_p4 = pneg %p1482_p3  ;;  %s300_s17 = sshll.u32 %s1418_s16, 4  ;;  %s1494_s17 = int_to_ptr.vmem [resolvable:$true] %s300_s17 }
   0x8   : > { %s1333_s19 = scalar_lea.vmem %s290_s13, 16  ;;  %s1340_s20 = scalar_lea.vmem %s290_s13, 32 }
   0x9   : > { %p1490_p5 = pnand %p1805_p2, %p1293_p4  ;;  %p1334_p7 = scmp.ne.s32.totalorder %s290_s13, %s1333_s19 }
   0xa   : > { %p1341_p10 = scmp.lt.s32.totalorder %s290_s13, %s290_s13  ;;  %p1342_p11 = scmp.lt.s32.totalorder %s1340_s20, %s1333_s19 }
   0xb   : > { %p1324_p6 = pneg %p1490_p5 }
   0xc   : > { %p1343_p12 = por %p1342_p11, %p1341_p10 }
   0xd   : > { %p1336_p8 = pnand %p1334_p7, %p1324_p6 }
   0xf   : > { %p1337_p9 = pneg %p1336_p8 }
  0x11   : > { %p1344_p13 = pnand %p1343_p12, %p1337_p9 }
  0x13   : > { %1347 = shalt.err (!%p1344_p13)
}
  0x14   : > { %1299 = dma.hbm_to_vmem [thread:$0]  (!%p1490_p5), %s1802_s7, 16, %s290_s13, [#allocation5]  }
  0x15   : > { %s1359_s23 = scalar_lea.vmem %s273_s15, 16  ;;  %s1366_s24 = scalar_lea.vmem %s273_s15, 32 }
  0x16   : > { %p1360_p0 = scmp.ne.s32.totalorder %s273_s15, %s1359_s23  ;;  %p1367_p7 = scmp.lt.s32.totalorder %s273_s15, %s273_s15 }
  0x17   : > { %p1368_p8 = scmp.lt.s32.totalorder %s1366_s24, %s1359_s23 }
  0x18   : > { %p1362_p1 = pnand %p1360_p0, %p1324_p6 }
  0x19   : > { %p1369_p2 = por %p1368_p8, %p1367_p7 }
  0x1a   : > { %p1363_p4 = pneg %p1362_p1 }
  0x1c   : > { %p1370_p10 = pnand %p1369_p2, %p1363_p4 }
  0x1e   : > { %1373 = shalt.err (!%p1370_p10)
}
  0x1f   : > { %1296 = dma.hbm_to_vmem [thread:$0]  (!%p1490_p5), %s1799_s4, 16, %s273_s15, [#allocation3]  }
  0x20   : > { %s1385_s27 = scalar_lea.vmem %s1494_s17, 16  ;;  %s1392_s28 = scalar_lea.vmem %s1494_s17, 32 }
  0x21   : > { %p1386_p9 = scmp.ne.s32.totalorder %s1494_s17, %s1385_s27  ;;  %p1393_p2 = scmp.lt.s32.totalorder %s1494_s17, %s1494_s17 }
  0x22   : > { %p1394_p13 = scmp.lt.s32.totalorder %s1392_s28, %s1385_s27 }
  0x23   : > { %p1388_p11 = pnand %p1386_p9, %p1324_p6 }
  0x24   : > { %p1395_p0 = por %p1394_p13, %p1393_p2 }
  0x25   : > { %p1389_p12 = pneg %p1388_p11 }
  0x27   : > { %p1396_p1 = pnand %p1395_p0, %p1389_p12 }
  0x29   : > { %1399 = shalt.err (!%p1396_p1)
}
  0x2a   : > { %1302 = dma.hbm_to_vmem [thread:$0]  (!%p1490_p5), %s1803_s8, 16, %s1494_s17, [#allocation5]  }
  0x2b   : > { %333 = sbr.rel (%p1482_p3) target bundleno = 739 (0x2e3), region = 56  ;;  %p1808_p6 = scmp.eq.s32.totalorder (!%p1482_p3), %s1477_s10, 0 }
  0x30   : > { %1405 = dma.done.wait (%p1808_p6), [#allocation3], 16   ;;  %p1809_p4 = pmov %p1808_p6 }
  0x32   : > { %1407 = vsyncadd (%p1809_p4), [#allocation3], 4294967280  ;;  %p1810_p7 = pmov %p1809_p4 }
  0x33   : > { %p1811_p8 = pmov %p1809_p4 }
  0x34   : > { %1409 = dma.done.wait (%p1810_p7), [#allocation5], 32  }
  0x35   : > { %1411 = vsyncadd (%p1811_p8), [#allocation5], 4294967264  ;;  %p383_p10 = scmp.lt.s32.totalorder %s1477_s10, 1  ;;  %vm418_vm0 = vcmask 261120   ;;  %v410_v0 = vld [vmem:[%s1798_s3 + $0x18] sm:$0xff]  ;;  %v409_v1 = vld [vmem:[%s1798_s3 + $0x10] sm:$0xff] }
  0x36   : > { %1225 = vmatprep.subr.mxu0 %v410_v0  ;;  %v408_v3 = vld [vmem:[%s1798_s3 + $0x8] sm:$0xff]  ;;  %v407_v4 = vld [vmem:[%s1798_s3] sm:$0xff]  ;;  %s1419_s27 = smov 16   ;;  %s1420_s17 = smov 112   ;;  %vm744_vm1 = vcmask 130048  }
  0x37   : > { %s1813_s10 = smov (!%p383_p10, %s1477_s10), 1  ;;  %1226 = vmatpush3.msra.mxu0 %v410_v0  ;;  %v1160_v21 = vld [vmem:[#allocation2] ss:$0 sm:$0xff]  ;;  %v719_v56 = vld [vmem:[%s1801_s6 + $0x8] sm:$0xff] }
  0x38   : > { %s1191_s11 = sshll.u32 %s1813_s10, 6  ;;  %s393_s22 = scalar_lea.vmem %s1797_s2, %s1813_s10  ;;  %1227 = vmatprep.subr.mxu0 %v409_v1  ;;  %1277 = vmatprep.subr.mxu1 %v719_v56  ;;  %v718_v57 = vld [vmem:[%s1801_s6] sm:$0xff]  ;;  %v717_v59 = vld [vmem:[%s1800_s5 + $0x8] sm:$0xff] }
  0x39   : > { %s1548_s15 = scalar_lea.vmem %s1795_s0, %s1191_s11  ;;  %1228 = vmatpush3.msra.mxu0 %v409_v1  ;;  %v1574_v6 = vld [vmem:[%s393_s22] ss:$0 sm:$0xff]  ;;  %s390_s12 = scalar_lea.vmem %s1796_s1, %s1813_s10  ;;  %1279 = vmatpush3.msra.mxu1 %v719_v56 }
  0x3a   : > { %v1557_v2 = vld [vmem:[%s1548_s15] sm:$0xff]  ;;  %v1572_v5 = vld [vmem:[%s1548_s15 + $0x10] sm:$0xff]  ;;  %1229 = vmatprep.subr.mxu0 %v408_v3  ;;  %v1579_v8 = vld [vmem:[%s1548_s15 + $0x8] sm:$0xff]  ;;  %1278 = vmatprep.subr.mxu1 %v718_v57  ;;  %s1774_s24 = scalar_lea.vmem %s1804_s9, %s1191_s11 }
  0x3b   : > { %1233 = vmatprep.mubr.msk.f32.mxu0 %vm418_vm0, %v1557_v2  ;;  %v630_v7 = vmul.f32 %v1574_v6, %v1572_v5  ;;  %1230 = vmatpush3.msra.mxu0 %v408_v3  ;;  %v1587_v9 = vld [vmem:[%s1548_s15 + $0x18] sm:$0xff]  ;;  %v1590_v10 = vld [vmem:[%s1548_s15 + $0x20] sm:$0xff]  ;;  %v1597_v11 = vld [vmem:[%s1548_s15 + $0x28] sm:$0xff]  ;;  %v628_v41 = vmul.f32 %v1574_v6, %v1557_v2  ;;  %v629_v43 = vmul.f32 %v1574_v6, %v1579_v8 }
  0x3c   : > { %1231 = vmatprep.subr.mxu0 %v407_v4  ;;  %v1600_v12 = vld [vmem:[%s1548_s15 + $0x30] sm:$0xff]  ;;  %v1607_v13 = vld [vmem:[%s1548_s15 + $0x38] sm:$0xff]  ;;  %v633_v14 = vmul.f32 %v1574_v6, %v1597_v11  ;;  %v631_v15 = vmul.f32 %v1574_v6, %v1587_v9  ;;  %v632_v17 = vmul.f32 %v1574_v6, %v1590_v10  ;;  %v1169_v38 = vld [vmem:[%s390_s12] ss:$0 sm:$0xff]  ;;  %1280 = vmatpush3.msra.mxu1 %v718_v57 }
  0x3d   : > { %648 = vrot.lane.b32.xlu0 %v630_v7, %s1419_s27  ;;  %1232 = vmatpush3.msra.mxu0 %v407_v4  ;;  %v635_v16 = vmul.f32 %v1574_v6, %v1607_v13  ;;  %v634_v18 = vmul.f32 %v1574_v6, %v1600_v12 }
  0x3e   : > { %1234 = vmatmul.mubr.msk.f32.vlgmr.msra.gmra.mxu0 %vm418_vm0, %v1579_v8  ;;  %654 = vrot.lane.b32.xlu1 %v633_v14, %s1419_s27 }
  0x3f   : > { %1236 = vmatprep.mubr.msk.f32.mxu0 %vm418_vm0, %v1572_v5  ;;  %1245 = vmatprep.subr.mxu0 %v719_v56 }
  0x40   : > { %1246 = vmatpush3.msra.mxu0 %v719_v56  ;;  %1261 = vmatprep.subr.mxu1 %v717_v59  ;;  %v716_v56 = vld [vmem:[%s1800_s5] sm:$0xff] }
  0x41   : > { %650 = vrot.lane.b32.xlu0 %v631_v15, %s1419_s27  ;;  %1247 = vmatprep.subr.mxu0 %v718_v57 }
  0x42   : > { %1237 = vmatmul.mubr.msk.f32.gmra.mxu0 %vm418_vm0, %v1587_v9  ;;  %658 = vrot.lane.b32.xlu1 %v635_v16, %s1419_s27 }
  0x43   : > { %1239 = vmatprep.mubr.msk.f32.mxu0 %vm418_vm0, %v1590_v10  ;;  %1248 = vmatpush3.msra.mxu0 %v718_v57 }
  0x45   : > { %652 = vrot.lane.b32.xlu0 %v632_v17, %s1419_s27 }
  0x46   : > { %1240 = vmatmul.mubr.msk.f32.gmra.mxu0 %vm418_vm0, %v1597_v11 }
  0x47   : > { %1242 = vmatprep.mubr.msk.f32.mxu0 %vm418_vm0, %v1600_v12 }
  0x49   : > { %656 = vrot.lane.b32.xlu0 %v634_v18, %s1419_s27 }
  0x4a   : > { %1243 = vmatmul.mubr.msk.f32.gmra.mxu0 %vm418_vm0, %v1607_v13 }
  0xaf   : > { %v649_v47 = vpop.permute.xlu0 %648 }
  0xb0   : > { %v655_v48 = vpop.permute.xlu1 %654  ;;  %v670_v6 = vadd.f32 %v649_v47, %v1572_v5 }
  0xb1   : > { %v673_v61 = vadd.f32 %v655_v48, %v1597_v11 }
  0xb3   : > { %v651_v49 = vpop.permute.xlu0 %650 }
  0xb4   : > { %v659_v50 = vpop.permute.xlu1 %658  ;;  %v671_v52 = vadd.f32 %v651_v49, %v1587_v9 }
  0xb5   : > { %v675_v15 = vadd.f32 %v659_v50, %v1607_v13 }
  0xb7   : > { %v653_v51 = vpop.permute.xlu0 %652 }
  0xb8   : > { %v672_v17 = vadd.f32 %v653_v51, %v1590_v10 }
  0xbb   : > { %v657_v54 = vpop.permute.xlu0 %656 }
  0xbc   : > { %v674_v1 = vadd.f32 %v657_v54, %v1600_v12 }
  0xfe   : > { %v1235_v19 = vpop.f32.mrf.mxu0 }
  0xff   : > { %v1673_v44 = vadd.f32 %v1235_v19, %v1160_v21 }
 0x100   : > { %v509_v20 = vpop.f32.mrf.mxu0 }
 0x101   : > { %v1666_v42 = vadd.f32 %v1160_v21, %v509_v20  ;;  %v549_v46 = vmax.f32 %v1673_v44, 0.0 }
 0x102   : > { %v1238_v22 = vpop.f32.mrf.mxu0 }
 0x103   : > { %v1626_v23 = vadd.f32 %v1238_v22, %v1160_v21  ;;  %v548_v45 = vmax.f32 %v1666_v42, 0.0 }
 0x104   : > { %v519_v24 = vpop.f32.mrf.mxu0 }
 0x105   : > { %v551_v25 = vmax.f32 %v1626_v23, 0.0  ;;  %v1629_v26 = vadd.f32 %v1160_v21, %v519_v24 }
 0x106   : > { %v1241_v27 = vpop.f32.mrf.mxu0 }
 0x107   : > { %690 = vrot.lane.b32.xlu1 %v551_v25, %s1419_s27  ;;  %v550_v29 = vmax.f32 %v1629_v26, 0.0  ;;  %v1635_v30 = vadd.f32 %v1241_v27, %v1160_v21 }
 0x108   : > { %v529_v28 = vpop.f32.mrf.mxu0 }
 0x109   : > { %v1637_v31 = vadd.f32 %v1160_v21, %v529_v28  ;;  %v553_v35 = vmax.f32 %v1635_v30, 0.0 }
 0x10a   : > { %v1244_v32 = vpop.f32.mrf.mxu0 }
 0x10b   : > { %v552_v33 = vmax.f32 %v1637_v31, 0.0  ;;  %688 = vrot.lane.b32.xlu1 %v550_v29, %s1419_s27  ;;  %v1648_v36 = vadd.f32 %v1244_v32, %v1160_v21 }
 0x10c   : > { %v539_v34 = vpop.f32.mrf.mxu0 }
 0x10d   : > { %692 = vrot.lane.b32.xlu0 %v552_v33, %s1419_s27  ;;  %v1653_v37 = vadd.f32 %v1160_v21, %v539_v34  ;;  %v555_v40 = vmax.f32 %v1648_v36, 0.0 }
 0x10f   : > { %v554_v39 = vmax.f32 %v1653_v37, 0.0  ;;  %694 = vrot.lane.b32.xlu1 %v553_v35, %s1419_s27 }
 0x111   : > { %562 = vrot.lane.b32.xlu0 %v1169_v38, %s1419_s27 }
 0x113   : > { %696 = vrot.lane.b32.xlu1 %v554_v39, %s1419_s27 }
 0x115   : > { %698 = vrot.lane.b32.xlu0 %v555_v40, %s1419_s27 }
 0x117   : > { %644 = vrot.lane.b32.xlu1 %v628_v41, %s1419_s27 }
 0x119   : > { %646 = vrot.lane.b32.xlu0 %v629_v43, %s1419_s27 }
 0x11b   : > { %684 = vrot.lane.b32.xlu1 %v548_v45, %s1419_s27 }
 0x11d   : > { %686 = vrot.lane.b32.xlu0 %v549_v46, %s1419_s27 }
 0x179   : > { %v691_v53 = vpop.permute.xlu1 %690 }
 0x17a   : > { %v711_v55 = vadd.f32 %v691_v53, %v671_v52 }
 0x17c   : > { %734 = vrot.lane.b32.xlu0 %v711_v55, %s1420_s17 }
 0x17d   : > { %v689_v58 = vpop.permute.xlu1 %688 }
 0x17e   : > { %v710_v16 = vadd.f32 %v689_v58, %v670_v6 }
 0x17f   : > { %v693_v60 = vpop.permute.xlu0 %692 }
 0x180   : > { %v712_v19 = vadd.f32 %v693_v60, %v672_v17 }
 0x181   : > { %v695_v62 = vpop.permute.xlu1 %694 }
 0x182   : > { %v713_v63 = vadd.f32 %v695_v62, %v673_v61 }
 0x183   : > { %v563_v0 = vpop.permute.xlu0 %562 }
 0x184   : > { %738 = vrot.lane.b32.xlu0 %v713_v63, %s1420_s17  ;;  %v565_v3 = vmul.f32 %v563_v0, %v1557_v2  ;;  %v568_v20 = vmul.f32 %v563_v0, %v1587_v9  ;;  %v566_v21 = vmul.f32 %v563_v0, %v1579_v8  ;;  %v570_v24 = vmul.f32 %v563_v0, %v1597_v11 }
 0x185   : > { %v697_v4 = vpop.permute.xlu1 %696  ;;  %v567_v27 = vmul.f32 %v563_v0, %v1572_v5  ;;  %v572_v32 = vmul.f32 %v563_v0, %v1607_v13  ;;  %v569_v41 = vmul.f32 %v563_v0, %v1590_v10  ;;  %v571_v48 = vmul.f32 %v563_v0, %v1600_v12 }
 0x186   : > { %v714_v7 = vadd.f32 %v697_v4, %v674_v1  ;;  %581 = vrot.lane.b32.xlu1 %v565_v3, %s1420_s17 }
 0x187   : > { %v699_v14 = vpop.permute.xlu0 %698 }
 0x188   : > { %740 = vrot.lane.b32.xlu0 %v714_v7, %s1420_s17  ;;  %v715_v18 = vadd.f32 %v699_v14, %v675_v15  ;;  %v1187_v14 = vld [vmem:[#allocation4] ss:$0 sm:$0xff] }
 0x189   : > { %v645_v34 = vpop.permute.xlu1 %644 }
 0x18a   : > { %732 = vrot.lane.b32.xlu1 %v710_v16, %s1420_s17  ;;  %v668_v47 = vadd.f32 %v645_v34, %v1557_v2 }
 0x18b   : > { %v647_v22 = vpop.permute.xlu0 %646 }
 0x18c   : > { %742 = vrot.lane.b32.xlu0 %v715_v18, %s1420_s17  ;;  %v669_v28 = vadd.f32 %v647_v22, %v1579_v8  ;;  %v1188_v18 = vld [vmem:[#allocation6] ss:$0 sm:$0xff] }
 0x18d   : > { %v685_v49 = vpop.permute.xlu1 %684 }
 0x18e   : > { %736 = vrot.lane.b32.xlu1 %v712_v19, %s1420_s17  ;;  %v708_v50 = vadd.f32 %v685_v49, %v668_v47 }
 0x18f   : > { %v687_v38 = vpop.permute.xlu0 %686 }
 0x190   : > { %587 = vrot.lane.b32.xlu0 %v568_v20, %s1420_s17  ;;  %v709_v43 = vadd.f32 %v687_v38, %v669_v28 }
 0x192   : > { %583 = vrot.lane.b32.xlu1 %v566_v21, %s1420_s17 }
 0x194   : > { %591 = vrot.lane.b32.xlu0 %v570_v24, %s1420_s17 }
 0x196   : > { %585 = vrot.lane.b32.xlu1 %v567_v27, %s1420_s17 }
 0x198   : > { %595 = vrot.lane.b32.xlu0 %v572_v32, %s1420_s17 }
 0x19a   : > { %589 = vrot.lane.b32.xlu1 %v569_v41, %s1420_s17 }
 0x19c   : > { %730 = vrot.lane.b32.xlu0 %v709_v43, %s1420_s17 }
 0x19e   : > { %593 = vrot.lane.b32.xlu1 %v571_v48, %s1420_s17 }
 0x1a2   : > { %728 = vrot.lane.b32.xlu1 %v708_v50, %s1420_s17 }
 0x1ee   : > { %v735_v51 = vpop.permute.xlu0 %734 }
 0x1f6   : > { %v739_v52 = vpop.permute.xlu0 %738 }
 0x1f8   : > { %v582_v53 = vpop.permute.xlu1 %581 }
 0x1f9   : > { %v605_v60 = vadd.f32 %v582_v53, %v1557_v2 }
 0x1fa   : > { %v741_v54 = vpop.permute.xlu0 %740 }
 0x1fb   : > { %v613_v63 = vadd.f32 %v605_v60, %v548_v45 }
 0x1fc   : > { %v733_v55 = vpop.permute.xlu1 %732 }
 0x1fd   : > { %1252 = vmatprep.mubr.msk.f32.mxu1 %vm744_vm1, %v733_v55 }
 0x1fe   : > { %v743_v57 = vpop.permute.xlu0 %742  ;;  %1253 = vmatmul.mubr.msk.f32.vlgmr.msra.gmra.mxu1 %vm744_vm1, %v735_v51 }
 0x1ff   : > { %1262 = vmatpush3.msra.mxu1 %v717_v59 }
 0x200   : > { %v737_v58 = vpop.permute.xlu1 %736  ;;  %1263 = vmatprep.subr.mxu1 %v716_v56 }
 0x201   : > { %1255 = vmatprep.mubr.msk.f32.mxu1 %vm744_vm1, %v737_v58  ;;  %1264 = vmatpush3.msra.mxu1 %v716_v56 }
 0x202   : > { %v588_v61 = vpop.permute.xlu0 %587  ;;  %1256 = vmatmul.mubr.msk.f32.gmra.mxu1 %vm744_vm1, %v739_v52 }
 0x203   : > { %1258 = vmatprep.mubr.msk.f32.mxu1 %vm744_vm1, %v741_v54  ;;  %v608_v1 = vadd.f32 %v588_v61, %v1587_v9 }
 0x204   : > { %v584_v62 = vpop.permute.xlu1 %583 }
 0x205   : > { %v606_v0 = vadd.f32 %v584_v62, %v1579_v8  ;;  %v616_v8 = vadd.f32 %v608_v1, %v551_v25 }
 0x206   : > { %1259 = vmatmul.mubr.msk.f32.gmra.mxu1 %vm744_vm1, %v743_v57  ;;  %v592_v2 = vpop.permute.xlu0 %591 }
 0x207   : > { %v614_v59 = vadd.f32 %v606_v0, %v549_v46  ;;  %1265 = vmatprep.mubr.msk.f32.mxu1 %vm744_vm1, %v613_v63  ;;  %v610_v45 = vadd.f32 %v592_v2, %v1597_v11 }
 0x208   : > { %v586_v3 = vpop.permute.xlu1 %585 }
 0x209   : > { %v607_v4 = vadd.f32 %v586_v3, %v1572_v5  ;;  %v618_v9 = vadd.f32 %v610_v45, %v553_v35 }
 0x20a   : > { %1266 = vmatmul.mubr.msk.f32.vlgmr.msra.gmra.mxu1 %vm744_vm1, %v614_v59  ;;  %v596_v46 = vpop.permute.xlu0 %595 }
 0x20b   : > { %v615_v42 = vadd.f32 %v607_v4, %v550_v29  ;;  %v612_v26 = vadd.f32 %v596_v46, %v1607_v13 }
 0x20c   : > { %v590_v44 = vpop.permute.xlu1 %589 }
 0x20d   : > { %v609_v6 = vadd.f32 %v590_v44, %v1590_v10  ;;  %1268 = vmatprep.mubr.msk.f32.mxu1 %vm744_vm1, %v615_v42  ;;  %v620_v11 = vadd.f32 %v612_v26, %v555_v40 }
 0x20e   : > { %1269 = vmatmul.mubr.msk.f32.gmra.mxu1 %vm744_vm1, %v616_v8  ;;  %v731_v31 = vpop.permute.xlu0 %730 }
 0x20f   : > { %v617_v5 = vadd.f32 %v609_v6, %v552_v33 }
 0x210   : > { %v594_v23 = vpop.permute.xlu1 %593 }
 0x211   : > { %v611_v25 = vadd.f32 %v594_v23, %v1600_v12  ;;  %1271 = vmatprep.mubr.msk.f32.mxu1 %vm744_vm1, %v617_v5 }
 0x212   : > { %1272 = vmatmul.mubr.msk.f32.gmra.mxu1 %vm744_vm1, %v618_v9 }
 0x213   : > { %v619_v10 = vadd.f32 %v611_v25, %v554_v39 }
 0x214   : > { %v729_v29 = vpop.permute.xlu1 %728 }
 0x215   : > { %1249 = vmatprep.mubr.msk.f32.mxu0 %vm744_vm1, %v729_v29  ;;  %1274 = vmatprep.mubr.msk.f32.mxu1 %vm744_vm1, %v619_v10 }
 0x216   : > { %1250 = vmatmul.mubr.msk.f32.vlgmr.msra.gmra.mxu0 %vm744_vm1, %v731_v31  ;;  %1275 = vmatmul.mubr.msk.f32.gmra.mxu1 %vm744_vm1, %v620_v11 }
 0x2be   : > { %v1254_v12 = vpop.f32.mrf.mxu1 }
 0x2c0   : > { %v837_v13 = vpop.f32.mrf.mxu1 }
 0x2c2   : > { %v1257_v30 = vpop.f32.mrf.mxu1 }
 0x2c4   : > { %v847_v33 = vpop.f32.mrf.mxu1 }
 0x2c6   : > { %v1260_v35 = vpop.f32.mrf.mxu1 }
 0x2c8   : > { %v857_v37 = vpop.f32.mrf.mxu1 }
 0x2ca   : > { %v1267_v39 = vpop.f32.mrf.mxu1 }
 0x2cc   : > { %v956_v36 = vpop.f32.mrf.mxu1 }
 0x2ce   : > { %v1270_v40 = vpop.f32.mrf.mxu1 }
 0x2cf   : > { %v972_v7 = vadd.f32 %v1270_v40, %v1254_v12 }
 0x2d0   : > { %v966_v15 = vpop.f32.mrf.mxu1 }
 0x2d1   : > { %v998_v16 = vmax.f32 %v972_v7, 0.0  ;;  %v967_v17 = vadd.f32 %v966_v15, %v837_v13 }
 0x2d2   : > { %v1273_v19 = vpop.f32.mrf.mxu1 }
 0x2d3   : > { %v1013_v20 = vmul.f32 %v1187_v14, %v998_v16  ;;  %v997_v21 = vmax.f32 %v967_v17, 0.0  ;;  %v982_v22 = vadd.f32 %v1273_v19, %v1257_v30 }
 0x2d4   : > { %v976_v24 = vpop.f32.mrf.mxu1 }
 0x2d5   : > { %v1028_v27 = vadd.f32 %v1188_v18, %v1013_v20  ;;  %v1012_v28 = vmul.f32 %v1187_v14, %v997_v21  ;;  %v1000_v32 = vmax.f32 %v982_v22, 0.0  ;;  %v977_v34 = vadd.f32 %v976_v24, %v847_v33 }
 0x2d6   : > { %v1251_v38 = vpop.f32.mrf.mxu0  ;;  %v1276_v41 = vpop.f32.mrf.mxu1 }
 0x2d7   : > { %1036 = vst.msk [vmem:[%s1774_s24 + $0x18] sm:$0xff] %vm418_vm0, %v1028_v27  ;;  %v1027_v43 = vadd.f32 %v1188_v18, %v1012_v28  ;;  %v1015_v47 = vmul.f32 %v1187_v14, %v1000_v32  ;;  %v999_v48 = vmax.f32 %v977_v34, 0.0  ;;  %v962_v49 = vadd.f32 %v1267_v39, %v1251_v38 }
 0x2d8   : > { %v992_v50 = vadd.f32 %v1276_v41, %v1260_v35  ;;  %v827_v51 = vpop.f32.mrf.mxu0  ;;  %v986_v52 = vpop.f32.mrf.mxu1 }
 0x2d9   : > { %1035 = vst.msk [vmem:[%s1774_s24 + $0x10] sm:$0xff] %vm418_vm0, %v1027_v43  ;;  %v1030_v53 = vadd.f32 %v1188_v18, %v1015_v47  ;;  %v1014_v54 = vmul.f32 %v1187_v14, %v999_v48  ;;  %v996_v55 = vmax.f32 %v962_v49, 0.0  ;;  %v957_v56 = vadd.f32 %v956_v36, %v827_v51 }
 0x2da   : > { %v1002_v57 = vmax.f32 %v992_v50, 0.0  ;;  %v987_v58 = vadd.f32 %v986_v52, %v857_v37 }
 0x2db   : > { %1038 = vst.msk [vmem:[%s1774_s24 + $0x28] sm:$0xff] %vm418_vm0, %v1030_v53  ;;  %v1029_v60 = vadd.f32 %v1188_v18, %v1014_v54  ;;  %v1011_v61 = vmul.f32 %v1187_v14, %v996_v55  ;;  %v995_v62 = vmax.f32 %v957_v56, 0.0 }
 0x2dc   : > { %v1017_v63 = vmul.f32 %v1187_v14, %v1002_v57  ;;  %v1001_v0 = vmax.f32 %v987_v58, 0.0 }
 0x2dd   : > { %1037 = vst.msk [vmem:[%s1774_s24 + $0x20] sm:$0xff] %vm418_vm0, %v1029_v60  ;;  %v1026_v59 = vadd.f32 %v1188_v18, %v1011_v61  ;;  %v1010_v2 = vmul.f32 %v1187_v14, %v995_v62 }
 0x2de   : > { %v1032_v1 = vadd.f32 %v1188_v18, %v1017_v63  ;;  %v1016_v3 = vmul.f32 %v1187_v14, %v1001_v0 }
 0x2df   : > { %1034 = vst.msk [vmem:[%s1774_s24 + $0x8] sm:$0xff] %vm418_vm0, %v1026_v59  ;;  %v1025_v4 = vadd.f32 %v1188_v18, %v1010_v2 }
 0x2e0   : > { %1040 = vst.msk [vmem:[%s1774_s24 + $0x38] sm:$0xff] %vm418_vm0, %v1032_v1  ;;  %v1031_v42 = vadd.f32 %v1188_v18, %v1016_v3 }
 0x2e1   : > { %1033 = vst.msk [vmem:[%s1774_s24] sm:$0xff] %vm418_vm0, %v1025_v4 }
 0x2e2   : > { %1039 = vst.msk [vmem:[%s1774_s24 + $0x30] sm:$0xff] %vm418_vm0, %v1031_v42 }
 0x2e3 PF: > { %s21_s30 = sadd.s32 1, %s1414_s30  }
 0x2e4   : > { %p18_p3 = scmp.ge.s32.totalorder %s21_s30, 4  }
 0x2e6   :  { %20 = sbr.rel (!%p18_p3) target bundleno = 2 (0x2), region = 105 }
 0x2eb   :  { %1062 = vsyncpa [#allocation3], 1 }
 0x2ec   :  { %1064 = vsyncpa [#allocation3 + $0x1], 1 }
 0x2ed   :  { %1065 = vsyncpa [#allocation5], 1 }

// kernel: _lambda_.16
= control target key start
LH: loop header
LB: loop body
LE: loop exit
PB: predicated region body
PF: predicated region fallthrough
CT: control target
= control target key end

     0   :  { %vm76_vm0 = vcmask 588800   ;;  %vm275_vm1 = vcmask 261120   ;;  %s1855_s0 = inlined_call_operand.vmem [shape: f32[128,32], index: 0, kind: input, shape index: {}]   ;;  %s1856_s1 = inlined_call_operand.vmem [shape: f32[128,72], index: 1, kind: input, shape index: {}]   ;;  %s1857_s2 = inlined_call_operand.vmem [shape: f32[72,8], index: 2, kind: input, shape index: {}]   ;;  %s1858_s3 = inlined_call_operand.vmem [shape: f32[8,64], index: 3, kind: input, shape index: {}]   ;;  %s1859_s4 = inlined_call_operand.vmem [shape: f32[32,64], index: 4, kind: input, shape index: {}]   ;;  %s1860_s5 = inlined_call_operand.vmem [shape: f32[1,64], index: 5, kind: input, shape index: {}]   ;;  %s1861_s6 = inlined_call_operand.vmem [shape: f32[64,32], index: 6, kind: input, shape index: {}]   ;;  %s1862_s7 = inlined_call_operand.vmem [shape: f32[1,32], index: 7, kind: input, shape index: {}]   ;;  %s1863_s8 = inlined_call_operand.vmem [shape: f32[1,32], index: 8, kind: input, shape index: {}]   ;;  %s1864_s9 = inlined_call_operand.vmem [shape: f32[128,32], index: 9, kind: output, shape index: {0}]   ;;  %s1865_s10 = inlined_call_operand.hbm [shape: f32[128,32], index: 10, kind: output, shape index: {1}]  }
   0x1   :  { %v75_v0 = vld [vmem:[%s1857_s2 + $0x40] sm:$0xff]  ;;  %v74_v1 = vld [vmem:[%s1857_s2 + $0x38] sm:$0xff]  ;;  %v73_v2 = vld [vmem:[%s1857_s2 + $0x30] sm:$0xff] }
   0x2   :  { %1171 = vmatprep.subr.mxu0 %v75_v0  ;;  %v51_v3 = vld [vmem:[%s1856_s1] sm:$0xff]  ;;  %v72_v4 = vld [vmem:[%s1857_s2 + $0x28] sm:$0xff]  ;;  %v70_v6 = vld [vmem:[%s1857_s2 + $0x18] sm:$0xff] }
   0x3   :  { %1172 = vmatpush3.msra.mxu0 %v75_v0  ;;  %1189 = vmatprep.mubr.msk.f32.mxu0 %vm76_vm0, %v51_v3  ;;  %v71_v5 = vld [vmem:[%s1857_s2 + $0x20] sm:$0xff]  ;;  %v274_v7 = vld [vmem:[%s1859_s4 + $0x18] sm:$0xff]  ;;  %v273_v8 = vld [vmem:[%s1859_s4 + $0x10] sm:$0xff] }
   0x4   :  { %1173 = vmatprep.subr.mxu0 %v74_v1  ;;  %1213 = vmatprep.subr.mxu1 %v274_v7  ;;  %v69_v9 = vld [vmem:[%s1857_s2 + $0x10] sm:$0xff]  ;;  %v272_v10 = vld [vmem:[%s1859_s4 + $0x8] sm:$0xff]  ;;  %v271_v12 = vld [vmem:[%s1859_s4] sm:$0xff] }
   0x5   :  { %1174 = vmatpush3.msra.mxu0 %v74_v1  ;;  %1214 = vmatpush3.msra.mxu1 %v274_v7  ;;  %v68_v11 = vld [vmem:[%s1857_s2 + $0x8] sm:$0xff]  ;;  %v67_v13 = vld [vmem:[%s1857_s2] sm:$0xff] }
   0x6   :  { %1175 = vmatprep.subr.mxu0 %v73_v2  ;;  %1215 = vmatprep.subr.mxu1 %v273_v8  ;;  %v1456_v14 = vld [vmem:[%s1855_s0] sm:$0xff]  ;;  %v1461_v15 = vld [vmem:[%s1855_s0 + $0x8] sm:$0xff] }
   0x7   :  { %1176 = vmatpush3.msra.mxu0 %v73_v2  ;;  %1216 = vmatpush3.msra.mxu1 %v273_v8 }
   0x8   :  { %1177 = vmatprep.subr.mxu0 %v72_v4  ;;  %1217 = vmatprep.subr.mxu1 %v272_v10 }
   0x9   :  { %1178 = vmatpush3.msra.mxu0 %v72_v4  ;;  %1218 = vmatpush3.msra.mxu1 %v272_v10 }
   0xa   :  { %1179 = vmatprep.subr.mxu0 %v71_v5  ;;  %1219 = vmatprep.subr.mxu1 %v271_v12 }
   0xb   :  { %1180 = vmatpush3.msra.mxu0 %v71_v5 }
   0xc   :  { %1181 = vmatprep.subr.mxu0 %v70_v6 }
   0xd   :  { %1182 = vmatpush3.msra.mxu0 %v70_v6 }
   0xe   :  { %1183 = vmatprep.subr.mxu0 %v69_v9 }
   0xf   :  { %1184 = vmatpush3.msra.mxu0 %v69_v9 }
  0x10   :  { %1185 = vmatprep.subr.mxu0 %v68_v11 }
  0x11   :  { %16 = vsyncpa [#allocation3], 0  ;;  %1186 = vmatpush3.msra.mxu0 %v68_v11  ;;  %v52_v16 = vld [vmem:[%s1856_s1 + $0x8] sm:$0xff]  ;;  %1220 = vmatpush3.msra.mxu1 %v271_v12  ;;  %v270_v17 = vld [vmem:[%s1858_s3] sm:$0xff]  ;;  %vm469_vm2 = vcmask 64512   ;;  %vm710_vm3 = vcmask 523264  }
  0x12   :  { %1187 = vmatprep.subr.mxu0 %v67_v13  ;;  %v53_v18 = vld [vmem:[%s1856_s1 + $0x10] sm:$0xff]  ;;  %1221 = vmatprep.mubr.msk.f32.mxu1 %vm275_vm1, %v1456_v14  ;;  %v1485_v20 = vld [vmem:[%s1855_s0 + $0x18] sm:$0xff]  ;;  %v1494_v22 = vld [vmem:[%s1855_s0 + $0x20] sm:$0xff]  ;;  %s1352_s12 = smov [#allocation2]  }
  0x13   :  { %1188 = vmatpush3.msra.mxu0 %v67_v13  ;;  %1222 = vmatmul.mubr.msk.f32.vlgmr.msra.gmra.mxu1 %vm275_vm1, %v1461_v15  ;;  %v1479_v19 = vld [vmem:[%s1855_s0 + $0x10] sm:$0xff]  ;;  %v54_v21 = vld [vmem:[%s1856_s1 + $0x18] sm:$0xff]  ;;  %v55_v23 = vld [vmem:[%s1856_s1 + $0x20] sm:$0xff] }
  0x14   :  { %1190 = vmatmul.mubr.msk.f32.vlgmr.msra.gmra.mxu0 %vm76_vm0, %v52_v16  ;;  %1245 = vmatprep.subr.mxu1 %v270_v17  ;;  %v1509_v24 = vld [vmem:[%s1855_s0 + $0x28] sm:$0xff]  ;;  %v1518_v26 = vld [vmem:[%s1855_s0 + $0x30] sm:$0xff]  ;;  %v1531_v28 = vld [vmem:[%s1855_s0 + $0x38] sm:$0xff] }
  0x15   :  { %1192 = vmatprep.mubr.msk.f32.mxu0 %vm76_vm0, %v53_v18  ;;  %1246 = vmatpush3.msra.mxu1 %v270_v17  ;;  %v56_v25 = vld [vmem:[%s1856_s1 + $0x28] sm:$0xff]  ;;  %v57_v27 = vld [vmem:[%s1856_s1 + $0x30] sm:$0xff]  ;;  %v58_v29 = vld [vmem:[%s1856_s1 + $0x38] sm:$0xff] }
  0x16   :  { %1224 = vmatprep.mubr.msk.f32.mxu1 %vm275_vm1, %v1479_v19  ;;  %v1540_v30 = vld [vmem:[%s1855_s0 + $0x40] sm:$0xff]  ;;  %v1553_v32 = vld [vmem:[%s1855_s0 + $0x48] sm:$0xff]  ;;  %v1562_v34 = vld [vmem:[%s1855_s0 + $0x50] sm:$0xff] }
  0x17   :  { %1225 = vmatmul.mubr.msk.f32.gmra.mxu1 %vm275_vm1, %v1485_v20  ;;  %v59_v31 = vld [vmem:[%s1856_s1 + $0x40] sm:$0xff]  ;;  %v60_v33 = vld [vmem:[%s1856_s1 + $0x48] sm:$0xff]  ;;  %v61_v35 = vld [vmem:[%s1856_s1 + $0x50] sm:$0xff] }
  0x18   :  { %1193 = vmatmul.mubr.msk.f32.gmra.mxu0 %vm76_vm0, %v54_v21  ;;  %1227 = vmatprep.mubr.msk.f32.mxu1 %vm275_vm1, %v1494_v22  ;;  %v1575_v36 = vld [vmem:[%s1855_s0 + $0x58] sm:$0xff]  ;;  %v1584_v38 = vld [vmem:[%s1855_s0 + $0x60] sm:$0xff]  ;;  %v1597_v40 = vld [vmem:[%s1855_s0 + $0x68] sm:$0xff] }
  0x19   :  { %1195 = vmatprep.mubr.msk.f32.mxu0 %vm76_vm0, %v55_v23  ;;  %v62_v37 = vld [vmem:[%s1856_s1 + $0x58] sm:$0xff]  ;;  %v63_v39 = vld [vmem:[%s1856_s1 + $0x60] sm:$0xff]  ;;  %v64_v41 = vld [vmem:[%s1856_s1 + $0x68] sm:$0xff] }
  0x1a   :  { %v1606_v42 = vld [vmem:[%s1855_s0 + $0x70] sm:$0xff]  ;;  %v1619_v44 = vld [vmem:[%s1855_s0 + $0x78] sm:$0xff]  ;;  %v707_v48 = vld [vmem:[%s1861_s6 + $0x28] sm:$0xff] }
  0x1b   :  { %1228 = vmatmul.mubr.msk.f32.gmra.mxu1 %vm275_vm1, %v1509_v24  ;;  %v65_v43 = vld [vmem:[%s1856_s1 + $0x70] sm:$0xff]  ;;  %v66_v45 = vld [vmem:[%s1856_s1 + $0x78] sm:$0xff]  ;;  %v706_v49 = vld [vmem:[%s1861_s6 + $0x20] sm:$0xff] }
  0x1c   :  { %1196 = vmatmul.mubr.msk.f32.gmra.mxu0 %vm76_vm0, %v56_v25  ;;  %1230 = vmatprep.mubr.msk.f32.mxu1 %vm275_vm1, %v1518_v26  ;;  %v709_v46 = vld [vmem:[%s1861_s6 + $0x38] sm:$0xff]  ;;  %v708_v47 = vld [vmem:[%s1861_s6 + $0x30] sm:$0xff]  ;;  %v703_v4 = vld [vmem:[%s1861_s6 + $0x8] sm:$0xff] }
  0x1d   :  { %1198 = vmatprep.mubr.msk.f32.mxu0 %vm76_vm0, %v57_v27  ;;  %1271 = vmatprep.subr.mxu0 %v709_v46  ;;  %v705_v50 = vld [vmem:[%s1861_s6 + $0x18] sm:$0xff]  ;;  %v704_v3 = vld [vmem:[%s1861_s6 + $0x10] sm:$0xff]  ;;  %v702_v5 = vld [vmem:[%s1861_s6] sm:$0xff] }
  0x1e   :  { %1311 = vmatprep.subr.mxu1 %v709_v46  ;;  %1272 = vmatpush3.msra.mxu0 %v709_v46 }
  0x1f   :  { %1231 = vmatmul.mubr.msk.f32.gmra.mxu1 %vm275_vm1, %v1531_v28  ;;  %1273 = vmatprep.subr.mxu0 %v708_v47 }
  0x20   :  { %1199 = vmatmul.mubr.msk.f32.gmra.mxu0 %vm76_vm0, %v58_v29  ;;  %1233 = vmatprep.mubr.msk.f32.mxu1 %vm275_vm1, %v1540_v30 }
  0x21   :  { %1201 = vmatprep.mubr.msk.f32.mxu0 %vm76_vm0, %v59_v31  ;;  %1274 = vmatpush3.msra.mxu0 %v708_v47 }
  0x22   :  { %1275 = vmatprep.subr.mxu0 %v707_v48 }
  0x23   :  { %1234 = vmatmul.mubr.msk.f32.gmra.mxu1 %vm275_vm1, %v1553_v32  ;;  %1276 = vmatpush3.msra.mxu0 %v707_v48 }
  0x24   :  { %1202 = vmatmul.mubr.msk.f32.gmra.mxu0 %vm76_vm0, %v60_v33  ;;  %1236 = vmatprep.mubr.msk.f32.mxu1 %vm275_vm1, %v1562_v34 }
  0x25   :  { %1204 = vmatprep.mubr.msk.f32.mxu0 %vm76_vm0, %v61_v35  ;;  %1277 = vmatprep.subr.mxu0 %v706_v49  ;;  %v1677_v35 = vld [vmem:[%s1860_s5] ss:$0 sm:$0xff] }
  0x26   :  { %1278 = vmatpush3.msra.mxu0 %v706_v49 }
  0x27   :  { %1237 = vmatmul.mubr.msk.f32.gmra.mxu1 %vm275_vm1, %v1575_v36  ;;  %1279 = vmatprep.subr.mxu0 %v705_v50 }
  0x28   :  { %1205 = vmatmul.mubr.msk.f32.gmra.mxu0 %vm76_vm0, %v62_v37  ;;  %1239 = vmatprep.mubr.msk.f32.mxu1 %vm275_vm1, %v1584_v38 }
  0x29   :  { %1207 = vmatprep.mubr.msk.f32.mxu0 %vm76_vm0, %v63_v39  ;;  %1280 = vmatpush3.msra.mxu0 %v705_v50 }
  0x2a   :  { %1281 = vmatprep.subr.mxu0 %v704_v3 }
  0x2b   :  { %1240 = vmatmul.mubr.msk.f32.gmra.mxu1 %vm275_vm1, %v1597_v40  ;;  %1282 = vmatpush3.msra.mxu0 %v704_v3 }
  0x2c   :  { %1208 = vmatmul.mubr.msk.f32.gmra.mxu0 %vm76_vm0, %v64_v41  ;;  %1242 = vmatprep.mubr.msk.f32.mxu1 %vm275_vm1, %v1606_v42 }
  0x2d   :  { %1210 = vmatprep.mubr.msk.f32.mxu0 %vm76_vm0, %v65_v43  ;;  %1283 = vmatprep.subr.mxu0 %v703_v4 }
  0x2e   :  { %1284 = vmatpush3.msra.mxu0 %v703_v4 }
  0x2f   :  { %1243 = vmatmul.mubr.msk.f32.gmra.mxu1 %vm275_vm1, %v1619_v44  ;;  %1285 = vmatprep.subr.mxu0 %v702_v5 }
  0x30   :  { %1211 = vmatmul.mubr.msk.f32.gmra.mxu0 %vm76_vm0, %v66_v45 }
  0x31   :  { %1286 = vmatpush3.msra.mxu0 %v702_v5 }
  0xd3   :  { %v1223_v6 = vpop.f32.mrf.mxu1 }
  0xd4   :  { %v1191_v51 = vpop.f32.mrf.mxu0 }
  0xd5   :  { %v390_v7 = vpop.f32.mrf.mxu1 }
  0xd6   :  { %v191_v52 = vpop.f32.mrf.mxu0 }
  0xd7   :  { %1247 = vmatprep.mubr.msk.f32.mxu1 %vm469_vm2, %v191_v52  ;;  %v1226_v8 = vpop.f32.mrf.mxu1 }
  0xd8   :  { %v1194_v53 = vpop.f32.mrf.mxu0  ;;  %1248 = vmatmul.mubr.msk.f32.vlgmr.msra.gmra.mxu1 %vm469_vm2, %v1191_v51 }
  0xd9   :  { %1319 = vmatpush3.msra.mxu1 %v709_v46  ;;  %v400_v9 = vpop.f32.mrf.mxu1 }
  0xda   :  { %v201_v54 = vpop.f32.mrf.mxu0  ;;  %1312 = vmatprep.subr.mxu1 %v708_v47 }
  0xdb   :  { %1250 = vmatprep.mubr.msk.f32.mxu1 %vm469_vm2, %v201_v54  ;;  %1320 = vmatpush3.msra.mxu1 %v708_v47  ;;  %v1229_v10 = vpop.f32.mrf.mxu1 }
  0xdc   :  { %v1197_v55 = vpop.f32.mrf.mxu0  ;;  %1251 = vmatmul.mubr.msk.f32.gmra.mxu1 %vm469_vm2, %v1194_v53  ;;  %1313 = vmatprep.subr.mxu1 %v707_v48 }
  0xdd   :  { %1321 = vmatpush3.msra.mxu1 %v707_v48  ;;  %v410_v11 = vpop.f32.mrf.mxu1 }
  0xde   :  { %v211_v56 = vpop.f32.mrf.mxu0  ;;  %1314 = vmatprep.subr.mxu1 %v706_v49 }
  0xdf   :  { %1253 = vmatprep.mubr.msk.f32.mxu1 %vm469_vm2, %v211_v56  ;;  %1322 = vmatpush3.msra.mxu1 %v706_v49  ;;  %v1232_v12 = vpop.f32.mrf.mxu1 }
  0xe0   :  { %v1200_v57 = vpop.f32.mrf.mxu0  ;;  %1254 = vmatmul.mubr.msk.f32.gmra.mxu1 %vm469_vm2, %v1197_v55  ;;  %1315 = vmatprep.subr.mxu1 %v705_v50 }
  0xe1   :  { %1323 = vmatpush3.msra.mxu1 %v705_v50  ;;  %v420_v13 = vpop.f32.mrf.mxu1 }
  0xe2   :  { %v221_v58 = vpop.f32.mrf.mxu0  ;;  %1316 = vmatprep.subr.mxu1 %v704_v3 }
  0xe3   :  { %1256 = vmatprep.mubr.msk.f32.mxu1 %vm469_vm2, %v221_v58  ;;  %1324 = vmatpush3.msra.mxu1 %v704_v3  ;;  %v1235_v16 = vpop.f32.mrf.mxu1 }
  0xe4   :  { %v1203_v59 = vpop.f32.mrf.mxu0  ;;  %1257 = vmatmul.mubr.msk.f32.gmra.mxu1 %vm469_vm2, %v1200_v57  ;;  %1317 = vmatprep.subr.mxu1 %v703_v4 }
  0xe5   :  { %1325 = vmatpush3.msra.mxu1 %v703_v4  ;;  %v430_v17 = vpop.f32.mrf.mxu1 }
  0xe6   :  { %v231_v60 = vpop.f32.mrf.mxu0  ;;  %1318 = vmatprep.subr.mxu1 %v702_v5 }
  0xe7   :  { %1259 = vmatprep.mubr.msk.f32.mxu1 %vm469_vm2, %v231_v60  ;;  %1326 = vmatpush3.msra.mxu1 %v702_v5  ;;  %v1238_v18 = vpop.f32.mrf.mxu1 }
  0xe8   :  { %v1206_v61 = vpop.f32.mrf.mxu0  ;;  %1260 = vmatmul.mubr.msk.f32.gmra.mxu1 %vm469_vm2, %v1203_v59 }
  0xe9   :  { %v440_v21 = vpop.f32.mrf.mxu1 }
  0xea   :  { %v241_v62 = vpop.f32.mrf.mxu0 }
  0xeb   :  { %1262 = vmatprep.mubr.msk.f32.mxu1 %vm469_vm2, %v241_v62  ;;  %v1241_v23 = vpop.f32.mrf.mxu1 }
  0xec   :  { %v1209_v63 = vpop.f32.mrf.mxu0  ;;  %1263 = vmatmul.mubr.msk.f32.gmra.mxu1 %vm469_vm2, %v1206_v61 }
  0xed   :  { %v1668_v25 = vpop.f32.mrf.mxu1 }
  0xee   :  { %v251_v0 = vpop.f32.mrf.mxu0 }
  0xef   :  { %1265 = vmatprep.mubr.msk.f32.mxu1 %vm469_vm2, %v251_v0  ;;  %v1670_v27 = vpop.f32.mrf.mxu1 }
  0xf0   :  { %v1212_v1 = vpop.f32.mrf.mxu0  ;;  %1266 = vmatmul.mubr.msk.f32.gmra.mxu1 %vm469_vm2, %v1209_v63 }
  0xf1   :  { %v1672_v29 = vpop.f32.mrf.mxu1 }
  0xf2   :  { %v261_v2 = vpop.f32.mrf.mxu0 }
  0xf3   :  { %1268 = vmatprep.mubr.msk.f32.mxu1 %vm469_vm2, %v261_v2 }
  0xf4   :  { %1269 = vmatmul.mubr.msk.f32.gmra.mxu1 %vm469_vm2, %v1212_v1 }
 0x198   :  { %v1249_v31 = vpop.f32.mrf.mxu1 }
 0x199   :  { %v590_v33 = vadd.f32 %v1249_v31, %v1223_v6 }
 0x19a   :  { %v584_v37 = vpop.f32.mrf.mxu1 }
 0x19b   :  { %v585_v39 = vadd.f32 %v584_v37, %v390_v7  ;;  %v671_v41 = vadd.f32 %v1677_v35, %v590_v33 }
 0x19c   :  { %v1252_v43 = vpop.f32.mrf.mxu1 }
 0x19d   :  { %v670_v45 = vadd.f32 %v1677_v35, %v585_v39  ;;  %v600_v46 = vadd.f32 %v1252_v43, %v1226_v8  ;;  %v687_v50 = vmax.f32 %v671_v41, 0.0 }
 0x19e   :  { %v594_v47 = vpop.f32.mrf.mxu1 }
 0x19f   :  { %v686_v48 = vmax.f32 %v670_v45, 0.0  ;;  %v595_v49 = vadd.f32 %v594_v47, %v400_v9  ;;  %v673_v51 = vadd.f32 %v1677_v35, %v600_v46 }
 0x1a0   :  { %v1255_v52 = vpop.f32.mrf.mxu1 }
 0x1a1   :  { %v672_v53 = vadd.f32 %v1677_v35, %v595_v49  ;;  %v610_v54 = vadd.f32 %v1255_v52, %v1229_v10  ;;  %1287 = vmatprep.mubr.msk.f32.mxu0 %vm710_vm3, %v686_v48  ;;  %v689_v58 = vmax.f32 %v673_v51, 0.0 }
 0x1a2   :  { %v604_v55 = vpop.f32.mrf.mxu1  ;;  %1288 = vmatmul.mubr.msk.f32.vlgmr.msra.gmra.mxu0 %vm710_vm3, %v687_v50 }
 0x1a3   :  { %v688_v56 = vmax.f32 %v672_v53, 0.0  ;;  %v605_v57 = vadd.f32 %v604_v55, %v410_v11  ;;  %v675_v59 = vadd.f32 %v1677_v35, %v610_v54 }
 0x1a4   :  { %v1258_v60 = vpop.f32.mrf.mxu1 }
 0x1a5   :  { %v674_v61 = vadd.f32 %v1677_v35, %v605_v57  ;;  %v620_v62 = vadd.f32 %v1258_v60, %v1232_v12  ;;  %1290 = vmatprep.mubr.msk.f32.mxu0 %vm710_vm3, %v688_v56  ;;  %v691_v2 = vmax.f32 %v675_v59, 0.0 }
 0x1a6   :  { %v614_v63 = vpop.f32.mrf.mxu1  ;;  %1291 = vmatmul.mubr.msk.f32.gmra.mxu0 %vm710_vm3, %v689_v58 }
 0x1a7   :  { %v690_v0 = vmax.f32 %v674_v61, 0.0  ;;  %v615_v1 = vadd.f32 %v614_v63, %v420_v13  ;;  %v677_v3 = vadd.f32 %v1677_v35, %v620_v62 }
 0x1a8   :  { %v1261_v4 = vpop.f32.mrf.mxu1 }
 0x1a9   :  { %v676_v5 = vadd.f32 %v1677_v35, %v615_v1  ;;  %v630_v6 = vadd.f32 %v1261_v4, %v1235_v16  ;;  %1293 = vmatprep.mubr.msk.f32.mxu0 %vm710_vm3, %v690_v0  ;;  %v693_v10 = vmax.f32 %v677_v3, 0.0 }
 0x1aa   :  { %v624_v7 = vpop.f32.mrf.mxu1  ;;  %1294 = vmatmul.mubr.msk.f32.gmra.mxu0 %vm710_vm3, %v691_v2 }
 0x1ab   :  { %v692_v8 = vmax.f32 %v676_v5, 0.0  ;;  %v625_v9 = vadd.f32 %v624_v7, %v430_v17  ;;  %v679_v11 = vadd.f32 %v1677_v35, %v630_v6 }
 0x1ac   :  { %v1264_v12 = vpop.f32.mrf.mxu1 }
 0x1ad   :  { %v678_v13 = vadd.f32 %v1677_v35, %v625_v9  ;;  %v640_v31 = vadd.f32 %v1264_v12, %v1238_v18  ;;  %1296 = vmatprep.mubr.msk.f32.mxu0 %vm710_vm3, %v692_v8  ;;  %v695_v39 = vmax.f32 %v679_v11, 0.0 }
 0x1ae   :  { %v634_v33 = vpop.f32.mrf.mxu1  ;;  %1297 = vmatmul.mubr.msk.f32.gmra.mxu0 %vm710_vm3, %v693_v10 }
 0x1af   :  { %v694_v16 = vmax.f32 %v678_v13, 0.0  ;;  %v635_v37 = vadd.f32 %v634_v33, %v440_v21  ;;  %v681_v41 = vadd.f32 %v1677_v35, %v640_v31 }
 0x1b0   :  { %v1267_v43 = vpop.f32.mrf.mxu1 }
 0x1b1   :  { %v680_v17 = vadd.f32 %v1677_v35, %v635_v37  ;;  %v650_v45 = vadd.f32 %v1267_v43, %v1241_v23  ;;  %1299 = vmatprep.mubr.msk.f32.mxu0 %vm710_vm3, %v694_v16  ;;  %v697_v48 = vmax.f32 %v681_v41, 0.0 }
 0x1b2   :  { %v644_v46 = vpop.f32.mrf.mxu1  ;;  %1300 = vmatmul.mubr.msk.f32.gmra.mxu0 %vm710_vm3, %v695_v39 }
 0x1b3   :  { %v696_v18 = vmax.f32 %v680_v17, 0.0  ;;  %v645_v47 = vadd.f32 %v644_v46, %v1668_v25  ;;  %v683_v49 = vadd.f32 %v1677_v35, %v650_v45 }
 0x1b4   :  { %v1270_v50 = vpop.f32.mrf.mxu1 }
 0x1b5   :  { %v682_v21 = vadd.f32 %v1677_v35, %v645_v47  ;;  %v660_v51 = vadd.f32 %v1270_v50, %v1670_v27  ;;  %1302 = vmatprep.mubr.msk.f32.mxu0 %vm710_vm3, %v696_v18  ;;  %v699_v54 = vmax.f32 %v683_v49, 0.0 }
 0x1b6   :  { %v654_v52 = vpop.f32.mrf.mxu1  ;;  %1303 = vmatmul.mubr.msk.f32.gmra.mxu0 %vm710_vm3, %v697_v48 }
 0x1b7   :  { %v698_v23 = vmax.f32 %v682_v21, 0.0  ;;  %v655_v53 = vadd.f32 %v654_v52, %v1672_v29  ;;  %v685_v55 = vadd.f32 %v1677_v35, %v660_v51  ;;  %v1717_v29 = vld [vmem:[%s1862_s7] ss:$0 sm:$0xff]  ;;  %s1005_s7 = sshll.u32 %s1352_s12, 4  ;;  %s1006_s7 = int_to_ptr.vmem [resolvable:$true] %s1005_s7 }
 0x1b8   :  { %s1330_s14 = scalar_lea.vmem %s1006_s7, 2048  ;;  %p1335_p1 = scmp.lt.s32.totalorder %s1006_s7, %s1006_s7 }
 0x1b9   :  { %v684_v25 = vadd.f32 %v1677_v35, %v655_v53  ;;  %1305 = vmatprep.mubr.msk.f32.mxu0 %vm710_vm3, %v698_v23  ;;  %v701_v57 = vmax.f32 %v685_v55, 0.0  ;;  %v1723_v35 = vld [vmem:[%s1863_s8] ss:$0 sm:$0xff]  ;;  %p1331_p0 = scmp.ne.s32.totalorder %s1006_s7, %s1330_s14  ;;  %p1336_p2 = scmp.lt.s32.totalorder %s1330_s14, %s1330_s14 }
 0x1ba   :  { %1306 = vmatmul.mubr.msk.f32.gmra.mxu0 %vm710_vm3, %v699_v54 }
 0x1bb   :  { %v700_v56 = vmax.f32 %v684_v25, 0.0  ;;  %p1337_p3 = por %p1336_p2, %p1335_p1 }
 0x1bd   :  { %1308 = vmatprep.mubr.msk.f32.mxu1 %vm710_vm3, %v700_v56  ;;  %p1338_p4 = pnand %p1337_p3, %p1331_p0 }
 0x1be   :  { %1309 = vmatmul.mubr.msk.f32.vlgmr.msra.gmra.mxu1 %vm710_vm3, %v701_v57 }
 0x262   :  { %v1289_v27 = vpop.f32.mrf.mxu0 }
 0x263   :  { %v905_v58 = vadd.f32 %v1289_v27, %v1461_v15 }
 0x264   :  { %v825_v59 = vpop.f32.mrf.mxu0 }
 0x265   :  { %921 = vst.msk [vmem:[%s1864_s9 + $0x8] sm:$0xff] %vm275_vm1, %v905_v58  ;;  %v944_v60 = vmul.f32 %v1717_v29, %v905_v58  ;;  %v904_v61 = vadd.f32 %v825_v59, %v1456_v14 }
 0x266   :  { %v1292_v62 = vpop.f32.mrf.mxu0 }
 0x267   :  { %v967_v63 = vadd.f32 %v1723_v35, %v944_v60  ;;  %920 = vst.msk [vmem:[%s1864_s9] sm:$0xff] %vm275_vm1, %v904_v61  ;;  %v943_v15 = vmul.f32 %v1717_v29, %v904_v61  ;;  %v907_v0 = vadd.f32 %v1292_v62, %v1485_v20 }
 0x268   :  { %v835_v1 = vpop.f32.mrf.mxu0 }
 0x269   :  { %983 = vst.msk [vmem:[#allocation2 + $0x8] sm:$0xff] %vm275_vm1, %v967_v63  ;;  %v966_v2 = vadd.f32 %v1723_v35, %v943_v15  ;;  %923 = vst.msk [vmem:[%s1864_s9 + $0x18] sm:$0xff] %vm275_vm1, %v907_v0  ;;  %v946_v14 = vmul.f32 %v1717_v29, %v907_v0  ;;  %v906_v3 = vadd.f32 %v835_v1, %v1479_v19 }
 0x26a   :  { %v1295_v4 = vpop.f32.mrf.mxu0 }
 0x26b   :  { %982 = vst.msk [vmem:[#allocation2] sm:$0xff] %vm275_vm1, %v966_v2  ;;  %v969_v5 = vadd.f32 %v1723_v35, %v946_v14  ;;  %922 = vst.msk [vmem:[%s1864_s9 + $0x10] sm:$0xff] %vm275_vm1, %v906_v3  ;;  %v945_v20 = vmul.f32 %v1717_v29, %v906_v3  ;;  %v909_v6 = vadd.f32 %v1295_v4, %v1509_v24 }
 0x26c   :  { %v845_v7 = vpop.f32.mrf.mxu0 }
 0x26d   :  { %985 = vst.msk [vmem:[#allocation2 + $0x18] sm:$0xff] %vm275_vm1, %v969_v5  ;;  %v968_v8 = vadd.f32 %v1723_v35, %v945_v20  ;;  %925 = vst.msk [vmem:[%s1864_s9 + $0x28] sm:$0xff] %vm275_vm1, %v909_v6  ;;  %v948_v19 = vmul.f32 %v1717_v29, %v909_v6  ;;  %v908_v9 = vadd.f32 %v845_v7, %v1494_v22 }
 0x26e   :  { %v1298_v10 = vpop.f32.mrf.mxu0 }
 0x26f   :  { %984 = vst.msk [vmem:[#allocation2 + $0x10] sm:$0xff] %vm275_vm1, %v968_v8  ;;  %v971_v11 = vadd.f32 %v1723_v35, %v948_v19  ;;  %924 = vst.msk [vmem:[%s1864_s9 + $0x20] sm:$0xff] %vm275_vm1, %v908_v9  ;;  %v947_v24 = vmul.f32 %v1717_v29, %v908_v9  ;;  %v911_v12 = vadd.f32 %v1298_v10, %v1531_v28 }
 0x270   :  { %v855_v13 = vpop.f32.mrf.mxu0 }
 0x271   :  { %987 = vst.msk [vmem:[#allocation2 + $0x28] sm:$0xff] %vm275_vm1, %v971_v11  ;;  %v970_v31 = vadd.f32 %v1723_v35, %v947_v24  ;;  %927 = vst.msk [vmem:[%s1864_s9 + $0x38] sm:$0xff] %vm275_vm1, %v911_v12  ;;  %v950_v22 = vmul.f32 %v1717_v29, %v911_v12  ;;  %v910_v33 = vadd.f32 %v855_v13, %v1518_v26 }
 0x272   :  { %v1301_v16 = vpop.f32.mrf.mxu0 }
 0x273   :  { %986 = vst.msk [vmem:[#allocation2 + $0x20] sm:$0xff] %vm275_vm1, %v970_v31  ;;  %v973_v37 = vadd.f32 %v1723_v35, %v950_v22  ;;  %926 = vst.msk [vmem:[%s1864_s9 + $0x30] sm:$0xff] %vm275_vm1, %v910_v33  ;;  %v949_v28 = vmul.f32 %v1717_v29, %v910_v33  ;;  %v913_v39 = vadd.f32 %v1301_v16, %v1553_v32 }
 0x274   :  { %v865_v41 = vpop.f32.mrf.mxu0 }
 0x275   :  { %989 = vst.msk [vmem:[#allocation2 + $0x38] sm:$0xff] %vm275_vm1, %v973_v37  ;;  %v972_v43 = vadd.f32 %v1723_v35, %v949_v28  ;;  %929 = vst.msk [vmem:[%s1864_s9 + $0x48] sm:$0xff] %vm275_vm1, %v913_v39  ;;  %v952_v26 = vmul.f32 %v1717_v29, %v913_v39  ;;  %v912_v17 = vadd.f32 %v865_v41, %v1540_v30 }
 0x276   :  { %v1304_v45 = vpop.f32.mrf.mxu0 }
 0x277   :  { %988 = vst.msk [vmem:[#allocation2 + $0x30] sm:$0xff] %vm275_vm1, %v972_v43  ;;  %v975_v46 = vadd.f32 %v1723_v35, %v952_v26  ;;  %928 = vst.msk [vmem:[%s1864_s9 + $0x40] sm:$0xff] %vm275_vm1, %v912_v17  ;;  %v951_v32 = vmul.f32 %v1717_v29, %v912_v17  ;;  %v915_v18 = vadd.f32 %v1304_v45, %v1575_v36 }
 0x278   :  { %v875_v47 = vpop.f32.mrf.mxu0 }
 0x279   :  { %991 = vst.msk [vmem:[#allocation2 + $0x48] sm:$0xff] %vm275_vm1, %v975_v46  ;;  %v974_v48 = vadd.f32 %v1723_v35, %v951_v32  ;;  %931 = vst.msk [vmem:[%s1864_s9 + $0x58] sm:$0xff] %vm275_vm1, %v915_v18  ;;  %v954_v30 = vmul.f32 %v1717_v29, %v915_v18  ;;  %v914_v49 = vadd.f32 %v875_v47, %v1562_v34 }
 0x27a   :  { %v1307_v50 = vpop.f32.mrf.mxu0 }
 0x27b   :  { %990 = vst.msk [vmem:[#allocation2 + $0x40] sm:$0xff] %vm275_vm1, %v974_v48  ;;  %v977_v21 = vadd.f32 %v1723_v35, %v954_v30  ;;  %930 = vst.msk [vmem:[%s1864_s9 + $0x50] sm:$0xff] %vm275_vm1, %v914_v49  ;;  %v953_v36 = vmul.f32 %v1717_v29, %v914_v49  ;;  %v917_v51 = vadd.f32 %v1307_v50, %v1597_v40 }
 0x27c   :  { %v885_v52 = vpop.f32.mrf.mxu0 }
 0x27d   :  { %993 = vst.msk [vmem:[#allocation2 + $0x58] sm:$0xff] %vm275_vm1, %v977_v21  ;;  %v976_v23 = vadd.f32 %v1723_v35, %v953_v36  ;;  %933 = vst.msk [vmem:[%s1864_s9 + $0x68] sm:$0xff] %vm275_vm1, %v917_v51  ;;  %v956_v34 = vmul.f32 %v1717_v29, %v917_v51  ;;  %v916_v53 = vadd.f32 %v885_v52, %v1584_v38 }
 0x27e   :  { %v1310_v54 = vpop.f32.mrf.mxu1 }
 0x27f   :  { %992 = vst.msk [vmem:[#allocation2 + $0x50] sm:$0xff] %vm275_vm1, %v976_v23  ;;  %v979_v55 = vadd.f32 %v1723_v35, %v956_v34  ;;  %932 = vst.msk [vmem:[%s1864_s9 + $0x60] sm:$0xff] %vm275_vm1, %v916_v53  ;;  %v955_v40 = vmul.f32 %v1717_v29, %v916_v53  ;;  %v919_v25 = vadd.f32 %v1310_v54, %v1619_v44 }
 0x280   :  { %v895_v56 = vpop.f32.mrf.mxu1 }
 0x281   :  { %995 = vst.msk [vmem:[#allocation2 + $0x68] sm:$0xff] %vm275_vm1, %v979_v55  ;;  %v978_v57 = vadd.f32 %v1723_v35, %v955_v40  ;;  %935 = vst.msk [vmem:[%s1864_s9 + $0x78] sm:$0xff] %vm275_vm1, %v919_v25  ;;  %v958_v38 = vmul.f32 %v1717_v29, %v919_v25  ;;  %v918_v27 = vadd.f32 %v895_v56, %v1606_v42 }
 0x283   :  { %994 = vst.msk [vmem:[#allocation2 + $0x60] sm:$0xff] %vm275_vm1, %v978_v57  ;;  %v981_v44 = vadd.f32 %v1723_v35, %v958_v38  ;;  %934 = vst.msk [vmem:[%s1864_s9 + $0x70] sm:$0xff] %vm275_vm1, %v918_v27  ;;  %v957_v58 = vmul.f32 %v1717_v29, %v918_v27 }
 0x285   :  { %997 = vst.msk [vmem:[#allocation2 + $0x78] sm:$0xff] %vm275_vm1, %v981_v44  ;;  %v980_v59 = vadd.f32 %v1723_v35, %v957_v58 }
 0x287   :  { %996 = vst.msk [vmem:[#allocation2 + $0x70] sm:$0xff] %vm275_vm1, %v980_v59 }
 0x288   :  { %1341 = shalt.err (!%p1338_p4)
}
 0x289   :  { %s1353_s15 = smov 128   ;;  %s1354_s16 = smov 8  }
 0x28a   :  { %1011 = dma.vmem_to_hbm [thread:$0]  %s1006_s7, 2048, %s1865_s10, [#allocation3], %s1353_s15, %s1353_s15, %s1354_s16  }
 0x28b   :  { %1350 = dma.done.wait [#allocation3], 2048  }
 0x28c   :  { %1351 = vsyncadd [#allocation3], 4294965248 }
 0x28d   :  { %1017 = vsyncpa [#allocation3], 1 }

// kernel: _lambda_.17
= control target key start
LH: loop header
LB: loop body
LE: loop exit
PB: predicated region body
PF: predicated region fallthrough
CT: control target
= control target key end

     0   :  { %vm196_vm0 = vcmask 523264   ;;  %s438_s1 = inlined_call_operand.vmem [shape: f32[128,64], index: 1, kind: input, shape index: {}]   ;;  %s439_s0 = inlined_call_operand.vmem [shape: f32[32,128], index: 0, kind: input, shape index: {}]   ;;  %s440_s2 = inlined_call_operand.vmem [shape: f32[1,64], index: 2, kind: input, shape index: {}]   ;;  %s441_s3 = inlined_call_operand.vmem [shape: f32[1,64], index: 3, kind: input, shape index: {}]   ;;  %s442_s4 = inlined_call_operand.vmem [shape: f32[1,64], index: 4, kind: input, shape index: {}]   ;;  %s443_s5 = inlined_call_operand.vmem [shape: f32[1,64], index: 5, kind: input, shape index: {}]   ;;  %s444_s6 = inlined_call_operand.vmem [shape: f32[32,64], index: 6, kind: output, shape index: {}]  }
   0x1   :  { %v42_v0 = vld [vmem:[%s438_s1 + $0x78] sm:$0xff]  ;;  %v41_v1 = vld [vmem:[%s438_s1 + $0x70] sm:$0xff]  ;;  %v40_v2 = vld [vmem:[%s438_s1 + $0x68] sm:$0xff] }
   0x2   :  { %233 = vmatprep.subr.mxu0 %v42_v0  ;;  %271 = vmatprep.subr.mxu1 %v42_v0  ;;  %v39_v3 = vld [vmem:[%s438_s1 + $0x60] sm:$0xff]  ;;  %v38_v4 = vld [vmem:[%s438_s1 + $0x58] sm:$0xff]  ;;  %v37_v5 = vld [vmem:[%s438_s1 + $0x50] sm:$0xff] }
   0x3   :  { %234 = vmatpush3.msra.mxu0 %v42_v0  ;;  %287 = vmatpush3.msra.mxu1 %v42_v0  ;;  %v36_v6 = vld [vmem:[%s438_s1 + $0x48] sm:$0xff]  ;;  %v35_v7 = vld [vmem:[%s438_s1 + $0x40] sm:$0xff]  ;;  %v34_v8 = vld [vmem:[%s438_s1 + $0x38] sm:$0xff] }
   0x4   :  { %235 = vmatprep.subr.mxu0 %v41_v1  ;;  %272 = vmatprep.subr.mxu1 %v41_v1  ;;  %v33_v9 = vld [vmem:[%s438_s1 + $0x30] sm:$0xff]  ;;  %v32_v10 = vld [vmem:[%s438_s1 + $0x28] sm:$0xff]  ;;  %v31_v11 = vld [vmem:[%s438_s1 + $0x20] sm:$0xff] }
   0x5   :  { %236 = vmatpush3.msra.mxu0 %v41_v1  ;;  %288 = vmatpush3.msra.mxu1 %v41_v1  ;;  %v30_v12 = vld [vmem:[%s438_s1 + $0x18] sm:$0xff]  ;;  %v29_v13 = vld [vmem:[%s438_s1 + $0x10] sm:$0xff]  ;;  %v28_v14 = vld [vmem:[%s438_s1 + $0x8] sm:$0xff] }
   0x6   :  { %237 = vmatprep.subr.mxu0 %v40_v2  ;;  %273 = vmatprep.subr.mxu1 %v40_v2  ;;  %v27_v15 = vld [vmem:[%s438_s1] sm:$0xff]  ;;  %v25_v17 = vld [vmem:[%s439_s0 + $0x10] sm:$0xff]  ;;  %v24_v18 = vld [vmem:[%s439_s0 + $0x8] sm:$0xff] }
   0x7   :  { %238 = vmatpush3.msra.mxu0 %v40_v2  ;;  %289 = vmatpush3.msra.mxu1 %v40_v2  ;;  %v23_v16 = vld [vmem:[%s439_s0] sm:$0xff]  ;;  %v26_v19 = vld [vmem:[%s439_s0 + $0x18] sm:$0xff] }
   0x8   :  { %239 = vmatprep.subr.mxu0 %v39_v3  ;;  %274 = vmatprep.subr.mxu1 %v39_v3  ;;  %v205_v20 = vld [vmem:[%s440_s2] ss:$0 sm:$0xff] }
   0x9   :  { %240 = vmatpush3.msra.mxu0 %v39_v3  ;;  %290 = vmatpush3.msra.mxu1 %v39_v3  ;;  %v206_v22 = vld [vmem:[%s441_s3] ss:$0 sm:$0xff] }
   0xa   :  { %241 = vmatprep.subr.mxu0 %v38_v4  ;;  %275 = vmatprep.subr.mxu1 %v38_v4  ;;  %v207_v26 = vld [vmem:[%s442_s4] ss:$0 sm:$0xff] }
   0xb   :  { %242 = vmatpush3.msra.mxu0 %v38_v4  ;;  %291 = vmatpush3.msra.mxu1 %v38_v4  ;;  %v208_v33 = vld [vmem:[%s443_s5] ss:$0 sm:$0xff] }
   0xc   :  { %243 = vmatprep.subr.mxu0 %v37_v5  ;;  %276 = vmatprep.subr.mxu1 %v37_v5 }
   0xd   :  { %244 = vmatpush3.msra.mxu0 %v37_v5  ;;  %292 = vmatpush3.msra.mxu1 %v37_v5 }
   0xe   :  { %245 = vmatprep.subr.mxu0 %v36_v6  ;;  %277 = vmatprep.subr.mxu1 %v36_v6 }
   0xf   :  { %246 = vmatpush3.msra.mxu0 %v36_v6  ;;  %293 = vmatpush3.msra.mxu1 %v36_v6 }
  0x10   :  { %247 = vmatprep.subr.mxu0 %v35_v7  ;;  %278 = vmatprep.subr.mxu1 %v35_v7 }
  0x11   :  { %248 = vmatpush3.msra.mxu0 %v35_v7  ;;  %294 = vmatpush3.msra.mxu1 %v35_v7 }
  0x12   :  { %249 = vmatprep.subr.mxu0 %v34_v8  ;;  %279 = vmatprep.subr.mxu1 %v34_v8 }
  0x13   :  { %250 = vmatpush3.msra.mxu0 %v34_v8  ;;  %295 = vmatpush3.msra.mxu1 %v34_v8 }
  0x14   :  { %251 = vmatprep.subr.mxu0 %v33_v9  ;;  %280 = vmatprep.subr.mxu1 %v33_v9 }
  0x15   :  { %252 = vmatpush3.msra.mxu0 %v33_v9  ;;  %296 = vmatpush3.msra.mxu1 %v33_v9 }
  0x16   :  { %253 = vmatprep.subr.mxu0 %v32_v10  ;;  %281 = vmatprep.subr.mxu1 %v32_v10 }
  0x17   :  { %254 = vmatpush3.msra.mxu0 %v32_v10  ;;  %297 = vmatpush3.msra.mxu1 %v32_v10 }
  0x18   :  { %255 = vmatprep.subr.mxu0 %v31_v11  ;;  %282 = vmatprep.subr.mxu1 %v31_v11 }
  0x19   :  { %256 = vmatpush3.msra.mxu0 %v31_v11  ;;  %298 = vmatpush3.msra.mxu1 %v31_v11 }
  0x1a   :  { %257 = vmatprep.subr.mxu0 %v30_v12  ;;  %283 = vmatprep.subr.mxu1 %v30_v12 }
  0x1b   :  { %258 = vmatpush3.msra.mxu0 %v30_v12  ;;  %299 = vmatpush3.msra.mxu1 %v30_v12 }
  0x1c   :  { %259 = vmatprep.subr.mxu0 %v29_v13  ;;  %284 = vmatprep.subr.mxu1 %v29_v13 }
  0x1d   :  { %260 = vmatpush3.msra.mxu0 %v29_v13  ;;  %300 = vmatpush3.msra.mxu1 %v29_v13 }
  0x1e   :  { %261 = vmatprep.subr.mxu0 %v28_v14  ;;  %285 = vmatprep.subr.mxu1 %v28_v14 }
  0x1f   :  { %262 = vmatpush3.msra.mxu0 %v28_v14  ;;  %301 = vmatpush3.msra.mxu1 %v28_v14 }
  0x20   :  { %263 = vmatprep.subr.mxu0 %v27_v15  ;;  %286 = vmatprep.subr.mxu1 %v27_v15 }
  0x21   :  { %264 = vmatpush3.msra.mxu0 %v27_v15  ;;  %302 = vmatpush3.msra.mxu1 %v27_v15 }
  0x22   :  { %265 = vmatprep.mubr.f32.mxu0 %v23_v16  ;;  %268 = vmatprep.mubr.f32.mxu1 %v25_v17 }
  0x23   :  { %266 = vmatmul.mubr.f32.vlgmr.msra.gmra.mxu0 %v24_v18  ;;  %269 = vmatmul.mubr.f32.vlgmr.msra.gmra.mxu1 %v26_v19 }
  0xe3   :  { %v267_v21 = vpop.f32.mrf.mxu0  ;;  %v270_v23 = vpop.f32.mrf.mxu1 }
  0xe4   :  { %v122_v24 = vadd.f32 %v267_v21, %v205_v20  ;;  %v132_v25 = vadd.f32 %v270_v23, %v205_v20 }
  0xe5   :  { %v116_v27 = vpop.f32.mrf.mxu0  ;;  %v126_v28 = vpop.f32.mrf.mxu1 }
  0xe6   :  { %v143_v29 = vmax.f32 %v122_v24, %v206_v22  ;;  %v145_v30 = vmax.f32 %v132_v25, %v206_v22  ;;  %v117_v31 = vadd.f32 %v205_v20, %v116_v27  ;;  %v127_v32 = vadd.f32 %v205_v20, %v126_v28 }
  0xe8   :  { %v154_v34 = vmul.f32 %v207_v26, %v143_v29  ;;  %v156_v35 = vmul.f32 %v207_v26, %v145_v30  ;;  %v142_v36 = vmax.f32 %v117_v31, %v206_v22  ;;  %v144_v37 = vmax.f32 %v127_v32, %v206_v22 }
  0xea   :  { %v165_v38 = vadd.f32 %v208_v33, %v154_v34  ;;  %v167_v39 = vadd.f32 %v208_v33, %v156_v35  ;;  %v153_v40 = vmul.f32 %v207_v26, %v142_v36  ;;  %v155_v41 = vmul.f32 %v207_v26, %v144_v37 }
  0xec   :  { %v210_v42 = vmul.f32 -1.442695, %v165_v38  ;;  %v212_v43 = vmul.f32 -1.442695, %v167_v39  ;;  %v164_v44 = vadd.f32 %v208_v33, %v153_v40  ;;  %v166_v45 = vadd.f32 %v208_v33, %v155_v41 }
  0xee   :  { %303 = vpow2.f32 %v210_v42  ;;  %v209_v46 = vmul.f32 -1.442695, %v164_v44  ;;  %v211_v47 = vmul.f32 -1.442695, %v166_v45 }
  0xef   :  { %305 = vpow2.f32 %v212_v43 }
  0xf0   :  { %307 = vpow2.f32 %v209_v46 }
  0xf1   :  { %309 = vpow2.f32 %v211_v47 }
  0xfb   :  { %v304_v48 = vpop.eup %303 }
  0xfc   :  { %v306_v49 = vpop.eup %305  ;;  %v181_v50 = vadd.f32 1.0, %v304_v48 }
  0xfd   :  { %v308_v51 = vpop.eup %307  ;;  %v183_v52 = vadd.f32 1.0, %v306_v49 }
  0xfe   :  { %v310_v53 = vpop.eup %309  ;;  %311 = vrcp.f32 %v181_v50  ;;  %v180_v54 = vadd.f32 1.0, %v308_v51 }
  0xff   :  { %313 = vrcp.f32 %v183_v52  ;;  %v182_v55 = vadd.f32 1.0, %v310_v53 }
 0x100   :  { %315 = vrcp.f32 %v180_v54 }
 0x101   :  { %317 = vrcp.f32 %v182_v55 }
 0x10b   :  { %v312_v56 = vpop.eup %311 }
 0x10c   :  { %v314_v57 = vpop.eup %313  ;;  %v193_v58 = vmul.f32 %v312_v56, %v165_v38 }
 0x10d   :  { %v316_v59 = vpop.eup %315  ;;  %v195_v60 = vmul.f32 %v314_v57, %v167_v39 }
 0x10e   :  { %v318_v61 = vpop.eup %317  ;;  %198 = vst.msk [vmem:[%s444_s6 + $0x8] sm:$0xff] %vm196_vm0, %v193_v58  ;;  %v192_v62 = vmul.f32 %v316_v59, %v164_v44 }
 0x10f   :  { %200 = vst.msk [vmem:[%s444_s6 + $0x18] sm:$0xff] %vm196_vm0, %v195_v60  ;;  %v194_v63 = vmul.f32 %v318_v61, %v166_v45 }
 0x110   :  { %197 = vst.msk [vmem:[%s444_s6] sm:$0xff] %vm196_vm0, %v192_v62 }
 0x111   :  { %199 = vst.msk [vmem:[%s444_s6 + $0x10] sm:$0xff] %vm196_vm0, %v194_v63 }

// kernel: _lambda_.18
= control target key start
LH: loop header
LB: loop body
LE: loop exit
PB: predicated region body
PF: predicated region fallthrough
CT: control target
= control target key end

     0   :  { %s941_s30 = smov 0   ;;  %s1052_s0 = inlined_call_operand.vmem [shape: f32[2,16,64], index: 0, kind: input, shape index: {}]   ;;  %s1053_s1 = inlined_call_operand.vmem [shape: f32[2,1,32], index: 1, kind: input, shape index: {}]   ;;  %s1054_s2 = inlined_call_operand.vmem [shape: f32[2,1,32], index: 2, kind: input, shape index: {}]   ;;  %s1055_s3 = inlined_call_operand.vmem [shape: f32[64,32], index: 3, kind: input, shape index: {}]   ;;  %s1056_s4 = inlined_call_operand.vmem [shape: f32[1,32], index: 4, kind: input, shape index: {}]   ;;  %s1057_s5 = inlined_call_operand.vmem [shape: f32[32,64], index: 5, kind: input, shape index: {}]   ;;  %s1058_s6 = inlined_call_operand.vmem [shape: f32[32,64], index: 6, kind: input, shape index: {}]   ;;  %s1059_s7 = inlined_call_operand.vmem [shape: f32[1,64], index: 7, kind: input, shape index: {}]   ;;  %s1060_s8 = inlined_call_operand.vmem [shape: f32[1,64], index: 8, kind: input, shape index: {}]   ;;  %s1061_s9 = inlined_call_operand.vmem [shape: f32[2,16,64], index: 9, kind: output, shape index: {}]  }
   0x1 LB: > { %s784_s10 = sadd.s32 4294967295, %s887_s30   ;;  %p788_p0 = scmp.ge.s32.totalorder %s887_s30, 1  ;;  %s887_s30 = sphi %s941_s30, %s19_s30  }
   0x2   : > { %p303_p1 = scmp.lt.s32.totalorder %s887_s30, 3 }
   0x4   : > { %p304_p2 = pnand %p788_p0, %p303_p1 }
   0x5   : > { %p345_p3 = scmp.lt.s32.totalorder (!%p304_p2), %s784_s10, 1  ;;  %s889_s15 = smov (!%p304_p2), 32  }
   0x6   : > { %307 = sbr.rel (%p304_p2) target bundleno = 675 (0x2a3), region = 56  ;;  %s890_s13 = smov (!%p304_p2), 96  }
   0xb   : > { %v370_v0 = vld [vmem:[%s1055_s3 + $0x38] sm:$0xff]  ;;  %v369_v1 = vld [vmem:[%s1055_s3 + $0x30] sm:$0xff]  ;;  %v368_v2 = vld [vmem:[%s1055_s3 + $0x28] sm:$0xff]  ;;  %s1063_s10 = smov (!%p345_p3, %s784_s10), 1  ;;  %vm378_vm0 = vcmask 523264   ;;  %vm528_vm1 = vcmask 261120  }
   0xc   : > { %830 = vmatprep.subr.mxu0 %v370_v0  ;;  %v367_v3 = vld [vmem:[%s1055_s3 + $0x20] sm:$0xff]  ;;  %s806_s19 = sshll.u32 %s1063_s10, 4  ;;  %v366_v4 = vld [vmem:[%s1055_s3 + $0x18] sm:$0xff]  ;;  %v365_v6 = vld [vmem:[%s1055_s3 + $0x10] sm:$0xff]  ;;  %s355_s14 = scalar_lea.vmem %s1054_s2, %s1063_s10 }
   0xd   : > { %831 = vmatpush3.msra.mxu0 %v370_v0  ;;  %s349_s22 = scalar_lea.vmem %s1052_s0, %s806_s19  ;;  %v364_v7 = vld [vmem:[%s1055_s3 + $0x8] sm:$0xff]  ;;  %v363_v8 = vld [vmem:[%s1055_s3] sm:$0xff]  ;;  %s352_s18 = scalar_lea.vmem %s1053_s1, %s1063_s10  ;;  %v521_v18 = vld [vmem:[%s1058_s6 + $0x18] sm:$0xff] }
   0xe   : > { %832 = vmatprep.subr.mxu0 %v369_v1  ;;  %v972_v5 = vld [vmem:[%s349_s22] sm:$0xff]  ;;  %v985_v9 = vld [vmem:[%s349_s22 + $0x8] sm:$0xff]  ;;  %v520_v19 = vld [vmem:[%s1058_s6 + $0x10] sm:$0xff]  ;;  %849 = vmatprep.subr.mxu1 %v521_v18  ;;  %s360_s27 = scalar_lea.vmem %s1061_s9, %s806_s19 }
   0xf   : > { %833 = vmatpush3.msra.mxu0 %v369_v1  ;;  %846 = vmatprep.mubr.msk.f32.mxu0 %vm378_vm0, %v972_v5  ;;  %v797_v10 = vld [vmem:[%s355_s14] ss:$0 sm:$0xff]  ;;  %v519_v24 = vld [vmem:[%s1058_s6 + $0x8] sm:$0xff]  ;;  %v517_v26 = vld [vmem:[%s1057_s5 + $0x18] sm:$0xff] }
  0x10   : > { %834 = vmatprep.subr.mxu0 %v368_v2  ;;  %v492_v11 = vmul.f32 %v797_v10, %v972_v5  ;;  %v493_v12 = vmul.f32 %v797_v10, %v985_v9  ;;  %v796_v13 = vld [vmem:[%s352_s18] ss:$0 sm:$0xff]  ;;  %850 = vmatpush3.msra.mxu1 %v521_v18  ;;  %v516_v40 = vld [vmem:[%s1057_s5 + $0x10] sm:$0xff]  ;;  %v515_v42 = vld [vmem:[%s1057_s5 + $0x8] sm:$0xff] }
  0x11   : > { %835 = vmatpush3.msra.mxu0 %v368_v2  ;;  %v793_v15 = vld [vmem:[%s1056_s4] ss:$0 sm:$0xff]  ;;  %851 = vmatprep.subr.mxu1 %v520_v19 }
  0x12   : > { %836 = vmatprep.subr.mxu0 %v367_v3  ;;  %496 = vrot.lane.b32.xlu0 %v492_v11, %s889_s15  ;;  %v518_v25 = vld [vmem:[%s1058_s6] sm:$0xff] }
  0x13   : > { %837 = vmatpush3.msra.mxu0 %v367_v3  ;;  %852 = vmatpush3.msra.mxu1 %v520_v19  ;;  %v514_v45 = vld [vmem:[%s1057_s5] sm:$0xff] }
  0x14   : > { %838 = vmatprep.subr.mxu0 %v366_v4  ;;  %853 = vmatprep.subr.mxu1 %v519_v24  ;;  %v802_v52 = vld [vmem:[%s1059_s7] ss:$0 sm:$0xff] }
  0x15   : > { %839 = vmatpush3.msra.mxu0 %v366_v4  ;;  %854 = vmatpush3.msra.mxu1 %v519_v24  ;;  %v803_v56 = vld [vmem:[%s1060_s8] ss:$0 sm:$0xff] }
  0x16   : > { %840 = vmatprep.subr.mxu0 %v365_v6  ;;  %498 = vrot.lane.b32.xlu0 %v493_v12, %s889_s15 }
  0x17   : > { %841 = vmatpush3.msra.mxu0 %v365_v6  ;;  %855 = vmatprep.subr.mxu1 %v518_v25 }
  0x18   : > { %842 = vmatprep.subr.mxu0 %v364_v7  ;;  %856 = vmatpush3.msra.mxu1 %v518_v25 }
  0x19   : > { %843 = vmatpush3.msra.mxu0 %v364_v7  ;;  %860 = vmatprep.subr.mxu1 %v517_v26 }
  0x1a   : > { %844 = vmatprep.subr.mxu0 %v363_v8  ;;  %468 = vrot.lane.b32.xlu0 %v796_v13, %s889_s15 }
  0x1b   : > { %845 = vmatpush3.msra.mxu0 %v363_v8 }
  0x1c   : > { %847 = vmatmul.mubr.msk.f32.vlgmr.msra.gmra.mxu0 %vm378_vm0, %v985_v9 }
  0x84   : > { %v497_v23 = vpop.permute.xlu0 %496 }
  0x85   : > { %v502_v28 = vadd.f32 %v497_v23, %v972_v5 }
  0x88   : > { %v499_v27 = vpop.permute.xlu0 %498 }
  0x89   : > { %v503_v31 = vadd.f32 %v499_v27, %v985_v9 }
  0x8c   : > { %v469_v30 = vpop.permute.xlu0 %468 }
  0x8d   : > { %v471_v33 = vmul.f32 %v469_v30, %v972_v5  ;;  %v472_v36 = vmul.f32 %v469_v30, %v985_v9 }
  0xdc   : > { %v848_v14 = vpop.f32.mrf.mxu0 }
  0xdd   : > { %v457_v20 = vadd.f32 %v848_v14, %v793_v15 }
  0xde   : > { %v451_v16 = vpop.f32.mrf.mxu0 }
  0xdf   : > { %v452_v17 = vadd.f32 %v793_v15, %v451_v16  ;;  %v461_v22 = vmax.f32 %v457_v20, 0.0 }
  0xe1   : > { %v460_v21 = vmax.f32 %v452_v17, 0.0 }
  0xe3   : > { %506 = vrot.lane.b32.xlu1 %v460_v21, %s889_s15 }
  0xe7   : > { %508 = vrot.lane.b32.xlu1 %v461_v22, %s889_s15 }
 0x155   : > { %v507_v29 = vpop.permute.xlu1 %506 }
 0x156   : > { %v512_v32 = vadd.f32 %v507_v29, %v502_v28 }
 0x158   : > { %524 = vrot.lane.b32.xlu1 %v512_v32, %s890_s13 }
 0x159   : > { %v509_v34 = vpop.permute.xlu1 %508 }
 0x15a   : > { %v513_v35 = vadd.f32 %v509_v34, %v503_v31 }
 0x15c   : > { %475 = vrot.lane.b32.xlu1 %v471_v33, %s890_s13  ;;  %526 = vrot.lane.b32.xlu0 %v513_v35, %s890_s13 }
 0x160   : > { %477 = vrot.lane.b32.xlu0 %v472_v36, %s890_s13 }
 0x1ca   : > { %v525_v37 = vpop.permute.xlu1 %524 }
 0x1cb   : > { %857 = vmatprep.mubr.msk.f32.mxu1 %vm528_vm1, %v525_v37 }
 0x1ce   : > { %v527_v38 = vpop.permute.xlu0 %526  ;;  %v476_v39 = vpop.permute.xlu1 %475 }
 0x1cf   : > { %v481_v41 = vadd.f32 %v476_v39, %v972_v5  ;;  %858 = vmatmul.mubr.msk.f32.vlgmr.msra.gmra.mxu1 %vm528_vm1, %v527_v38 }
 0x1d0   : > { %861 = vmatpush3.msra.mxu1 %v517_v26 }
 0x1d1   : > { %v483_v43 = vadd.f32 %v481_v41, %v460_v21  ;;  %862 = vmatprep.subr.mxu1 %v516_v40 }
 0x1d2   : > { %v478_v44 = vpop.permute.xlu0 %477  ;;  %863 = vmatpush3.msra.mxu1 %v516_v40 }
 0x1d3   : > { %v482_v46 = vadd.f32 %v478_v44, %v985_v9  ;;  %864 = vmatprep.subr.mxu1 %v515_v42  ;;  %868 = vmatprep.mubr.msk.f32.mxu1 %vm528_vm1, %v483_v43 }
 0x1d4   : > { %865 = vmatpush3.msra.mxu1 %v515_v42 }
 0x1d5   : > { %v484_v47 = vadd.f32 %v482_v46, %v461_v22  ;;  %866 = vmatprep.subr.mxu1 %v514_v45 }
 0x1d6   : > { %867 = vmatpush3.msra.mxu1 %v514_v45 }
 0x1d7   : > { %869 = vmatmul.mubr.msk.f32.vlgmr.msra.gmra.mxu1 %vm528_vm1, %v484_v47 }
 0x28f   : > { %v859_v48 = vpop.f32.mrf.mxu1 }
 0x291   : > { %v599_v49 = vpop.f32.mrf.mxu1 }
 0x297   : > { %v870_v50 = vpop.f32.mrf.mxu1 }
 0x298   : > { %v686_v51 = vadd.f32 %v870_v50, %v859_v48 }
 0x299   : > { %v680_v53 = vpop.f32.mrf.mxu1 }
 0x29a   : > { %v690_v54 = vmax.f32 %v686_v51, 0.0  ;;  %v681_v55 = vadd.f32 %v680_v53, %v599_v49 }
 0x29c   : > { %v699_v57 = vmul.f32 %v802_v52, %v690_v54  ;;  %v689_v58 = vmax.f32 %v681_v55, 0.0 }
 0x29e   : > { %v708_v59 = vadd.f32 %v803_v56, %v699_v57  ;;  %v698_v60 = vmul.f32 %v802_v52, %v689_v58 }
 0x2a0   : > { %710 = vst.msk [vmem:[%s360_s27 + $0x8] sm:$0xff] %vm378_vm0, %v708_v59  ;;  %v707_v61 = vadd.f32 %v803_v56, %v698_v60 }
 0x2a2   : > { %709 = vst.msk [vmem:[%s360_s27] sm:$0xff] %vm378_vm0, %v707_v61 }
 0x2a3 PF: > { %s19_s30 = sadd.s32 1, %s887_s30  }
 0x2a4   : > { %p16_p4 = scmp.ge.s32.totalorder %s19_s30, 4  }
 0x2a6   :  { %18 = sbr.rel (!%p16_p4) target bundleno = 1 (0x1), region = 92 }

// kernel: _lambda_.19
= control target key start
LH: loop header
LB: loop body
LE: loop exit
PB: predicated region body
PF: predicated region fallthrough
CT: control target
= control target key end

     0   :  { %v687_v1 = vmov 0.0   ;;  %vm65_vm0 = vcmask 130048   ;;  %s974_s0 = inlined_call_operand.vmem [shape: f32[32,64], index: 0, kind: input, shape index: {}]   ;;  %s975_s1 = inlined_call_operand.vmem [shape: f32[32,144], index: 1, kind: input, shape index: {}]   ;;  %s976_s2 = inlined_call_operand.vmem [shape: f32[144,16], index: 2, kind: input, shape index: {}]   ;;  %s977_s3 = inlined_call_operand.vmem [shape: f32[16,128], index: 3, kind: input, shape index: {}]   ;;  %s978_s4 = inlined_call_operand.vmem [shape: f32[64,128], index: 4, kind: input, shape index: {}]   ;;  %s979_s5 = inlined_call_operand.vmem [shape: f32[1,128], index: 5, kind: input, shape index: {}]   ;;  %s980_s6 = inlined_call_operand.vmem [shape: f32[128,64], index: 6, kind: input, shape index: {}]   ;;  %s981_s7 = inlined_call_operand.vmem [shape: f32[1,64], index: 7, kind: input, shape index: {}]   ;;  %s982_s8 = inlined_call_operand.vmem [shape: f32[1,64], index: 8, kind: input, shape index: {}]   ;;  %s983_s9 = inlined_call_operand.vmem [shape: f32[32,64], index: 9, kind: output, shape index: {0}]   ;;  %s984_s10 = inlined_call_operand.hbm [shape: f32[32,64], index: 10, kind: output, shape index: {1}]  }
   0x1   :  { %v62_v0 = vld [vmem:[%s976_s2 + $0x78] sm:$0xff]  ;;  %78 = vmatprep.subr.mxu0 %v687_v1  ;;  %v61_v2 = vld [vmem:[%s976_s2 + $0x70] sm:$0xff]  ;;  %v60_v3 = vld [vmem:[%s976_s2 + $0x68] sm:$0xff] }
   0x2   :  { %79 = vmatpush1.msra.mxu0 %v62_v0  ;;  %v59_v4 = vld [vmem:[%s976_s2 + $0x60] sm:$0xff]  ;;  %v40_v5 = vld [vmem:[%s975_s1 + $0x8] sm:$0xff]  ;;  %v58_v6 = vld [vmem:[%s976_s2 + $0x58] sm:$0xff] }
   0x3   :  { %80 = vmatprep.subr.mxu0 %v687_v1  ;;  %538 = vmatprep.mubr.msk.f32.mxu0 %vm65_vm0, %v40_v5  ;;  %v57_v7 = vld [vmem:[%s976_s2 + $0x50] sm:$0xff] }
   0x4   :  { %81 = vmatpush1.msra.mxu0 %v61_v2 }
   0x5   :  { %82 = vmatprep.subr.mxu0 %v687_v1 }
   0x6   :  { %83 = vmatpush1.msra.mxu0 %v60_v3 }
   0x7   :  { %84 = vmatprep.subr.mxu0 %v687_v1 }
   0x8   :  { %85 = vmatpush1.msra.mxu0 %v59_v4 }
   0x9   :  { %86 = vmatprep.subr.mxu0 %v687_v1 }
   0xa   :  { %87 = vmatpush1.msra.mxu0 %v58_v6 }
   0xb   :  { %16 = vsyncpa [#allocation3], 0  ;;  %88 = vmatprep.subr.mxu0 %v687_v1  ;;  %v56_v8 = vld [vmem:[%s976_s2 + $0x48] sm:$0xff]  ;;  %v55_v9 = vld [vmem:[%s976_s2 + $0x40] sm:$0xff]  ;;  %vm173_vm1 = vcmask 523264  }
   0xc   :  { %89 = vmatpush1.msra.mxu0 %v57_v7  ;;  %v54_v10 = vld [vmem:[%s976_s2 + $0x38] sm:$0xff]  ;;  %v53_v11 = vld [vmem:[%s976_s2 + $0x30] sm:$0xff]  ;;  %v52_v12 = vld [vmem:[%s976_s2 + $0x28] sm:$0xff] }
   0xd   :  { %90 = vmatprep.subr.mxu0 %v687_v1  ;;  %v51_v13 = vld [vmem:[%s976_s2 + $0x20] sm:$0xff]  ;;  %v50_v14 = vld [vmem:[%s976_s2 + $0x18] sm:$0xff]  ;;  %v49_v15 = vld [vmem:[%s976_s2 + $0x10] sm:$0xff] }
   0xe   :  { %91 = vmatpush1.msra.mxu0 %v56_v8  ;;  %v48_v16 = vld [vmem:[%s976_s2 + $0x8] sm:$0xff]  ;;  %v47_v17 = vld [vmem:[%s976_s2] sm:$0xff]  ;;  %v172_v21 = vld [vmem:[%s978_s4 + $0x38] sm:$0xff] }
   0xf   :  { %92 = vmatprep.subr.mxu0 %v687_v1  ;;  %v64_v18 = vld [vmem:[%s976_s2 + $0x88] sm:$0xff]  ;;  %v63_v19 = vld [vmem:[%s976_s2 + $0x80] sm:$0xff]  ;;  %v42_v22 = vld [vmem:[%s975_s1 + $0x18] sm:$0xff] }
  0x10   :  { %93 = vmatpush1.msra.mxu0 %v55_v9  ;;  %v39_v20 = vld [vmem:[%s975_s1] sm:$0xff]  ;;  %v171_v23 = vld [vmem:[%s978_s4 + $0x30] sm:$0xff]  ;;  %v170_v25 = vld [vmem:[%s978_s4 + $0x28] sm:$0xff] }
  0x11   :  { %94 = vmatprep.subr.mxu0 %v687_v1  ;;  %v41_v24 = vld [vmem:[%s975_s1 + $0x10] sm:$0xff]  ;;  %v44_v26 = vld [vmem:[%s975_s1 + $0x28] sm:$0xff]  ;;  %v169_v27 = vld [vmem:[%s978_s4 + $0x20] sm:$0xff] }
  0x12   :  { %95 = vmatpush1.msra.mxu0 %v54_v10  ;;  %v43_v28 = vld [vmem:[%s975_s1 + $0x20] sm:$0xff]  ;;  %v168_v29 = vld [vmem:[%s978_s4 + $0x18] sm:$0xff]  ;;  %v167_v31 = vld [vmem:[%s978_s4 + $0x10] sm:$0xff] }
  0x13   :  { %96 = vmatprep.subr.mxu0 %v687_v1  ;;  %v46_v30 = vld [vmem:[%s975_s1 + $0x38] sm:$0xff]  ;;  %v45_v32 = vld [vmem:[%s975_s1 + $0x30] sm:$0xff]  ;;  %v166_v33 = vld [vmem:[%s978_s4 + $0x8] sm:$0xff]  ;;  %s688_s1 = smov [#allocation2]  }
  0x14   :  { %97 = vmatpush1.msra.mxu0 %v53_v11  ;;  %v164_v34 = vld [vmem:[%s977_s3 + $0x8] sm:$0xff]  ;;  %v165_v35 = vld [vmem:[%s978_s4] sm:$0xff]  ;;  %v875_v39 = vld [vmem:[%s974_s0 + $0x10] sm:$0xff]  ;;  %s525_s21 = sshll.u32 %s688_s1, 4  ;;  %s526_s21 = int_to_ptr.vmem [resolvable:$true] %s525_s21 }
  0x15   :  { %98 = vmatprep.subr.mxu0 %v687_v1  ;;  %613 = vmatprep.subr.mxu1 %v164_v34  ;;  %v163_v36 = vld [vmem:[%s977_s3] sm:$0xff]  ;;  %v868_v38 = vld [vmem:[%s974_s0 + $0x8] sm:$0xff]  ;;  %v882_v40 = vld [vmem:[%s974_s0 + $0x18] sm:$0xff]  ;;  %s665_s24 = scalar_lea.vmem %s526_s21, 512  ;;  %p670_p1 = scmp.lt.s32.totalorder %s526_s21, %s526_s21 }
  0x16   :  { %99 = vmatpush1.msra.mxu0 %v52_v12  ;;  %614 = vmatpush3.msra.mxu1 %v164_v34  ;;  %v861_v37 = vld [vmem:[%s974_s0] sm:$0xff]  ;;  %v398_v41 = vld [vmem:[%s980_s6 + $0x78] sm:$0xff]  ;;  %v397_v45 = vld [vmem:[%s980_s6 + $0x70] sm:$0xff]  ;;  %p666_p0 = scmp.ne.s32.totalorder %s526_s21, %s665_s24  ;;  %p671_p2 = scmp.lt.s32.totalorder %s665_s24, %s665_s24 }
  0x17   :  { %100 = vmatprep.subr.mxu0 %v687_v1  ;;  %615 = vmatprep.subr.mxu1 %v163_v36  ;;  %v396_v47 = vld [vmem:[%s980_s6 + $0x68] sm:$0xff]  ;;  %v395_v49 = vld [vmem:[%s980_s6 + $0x60] sm:$0xff]  ;;  %v394_v51 = vld [vmem:[%s980_s6 + $0x58] sm:$0xff] }
  0x18   :  { %101 = vmatpush1.msra.mxu0 %v51_v13  ;;  %616 = vmatpush3.msra.mxu1 %v163_v36  ;;  %v393_v53 = vld [vmem:[%s980_s6 + $0x50] sm:$0xff]  ;;  %v392_v55 = vld [vmem:[%s980_s6 + $0x48] sm:$0xff]  ;;  %v391_v56 = vld [vmem:[%s980_s6 + $0x40] sm:$0xff]  ;;  %p672_p3 = por %p671_p2, %p670_p1 }
  0x19   :  { %102 = vmatprep.subr.mxu0 %v687_v1  ;;  %623 = vmatprep.subr.mxu1 %v398_v41  ;;  %v390_v57 = vld [vmem:[%s980_s6 + $0x38] sm:$0xff]  ;;  %v389_v58 = vld [vmem:[%s980_s6 + $0x30] sm:$0xff]  ;;  %v388_v59 = vld [vmem:[%s980_s6 + $0x28] sm:$0xff] }
  0x1a   :  { %103 = vmatpush1.msra.mxu0 %v50_v14  ;;  %v387_v60 = vld [vmem:[%s980_s6 + $0x20] sm:$0xff]  ;;  %v386_v61 = vld [vmem:[%s980_s6 + $0x18] sm:$0xff]  ;;  %v385_v62 = vld [vmem:[%s980_s6 + $0x10] sm:$0xff]  ;;  %p673_p4 = pnand %p672_p3, %p666_p0 }
  0x1b   :  { %104 = vmatprep.subr.mxu0 %v687_v1  ;;  %v384_v63 = vld [vmem:[%s980_s6 + $0x8] sm:$0xff]  ;;  %v383_v0 = vld [vmem:[%s980_s6] sm:$0xff] }
  0x1c   :  { %105 = vmatpush1.msra.mxu0 %v49_v15  ;;  %v550_v5 = vld [vmem:[%s979_s5] ss:$0 sm:$0xff] }
  0x1d   :  { %106 = vmatprep.subr.mxu0 %v687_v1 }
  0x1e   :  { %107 = vmatpush1.msra.mxu0 %v48_v16 }
  0x1f   :  { %108 = vmatprep.subr.mxu0 %v687_v1 }
  0x20   :  { %109 = vmatpush1.msra.mxu0 %v47_v17 }
  0x21   :  { %138 = vmatprep.subr.mxu0 %v687_v1 }
  0x22   :  { %139 = vmatpush2.msra.mxu0 %v64_v18 }
  0x23   :  { %140 = vmatprep.subr.mxu0 %v687_v1 }
  0x24   :  { %141 = vmatpush2.msra.mxu0 %v63_v19 }
  0x25   :  { %143 = vmatmul.mubr.f32.vlgmr.msra.gmra.mxu0 %v39_v20  ;;  %591 = vmatprep.subr.mxu0 %v172_v21 }
  0x26   :  { %539 = vmatprep.mubr.msk.f32.mxu0 %vm65_vm0, %v42_v22  ;;  %592 = vmatpush3.msra.mxu0 %v172_v21 }
  0x27   :  { %593 = vmatprep.subr.mxu0 %v171_v23 }
  0x28   :  { %594 = vmatpush3.msra.mxu0 %v171_v23  ;;  %v551_v23 = vld [vmem:[%s981_s7] ss:$0 sm:$0xff] }
  0x29   :  { %148 = vmatmul.mubr.f32.gmra.mxu0 %v41_v24  ;;  %595 = vmatprep.subr.mxu0 %v170_v25 }
  0x2a   :  { %540 = vmatprep.mubr.msk.f32.mxu0 %vm65_vm0, %v44_v26  ;;  %596 = vmatpush3.msra.mxu0 %v170_v25  ;;  %v552_v25 = vld [vmem:[%s982_s8] ss:$0 sm:$0xff] }
  0x2b   :  { %597 = vmatprep.subr.mxu0 %v169_v27 }
  0x2c   :  { %598 = vmatpush3.msra.mxu0 %v169_v27 }
  0x2d   :  { %153 = vmatmul.mubr.f32.gmra.mxu0 %v43_v28  ;;  %599 = vmatprep.subr.mxu0 %v168_v29 }
  0x2e   :  { %541 = vmatprep.mubr.msk.f32.mxu0 %vm65_vm0, %v46_v30  ;;  %600 = vmatpush3.msra.mxu0 %v168_v29 }
  0x2f   :  { %601 = vmatprep.subr.mxu0 %v167_v31 }
  0x30   :  { %602 = vmatpush3.msra.mxu0 %v167_v31 }
  0x31   :  { %158 = vmatmul.mubr.f32.gmra.mxu0 %v45_v32  ;;  %603 = vmatprep.subr.mxu0 %v166_v33 }
  0x32   :  { %604 = vmatpush3.msra.mxu0 %v166_v33  ;;  %607 = vmatprep.mubr.msk.f32.mxu0 %vm173_vm1, %v861_v37 }
  0x33   :  { %605 = vmatprep.subr.mxu0 %v165_v35 }
  0x34   :  { %606 = vmatpush3.msra.mxu0 %v165_v35 }
  0x35   :  { %608 = vmatmul.mubr.msk.f32.vlgmr.msra.gmra.mxu0 %vm173_vm1, %v868_v38 }
  0x36   :  { %610 = vmatprep.mubr.msk.f32.mxu0 %vm173_vm1, %v875_v39 }
  0x39   :  { %611 = vmatmul.mubr.msk.f32.gmra.mxu0 %vm173_vm1, %v882_v40 }
  0xe5   :  { %v144_v42 = vpop.f32.mrf.mxu0 }
  0xe6   :  { %617 = vmatprep.mubr.msk.f32.mxu1 %vm65_vm0, %v144_v42 }
  0xe7   :  { %v146_v43 = vpop.f32.mrf.mxu0 }
  0xe9   :  { %v149_v44 = vpop.f32.mrf.mxu0 }
  0xea   :  { %618 = vmatmul.mubr.msk.f32.vlgmr.msra.gmra.mxu1 %vm65_vm0, %v149_v44 }
  0xeb   :  { %v151_v46 = vpop.f32.mrf.mxu0  ;;  %624 = vmatpush3.msra.mxu1 %v398_v41 }
  0xec   :  { %625 = vmatprep.subr.mxu1 %v397_v45 }
  0xed   :  { %v154_v48 = vpop.f32.mrf.mxu0  ;;  %626 = vmatpush3.msra.mxu1 %v397_v45 }
  0xee   :  { %620 = vmatprep.mubr.msk.f32.mxu1 %vm65_vm0, %v154_v48  ;;  %627 = vmatprep.subr.mxu1 %v396_v47 }
  0xef   :  { %v156_v50 = vpop.f32.mrf.mxu0  ;;  %628 = vmatpush3.msra.mxu1 %v396_v47 }
  0xf0   :  { %629 = vmatprep.subr.mxu1 %v395_v49 }
  0xf1   :  { %v159_v52 = vpop.f32.mrf.mxu0  ;;  %630 = vmatpush3.msra.mxu1 %v395_v49 }
  0xf2   :  { %621 = vmatmul.mubr.msk.f32.gmra.mxu1 %vm65_vm0, %v159_v52  ;;  %631 = vmatprep.subr.mxu1 %v394_v51 }
  0xf3   :  { %v161_v54 = vpop.f32.mrf.mxu0  ;;  %632 = vmatpush3.msra.mxu1 %v394_v51 }
  0xf4   :  { %633 = vmatprep.subr.mxu1 %v393_v53 }
  0xf5   :  { %634 = vmatpush3.msra.mxu1 %v393_v53  ;;  %v609_v1 = vpop.f32.mrf.mxu0 }
  0xf6   :  { %635 = vmatprep.subr.mxu1 %v392_v55 }
  0xf7   :  { %636 = vmatpush3.msra.mxu1 %v392_v55  ;;  %v252_v3 = vpop.f32.mrf.mxu0 }
  0xf8   :  { %637 = vmatprep.subr.mxu1 %v391_v56 }
  0xf9   :  { %638 = vmatpush3.msra.mxu1 %v391_v56  ;;  %v612_v10 = vpop.f32.mrf.mxu0 }
  0xfa   :  { %639 = vmatprep.subr.mxu1 %v390_v57 }
  0xfb   :  { %640 = vmatpush3.msra.mxu1 %v390_v57  ;;  %v262_v15 = vpop.f32.mrf.mxu0 }
  0xfc   :  { %641 = vmatprep.subr.mxu1 %v389_v58 }
  0xfd   :  { %642 = vmatpush3.msra.mxu1 %v389_v58 }
  0xfe   :  { %643 = vmatprep.subr.mxu1 %v388_v59 }
  0xff   :  { %644 = vmatpush3.msra.mxu1 %v388_v59 }
 0x100   :  { %645 = vmatprep.subr.mxu1 %v387_v60 }
 0x101   :  { %646 = vmatpush3.msra.mxu1 %v387_v60 }
 0x102   :  { %647 = vmatprep.subr.mxu1 %v386_v61 }
 0x103   :  { %648 = vmatpush3.msra.mxu1 %v386_v61 }
 0x104   :  { %649 = vmatprep.subr.mxu1 %v385_v62 }
 0x105   :  { %650 = vmatpush3.msra.mxu1 %v385_v62 }
 0x106   :  { %651 = vmatprep.subr.mxu1 %v384_v63 }
 0x107   :  { %652 = vmatpush3.msra.mxu1 %v384_v63 }
 0x108   :  { %653 = vmatprep.subr.mxu1 %v383_v0 }
 0x109   :  { %654 = vmatpush3.msra.mxu1 %v383_v0 }
 0x1aa   :  { %v619_v2 = vpop.f32.mrf.mxu1 }
 0x1ab   :  { %v355_v4 = vadd.f32 %v619_v2, %v609_v1 }
 0x1ac   :  { %v349_v6 = vpop.f32.mrf.mxu1 }
 0x1ad   :  { %v350_v7 = vadd.f32 %v349_v6, %v252_v3  ;;  %v376_v8 = vadd.f32 %v550_v5, %v355_v4 }
 0x1af   :  { %v375_v9 = vadd.f32 %v550_v5, %v350_v7  ;;  %v380_v12 = vmax.f32 %v376_v8, 0.0 }
 0x1b1   :  { %v379_v11 = vmax.f32 %v375_v9, 0.0 }
 0x1b2   :  { %v622_v13 = vpop.f32.mrf.mxu1 }
 0x1b3   :  { %v365_v14 = vadd.f32 %v622_v13, %v612_v10  ;;  %655 = vmatprep.mubr.f32.mxu1 %v379_v11 }
 0x1b4   :  { %v359_v16 = vpop.f32.mrf.mxu1  ;;  %656 = vmatmul.mubr.f32.vlgmr.msra.gmra.mxu1 %v380_v12 }
 0x1b5   :  { %v360_v17 = vadd.f32 %v359_v16, %v262_v15  ;;  %v378_v18 = vadd.f32 %v550_v5, %v365_v14 }
 0x1b7   :  { %v377_v19 = vadd.f32 %v550_v5, %v360_v17  ;;  %v382_v21 = vmax.f32 %v378_v18, 0.0 }
 0x1b9   :  { %v381_v20 = vmax.f32 %v377_v19, 0.0 }
 0x1bb   :  { %658 = vmatprep.mubr.f32.mxu1 %v381_v20 }
 0x1bc   :  { %659 = vmatmul.mubr.f32.gmra.mxu1 %v382_v21 }
 0x274   :  { %v657_v22 = vpop.f32.mrf.mxu1 }
 0x275   :  { %v485_v24 = vadd.f32 %v657_v22, %v868_v38 }
 0x276   :  { %v465_v26 = vpop.f32.mrf.mxu1 }
 0x277   :  { %489 = vst.msk [vmem:[%s983_s9 + $0x8] sm:$0xff] %vm173_vm1, %v485_v24  ;;  %v500_v27 = vmul.f32 %v551_v23, %v485_v24  ;;  %v484_v28 = vadd.f32 %v465_v26, %v861_v37 }
 0x279   :  { %v511_v29 = vadd.f32 %v552_v25, %v500_v27  ;;  %488 = vst.msk [vmem:[%s983_s9] sm:$0xff] %vm173_vm1, %v484_v28  ;;  %v499_v30 = vmul.f32 %v551_v23, %v484_v28 }
 0x27b   :  { %515 = vst.msk [vmem:[#allocation2 + $0x8] sm:$0xff] %vm173_vm1, %v511_v29  ;;  %v510_v31 = vadd.f32 %v552_v25, %v499_v30 }
 0x27c   :  { %v660_v32 = vpop.f32.mrf.mxu1 }
 0x27d   :  { %514 = vst.msk [vmem:[#allocation2] sm:$0xff] %vm173_vm1, %v510_v31  ;;  %v487_v33 = vadd.f32 %v660_v32, %v882_v40 }
 0x27e   :  { %v475_v34 = vpop.f32.mrf.mxu1 }
 0x27f   :  { %491 = vst.msk [vmem:[%s983_s9 + $0x18] sm:$0xff] %vm173_vm1, %v487_v33  ;;  %v502_v35 = vmul.f32 %v551_v23, %v487_v33  ;;  %v486_v36 = vadd.f32 %v475_v34, %v875_v39 }
 0x281   :  { %v513_v37 = vadd.f32 %v552_v25, %v502_v35  ;;  %490 = vst.msk [vmem:[%s983_s9 + $0x10] sm:$0xff] %vm173_vm1, %v486_v36  ;;  %v501_v38 = vmul.f32 %v551_v23, %v486_v36 }
 0x283   :  { %517 = vst.msk [vmem:[#allocation2 + $0x18] sm:$0xff] %vm173_vm1, %v513_v37  ;;  %v512_v40 = vadd.f32 %v552_v25, %v501_v38 }
 0x285   :  { %516 = vst.msk [vmem:[#allocation2 + $0x10] sm:$0xff] %vm173_vm1, %v512_v40 }
 0x286   :  { %676 = shalt.err (!%p673_p4)
}
 0x287   :  { %s689_s25 = smov 128   ;;  %s690_s3 = smov 8  }
 0x288   :  { %531 = dma.vmem_to_hbm [thread:$0]  %s526_s21, 512, %s984_s10, [#allocation3], %s689_s25, %s689_s25, %s690_s3  }
 0x289   :  { %685 = dma.done.wait [#allocation3], 512  }
 0x28a   :  { %686 = vsyncadd [#allocation3], 4294966784 }
 0x28b   :  { %537 = vsyncpa [#allocation3], 1 }

// kernel: _lambda_.20
= control target key start
LH: loop header
LB: loop body
LE: loop exit
PB: predicated region body
PF: predicated region fallthrough
CT: control target
= control target key end

     0   :  { %s294_s1 = inlined_call_operand.vmem [shape: f32[256,128], index: 1, kind: input, shape index: {}]   ;;  %s295_s0 = inlined_call_operand.vmem [shape: f32[8,256], index: 0, kind: input, shape index: {}]   ;;  %s296_s2 = inlined_call_operand.vmem [shape: f32[1,128], index: 2, kind: input, shape index: {}]   ;;  %s297_s3 = inlined_call_operand.vmem [shape: f32[8,128], index: 3, kind: output, shape index: {}]  }
   0x1   :  { %v47_v0 = vld [vmem:[%s294_s1 + $0xf8] sm:$0xff]  ;;  %v46_v2 = vld [vmem:[%s294_s1 + $0xf0] sm:$0xff]  ;;  %v45_v4 = vld [vmem:[%s294_s1 + $0xe8] sm:$0xff] }
   0x2   :  { %v31_v1 = vld [vmem:[%s294_s1 + $0x78] sm:$0xff]  ;;  %131 = vmatprep.subr.mxu0 %v47_v0  ;;  %v30_v3 = vld [vmem:[%s294_s1 + $0x70] sm:$0xff]  ;;  %v29_v5 = vld [vmem:[%s294_s1 + $0x68] sm:$0xff] }
   0x3   :  { %132 = vmatpush3.msra.mxu0 %v31_v1  ;;  %v44_v6 = vld [vmem:[%s294_s1 + $0xe0] sm:$0xff]  ;;  %v43_v8 = vld [vmem:[%s294_s1 + $0xd8] sm:$0xff]  ;;  %v42_v10 = vld [vmem:[%s294_s1 + $0xd0] sm:$0xff] }
   0x4   :  { %133 = vmatprep.subr.mxu0 %v46_v2  ;;  %v28_v7 = vld [vmem:[%s294_s1 + $0x60] sm:$0xff]  ;;  %v27_v9 = vld [vmem:[%s294_s1 + $0x58] sm:$0xff]  ;;  %v26_v11 = vld [vmem:[%s294_s1 + $0x50] sm:$0xff] }
   0x5   :  { %134 = vmatpush3.msra.mxu0 %v30_v3  ;;  %v41_v12 = vld [vmem:[%s294_s1 + $0xc8] sm:$0xff]  ;;  %v40_v15 = vld [vmem:[%s294_s1 + $0xc0] sm:$0xff]  ;;  %v39_v17 = vld [vmem:[%s294_s1 + $0xb8] sm:$0xff] }
   0x6   :  { %135 = vmatprep.subr.mxu0 %v45_v4  ;;  %v15_v13 = vld [vmem:[%s295_s0 + $0x8] sm:$0xff]  ;;  %v24_v16 = vld [vmem:[%s294_s1 + $0x40] sm:$0xff]  ;;  %v23_v18 = vld [vmem:[%s294_s1 + $0x38] sm:$0xff] }
   0x7   :  { %136 = vmatpush3.msra.mxu0 %v29_v5  ;;  %v25_v14 = vld [vmem:[%s294_s1 + $0x48] sm:$0xff]  ;;  %119 = vmatprep.mubr.f32.mxu0 %v15_v13  ;;  %v38_v19 = vld [vmem:[%s294_s1 + $0xb0] sm:$0xff]  ;;  %v36_v23 = vld [vmem:[%s294_s1 + $0xa0] sm:$0xff] }
   0x8   :  { %137 = vmatprep.subr.mxu0 %v44_v6  ;;  %v22_v20 = vld [vmem:[%s294_s1 + $0x30] sm:$0xff]  ;;  %v37_v21 = vld [vmem:[%s294_s1 + $0xa8] sm:$0xff]  ;;  %v20_v24 = vld [vmem:[%s294_s1 + $0x20] sm:$0xff] }
   0x9   :  { %138 = vmatpush3.msra.mxu0 %v28_v7  ;;  %v21_v22 = vld [vmem:[%s294_s1 + $0x28] sm:$0xff]  ;;  %v35_v25 = vld [vmem:[%s294_s1 + $0x98] sm:$0xff]  ;;  %v34_v27 = vld [vmem:[%s294_s1 + $0x90] sm:$0xff] }
   0xa   :  { %139 = vmatprep.subr.mxu0 %v43_v8  ;;  %v19_v26 = vld [vmem:[%s294_s1 + $0x18] sm:$0xff]  ;;  %v18_v28 = vld [vmem:[%s294_s1 + $0x10] sm:$0xff]  ;;  %v33_v29 = vld [vmem:[%s294_s1 + $0x88] sm:$0xff] }
   0xb   :  { %140 = vmatpush3.msra.mxu0 %v27_v9  ;;  %v17_v30 = vld [vmem:[%s294_s1 + $0x8] sm:$0xff]  ;;  %v32_v31 = vld [vmem:[%s294_s1 + $0x80] sm:$0xff] }
   0xc   :  { %141 = vmatprep.subr.mxu0 %v42_v10  ;;  %v16_v32 = vld [vmem:[%s294_s1] sm:$0xff] }
   0xd   :  { %142 = vmatpush3.msra.mxu0 %v26_v11  ;;  %v14_v33 = vld [vmem:[%s295_s0] sm:$0xff] }
   0xe   :  { %143 = vmatprep.subr.mxu0 %v41_v12  ;;  %v130_v35 = vld [vmem:[%s296_s2] ss:$0 sm:$0xff] }
   0xf   :  { %144 = vmatpush3.msra.mxu0 %v25_v14 }
  0x10   :  { %145 = vmatprep.subr.mxu0 %v40_v15 }
  0x11   :  { %146 = vmatpush3.msra.mxu0 %v24_v16 }
  0x12   :  { %147 = vmatprep.subr.mxu0 %v39_v17 }
  0x13   :  { %148 = vmatpush3.msra.mxu0 %v23_v18 }
  0x14   :  { %149 = vmatprep.subr.mxu0 %v38_v19 }
  0x15   :  { %150 = vmatpush3.msra.mxu0 %v22_v20 }
  0x16   :  { %151 = vmatprep.subr.mxu0 %v37_v21 }
  0x17   :  { %152 = vmatpush3.msra.mxu0 %v21_v22 }
  0x18   :  { %153 = vmatprep.subr.mxu0 %v36_v23 }
  0x19   :  { %154 = vmatpush3.msra.mxu0 %v20_v24 }
  0x1a   :  { %155 = vmatprep.subr.mxu0 %v35_v25 }
  0x1b   :  { %156 = vmatpush3.msra.mxu0 %v19_v26 }
  0x1c   :  { %157 = vmatprep.subr.mxu0 %v34_v27 }
  0x1d   :  { %158 = vmatpush3.msra.mxu0 %v18_v28 }
  0x1e   :  { %159 = vmatprep.subr.mxu0 %v33_v29 }
  0x1f   :  { %160 = vmatpush3.msra.mxu0 %v17_v30 }
  0x20   :  { %161 = vmatprep.subr.mxu0 %v32_v31 }
  0x21   :  { %162 = vmatpush3.msra.mxu0 %v16_v32 }
  0x22   :  { %120 = vmatmul.mubr.f32.vlgmr.msra.gmra.mxu0 %v14_v33 }
  0xe2   :  { %v163_v34 = vpop.f32.mrf.mxu0 }
  0xe4   :  { %v164_v36 = vpop.f32.mrf.mxu0 }
  0xe5   :  { %v165_v37 = vadd.f32 %v164_v36, %v163_v34 }
  0xe7   :  { %v122_v38 = vadd.f32 %v165_v37, %v130_v35 }
  0xe9   :  { %125 = vst [vmem:[%s297_s3] sm:$0xff] %v122_v38 }

// kernel: _lambda_.21
= control target key start
LH: loop header
LB: loop body
LE: loop exit
PB: predicated region body
PF: predicated region fallthrough
CT: control target
= control target key end

     0   :  { %16 = vsyncpa [#allocation3], 0  ;;  %v708_v4 = vmov 0.0   ;;  %vm709_vm0 = vmmov 0   ;;  %vm76_vm1 = vcmask 261120   ;;  %s1131_s0 = inlined_call_operand.vmem [shape: f32[8,128], index: 0, kind: input, shape index: {}]   ;;  %s1132_s1 = inlined_call_operand.vmem [shape: f32[8,288], index: 1, kind: input, shape index: {}]   ;;  %s1133_s2 = inlined_call_operand.vmem [shape: f32[288,32], index: 2, kind: input, shape index: {}]   ;;  %s1134_s3 = inlined_call_operand.vmem [shape: f32[32,256], index: 3, kind: input, shape index: {}]   ;;  %s1135_s4 = inlined_call_operand.vmem [shape: f32[128,256], index: 4, kind: input, shape index: {}]   ;;  %s1136_s5 = inlined_call_operand.vmem [shape: f32[1,256], index: 5, kind: input, shape index: {}]   ;;  %s1137_s6 = inlined_call_operand.vmem [shape: f32[256,128], index: 6, kind: input, shape index: {}]   ;;  %s1138_s7 = inlined_call_operand.vmem [shape: f32[1,128], index: 7, kind: input, shape index: {}]   ;;  %s1139_s8 = inlined_call_operand.vmem [shape: f32[1,128], index: 8, kind: input, shape index: {}]   ;;  %s1140_s9 = inlined_call_operand.hbm [shape: f32[8,128], index: 9, kind: output, shape index: {0}]   ;;  %s1141_s10 = inlined_call_operand.hbm [shape: f32[8,128], index: 10, kind: output, shape index: {1}]  }
   0x1   :  { %v71_v0 = vld [vmem:[%s1133_s2 + $0xf8] sm:$0xff]  ;;  %v70_v2 = vld [vmem:[%s1133_s2 + $0xf0] sm:$0xff]  ;;  %649 = vmatprep.subr.mxu1 %v708_v4  ;;  %v69_v5 = vld [vmem:[%s1133_s2 + $0xe8] sm:$0xff]  ;;  %657 = vmatprep.mubr.msk.f32.mxu1 %vm709_vm0, %v708_v4 }
   0x2   :  { %v55_v1 = vld [vmem:[%s1133_s2 + $0x78] sm:$0xff]  ;;  %574 = vmatprep.subr.mxu0 %v71_v0  ;;  %v54_v3 = vld [vmem:[%s1133_s2 + $0x70] sm:$0xff]  ;;  %v53_v6 = vld [vmem:[%s1133_s2 + $0x68] sm:$0xff] }
   0x3   :  { %575 = vmatpush3.msra.mxu0 %v55_v1  ;;  %v68_v7 = vld [vmem:[%s1133_s2 + $0xe0] sm:$0xff]  ;;  %v67_v9 = vld [vmem:[%s1133_s2 + $0xd8] sm:$0xff]  ;;  %v66_v11 = vld [vmem:[%s1133_s2 + $0xd0] sm:$0xff] }
   0x4   :  { %576 = vmatprep.subr.mxu0 %v70_v2  ;;  %v52_v8 = vld [vmem:[%s1133_s2 + $0x60] sm:$0xff]  ;;  %v51_v10 = vld [vmem:[%s1133_s2 + $0x58] sm:$0xff]  ;;  %v50_v12 = vld [vmem:[%s1133_s2 + $0x50] sm:$0xff] }
   0x5   :  { %577 = vmatpush3.msra.mxu0 %v54_v3  ;;  %v75_v13 = vld [vmem:[%s1133_s2 + $0x118] sm:$0xff]  ;;  %v65_v14 = vld [vmem:[%s1133_s2 + $0xc8] sm:$0xff]  ;;  %v74_v15 = vld [vmem:[%s1133_s2 + $0x110] sm:$0xff] }
   0x6   :  { %578 = vmatprep.subr.mxu0 %v69_v5  ;;  %650 = vmatpush3.msra.mxu1 %v75_v13  ;;  %v49_v16 = vld [vmem:[%s1133_s2 + $0x48] sm:$0xff]  ;;  %v64_v18 = vld [vmem:[%s1133_s2 + $0xc0] sm:$0xff]  ;;  %v63_v21 = vld [vmem:[%s1133_s2 + $0xb8] sm:$0xff] }
   0x7   :  { %579 = vmatpush3.msra.mxu0 %v53_v6  ;;  %651 = vmatprep.subr.mxu1 %v708_v4  ;;  %v38_v17 = vld [vmem:[%s1132_s1 + $0x8] sm:$0xff]  ;;  %v48_v20 = vld [vmem:[%s1133_s2 + $0x40] sm:$0xff]  ;;  %v47_v23 = vld [vmem:[%s1133_s2 + $0x38] sm:$0xff] }
   0x8   :  { %580 = vmatprep.subr.mxu0 %v68_v7  ;;  %652 = vmatpush3.msra.mxu1 %v74_v15  ;;  %v73_v19 = vld [vmem:[%s1133_s2 + $0x108] sm:$0xff]  ;;  %v72_v22 = vld [vmem:[%s1133_s2 + $0x100] sm:$0xff]  ;;  %v39_v24 = vld [vmem:[%s1132_s1 + $0x10] sm:$0xff] }
   0x9   :  { %581 = vmatpush3.msra.mxu0 %v52_v8  ;;  %653 = vmatprep.subr.mxu1 %v708_v4  ;;  %v62_v25 = vld [vmem:[%s1133_s2 + $0xb0] sm:$0xff]  ;;  %v259_v26 = vld [vmem:[%s1135_s4 + $0xf8] sm:$0xff]  ;;  %v61_v29 = vld [vmem:[%s1133_s2 + $0xa8] sm:$0xff] }
   0xa   :  { %582 = vmatprep.subr.mxu0 %v67_v9  ;;  %144 = vmatprep.mubr.f32.mxu0 %v38_v17  ;;  %v46_v27 = vld [vmem:[%s1133_s2 + $0x30] sm:$0xff]  ;;  %v257_v30 = vld [vmem:[%s1135_s4 + $0xe8] sm:$0xff]  ;;  %v256_v32 = vld [vmem:[%s1135_s4 + $0xe0] sm:$0xff] }
   0xb   :  { %583 = vmatpush3.msra.mxu0 %v51_v10  ;;  %654 = vmatpush3.msra.mxu1 %v73_v19  ;;  %v258_v28 = vld [vmem:[%s1135_s4 + $0xf0] sm:$0xff]  ;;  %v45_v31 = vld [vmem:[%s1133_s2 + $0x28] sm:$0xff]  ;;  %v60_v33 = vld [vmem:[%s1133_s2 + $0xa0] sm:$0xff] }
   0xc   :  { %584 = vmatprep.subr.mxu0 %v66_v11  ;;  %655 = vmatprep.subr.mxu1 %v708_v4  ;;  %v255_v34 = vld [vmem:[%s1135_s4 + $0xd8] sm:$0xff]  ;;  %v44_v35 = vld [vmem:[%s1133_s2 + $0x20] sm:$0xff]  ;;  %v254_v36 = vld [vmem:[%s1135_s4 + $0xd0] sm:$0xff] }
   0xd   :  { %585 = vmatpush3.msra.mxu0 %v50_v12  ;;  %656 = vmatpush3.msra.mxu1 %v72_v22  ;;  %v59_v37 = vld [vmem:[%s1133_s2 + $0x98] sm:$0xff]  ;;  %v253_v38 = vld [vmem:[%s1135_s4 + $0xc8] sm:$0xff]  ;;  %v252_v40 = vld [vmem:[%s1135_s4 + $0xc0] sm:$0xff] }
   0xe   :  { %586 = vmatprep.subr.mxu0 %v65_v14  ;;  %658 = vmatmul.mubr.msk.f32.vlgmr.msra.gmra.mxu1 %vm76_vm1, %v39_v24  ;;  %v43_v39 = vld [vmem:[%s1133_s2 + $0x18] sm:$0xff]  ;;  %v58_v41 = vld [vmem:[%s1133_s2 + $0x90] sm:$0xff] }
   0xf   :  { %587 = vmatpush3.msra.mxu0 %v49_v16  ;;  %260 = vmatprep.subr.mxu1 %v259_v26  ;;  %v251_v42 = vld [vmem:[%s1135_s4 + $0xb8] sm:$0xff] }
  0x10   :  { %588 = vmatprep.subr.mxu0 %v64_v18  ;;  %261 = vmatpush1.msra.mxu1 %v258_v28 }
  0x11   :  { %589 = vmatpush3.msra.mxu0 %v48_v20  ;;  %262 = vmatprep.subr.mxu1 %v257_v30 }
  0x12   :  { %590 = vmatprep.subr.mxu0 %v63_v21  ;;  %263 = vmatpush1.msra.mxu1 %v256_v32 }
  0x13   :  { %591 = vmatpush3.msra.mxu0 %v47_v23  ;;  %264 = vmatprep.subr.mxu1 %v255_v34 }
  0x14   :  { %592 = vmatprep.subr.mxu0 %v62_v25  ;;  %265 = vmatpush1.msra.mxu1 %v254_v36 }
  0x15   :  { %593 = vmatpush3.msra.mxu0 %v46_v27 }
  0x16   :  { %594 = vmatprep.subr.mxu0 %v61_v29 }
  0x17   :  { %595 = vmatpush3.msra.mxu0 %v45_v31 }
  0x18   :  { %596 = vmatprep.subr.mxu0 %v60_v33 }
  0x19   :  { %597 = vmatpush3.msra.mxu0 %v44_v35 }
  0x1a   :  { %17 = vsyncpa [#allocation5], 0  ;;  %598 = vmatprep.subr.mxu0 %v59_v37  ;;  %v42_v43 = vld [vmem:[%s1133_s2 + $0x10] sm:$0xff]  ;;  %266 = vmatprep.subr.mxu1 %v253_v38  ;;  %v57_v45 = vld [vmem:[%s1133_s2 + $0x88] sm:$0xff]  ;;  %s711_s22 = smov [#allocation4]  }
  0x1b   :  { %v250_v44 = vld [vmem:[%s1135_s4 + $0xb0] sm:$0xff]  ;;  %599 = vmatpush3.msra.mxu0 %v43_v39  ;;  %267 = vmatpush1.msra.mxu1 %v252_v40  ;;  %v249_v46 = vld [vmem:[%s1135_s4 + $0xa8] sm:$0xff]  ;;  %v248_v48 = vld [vmem:[%s1135_s4 + $0xa0] sm:$0xff] }
  0x1c   :  { %600 = vmatprep.subr.mxu0 %v58_v41  ;;  %v41_v47 = vld [vmem:[%s1133_s2 + $0x8] sm:$0xff]  ;;  %268 = vmatprep.subr.mxu1 %v251_v42  ;;  %v56_v49 = vld [vmem:[%s1133_s2 + $0x80] sm:$0xff]  ;;  %v247_v50 = vld [vmem:[%s1135_s4 + $0x98] sm:$0xff] }
  0x1d   :  { %601 = vmatpush3.msra.mxu0 %v42_v43  ;;  %269 = vmatpush1.msra.mxu1 %v250_v44  ;;  %v40_v51 = vld [vmem:[%s1133_s2] sm:$0xff]  ;;  %v246_v52 = vld [vmem:[%s1135_s4 + $0x90] sm:$0xff]  ;;  %v245_v54 = vld [vmem:[%s1135_s4 + $0x88] sm:$0xff]  ;;  %s558_s2 = sshll.u32 %s711_s22, 4  ;;  %s559_s2 = int_to_ptr.vmem [resolvable:$true] %s558_s2 }
  0x1e   :  { %602 = vmatprep.subr.mxu0 %v57_v45  ;;  %270 = vmatprep.subr.mxu1 %v249_v46  ;;  %v37_v53 = vld [vmem:[%s1132_s1] sm:$0xff]  ;;  %v243_v56 = vld [vmem:[%s1135_s4 + $0x78] sm:$0xff]  ;;  %v242_v57 = vld [vmem:[%s1135_s4 + $0x70] sm:$0xff] }
  0x1f   :  { %603 = vmatpush3.msra.mxu0 %v41_v47  ;;  %271 = vmatpush1.msra.mxu1 %v248_v48  ;;  %v244_v55 = vld [vmem:[%s1135_s4 + $0x80] sm:$0xff]  ;;  %v241_v58 = vld [vmem:[%s1135_s4 + $0x68] sm:$0xff]  ;;  %v239_v60 = vld [vmem:[%s1135_s4 + $0x58] sm:$0xff] }
  0x20   :  { %604 = vmatprep.subr.mxu0 %v56_v49  ;;  %272 = vmatprep.subr.mxu1 %v247_v50  ;;  %v240_v59 = vld [vmem:[%s1135_s4 + $0x60] sm:$0xff]  ;;  %v238_v61 = vld [vmem:[%s1135_s4 + $0x50] sm:$0xff]  ;;  %v237_v62 = vld [vmem:[%s1135_s4 + $0x48] sm:$0xff] }
  0x21   :  { %605 = vmatpush3.msra.mxu0 %v40_v51  ;;  %273 = vmatpush1.msra.mxu1 %v246_v52  ;;  %v236_v63 = vld [vmem:[%s1135_s4 + $0x40] sm:$0xff]  ;;  %v235_v0 = vld [vmem:[%s1135_s4 + $0x38] sm:$0xff]  ;;  %v234_v1 = vld [vmem:[%s1135_s4 + $0x30] sm:$0xff] }
  0x22   :  { %145 = vmatmul.mubr.f32.vlgmr.msra.gmra.mxu0 %v37_v53  ;;  %274 = vmatprep.subr.mxu1 %v245_v54  ;;  %v233_v2 = vld [vmem:[%s1135_s4 + $0x28] sm:$0xff]  ;;  %v232_v3 = vld [vmem:[%s1135_s4 + $0x20] sm:$0xff]  ;;  %v231_v5 = vld [vmem:[%s1135_s4 + $0x18] sm:$0xff] }
  0x23   :  { %275 = vmatpush1.msra.mxu1 %v244_v55  ;;  %324 = vmatprep.mubr.f32.mxu1 %v708_v4  ;;  %v230_v6 = vld [vmem:[%s1135_s4 + $0x10] sm:$0xff]  ;;  %v229_v7 = vld [vmem:[%s1135_s4 + $0x8] sm:$0xff]  ;;  %v228_v8 = vld [vmem:[%s1135_s4] sm:$0xff]  ;;  %v407_v55 = vlaneseq }
  0x24   :  { %276 = vmatprep.subr.mxu1 %v243_v56  ;;  %v990_v9 = vld [vmem:[%s1131_s0] sm:$0xff]  ;;  %v227_v10 = vld [vmem:[%s1134_s3 + $0x38] sm:$0xff]  ;;  %v226_v11 = vld [vmem:[%s1134_s3 + $0x30] sm:$0xff] }
  0x25   :  { %277 = vmatpush1.msra.mxu1 %v242_v57  ;;  %v225_v12 = vld [vmem:[%s1134_s3 + $0x28] sm:$0xff]  ;;  %v224_v13 = vld [vmem:[%s1134_s3 + $0x20] sm:$0xff]  ;;  %v223_v14 = vld [vmem:[%s1134_s3 + $0x18] sm:$0xff]  ;;  %v408_v56 = vshrl.u32 %v407_v55, 7 }
  0x26   :  { %278 = vmatprep.subr.mxu1 %v241_v58  ;;  %v221_v15 = vld [vmem:[%s1134_s3 + $0x8] sm:$0xff]  ;;  %v220_v16 = vld [vmem:[%s1134_s3] sm:$0xff]  ;;  %v452_v17 = vld [vmem:[%s1137_s6 + $0xf8] sm:$0xff] }
  0x27   :  { %279 = vmatpush1.msra.mxu1 %v240_v59  ;;  %v436_v18 = vld [vmem:[%s1137_s6 + $0x78] sm:$0xff]  ;;  %v451_v19 = vld [vmem:[%s1137_s6 + $0xf0] sm:$0xff]  ;;  %614 = vmatprep.subr.mxu0 %v452_v17  ;;  %v450_v21 = vld [vmem:[%s1137_s6 + $0xe8] sm:$0xff]  ;;  %v409_v58 = vsub.s32 0, %v408_v56 }
  0x28   :  { %280 = vmatprep.subr.mxu1 %v239_v60  ;;  %v435_v20 = vld [vmem:[%s1137_s6 + $0x70] sm:$0xff]  ;;  %615 = vmatpush3.msra.mxu0 %v436_v18  ;;  %v434_v22 = vld [vmem:[%s1137_s6 + $0x68] sm:$0xff]  ;;  %v449_v23 = vld [vmem:[%s1137_s6 + $0xe0] sm:$0xff]  ;;  %v413_v60 = vsub.s32 1, %v408_v56 }
  0x29   :  { %281 = vmatpush1.msra.mxu1 %v238_v61  ;;  %616 = vmatprep.subr.mxu0 %v451_v19  ;;  %v433_v24 = vld [vmem:[%s1137_s6 + $0x60] sm:$0xff]  ;;  %v448_v25 = vld [vmem:[%s1137_s6 + $0xd8] sm:$0xff]  ;;  %v447_v27 = vld [vmem:[%s1137_s6 + $0xd0] sm:$0xff] }
  0x2a   :  { %282 = vmatprep.subr.mxu1 %v237_v62  ;;  %617 = vmatpush3.msra.mxu0 %v435_v20  ;;  %v432_v26 = vld [vmem:[%s1137_s6 + $0x58] sm:$0xff]  ;;  %v431_v28 = vld [vmem:[%s1137_s6 + $0x50] sm:$0xff]  ;;  %v446_v29 = vld [vmem:[%s1137_s6 + $0xc8] sm:$0xff] }
  0x2b   :  { %283 = vmatpush1.msra.mxu1 %v236_v63  ;;  %618 = vmatprep.subr.mxu0 %v450_v21  ;;  %v430_v30 = vld [vmem:[%s1137_s6 + $0x48] sm:$0xff]  ;;  %v445_v31 = vld [vmem:[%s1137_s6 + $0xc0] sm:$0xff]  ;;  %v444_v33 = vld [vmem:[%s1137_s6 + $0xb8] sm:$0xff] }
  0x2c   :  { %284 = vmatprep.subr.mxu1 %v235_v0  ;;  %619 = vmatpush3.msra.mxu0 %v434_v22  ;;  %v429_v32 = vld [vmem:[%s1137_s6 + $0x40] sm:$0xff]  ;;  %v428_v34 = vld [vmem:[%s1137_s6 + $0x38] sm:$0xff]  ;;  %v443_v35 = vld [vmem:[%s1137_s6 + $0xb0] sm:$0xff] }
  0x2d   :  { %285 = vmatpush1.msra.mxu1 %v234_v1  ;;  %620 = vmatprep.subr.mxu0 %v449_v23  ;;  %v427_v36 = vld [vmem:[%s1137_s6 + $0x30] sm:$0xff]  ;;  %v442_v37 = vld [vmem:[%s1137_s6 + $0xa8] sm:$0xff]  ;;  %v441_v45 = vld [vmem:[%s1137_s6 + $0xa0] sm:$0xff] }
  0x2e   :  { %286 = vmatprep.subr.mxu1 %v233_v2  ;;  %621 = vmatpush3.msra.mxu0 %v433_v24  ;;  %v426_v38 = vld [vmem:[%s1137_s6 + $0x28] sm:$0xff]  ;;  %v425_v46 = vld [vmem:[%s1137_s6 + $0x20] sm:$0xff]  ;;  %v440_v47 = vld [vmem:[%s1137_s6 + $0x98] sm:$0xff] }
  0x2f   :  { %287 = vmatpush1.msra.mxu1 %v232_v3  ;;  %622 = vmatprep.subr.mxu0 %v448_v25  ;;  %v424_v48 = vld [vmem:[%s1137_s6 + $0x18] sm:$0xff]  ;;  %v439_v49 = vld [vmem:[%s1137_s6 + $0x90] sm:$0xff]  ;;  %v438_v51 = vld [vmem:[%s1137_s6 + $0x88] sm:$0xff] }
  0x30   :  { %288 = vmatprep.subr.mxu1 %v231_v5  ;;  %623 = vmatpush3.msra.mxu0 %v432_v26  ;;  %v423_v50 = vld [vmem:[%s1137_s6 + $0x10] sm:$0xff]  ;;  %v422_v52 = vld [vmem:[%s1137_s6 + $0x8] sm:$0xff]  ;;  %v437_v53 = vld [vmem:[%s1137_s6 + $0x80] sm:$0xff] }
  0x31   :  { %289 = vmatpush1.msra.mxu1 %v230_v6  ;;  %624 = vmatprep.subr.mxu0 %v447_v27  ;;  %v421_v54 = vld [vmem:[%s1137_s6] sm:$0xff]  ;;  %s710_s6 = smov [#allocation2]  }
  0x32   :  { %290 = vmatprep.subr.mxu1 %v229_v7  ;;  %625 = vmatpush3.msra.mxu0 %v431_v28  ;;  %v405_v59 = vld [vmem:[%s1136_s5] sm:$0x3]  ;;  %s548_s18 = sshll.u32 %s710_s6, 4  ;;  %s549_s18 = int_to_ptr.vmem [resolvable:$true] %s548_s18 }
  0x33   :  { %291 = vmatpush1.msra.mxu1 %v228_v8  ;;  %626 = vmatprep.subr.mxu0 %v446_v29  ;;  %v410_v63 = vrot.slane %v405_v59, %v409_v58  ;;  %v414_v1 = vrot.slane %v405_v59, %v413_v60  ;;  %s664_s23 = scalar_lea.vmem %s549_s18, 128  ;;  %p669_p1 = scmp.lt.s32.totalorder %s549_s18, %s549_s18 }
  0x34   :  { %325 = vmatmul.mubr.f32.vlgmr.msra.gmra.mxu1 %v990_v9  ;;  %358 = vmatprep.subr.mxu1 %v227_v10  ;;  %p665_p0 = scmp.ne.s32.totalorder %s549_s18, %s664_s23  ;;  %p670_p2 = scmp.lt.s32.totalorder %s664_s23, %s664_s23 }
  0x35   :  { %398 = vmatprep.mubr.f32.mxu1 %v708_v4  ;;  %359 = vmatpush1.msra.mxu1 %v226_v11  ;;  %v222_v4 = vld [vmem:[%s1134_s3 + $0x10] sm:$0xff] }
  0x36   :  { %360 = vmatprep.subr.mxu1 %v225_v12  ;;  %627 = vmatpush3.msra.mxu0 %v430_v30  ;;  %p671_p3 = por %p670_p2, %p669_p1 }
  0x37   :  { %361 = vmatpush1.msra.mxu1 %v224_v13  ;;  %628 = vmatprep.subr.mxu0 %v445_v31  ;;  %v572_v13 = vld [vmem:[%s1138_s7] ss:$0 sm:$0xff] }
  0x38   :  { %362 = vmatprep.subr.mxu1 %v223_v14  ;;  %629 = vmatpush3.msra.mxu0 %v429_v32  ;;  %p672_p4 = pnand %p671_p3, %p665_p0 }
  0x39   :  { %363 = vmatpush1.msra.mxu1 %v222_v4  ;;  %630 = vmatprep.subr.mxu0 %v444_v33  ;;  %v573_v4 = vld [vmem:[%s1139_s8] ss:$0 sm:$0xff] }
  0x3a   :  { %364 = vmatprep.subr.mxu1 %v221_v15  ;;  %631 = vmatpush3.msra.mxu0 %v428_v34 }
  0x3b   :  { %365 = vmatpush1.msra.mxu1 %v220_v16  ;;  %632 = vmatprep.subr.mxu0 %v443_v35 }
  0x3c   :  { %633 = vmatpush3.msra.mxu0 %v427_v36 }
  0x3d   :  { %634 = vmatprep.subr.mxu0 %v442_v37 }
  0x3e   :  { %635 = vmatpush3.msra.mxu0 %v426_v38 }
  0x3f   :  { %636 = vmatprep.subr.mxu0 %v441_v45 }
  0x40   :  { %637 = vmatpush3.msra.mxu0 %v425_v46 }
  0x41   :  { %638 = vmatprep.subr.mxu0 %v440_v47 }
  0x42   :  { %639 = vmatpush3.msra.mxu0 %v424_v48 }
  0x43   :  { %640 = vmatprep.subr.mxu0 %v439_v49 }
  0x44   :  { %641 = vmatpush3.msra.mxu0 %v423_v50 }
  0x45   :  { %642 = vmatprep.subr.mxu0 %v438_v51 }
  0x46   :  { %643 = vmatpush3.msra.mxu0 %v422_v52 }
  0x47   :  { %644 = vmatprep.subr.mxu0 %v437_v53 }
  0x48   :  { %645 = vmatpush3.msra.mxu0 %v421_v54 }
  0xce   :  { %v216_v39 = vpop.f32.mrf.mxu1 }
  0xd0   :  { %v659_v40 = vpop.f32.mrf.mxu1 }
  0xe2   :  { %v606_v41 = vpop.f32.mrf.mxu0 }
  0xe4   :  { %v607_v42 = vpop.f32.mrf.mxu0 }
  0xe5   :  { %v608_v43 = vadd.f32 %v607_v42, %v606_v41 }
  0xe7   :  { %v217_v44 = vadd.f32 %v608_v43, %v216_v39 }
  0xe9   :  { %571 = vmatmul.mubr.msk.f32.vlgmr.msra.gmra.mxu1 %vm76_vm1, %v217_v44 }
  0xf4   :  { %v326_v57 = vpop.f32.mrf.mxu1 }
  0xf6   :  { %v328_v61 = vpop.f32.mrf.mxu1 }
 0x1a9   :  { %v400_v62 = vpop.f32.mrf.mxu1 }
 0x1aa   :  { %v401_v0 = vadd.f32 %v400_v62, %v326_v57 }
 0x1ab   :  { %v402_v2 = vpop.f32.mrf.mxu1 }
 0x1ac   :  { %v403_v3 = vadd.f32 %v402_v2, %v328_v61  ;;  %v417_v5 = vadd.f32 %v410_v63, %v401_v0 }
 0x1ae   :  { %v418_v6 = vadd.f32 %v414_v1, %v403_v3  ;;  %v419_v8 = vmax.f32 %v417_v5, 0.0 }
 0x1b0   :  { %v420_v7 = vmax.f32 %v418_v6, 0.0 }
 0x1b2   :  { %517 = vmatprep.mubr.f32.mxu0 %v420_v7 }
 0x1b3   :  { %518 = vmatmul.mubr.f32.vlgmr.msra.gmra.mxu0 %v419_v8 }
 0x273   :  { %v646_v10 = vpop.f32.mrf.mxu0 }
 0x275   :  { %v647_v11 = vpop.f32.mrf.mxu0 }
 0x276   :  { %v648_v12 = vadd.f32 %v647_v11, %v646_v10 }
 0x278   :  { %v523_v14 = vadd.f32 %v648_v12, %v990_v9 }
 0x27a   :  { %524 = vst [vmem:[#allocation2] sm:$0xff] %v523_v14  ;;  %v532_v15 = vmul.f32 %v572_v13, %v523_v14 }
 0x27b   :  { %675 = shalt.err (!%p672_p4)
}
 0x27c   :  { %551 = dma.vmem_to_hbm [thread:$0]  %s549_s18, 128, %s1140_s9, [#allocation3]   ;;  %v540_v9 = vadd.f32 %v573_v4, %v532_v15 }
 0x27d   :  { %s684_s24 = scalar_lea.vmem %s559_s2, 128  ;;  %p689_p6 = scmp.lt.s32.totalorder %s559_s2, %s559_s2 }
 0x27e   :  { %541 = vst [vmem:[#allocation4] sm:$0xff] %v540_v9  ;;  %p685_p5 = scmp.ne.s32.totalorder %s559_s2, %s684_s24  ;;  %p690_p7 = scmp.lt.s32.totalorder %s684_s24, %s684_s24 }
 0x280   :  { %p691_p8 = por %p690_p7, %p689_p6 }
 0x282   :  { %p692_p9 = pnand %p691_p8, %p685_p5 }
 0x284   :  { %695 = shalt.err (!%p692_p9)
}
 0x285   :  { %561 = dma.vmem_to_hbm [thread:$0]  %s559_s2, 128, %s1141_s10, [#allocation5]  }
 0x286   :  { %704 = dma.done.wait [#allocation3], 128  }
 0x287   :  { %705 = vsyncadd [#allocation3], 4294967168 }
 0x288   :  { %706 = dma.done.wait [#allocation5], 128  }
 0x289   :  { %707 = vsyncadd [#allocation5], 4294967168 }
 0x28a   :  { %568 = vsyncpa [#allocation3], 1 }
 0x28b   :  { %569 = vsyncpa [#allocation5], 1 }

</bundles_post_ra>
